<compile_context>
chip_gen: v5e
topology: v5e:2x2
jax: 0.10.0
libtpu: 0.0.40
codegen_flags: <defaults>
</compile_context>

<pallas_src>
import jax
import jax.numpy as jnp
from jax import lax
from jax.experimental import pallas as pl
from jax.experimental.pallas import tpu as pltpu


def _ceil8(x):
    return (x + 7) // 8 * 8


# ----------------------------------------------------------------------------
# Fused Pallas implementation
# ----------------------------------------------------------------------------
def motion_gru_pallas(x_t, pre_offset, mean, params, neighbour=3):
    f32 = jnp.float32
    bf16 = jnp.bfloat16
    B, C, H, W = x_t.shape
    M = pre_offset.shape[1]
    N = neighbour * neighbour
    assert M == 2 * N, "motion_hidden must equal 2 * neighbour**2"
    Hp, Wp = H + 2, W + 2
    P = Hp * Wp                        # flattened zero-padded grid
    HW = H * W                         # compact (lane-dense) grid
    Cout = params['Wc'].shape[0]

    # 8-aligned channel block sizes -> every in-kernel sublane slice is aligned
    CMp = _ceil8(C + M + 1)            # stacked-input channels + bias channel (24)
    Mp = _ceil8(M)                     # motion channels                       (24)
    Np = _ceil8(N)                     # warp-gate channels                    (16)
    Coutp = _ceil8(Cout)               # warp output channels                  (8)
    Hpp = _ceil8(Hp)                   # row-padded image height               (24)
    GROWS = 3 * Mp + Np                # fused gate-conv output rows           (88)

    mg = Wp + 1                        # 3x3-conv tap margin on the flat grid
    Pw = P + 2 * mg                    # "single-wide" grid (one conv deep)
    Pww = P + 4 * mg                   # "double-wide" grid (two convs deep)

    x_f = x_t.astype(f32)
    off_f = pre_offset.astype(f32)
    mean_f = mean.astype(f32)

    def pad_hw(a):                     # (B, ch, H, W) -> (B, ch, Hp, Wp)
        return jnp.pad(a, ((0, 0), (0, 0), (1, 1), (1, 1)))

    def pad_ch(a, tgt):
        return jnp.pad(a, ((0, 0), (0, tgt - a.shape[1]), (0, 0), (0, 0)))

    # channel-major flattened slabs (spatial on lanes)
    sp_flat = pad_hw(pad_ch(jnp.concatenate([x_f, off_f], 1), CMp)).reshape(B, CMp, P)
    sp_dw = jnp.pad(sp_flat, ((0, 0), (0, 0), (2 * mg, 2 * mg)))       # (B, CMp, Pww)
    sp_dw = sp_dw.at[:, CMp - 1, :].set(1.0)      # spare ones-channel carries the bias
    pre_flat = pad_hw(pad_ch(off_f, Mp)).reshape(B, Mp, P)
    pre_sw = jnp.pad(pre_flat, ((0, 0), (0, 0), (mg, mg)))             # (B, Mp, Pw)

    # compact (lane-dense) copies for the elementwise GRU blend / mean update
    pre_c = jnp.pad(off_f, ((0, 0), (0, Mp - M), (0, 0), (0, 0))).reshape(B, Mp, HW)
    mean_c = jnp.pad(mean_f, ((0, 0), (0, Mp - M), (0, 0), (0, 0))).reshape(B, Mp, HW)

    # per-channel padded image, rows padded to Hpp (warp column matmul operand)
    x2 = jnp.pad(pad_hw(x_f), ((0, 0), (0, 0), (0, Hpp - Hp), (0, 0)))
    x2 = x2.reshape(B, C * Hpp, Wp)                                    # (B, C*Hpp, Wp)

    # --- constant weight re-packing (pure layout plumbing) -------------------
    def conv_mat(w, cin_block, rows_out):
        # (cout, cin, 3, 3) torch conv weight -> (rows_out, 9*cin_block),
        # columns tap-major to match the in-kernel patch stack.
        cout, cin = w.shape[0], w.shape[1]
        wm = jnp.transpose(w, (0, 2, 3, 1)).reshape(cout, 9, cin)
        wm = jnp.pad(wm, ((0, rows_out - cout), (0, 0), (0, cin_block - cin)))
        return wm.reshape(rows_out, 9 * cin_block).astype(f32)

    Wu, Wr, Wo = params['Wu'], params['Wr'], params['Wo']
    Wg, Wc = params['Wg'], params['Wc']
    w_all = jnp.concatenate([
        conv_mat(Wu, CMp, Mp),                 # update gate
        conv_mat(Wr, CMp, Mp),                 # reset gate
        conv_mat(Wo[:, :C], CMp, Mp),          # output gate (x part only)
        conv_mat(Wg, CMp, Np),                 # warp gate
    ], axis=0)                                                          # (GROWS, 9*CMp)
    # fold biases into the centre-tap column of the spare ones-channel
    bias_col = 4 * CMp + (CMp - 1)
    w_all = w_all.at[0:M, bias_col].set(params['bu'].astype(f32))
    w_all = w_all.at[Mp:Mp + M, bias_col].set(params['br'].astype(f32))
    w_all = w_all.at[2 * Mp:2 * Mp + M, bias_col].set(params['bo'].astype(f32))
    w_all = w_all.at[3 * Mp:3 * Mp + N, bias_col].set(params['bg'].astype(f32))
    w_all = w_all.astype(bf16)
    w_oo = conv_mat(Wo[:, C:], Mp, Mp).astype(bf16)                    # (Mp, 9*Mp)

    # compaction source row: compact pixel k lives at padded flat index src[k]
    hh = jnp.arange(H, dtype=jnp.int32)[:, None]
    ww = jnp.arange(W, dtype=jnp.int32)[None, :]
    src_row = ((hh + 1) * Wp + (ww + 1)).reshape(1, HW).astype(jnp.int32)

    # base sampling grid p_0 + p_n (rows 0:N = x coords, N:2N = y coords)
    n_idx = jnp.arange(N)
    bx = jnp.broadcast_to(jnp.arange(H, dtype=f32)[None, :, None]
                          + (n_idx // neighbour).astype(f32)[:, None, None], (N, H, W))
    by = jnp.broadcast_to(jnp.arange(W, dtype=f32)[None, None, :]
                          + (n_idx % neighbour).astype(f32)[:, None, None], (N, H, W))
    p0 = jnp.pad(jnp.concatenate([bx, by], 0).reshape(2 * N, HW),
                 ((0, Mp - 2 * N), (0, 0)))                             # (Mp, HW)

    # stride-3 warp conv folded with the per-channel block-sum:
    # wtilde[n, co, c*Hpp + r] = Wc[co, c, n//3, n%3]
    wmat = jnp.transpose(Wc, (2, 3, 1, 0)).reshape(N, C, Cout)
    wt = jnp.pad(jnp.transpose(wmat, (0, 2, 1)), ((0, 0), (0, Coutp - Cout), (0, 0)))
    wtilde = jnp.repeat(wt[:, :, :, None], Hpp, axis=3).reshape(N, Coutp, C * Hpp)
    wtilde = wtilde.astype(f32)

    # --- the fused kernel -----------------------------------------------------
    def kernel(sp_ref, pre_ref, prec_ref, meanc_ref, x2_ref, wall_ref, woo_ref,
               src_ref, p0_ref, wt_ref, off_out_ref, mean_out_ref, out_ref):
        sp = sp_ref[0]            # (CMp, Pww)   padded [x_t; pre_offset; 1s]
        pre = pre_ref[0]          # (Mp, Pw)     padded pre_offset
        prc = prec_ref[0]         # (Mp, HW)     compact pre_offset
        mnc = meanc_ref[0]        # (Mp, HW)     compact mean
        x2v = x2_ref[0]           # (C*Hpp, Wp)  per-channel padded image

        def patch_stack(a, out_len):
            # 3x3-conv im2col via static lane slices of a margin-padded slab.
            blocks = []
            for di in range(3):
                for dj in range(3):
                    s = (di - 1) * Wp + (dj - 1)
                    blocks.append(a[:, mg + s: mg + s + out_len])
            return jnp.concatenate(blocks, axis=0)

        # one bf16 MXU matmul for update / reset / output-x / warp-gate convs
        # (bias is carried by the ones-channel centre-tap column)
        g = jnp.dot(wall_ref[...], patch_stack(sp, Pw).astype(bf16),
                    preferred_element_type=jnp.float32)                  # (GROWS, Pw)

        # output-gate conv on (pre_offset * reset) -- second bf16 MXU matmul
        rst_sw = jax.nn.sigmoid(g[Mp:2 * Mp])                            # (Mp, Pw)
        prg = pre * rst_sw                     # exactly zero outside the interior
        og_pre = g[2 * Mp:3 * Mp, mg:mg + P] + jnp.dot(
            woo_ref[...], patch_stack(prg, P).astype(bf16),
            preferred_element_type=jnp.float32)                          # (Mp, P)

        # one-hot compaction matrix built in-kernel (no DMA): padded P -> HW
        rowp = lax.broadcasted_iota(jnp.int32, (P, HW), 0)
        gsel = (rowp == src_ref[...]).astype(jnp.float32)                # (P, HW)

        # compact only the gate pre-activations (one small f32 MXU matmul)
        packed = jnp.concatenate([g[0:Mp, mg:mg + P],                    # update pre-act
                                  og_pre,                                # output pre-act
                                  g[3 * Mp:3 * Mp + Np, mg:mg + P]],     # warp-gate pre
                                 axis=0)                                 # (2Mp+Np, P)
        comp = jnp.dot(packed, gsel, preferred_element_type=jnp.float32)  # (2Mp+Np, HW)

        upd = jax.nn.sigmoid(comp[0:Mp])                                 # (Mp, HW)
        og = jnp.tanh(comp[Mp:2 * Mp])                                   # (Mp, HW)
        m_c = jax.nn.sigmoid(comp[2 * Mp:2 * Mp + Np])                   # (Np, HW)

        # GRU blend + mean update, elementwise on the lane-dense compact grid
        mean_new = mnc + 0.5 * (prc - mnc)
        off_c = prc * (1.0 - upd) + og * upd + mean_new
        off_out_ref[0] = off_c
        mean_out_ref[0] = mean_new

        # ---- warp: separable bilinear gather + fused stride-3 conv ----
        p = p0_ref[...] + off_c                                          # (Mp, HW), f32
        col_iota = lax.broadcasted_iota(jnp.int32, (Wp, HW), 0).astype(jnp.float32)
        row_iota = lax.broadcasted_iota(jnp.int32, (Hpp, HW), 0).astype(jnp.float32)

        # stage 1: column gather for all 9 neighbours in ONE wide MXU matmul;
        # warp gate m_c is folded into the column weights.
        colw_blocks = []
        for n in range(N):
            py = p[N + n:N + n + 1, :]
            fy = jnp.floor(py)
            qly = jnp.clip(fy, 0.0, Wp - 1.0)
            qry = jnp.clip(fy + 1.0, 0.0, Wp - 1.0)
            pcy = jnp.clip(py, 0.0, Wp - 1.0)
            wyl = 1.0 + (qly - pcy)
            wyr = 1.0 - (qry - pcy)
            # float equality on small integers (< Wp) is exact; clamped corners
            # collapsing onto the same index sum their weights (matches torch).
            colw = (jnp.where(col_iota == qly, wyl, 0.0)
                    + jnp.where(col_iota == qry, wyr, 0.0))              # (Wp, HW)
            colw_blocks.append(colw * m_c[n:n + 1, :])
        colw_all = jnp.concatenate(colw_blocks, axis=1)                  # (Wp, N*HW)
        y_all = jnp.dot(x2v, colw_all,
                        preferred_element_type=jnp.float32)              # (C*Hpp, N*HW)

        # stage 2: row weights + fused stride-3 conv, accumulate over neighbours
        acc = jnp.zeros((Coutp, HW), jnp.float32)
        for n in range(N):
            px = p[n:n + 1, :]
            fx = jnp.floor(px)
            qlx = jnp.clip(fx, 0.0, Hp - 1.0)
            qrx = jnp.clip(fx + 1.0, 0.0, Hp - 1.0)
            pcx = jnp.clip(px, 0.0, Hp - 1.0)
            wxl = 1.0 + (qlx - pcx)
            wxr = 1.0 - (qrx - pcx)
            roww = (jnp.where(row_iota == qlx, wxl, 0.0)
                    + jnp.where(row_iota == qrx, wxr, 0.0))              # (Hpp, HW)
            y_n = y_all[:, n * HW:(n + 1) * HW]                          # (C*Hpp, HW)
            # apply row weights per C-block (no [roww]*C concat temp)
            z = jnp.concatenate(
                [y_n[c * Hpp:(c + 1) * Hpp, :] * roww for c in range(C)], axis=0)
            acc = acc + jnp.dot(wt_ref[n], z,
                                preferred_element_type=jnp.float32)      # (Coutp, HW)
        out_ref[0] = acc

    grid_spec = pltpu.PrefetchScalarGridSpec(
        num_scalar_prefetch=0,
        grid=(B,),
        in_specs=[
            pl.BlockSpec((1, CMp, Pww), lambda b: (b, 0, 0)),
            pl.BlockSpec((1, Mp, Pw), lambda b: (b, 0, 0)),
            pl.BlockSpec((1, Mp, HW), lambda b: (b, 0, 0)),
            pl.BlockSpec((1, Mp, HW), lambda b: (b, 0, 0)),
            pl.BlockSpec((1, C * Hpp, Wp), lambda b: (b, 0, 0)),
            pl.BlockSpec((GROWS, 9 * CMp), lambda b: (0, 0)),
            pl.BlockSpec((Mp, 9 * Mp), lambda b: (0, 0)),
            pl.BlockSpec((1, HW), lambda b: (0, 0)),
            pl.BlockSpec((Mp, HW), lambda b: (0, 0)),
            pl.BlockSpec((N, Coutp, C * Hpp), lambda b: (0, 0, 0)),
        ],
        out_specs=(
            pl.BlockSpec((1, Mp, HW), lambda b: (b, 0, 0)),
            pl.BlockSpec((1, Mp, HW), lambda b: (b, 0, 0)),
            pl.BlockSpec((1, Coutp, HW), lambda b: (b, 0, 0)),
        ),
    )
    off_out, mean_out, warp_out = pl.pallas_call(
        kernel,
        out_shape=(
            jax.ShapeDtypeStruct((B, Mp, HW), f32),     # compact offset
            jax.ShapeDtypeStruct((B, Mp, HW), f32),     # compact mean
            jax.ShapeDtypeStruct((B, Coutp, HW), f32),  # warped output
        ),
        grid_spec=grid_spec,
        compiler_params=pltpu.CompilerParams(dimension_semantics=("parallel",)),
    )(sp_dw, pre_sw, pre_c, mean_c, x2, w_all, w_oo, src_row, p0, wtilde)

    out = warp_out[:, :Cout].reshape(B, Cout, H, W)
    offset = off_out[:, :M].reshape(B, M, H, W)
    mean_new = mean_out[:, :M].reshape(B, M, H, W)
    return out, offset, mean_new


# ----------------------------------------------------------------------------
# Pure-JAX reference (mirrors the PyTorch code, NCHW) for verification
# ----------------------------------------------------------------------------
def conv_nchw(x, w, b, stride, padding):
    out = lax.conv_general_dilated(
        x, w, (stride, stride), [(padding, padding)] * 2,
        dimension_numbers=('NCHW', 'OIHW', 'NCHW'),
        precision=lax.Precision.HIGHEST)
    if b is not None:
        out = out + b[None, :, None, None]
    return out


def warp_ref(x, offset, Wg, bg, Wc, neighbour=3):
    B, C, H, W = x.shape
    N = neighbour * neighbour
    m = jax.nn.sigmoid(conv_nchw(x, Wg, bg, 1, 1))
    xpad = jnp.pad(x, ((0, 0), (0, 0), (1, 1), (1, 1)))
    Hp, Wp = H + 2, W + 2

    rng = jnp.arange(-(neighbour - 1) // 2, (neighbour - 1) // 2 + 1)
    pnx, pny = jnp.meshgrid(rng, rng, indexing='ij')
    p_n = jnp.concatenate([pnx.reshape(-1), pny.reshape(-1)], 0
                          ).reshape(1, 2 * N, 1, 1).astype(jnp.float32)
    p0x, p0y = jnp.meshgrid(jnp.arange(1, H + 1), jnp.arange(1, W + 1), indexing='ij')
    p0x = jnp.tile(p0x.reshape(1, 1, H, W), (1, N, 1, 1))
    p0y = jnp.tile(p0y.reshape(1, 1, H, W), (1, N, 1, 1))
    p_0 = jnp.concatenate([p0x, p0y], 1).astype(jnp.float32)

    p = p_0 + p_n + offset
    p = jnp.transpose(p, (0, 2, 3, 1))
    q_lt = jnp.floor(p)
    q_rb = q_lt + 1
    q_lt = jnp.concatenate([jnp.clip(q_lt[..., :N], 0, Hp - 1),
                            jnp.clip(q_lt[..., N:], 0, Wp - 1)], -1).astype(jnp.int32)
    q_rb = jnp.concatenate([jnp.clip(q_rb[..., :N], 0, Hp - 1),
                            jnp.clip(q_rb[..., N:], 0, Wp - 1)], -1).astype(jnp.int32)
    q_lb = jnp.concatenate([q_lt[..., :N], q_rb[..., N:]], -1)
    q_rt = jnp.concatenate([q_rb[..., :N], q_lt[..., N:]], -1)
    p = jnp.concatenate([jnp.clip(p[..., :N], 0, Hp - 1),
                         jnp.clip(p[..., N:], 0, Wp - 1)], -1)

    def g(q, sx, sy):
        return ((1 + sx * (q[..., :N].astype(p.dtype) - p[..., :N]))
                * (1 + sy * (q[..., N:].astype(p.dtype) - p[..., N:])))

    g_lt, g_rb = g(q_lt, 1, 1), g(q_rb, -1, -1)
    g_lb, g_rt = g(q_lb, 1, -1), g(q_rt, -1, 1)

    xflat = xpad.reshape(B, C, Hp * Wp)

    def get_x_q(q):
        idx = (q[..., :N] * Wp + q[..., N:]).reshape(B, 1, H * W * N)
        idx = jnp.broadcast_to(idx, (B, C, H * W * N))
        return jnp.take_along_axis(xflat, idx, axis=-1).reshape(B, C, H, W, N)

    x_warped = (g_lt[:, None] * get_x_q(q_lt) + g_rb[:, None] * get_x_q(q_rb)
                + g_lb[:, None] * get_x_q(q_lb) + g_rt[:, None] * get_x_q(q_rt))
    x_warped = x_warped * jnp.transpose(m, (0, 2, 3, 1))[:, None]

    chunks = [x_warped[..., s:s + neighbour].reshape(B, C, H, W * neighbour)
              for s in range(0, N, neighbour)]
    xw_rs = jnp.concatenate(chunks, -1).reshape(B, C, H * neighbour, W * neighbour)
    return conv_nchw(xw_rs, Wc, None, neighbour, 0)


def motion_gru_ref(x_t, pre_offset, mean, params, neighbour=3):
    stacked = jnp.concatenate([x_t, pre_offset], 1)
    u = jax.nn.sigmoid(conv_nchw(stacked, params['Wu'], params['bu'], 1, 1))
    r = jax.nn.sigmoid(conv_nchw(stacked, params['Wr'], params['br'], 1, 1))
    o = jnp.tanh(conv_nchw(jnp.concatenate([x_t, pre_offset * r], 1),
                           params['Wo'], params['bo'], 1, 1))
    offset = pre_offset * (1 - u) + o * u
    mean = mean + 0.5 * (pre_offset - mean)
    offset = offset + mean
    out = warp_ref(x_t, offset, params['Wg'], params['bg'], params['Wc'], neighbour)
    return out, offset, mean


# ----------------------------------------------------------------------------
if __name__ == "__main__":
    B, C, H, W = 2, 4, 16, 16
    neighbour = 3
    N = neighbour * neighbour
    M = 2 * N        # motion_hidden must equal 2 * neighbour**2 (Warp offset layout)

    key = jax.random.PRNGKey(0)
    keys = jax.random.split(key, 12)
    s = 0.1
    params = {
        'Wu': s * jax.random.normal(keys[0], (M, C + M, 3, 3), jnp.float32),
        'bu': s * jax.random.normal(keys[1], (M,), jnp.float32),
        'Wr': s * jax.random.normal(keys[2], (M, C + M, 3, 3), jnp.float32),
        'br': s * jax.random.normal(keys[3], (M,), jnp.float32),
        'Wo': s * jax.random.normal(keys[4], (M, C + M, 3, 3), jnp.float32),
        'bo': s * jax.random.normal(keys[5], (M,), jnp.float32),
        'Wg': s * jax.random.normal(keys[6], (N, C, 3, 3), jnp.float32),
        'bg': s * jax.random.normal(keys[7], (N,), jnp.float32),
        'Wc': s * jax.random.normal(keys[8], (C, C, 3, 3), jnp.float32),  # bias=None in torch
    }
    x_t = jax.random.normal(keys[9], (B, C, H, W), jnp.float32)
    pre_offset = 0.5 * jax.random.normal(keys[10], (B, M, H, W), jnp.float32)
    mean = 0.5 * jax.random.normal(keys[11], (B, M, H, W), jnp.float32)

    out, offset, mean_new = motion_gru_pallas(x_t, pre_offset, mean, params, neighbour)
    jax.block_until_ready((out, offset, mean_new))

    # verification against the pure-JAX reference
    _, ref_off, ref_mean = motion_gru_ref(x_t, pre_offset, mean, params, neighbour)
    assert jnp.allclose(mean_new, ref_mean, atol=1e-5), "mean mismatch"
    # gates run in bf16 on the MXU -> slightly looser offset / warp tolerance
    assert jnp.allclose(offset, ref_off, atol=2e-2), "offset mismatch"
    # compare the warp with identical offsets to avoid floor() boundary sensitivity
    ref_warp = warp_ref(x_t, offset, params['Wg'], params['bg'], params['Wc'], neighbour)
    assert jnp.allclose(out, ref_warp, atol=2e-2), "warp output mismatch"

    print("KERNEL_OK")
</pallas_src>

<mosaic_0001>
module attributes {stable_mosaic.version = 11 : i64} {
  func.func @kernel(%arg0: i32, %arg1: memref<1x24x400xf32, #tpu.memory_space<vmem>>, %arg2: memref<1x24x362xf32, #tpu.memory_space<vmem>>, %arg3: memref<1x24x256xf32, #tpu.memory_space<vmem>>, %arg4: memref<1x24x256xf32, #tpu.memory_space<vmem>>, %arg5: memref<1x96x18xf32, #tpu.memory_space<vmem>>, %arg6: memref<88x216xbf16, #tpu.memory_space<vmem>>, %arg7: memref<24x216xbf16, #tpu.memory_space<vmem>>, %arg8: memref<1x256xi32, #tpu.memory_space<vmem>>, %arg9: memref<24x256xf32, #tpu.memory_space<vmem>>, %arg10: memref<9x8x96xf32, #tpu.memory_space<vmem>>, %arg11: memref<1x24x256xf32, #tpu.memory_space<vmem>>, %arg12: memref<1x24x256xf32, #tpu.memory_space<vmem>>, %arg13: memref<1x8x256xf32, #tpu.memory_space<vmem>>) attributes {dimension_semantics = [#tpu.dimension_semantics<parallel>], iteration_bounds = array<i64: 2>, scalar_prefetch = 0 : i64, scratch_operands = 0 : i64, tpu.core_type = #tpu.core_type<tc>, window_params = [{transform_indices = @transform_0, window_bounds = array<i64: 1, 24, 400>}, {transform_indices = @transform_1, window_bounds = array<i64: 1, 24, 362>}, {transform_indices = @transform_2, window_bounds = array<i64: 1, 24, 256>}, {transform_indices = @transform_3, window_bounds = array<i64: 1, 24, 256>}, {transform_indices = @transform_4, window_bounds = array<i64: 1, 96, 18>}, {pipeline_mode = #tpu.pipeline_mode<synchronous>, transform_indices = @transform_5, window_bounds = array<i64: 88, 216>}, {pipeline_mode = #tpu.pipeline_mode<synchronous>, transform_indices = @transform_6, window_bounds = array<i64: 24, 216>}, {pipeline_mode = #tpu.pipeline_mode<synchronous>, transform_indices = @transform_7, window_bounds = array<i64: 1, 256>}, {pipeline_mode = #tpu.pipeline_mode<synchronous>, transform_indices = @transform_8, window_bounds = array<i64: 24, 256>}, {pipeline_mode = #tpu.pipeline_mode<synchronous>, transform_indices = @transform_9, window_bounds = array<i64: 9, 8, 96>}, {transform_indices = @transform_10, window_bounds = array<i64: 1, 24, 256>}, {transform_indices = @transform_11, window_bounds = array<i64: 1, 24, 256>}, {transform_indices = @transform_12, window_bounds = array<i64: 1, 8, 256>}]} {
    %c0 = arith.constant 0 : index
    %c0_0 = arith.constant 0 : index
    %c0_1 = arith.constant 0 : index
    %0 = vector.load %arg1[%c0, %c0_0, %c0_1] : memref<1x24x400xf32, #tpu.memory_space<vmem>>, vector<1x24x400xf32>
    %1 = vector.shape_cast %0 : vector<1x24x400xf32> to vector<24x400xf32>
    %c0_2 = arith.constant 0 : index
    %c0_3 = arith.constant 0 : index
    %c0_4 = arith.constant 0 : index
    %2 = vector.load %arg2[%c0_2, %c0_3, %c0_4] : memref<1x24x362xf32, #tpu.memory_space<vmem>>, vector<1x24x362xf32>
    %3 = vector.shape_cast %2 : vector<1x24x362xf32> to vector<24x362xf32>
    %c0_5 = arith.constant 0 : index
    %c0_6 = arith.constant 0 : index
    %c0_7 = arith.constant 0 : index
    %4 = vector.load %arg3[%c0_5, %c0_6, %c0_7] : memref<1x24x256xf32, #tpu.memory_space<vmem>>, vector<1x24x256xf32>
    %5 = vector.shape_cast %4 : vector<1x24x256xf32> to vector<24x256xf32>
    %c0_8 = arith.constant 0 : index
    %c0_9 = arith.constant 0 : index
    %c0_10 = arith.constant 0 : index
    %6 = vector.load %arg4[%c0_8, %c0_9, %c0_10] : memref<1x24x256xf32, #tpu.memory_space<vmem>>, vector<1x24x256xf32>
    %7 = vector.shape_cast %6 : vector<1x24x256xf32> to vector<24x256xf32>
    %c0_11 = arith.constant 0 : index
    %c0_12 = arith.constant 0 : index
    %c0_13 = arith.constant 0 : index
    %8 = vector.load %arg5[%c0_11, %c0_12, %c0_13] : memref<1x96x18xf32, #tpu.memory_space<vmem>>, vector<1x96x18xf32>
    %9 = vector.shape_cast %8 : vector<1x96x18xf32> to vector<96x18xf32>
    %c0_14 = arith.constant 0 : index
    %c0_15 = arith.constant 0 : index
    %10 = vector.load %arg6[%c0_14, %c0_15] : memref<88x216xbf16, #tpu.memory_space<vmem>>, vector<88x216xbf16>
    %11 = vector.extract_strided_slice %1 {offsets = [0, 0], sizes = [24, 362], strides = [1, 1]} : vector<24x400xf32> to vector<24x362xf32>
    %12 = vector.extract_strided_slice %1 {offsets = [0, 1], sizes = [24, 362], strides = [1, 1]} : vector<24x400xf32> to vector<24x362xf32>
    %13 = vector.extract_strided_slice %1 {offsets = [0, 2], sizes = [24, 362], strides = [1, 1]} : vector<24x400xf32> to vector<24x362xf32>
    %14 = vector.extract_strided_slice %1 {offsets = [0, 18], sizes = [24, 362], strides = [1, 1]} : vector<24x400xf32> to vector<24x362xf32>
    %15 = vector.extract_strided_slice %1 {offsets = [0, 19], sizes = [24, 362], strides = [1, 1]} : vector<24x400xf32> to vector<24x362xf32>
    %16 = vector.extract_strided_slice %1 {offsets = [0, 20], sizes = [24, 362], strides = [1, 1]} : vector<24x400xf32> to vector<24x362xf32>
    %17 = vector.extract_strided_slice %1 {offsets = [0, 36], sizes = [24, 362], strides = [1, 1]} : vector<24x400xf32> to vector<24x362xf32>
    %18 = vector.extract_strided_slice %1 {offsets = [0, 37], sizes = [24, 362], strides = [1, 1]} : vector<24x400xf32> to vector<24x362xf32>
    %19 = vector.extract_strided_slice %1 {offsets = [0, 38], sizes = [24, 362], strides = [1, 1]} : vector<24x400xf32> to vector<24x362xf32>
    %20 = tpu.concatenate %11, %12, %13, %14, %15, %16, %17, %18, %19 in 0 : vector<24x362xf32>, vector<24x362xf32>, vector<24x362xf32>, vector<24x362xf32>, vector<24x362xf32>, vector<24x362xf32>, vector<24x362xf32>, vector<24x362xf32>, vector<24x362xf32> -> vector<216x362xf32>
    %21 = arith.truncf %20 : vector<216x362xf32> to vector<216x362xbf16>
    %cst = arith.constant dense<0.000000e+00> : vector<88x362xf32>
    %22 = tpu.matmul %10, %21, %cst {dimension_numbers = #tpu.dot_dimension_numbers<[1], [0], [0], [1], [0, 0, 1, 1], [], []>} : vector<88x216xbf16>, vector<216x362xbf16>, vector<88x362xf32> -> vector<88x362xf32>
    %23 = vector.extract_strided_slice %22 {offsets = [24, 0], sizes = [24, 362], strides = [1, 1]} : vector<88x362xf32> to vector<24x362xf32>
    %24 = arith.negf %23 : vector<24x362xf32>
    %25 = math.exp %24 : vector<24x362xf32>
    %cst_16 = arith.constant 1.000000e+00 : f32
    %26 = vector.broadcast %cst_16 : f32 to vector<24x362xf32>
    %27 = arith.addf %26, %25 : vector<24x362xf32>
    %28 = arith.divf %26, %27 : vector<24x362xf32>
    %29 = arith.mulf %3, %28 : vector<24x362xf32>
    %30 = vector.extract_strided_slice %22 {offsets = [48, 19], sizes = [24, 324], strides = [1, 1]} : vector<88x362xf32> to vector<24x324xf32>
    %c0_17 = arith.constant 0 : index
    %c0_18 = arith.constant 0 : index
    %31 = vector.load %arg7[%c0_17, %c0_18] : memref<24x216xbf16, #tpu.memory_space<vmem>>, vector<24x216xbf16>
    %32 = vector.extract_strided_slice %29 {offsets = [0, 0], sizes = [24, 324], strides = [1, 1]} : vector<24x362xf32> to vector<24x324xf32>
    %33 = vector.extract_strided_slice %29 {offsets = [0, 1], sizes = [24, 324], strides = [1, 1]} : vector<24x362xf32> to vector<24x324xf32>
    %34 = vector.extract_strided_slice %29 {offsets = [0, 2], sizes = [24, 324], strides = [1, 1]} : vector<24x362xf32> to vector<24x324xf32>
    %35 = vector.extract_strided_slice %29 {offsets = [0, 18], sizes = [24, 324], strides = [1, 1]} : vector<24x362xf32> to vector<24x324xf32>
    %36 = vector.extract_strided_slice %29 {offsets = [0, 19], sizes = [24, 324], strides = [1, 1]} : vector<24x362xf32> to vector<24x324xf32>
    %37 = vector.extract_strided_slice %29 {offsets = [0, 20], sizes = [24, 324], strides = [1, 1]} : vector<24x362xf32> to vector<24x324xf32>
    %38 = vector.extract_strided_slice %29 {offsets = [0, 36], sizes = [24, 324], strides = [1, 1]} : vector<24x362xf32> to vector<24x324xf32>
    %39 = vector.extract_strided_slice %29 {offsets = [0, 37], sizes = [24, 324], strides = [1, 1]} : vector<24x362xf32> to vector<24x324xf32>
    %40 = vector.extract_strided_slice %29 {offsets = [0, 38], sizes = [24, 324], strides = [1, 1]} : vector<24x362xf32> to vector<24x324xf32>
    %41 = tpu.concatenate %32, %33, %34, %35, %36, %37, %38, %39, %40 in 0 : vector<24x324xf32>, vector<24x324xf32>, vector<24x324xf32>, vector<24x324xf32>, vector<24x324xf32>, vector<24x324xf32>, vector<24x324xf32>, vector<24x324xf32>, vector<24x324xf32> -> vector<216x324xf32>
    %42 = arith.truncf %41 : vector<216x324xf32> to vector<216x324xbf16>
    %cst_19 = arith.constant dense<0.000000e+00> : vector<24x324xf32>
    %43 = tpu.matmul %31, %42, %cst_19 {dimension_numbers = #tpu.dot_dimension_numbers<[1], [0], [0], [1], [0, 0, 1, 1], [], []>} : vector<24x216xbf16>, vector<216x324xbf16>, vector<24x324xf32> -> vector<24x324xf32>
    %44 = arith.addf %30, %43 : vector<24x324xf32>
    %45 = tpu.iota {dimensions = array<i32: 0>} : vector<324x256xi32>
    %c0_20 = arith.constant 0 : index
    %c0_21 = arith.constant 0 : index
    %46 = vector.load %arg8[%c0_20, %c0_21] : memref<1x256xi32, #tpu.memory_space<vmem>>, vector<1x256xi32>
    %47 = vector.broadcast %46 : vector<1x256xi32> to vector<324x256xi32>
    %48 = arith.cmpi eq, %45, %47 : vector<324x256xi32>
    %49 = arith.extui %48 : vector<324x256xi1> to vector<324x256xi32>
    %50 = arith.sitofp %49 : vector<324x256xi32> to vector<324x256xf32>
    %51 = vector.extract_strided_slice %22 {offsets = [0, 19], sizes = [24, 324], strides = [1, 1]} : vector<88x362xf32> to vector<24x324xf32>
    %52 = vector.extract_strided_slice %22 {offsets = [72, 19], sizes = [16, 324], strides = [1, 1]} : vector<88x362xf32> to vector<16x324xf32>
    %53 = tpu.concatenate %51, %44, %52 in 0 : vector<24x324xf32>, vector<24x324xf32>, vector<16x324xf32> -> vector<64x324xf32>
    %cst_22 = arith.constant dense<0.000000e+00> : vector<64x256xf32>
    %54 = tpu.matmul %53, %50, %cst_22 {dimension_numbers = #tpu.dot_dimension_numbers<[1], [0], [0], [1], [0, 0, 1, 1], [], []>} : vector<64x324xf32>, vector<324x256xf32>, vector<64x256xf32> -> vector<64x256xf32>
    %55 = vector.extract_strided_slice %54 {offsets = [0, 0], sizes = [24, 256], strides = [1, 1]} : vector<64x256xf32> to vector<24x256xf32>
    %56 = arith.negf %55 : vector<24x256xf32>
    %57 = math.exp %56 : vector<24x256xf32>
    %cst_23 = arith.constant 1.000000e+00 : f32
    %58 = vector.broadcast %cst_23 : f32 to vector<24x256xf32>
    %59 = arith.addf %58, %57 : vector<24x256xf32>
    %60 = arith.divf %58, %59 : vector<24x256xf32>
    %61 = vector.extract_strided_slice %54 {offsets = [24, 0], sizes = [24, 256], strides = [1, 1]} : vector<64x256xf32> to vector<24x256xf32>
    %62 = math.tanh %61 : vector<24x256xf32>
    %63 = vector.extract_strided_slice %54 {offsets = [48, 0], sizes = [16, 256], strides = [1, 1]} : vector<64x256xf32> to vector<16x256xf32>
    %64 = arith.negf %63 : vector<16x256xf32>
    %65 = math.exp %64 : vector<16x256xf32>
    %cst_24 = arith.constant 1.000000e+00 : f32
    %66 = vector.broadcast %cst_24 : f32 to vector<16x256xf32>
    %67 = arith.addf %66, %65 : vector<16x256xf32>
    %68 = arith.divf %66, %67 : vector<16x256xf32>
    %69 = arith.subf %5, %7 : vector<24x256xf32>
    %cst_25 = arith.constant 5.000000e-01 : f32
    %70 = vector.broadcast %cst_25 : f32 to vector<24x256xf32>
    %71 = arith.mulf %70, %69 : vector<24x256xf32>
    %72 = arith.addf %7, %71 : vector<24x256xf32>
    %cst_26 = arith.constant 1.000000e+00 : f32
    %73 = vector.broadcast %cst_26 : f32 to vector<24x256xf32>
    %74 = arith.subf %73, %60 : vector<24x256xf32>
    %75 = arith.mulf %5, %74 : vector<24x256xf32>
    %76 = arith.mulf %62, %60 : vector<24x256xf32>
    %77 = arith.addf %75, %76 : vector<24x256xf32>
    %78 = arith.addf %77, %72 : vector<24x256xf32>
    %c0_27 = arith.constant 0 : index
    %c0_28 = arith.constant 0 : index
    %c0_29 = arith.constant 0 : index
    %79 = vector.load %arg11[%c0_27, %c0_28, %c0_29] : memref<1x24x256xf32, #tpu.memory_space<vmem>>, vector<1x24x256xf32>
    %80 = vector.shape_cast %79 : vector<1x24x256xf32> to vector<24x256xf32>
    %81 = vector.shape_cast %78 : vector<24x256xf32> to vector<1x24x256xf32>
    tpu.vector_store %arg11[%c0_27, %c0_28, %c0_29], %81 {strides = array<i32>} : memref<1x24x256xf32, #tpu.memory_space<vmem>>, vector<1x24x256xf32>,
    %c0_30 = arith.constant 0 : index
    %c0_31 = arith.constant 0 : index
    %c0_32 = arith.constant 0 : index
    %82 = vector.load %arg12[%c0_30, %c0_31, %c0_32] : memref<1x24x256xf32, #tpu.memory_space<vmem>>, vector<1x24x256xf32>
    %83 = vector.shape_cast %82 : vector<1x24x256xf32> to vector<24x256xf32>
    %84 = vector.shape_cast %72 : vector<24x256xf32> to vector<1x24x256xf32>
    tpu.vector_store %arg12[%c0_30, %c0_31, %c0_32], %84 {strides = array<i32>} : memref<1x24x256xf32, #tpu.memory_space<vmem>>, vector<1x24x256xf32>,
    %c0_33 = arith.constant 0 : index
    %c0_34 = arith.constant 0 : index
    %85 = vector.load %arg9[%c0_33, %c0_34] : memref<24x256xf32, #tpu.memory_space<vmem>>, vector<24x256xf32>
    %86 = arith.addf %85, %78 : vector<24x256xf32>
    %87 = tpu.iota {dimensions = array<i32: 0>} : vector<18x256xi32>
    %88 = arith.sitofp %87 : vector<18x256xi32> to vector<18x256xf32>
    %89 = tpu.iota {dimensions = array<i32: 0>} : vector<24x256xi32>
    %90 = arith.sitofp %89 : vector<24x256xi32> to vector<24x256xf32>
    %91 = vector.extract_strided_slice %86 {offsets = [9, 0], sizes = [1, 256], strides = [1, 1]} : vector<24x256xf32> to vector<1x256xf32>
    %92 = math.floor %91 : vector<1x256xf32>
    %cst_35 = arith.constant 0.000000e+00 : f32
    %cst_36 = arith.constant 1.700000e+01 : f32
    %93 = vector.broadcast %cst_35 : f32 to vector<1x256xf32>
    %94 = arith.maximumf %93, %92 : vector<1x256xf32>
    %95 = vector.broadcast %cst_36 : f32 to vector<1x256xf32>
    %96 = arith.minimumf %95, %94 : vector<1x256xf32>
    %cst_37 = arith.constant 1.000000e+00 : f32
    %97 = vector.broadcast %cst_37 : f32 to vector<1x256xf32>
    %98 = arith.addf %92, %97 : vector<1x256xf32>
    %cst_38 = arith.constant 0.000000e+00 : f32
    %cst_39 = arith.constant 1.700000e+01 : f32
    %99 = vector.broadcast %cst_38 : f32 to vector<1x256xf32>
    %100 = arith.maximumf %99, %98 : vector<1x256xf32>
    %101 = vector.broadcast %cst_39 : f32 to vector<1x256xf32>
    %102 = arith.minimumf %101, %100 : vector<1x256xf32>
    %cst_40 = arith.constant 0.000000e+00 : f32
    %cst_41 = arith.constant 1.700000e+01 : f32
    %103 = vector.broadcast %cst_40 : f32 to vector<1x256xf32>
    %104 = arith.maximumf %103, %91 : vector<1x256xf32>
    %105 = vector.broadcast %cst_41 : f32 to vector<1x256xf32>
    %106 = arith.minimumf %105, %104 : vector<1x256xf32>
    %107 = arith.subf %96, %106 : vector<1x256xf32>
    %cst_42 = arith.constant 1.000000e+00 : f32
    %108 = vector.broadcast %cst_42 : f32 to vector<1x256xf32>
    %109 = arith.addf %108, %107 : vector<1x256xf32>
    %110 = arith.subf %102, %106 : vector<1x256xf32>
    %cst_43 = arith.constant 1.000000e+00 : f32
    %111 = vector.broadcast %cst_43 : f32 to vector<1x256xf32>
    %112 = arith.subf %111, %110 : vector<1x256xf32>
    %113 = vector.broadcast %96 : vector<1x256xf32> to vector<18x256xf32>
    %114 = arith.cmpf oeq, %88, %113 : vector<18x256xf32>
    %cst_44 = arith.constant 0.000000e+00 : f32
    %115 = vector.shape_cast %109 : vector<1x256xf32> to vector<1x256xf32>
    %116 = vector.broadcast %115 : vector<1x256xf32> to vector<18x256xf32>
    %117 = vector.broadcast %cst_44 : f32 to vector<18x256xf32>
    %118 = arith.select %114, %116, %117 : vector<18x256xi1>, vector<18x256xf32>
    %119 = vector.broadcast %102 : vector<1x256xf32> to vector<18x256xf32>
    %120 = arith.cmpf oeq, %88, %119 : vector<18x256xf32>
    %cst_45 = arith.constant 0.000000e+00 : f32
    %121 = vector.shape_cast %112 : vector<1x256xf32> to vector<1x256xf32>
    %122 = vector.broadcast %121 : vector<1x256xf32> to vector<18x256xf32>
    %123 = vector.broadcast %cst_45 : f32 to vector<18x256xf32>
    %124 = arith.select %120, %122, %123 : vector<18x256xi1>, vector<18x256xf32>
    %125 = arith.addf %118, %124 : vector<18x256xf32>
    %126 = vector.extract_strided_slice %68 {offsets = [0, 0], sizes = [1, 256], strides = [1, 1]} : vector<16x256xf32> to vector<1x256xf32>
    %127 = vector.broadcast %126 : vector<1x256xf32> to vector<18x256xf32>
    %128 = arith.mulf %125, %127 : vector<18x256xf32>
    %129 = vector.extract_strided_slice %86 {offsets = [10, 0], sizes = [1, 256], strides = [1, 1]} : vector<24x256xf32> to vector<1x256xf32>
    %130 = math.floor %129 : vector<1x256xf32>
    %cst_46 = arith.constant 0.000000e+00 : f32
    %cst_47 = arith.constant 1.700000e+01 : f32
    %131 = vector.broadcast %cst_46 : f32 to vector<1x256xf32>
    %132 = arith.maximumf %131, %130 : vector<1x256xf32>
    %133 = vector.broadcast %cst_47 : f32 to vector<1x256xf32>
    %134 = arith.minimumf %133, %132 : vector<1x256xf32>
    %cst_48 = arith.constant 1.000000e+00 : f32
    %135 = vector.broadcast %cst_48 : f32 to vector<1x256xf32>
    %136 = arith.addf %130, %135 : vector<1x256xf32>
    %cst_49 = arith.constant 0.000000e+00 : f32
    %cst_50 = arith.constant 1.700000e+01 : f32
    %137 = vector.broadcast %cst_49 : f32 to vector<1x256xf32>
    %138 = arith.maximumf %137, %136 : vector<1x256xf32>
    %139 = vector.broadcast %cst_50 : f32 to vector<1x256xf32>
    %140 = arith.minimumf %139, %138 : vector<1x256xf32>
    %cst_51 = arith.constant 0.000000e+00 : f32
    %cst_52 = arith.constant 1.700000e+01 : f32
    %141 = vector.broadcast %cst_51 : f32 to vector<1x256xf32>
    %142 = arith.maximumf %141, %129 : vector<1x256xf32>
    %143 = vector.broadcast %cst_52 : f32 to vector<1x256xf32>
    %144 = arith.minimumf %143, %142 : vector<1x256xf32>
    %145 = arith.subf %134, %144 : vector<1x256xf32>
    %cst_53 = arith.constant 1.000000e+00 : f32
    %146 = vector.broadcast %cst_53 : f32 to vector<1x256xf32>
    %147 = arith.addf %146, %145 : vector<1x256xf32>
    %148 = arith.subf %140, %144 : vector<1x256xf32>
    %cst_54 = arith.constant 1.000000e+00 : f32
    %149 = vector.broadcast %cst_54 : f32 to vector<1x256xf32>
    %150 = arith.subf %149, %148 : vector<1x256xf32>
    %151 = vector.broadcast %134 : vector<1x256xf32> to vector<18x256xf32>
    %152 = arith.cmpf oeq, %88, %151 : vector<18x256xf32>
    %cst_55 = arith.constant 0.000000e+00 : f32
    %153 = vector.shape_cast %147 : vector<1x256xf32> to vector<1x256xf32>
    %154 = vector.broadcast %153 : vector<1x256xf32> to vector<18x256xf32>
    %155 = vector.broadcast %cst_55 : f32 to vector<18x256xf32>
    %156 = arith.select %152, %154, %155 : vector<18x256xi1>, vector<18x256xf32>
    %157 = vector.broadcast %140 : vector<1x256xf32> to vector<18x256xf32>
    %158 = arith.cmpf oeq, %88, %157 : vector<18x256xf32>
    %cst_56 = arith.constant 0.000000e+00 : f32
    %159 = vector.shape_cast %150 : vector<1x256xf32> to vector<1x256xf32>
    %160 = vector.broadcast %159 : vector<1x256xf32> to vector<18x256xf32>
    %161 = vector.broadcast %cst_56 : f32 to vector<18x256xf32>
    %162 = arith.select %158, %160, %161 : vector<18x256xi1>, vector<18x256xf32>
    %163 = arith.addf %156, %162 : vector<18x256xf32>
    %164 = vector.extract_strided_slice %68 {offsets = [1, 0], sizes = [1, 256], strides = [1, 1]} : vector<16x256xf32> to vector<1x256xf32>
    %165 = vector.broadcast %164 : vector<1x256xf32> to vector<18x256xf32>
    %166 = arith.mulf %163, %165 : vector<18x256xf32>
    %167 = vector.extract_strided_slice %86 {offsets = [11, 0], sizes = [1, 256], strides = [1, 1]} : vector<24x256xf32> to vector<1x256xf32>
    %168 = math.floor %167 : vector<1x256xf32>
    %cst_57 = arith.constant 0.000000e+00 : f32
    %cst_58 = arith.constant 1.700000e+01 : f32
    %169 = vector.broadcast %cst_57 : f32 to vector<1x256xf32>
    %170 = arith.maximumf %169, %168 : vector<1x256xf32>
    %171 = vector.broadcast %cst_58 : f32 to vector<1x256xf32>
    %172 = arith.minimumf %171, %170 : vector<1x256xf32>
    %cst_59 = arith.constant 1.000000e+00 : f32
    %173 = vector.broadcast %cst_59 : f32 to vector<1x256xf32>
    %174 = arith.addf %168, %173 : vector<1x256xf32>
    %cst_60 = arith.constant 0.000000e+00 : f32
    %cst_61 = arith.constant 1.700000e+01 : f32
    %175 = vector.broadcast %cst_60 : f32 to vector<1x256xf32>
    %176 = arith.maximumf %175, %174 : vector<1x256xf32>
    %177 = vector.broadcast %cst_61 : f32 to vector<1x256xf32>
    %178 = arith.minimumf %177, %176 : vector<1x256xf32>
    %cst_62 = arith.constant 0.000000e+00 : f32
    %cst_63 = arith.constant 1.700000e+01 : f32
    %179 = vector.broadcast %cst_62 : f32 to vector<1x256xf32>
    %180 = arith.maximumf %179, %167 : vector<1x256xf32>
    %181 = vector.broadcast %cst_63 : f32 to vector<1x256xf32>
    %182 = arith.minimumf %181, %180 : vector<1x256xf32>
    %183 = arith.subf %172, %182 : vector<1x256xf32>
    %cst_64 = arith.constant 1.000000e+00 : f32
    %184 = vector.broadcast %cst_64 : f32 to vector<1x256xf32>
    %185 = arith.addf %184, %183 : vector<1x256xf32>
    %186 = arith.subf %178, %182 : vector<1x256xf32>
    %cst_65 = arith.constant 1.000000e+00 : f32
    %187 = vector.broadcast %cst_65 : f32 to vector<1x256xf32>
    %188 = arith.subf %187, %186 : vector<1x256xf32>
    %189 = vector.broadcast %172 : vector<1x256xf32> to vector<18x256xf32>
    %190 = arith.cmpf oeq, %88, %189 : vector<18x256xf32>
    %cst_66 = arith.constant 0.000000e+00 : f32
    %191 = vector.shape_cast %185 : vector<1x256xf32> to vector<1x256xf32>
    %192 = vector.broadcast %191 : vector<1x256xf32> to vector<18x256xf32>
    %193 = vector.broadcast %cst_66 : f32 to vector<18x256xf32>
    %194 = arith.select %190, %192, %193 : vector<18x256xi1>, vector<18x256xf32>
    %195 = vector.broadcast %178 : vector<1x256xf32> to vector<18x256xf32>
    %196 = arith.cmpf oeq, %88, %195 : vector<18x256xf32>
    %cst_67 = arith.constant 0.000000e+00 : f32
    %197 = vector.shape_cast %188 : vector<1x256xf32> to vector<1x256xf32>
    %198 = vector.broadcast %197 : vector<1x256xf32> to vector<18x256xf32>
    %199 = vector.broadcast %cst_67 : f32 to vector<18x256xf32>
    %200 = arith.select %196, %198, %199 : vector<18x256xi1>, vector<18x256xf32>
    %201 = arith.addf %194, %200 : vector<18x256xf32>
    %202 = vector.extract_strided_slice %68 {offsets = [2, 0], sizes = [1, 256], strides = [1, 1]} : vector<16x256xf32> to vector<1x256xf32>
    %203 = vector.broadcast %202 : vector<1x256xf32> to vector<18x256xf32>
    %204 = arith.mulf %201, %203 : vector<18x256xf32>
    %205 = vector.extract_strided_slice %86 {offsets = [12, 0], sizes = [1, 256], strides = [1, 1]} : vector<24x256xf32> to vector<1x256xf32>
    %206 = math.floor %205 : vector<1x256xf32>
    %cst_68 = arith.constant 0.000000e+00 : f32
    %cst_69 = arith.constant 1.700000e+01 : f32
    %207 = vector.broadcast %cst_68 : f32 to vector<1x256xf32>
    %208 = arith.maximumf %207, %206 : vector<1x256xf32>
    %209 = vector.broadcast %cst_69 : f32 to vector<1x256xf32>
    %210 = arith.minimumf %209, %208 : vector<1x256xf32>
    %cst_70 = arith.constant 1.000000e+00 : f32
    %211 = vector.broadcast %cst_70 : f32 to vector<1x256xf32>
    %212 = arith.addf %206, %211 : vector<1x256xf32>
    %cst_71 = arith.constant 0.000000e+00 : f32
    %cst_72 = arith.constant 1.700000e+01 : f32
    %213 = vector.broadcast %cst_71 : f32 to vector<1x256xf32>
    %214 = arith.maximumf %213, %212 : vector<1x256xf32>
    %215 = vector.broadcast %cst_72 : f32 to vector<1x256xf32>
    %216 = arith.minimumf %215, %214 : vector<1x256xf32>
    %cst_73 = arith.constant 0.000000e+00 : f32
    %cst_74 = arith.constant 1.700000e+01 : f32
    %217 = vector.broadcast %cst_73 : f32 to vector<1x256xf32>
    %218 = arith.maximumf %217, %205 : vector<1x256xf32>
    %219 = vector.broadcast %cst_74 : f32 to vector<1x256xf32>
    %220 = arith.minimumf %219, %218 : vector<1x256xf32>
    %221 = arith.subf %210, %220 : vector<1x256xf32>
    %cst_75 = arith.constant 1.000000e+00 : f32
    %222 = vector.broadcast %cst_75 : f32 to vector<1x256xf32>
    %223 = arith.addf %222, %221 : vector<1x256xf32>
    %224 = arith.subf %216, %220 : vector<1x256xf32>
    %cst_76 = arith.constant 1.000000e+00 : f32
    %225 = vector.broadcast %cst_76 : f32 to vector<1x256xf32>
    %226 = arith.subf %225, %224 : vector<1x256xf32>
    %227 = vector.broadcast %210 : vector<1x256xf32> to vector<18x256xf32>
    %228 = arith.cmpf oeq, %88, %227 : vector<18x256xf32>
    %cst_77 = arith.constant 0.000000e+00 : f32
    %229 = vector.shape_cast %223 : vector<1x256xf32> to vector<1x256xf32>
    %230 = vector.broadcast %229 : vector<1x256xf32> to vector<18x256xf32>
    %231 = vector.broadcast %cst_77 : f32 to vector<18x256xf32>
    %232 = arith.select %228, %230, %231 : vector<18x256xi1>, vector<18x256xf32>
    %233 = vector.broadcast %216 : vector<1x256xf32> to vector<18x256xf32>
    %234 = arith.cmpf oeq, %88, %233 : vector<18x256xf32>
    %cst_78 = arith.constant 0.000000e+00 : f32
    %235 = vector.shape_cast %226 : vector<1x256xf32> to vector<1x256xf32>
    %236 = vector.broadcast %235 : vector<1x256xf32> to vector<18x256xf32>
    %237 = vector.broadcast %cst_78 : f32 to vector<18x256xf32>
    %238 = arith.select %234, %236, %237 : vector<18x256xi1>, vector<18x256xf32>
    %239 = arith.addf %232, %238 : vector<18x256xf32>
    %240 = vector.extract_strided_slice %68 {offsets = [3, 0], sizes = [1, 256], strides = [1, 1]} : vector<16x256xf32> to vector<1x256xf32>
    %241 = vector.broadcast %240 : vector<1x256xf32> to vector<18x256xf32>
    %242 = arith.mulf %239, %241 : vector<18x256xf32>
    %243 = vector.extract_strided_slice %86 {offsets = [13, 0], sizes = [1, 256], strides = [1, 1]} : vector<24x256xf32> to vector<1x256xf32>
    %244 = math.floor %243 : vector<1x256xf32>
    %cst_79 = arith.constant 0.000000e+00 : f32
    %cst_80 = arith.constant 1.700000e+01 : f32
    %245 = vector.broadcast %cst_79 : f32 to vector<1x256xf32>
    %246 = arith.maximumf %245, %244 : vector<1x256xf32>
    %247 = vector.broadcast %cst_80 : f32 to vector<1x256xf32>
    %248 = arith.minimumf %247, %246 : vector<1x256xf32>
    %cst_81 = arith.constant 1.000000e+00 : f32
    %249 = vector.broadcast %cst_81 : f32 to vector<1x256xf32>
    %250 = arith.addf %244, %249 : vector<1x256xf32>
    %cst_82 = arith.constant 0.000000e+00 : f32
    %cst_83 = arith.constant 1.700000e+01 : f32
    %251 = vector.broadcast %cst_82 : f32 to vector<1x256xf32>
    %252 = arith.maximumf %251, %250 : vector<1x256xf32>
    %253 = vector.broadcast %cst_83 : f32 to vector<1x256xf32>
    %254 = arith.minimumf %253, %252 : vector<1x256xf32>
    %cst_84 = arith.constant 0.000000e+00 : f32
    %cst_85 = arith.constant 1.700000e+01 : f32
    %255 = vector.broadcast %cst_84 : f32 to vector<1x256xf32>
    %256 = arith.maximumf %255, %243 : vector<1x256xf32>
    %257 = vector.broadcast %cst_85 : f32 to vector<1x256xf32>
    %258 = arith.minimumf %257, %256 : vector<1x256xf32>
    %259 = arith.subf %248, %258 : vector<1x256xf32>
    %cst_86 = arith.constant 1.000000e+00 : f32
    %260 = vector.broadcast %cst_86 : f32 to vector<1x256xf32>
    %261 = arith.addf %260, %259 : vector<1x256xf32>
    %262 = arith.subf %254, %258 : vector<1x256xf32>
    %cst_87 = arith.constant 1.000000e+00 : f32
    %263 = vector.broadcast %cst_87 : f32 to vector<1x256xf32>
    %264 = arith.subf %263, %262 : vector<1x256xf32>
    %265 = vector.broadcast %248 : vector<1x256xf32> to vector<18x256xf32>
    %266 = arith.cmpf oeq, %88, %265 : vector<18x256xf32>
    %cst_88 = arith.constant 0.000000e+00 : f32
    %267 = vector.shape_cast %261 : vector<1x256xf32> to vector<1x256xf32>
    %268 = vector.broadcast %267 : vector<1x256xf32> to vector<18x256xf32>
    %269 = vector.broadcast %cst_88 : f32 to vector<18x256xf32>
    %270 = arith.select %266, %268, %269 : vector<18x256xi1>, vector<18x256xf32>
    %271 = vector.broadcast %254 : vector<1x256xf32> to vector<18x256xf32>
    %272 = arith.cmpf oeq, %88, %271 : vector<18x256xf32>
    %cst_89 = arith.constant 0.000000e+00 : f32
    %273 = vector.shape_cast %264 : vector<1x256xf32> to vector<1x256xf32>
    %274 = vector.broadcast %273 : vector<1x256xf32> to vector<18x256xf32>
    %275 = vector.broadcast %cst_89 : f32 to vector<18x256xf32>
    %276 = arith.select %272, %274, %275 : vector<18x256xi1>, vector<18x256xf32>
    %277 = arith.addf %270, %276 : vector<18x256xf32>
    %278 = vector.extract_strided_slice %68 {offsets = [4, 0], sizes = [1, 256], strides = [1, 1]} : vector<16x256xf32> to vector<1x256xf32>
    %279 = vector.broadcast %278 : vector<1x256xf32> to vector<18x256xf32>
    %280 = arith.mulf %277, %279 : vector<18x256xf32>
    %281 = vector.extract_strided_slice %86 {offsets = [14, 0], sizes = [1, 256], strides = [1, 1]} : vector<24x256xf32> to vector<1x256xf32>
    %282 = math.floor %281 : vector<1x256xf32>
    %cst_90 = arith.constant 0.000000e+00 : f32
    %cst_91 = arith.constant 1.700000e+01 : f32
    %283 = vector.broadcast %cst_90 : f32 to vector<1x256xf32>
    %284 = arith.maximumf %283, %282 : vector<1x256xf32>
    %285 = vector.broadcast %cst_91 : f32 to vector<1x256xf32>
    %286 = arith.minimumf %285, %284 : vector<1x256xf32>
    %cst_92 = arith.constant 1.000000e+00 : f32
    %287 = vector.broadcast %cst_92 : f32 to vector<1x256xf32>
    %288 = arith.addf %282, %287 : vector<1x256xf32>
    %cst_93 = arith.constant 0.000000e+00 : f32
    %cst_94 = arith.constant 1.700000e+01 : f32
    %289 = vector.broadcast %cst_93 : f32 to vector<1x256xf32>
    %290 = arith.maximumf %289, %288 : vector<1x256xf32>
    %291 = vector.broadcast %cst_94 : f32 to vector<1x256xf32>
    %292 = arith.minimumf %291, %290 : vector<1x256xf32>
    %cst_95 = arith.constant 0.000000e+00 : f32
    %cst_96 = arith.constant 1.700000e+01 : f32
    %293 = vector.broadcast %cst_95 : f32 to vector<1x256xf32>
    %294 = arith.maximumf %293, %281 : vector<1x256xf32>
    %295 = vector.broadcast %cst_96 : f32 to vector<1x256xf32>
    %296 = arith.minimumf %295, %294 : vector<1x256xf32>
    %297 = arith.subf %286, %296 : vector<1x256xf32>
    %cst_97 = arith.constant 1.000000e+00 : f32
    %298 = vector.broadcast %cst_97 : f32 to vector<1x256xf32>
    %299 = arith.addf %298, %297 : vector<1x256xf32>
    %300 = arith.subf %292, %296 : vector<1x256xf32>
    %cst_98 = arith.constant 1.000000e+00 : f32
    %301 = vector.broadcast %cst_98 : f32 to vector<1x256xf32>
    %302 = arith.subf %301, %300 : vector<1x256xf32>
    %303 = vector.broadcast %286 : vector<1x256xf32> to vector<18x256xf32>
    %304 = arith.cmpf oeq, %88, %303 : vector<18x256xf32>
    %cst_99 = arith.constant 0.000000e+00 : f32
    %305 = vector.shape_cast %299 : vector<1x256xf32> to vector<1x256xf32>
    %306 = vector.broadcast %305 : vector<1x256xf32> to vector<18x256xf32>
    %307 = vector.broadcast %cst_99 : f32 to vector<18x256xf32>
    %308 = arith.select %304, %306, %307 : vector<18x256xi1>, vector<18x256xf32>
    %309 = vector.broadcast %292 : vector<1x256xf32> to vector<18x256xf32>
    %310 = arith.cmpf oeq, %88, %309 : vector<18x256xf32>
    %cst_100 = arith.constant 0.000000e+00 : f32
    %311 = vector.shape_cast %302 : vector<1x256xf32> to vector<1x256xf32>
    %312 = vector.broadcast %311 : vector<1x256xf32> to vector<18x256xf32>
    %313 = vector.broadcast %cst_100 : f32 to vector<18x256xf32>
    %314 = arith.select %310, %312, %313 : vector<18x256xi1>, vector<18x256xf32>
    %315 = arith.addf %308, %314 : vector<18x256xf32>
    %316 = vector.extract_strided_slice %68 {offsets = [5, 0], sizes = [1, 256], strides = [1, 1]} : vector<16x256xf32> to vector<1x256xf32>
    %317 = vector.broadcast %316 : vector<1x256xf32> to vector<18x256xf32>
    %318 = arith.mulf %315, %317 : vector<18x256xf32>
    %319 = vector.extract_strided_slice %86 {offsets = [15, 0], sizes = [1, 256], strides = [1, 1]} : vector<24x256xf32> to vector<1x256xf32>
    %320 = math.floor %319 : vector<1x256xf32>
    %cst_101 = arith.constant 0.000000e+00 : f32
    %cst_102 = arith.constant 1.700000e+01 : f32
    %321 = vector.broadcast %cst_101 : f32 to vector<1x256xf32>
    %322 = arith.maximumf %321, %320 : vector<1x256xf32>
    %323 = vector.broadcast %cst_102 : f32 to vector<1x256xf32>
    %324 = arith.minimumf %323, %322 : vector<1x256xf32>
    %cst_103 = arith.constant 1.000000e+00 : f32
    %325 = vector.broadcast %cst_103 : f32 to vector<1x256xf32>
    %326 = arith.addf %320, %325 : vector<1x256xf32>
    %cst_104 = arith.constant 0.000000e+00 : f32
    %cst_105 = arith.constant 1.700000e+01 : f32
    %327 = vector.broadcast %cst_104 : f32 to vector<1x256xf32>
    %328 = arith.maximumf %327, %326 : vector<1x256xf32>
    %329 = vector.broadcast %cst_105 : f32 to vector<1x256xf32>
    %330 = arith.minimumf %329, %328 : vector<1x256xf32>
    %cst_106 = arith.constant 0.000000e+00 : f32
    %cst_107 = arith.constant 1.700000e+01 : f32
    %331 = vector.broadcast %cst_106 : f32 to vector<1x256xf32>
    %332 = arith.maximumf %331, %319 : vector<1x256xf32>
    %333 = vector.broadcast %cst_107 : f32 to vector<1x256xf32>
    %334 = arith.minimumf %333, %332 : vector<1x256xf32>
    %335 = arith.subf %324, %334 : vector<1x256xf32>
    %cst_108 = arith.constant 1.000000e+00 : f32
    %336 = vector.broadcast %cst_108 : f32 to vector<1x256xf32>
    %337 = arith.addf %336, %335 : vector<1x256xf32>
    %338 = arith.subf %330, %334 : vector<1x256xf32>
    %cst_109 = arith.constant 1.000000e+00 : f32
    %339 = vector.broadcast %cst_109 : f32 to vector<1x256xf32>
    %340 = arith.subf %339, %338 : vector<1x256xf32>
    %341 = vector.broadcast %324 : vector<1x256xf32> to vector<18x256xf32>
    %342 = arith.cmpf oeq, %88, %341 : vector<18x256xf32>
    %cst_110 = arith.constant 0.000000e+00 : f32
    %343 = vector.shape_cast %337 : vector<1x256xf32> to vector<1x256xf32>
    %344 = vector.broadcast %343 : vector<1x256xf32> to vector<18x256xf32>
    %345 = vector.broadcast %cst_110 : f32 to vector<18x256xf32>
    %346 = arith.select %342, %344, %345 : vector<18x256xi1>, vector<18x256xf32>
    %347 = vector.broadcast %330 : vector<1x256xf32> to vector<18x256xf32>
    %348 = arith.cmpf oeq, %88, %347 : vector<18x256xf32>
    %cst_111 = arith.constant 0.000000e+00 : f32
    %349 = vector.shape_cast %340 : vector<1x256xf32> to vector<1x256xf32>
    %350 = vector.broadcast %349 : vector<1x256xf32> to vector<18x256xf32>
    %351 = vector.broadcast %cst_111 : f32 to vector<18x256xf32>
    %352 = arith.select %348, %350, %351 : vector<18x256xi1>, vector<18x256xf32>
    %353 = arith.addf %346, %352 : vector<18x256xf32>
    %354 = vector.extract_strided_slice %68 {offsets = [6, 0], sizes = [1, 256], strides = [1, 1]} : vector<16x256xf32> to vector<1x256xf32>
    %355 = vector.broadcast %354 : vector<1x256xf32> to vector<18x256xf32>
    %356 = arith.mulf %353, %355 : vector<18x256xf32>
    %357 = vector.extract_strided_slice %86 {offsets = [16, 0], sizes = [1, 256], strides = [1, 1]} : vector<24x256xf32> to vector<1x256xf32>
    %358 = math.floor %357 : vector<1x256xf32>
    %cst_112 = arith.constant 0.000000e+00 : f32
    %cst_113 = arith.constant 1.700000e+01 : f32
    %359 = vector.broadcast %cst_112 : f32 to vector<1x256xf32>
    %360 = arith.maximumf %359, %358 : vector<1x256xf32>
    %361 = vector.broadcast %cst_113 : f32 to vector<1x256xf32>
    %362 = arith.minimumf %361, %360 : vector<1x256xf32>
    %cst_114 = arith.constant 1.000000e+00 : f32
    %363 = vector.broadcast %cst_114 : f32 to vector<1x256xf32>
    %364 = arith.addf %358, %363 : vector<1x256xf32>
    %cst_115 = arith.constant 0.000000e+00 : f32
    %cst_116 = arith.constant 1.700000e+01 : f32
    %365 = vector.broadcast %cst_115 : f32 to vector<1x256xf32>
    %366 = arith.maximumf %365, %364 : vector<1x256xf32>
    %367 = vector.broadcast %cst_116 : f32 to vector<1x256xf32>
    %368 = arith.minimumf %367, %366 : vector<1x256xf32>
    %cst_117 = arith.constant 0.000000e+00 : f32
    %cst_118 = arith.constant 1.700000e+01 : f32
    %369 = vector.broadcast %cst_117 : f32 to vector<1x256xf32>
    %370 = arith.maximumf %369, %357 : vector<1x256xf32>
    %371 = vector.broadcast %cst_118 : f32 to vector<1x256xf32>
    %372 = arith.minimumf %371, %370 : vector<1x256xf32>
    %373 = arith.subf %362, %372 : vector<1x256xf32>
    %cst_119 = arith.constant 1.000000e+00 : f32
    %374 = vector.broadcast %cst_119 : f32 to vector<1x256xf32>
    %375 = arith.addf %374, %373 : vector<1x256xf32>
    %376 = arith.subf %368, %372 : vector<1x256xf32>
    %cst_120 = arith.constant 1.000000e+00 : f32
    %377 = vector.broadcast %cst_120 : f32 to vector<1x256xf32>
    %378 = arith.subf %377, %376 : vector<1x256xf32>
    %379 = vector.broadcast %362 : vector<1x256xf32> to vector<18x256xf32>
    %380 = arith.cmpf oeq, %88, %379 : vector<18x256xf32>
    %cst_121 = arith.constant 0.000000e+00 : f32
    %381 = vector.shape_cast %375 : vector<1x256xf32> to vector<1x256xf32>
    %382 = vector.broadcast %381 : vector<1x256xf32> to vector<18x256xf32>
    %383 = vector.broadcast %cst_121 : f32 to vector<18x256xf32>
    %384 = arith.select %380, %382, %383 : vector<18x256xi1>, vector<18x256xf32>
    %385 = vector.broadcast %368 : vector<1x256xf32> to vector<18x256xf32>
    %386 = arith.cmpf oeq, %88, %385 : vector<18x256xf32>
    %cst_122 = arith.constant 0.000000e+00 : f32
    %387 = vector.shape_cast %378 : vector<1x256xf32> to vector<1x256xf32>
    %388 = vector.broadcast %387 : vector<1x256xf32> to vector<18x256xf32>
    %389 = vector.broadcast %cst_122 : f32 to vector<18x256xf32>
    %390 = arith.select %386, %388, %389 : vector<18x256xi1>, vector<18x256xf32>
    %391 = arith.addf %384, %390 : vector<18x256xf32>
    %392 = vector.extract_strided_slice %68 {offsets = [7, 0], sizes = [1, 256], strides = [1, 1]} : vector<16x256xf32> to vector<1x256xf32>
    %393 = vector.broadcast %392 : vector<1x256xf32> to vector<18x256xf32>
    %394 = arith.mulf %391, %393 : vector<18x256xf32>
    %395 = vector.extract_strided_slice %86 {offsets = [17, 0], sizes = [1, 256], strides = [1, 1]} : vector<24x256xf32> to vector<1x256xf32>
    %396 = math.floor %395 : vector<1x256xf32>
    %cst_123 = arith.constant 0.000000e+00 : f32
    %cst_124 = arith.constant 1.700000e+01 : f32
    %397 = vector.broadcast %cst_123 : f32 to vector<1x256xf32>
    %398 = arith.maximumf %397, %396 : vector<1x256xf32>
    %399 = vector.broadcast %cst_124 : f32 to vector<1x256xf32>
    %400 = arith.minimumf %399, %398 : vector<1x256xf32>
    %cst_125 = arith.constant 1.000000e+00 : f32
    %401 = vector.broadcast %cst_125 : f32 to vector<1x256xf32>
    %402 = arith.addf %396, %401 : vector<1x256xf32>
    %cst_126 = arith.constant 0.000000e+00 : f32
    %cst_127 = arith.constant 1.700000e+01 : f32
    %403 = vector.broadcast %cst_126 : f32 to vector<1x256xf32>
    %404 = arith.maximumf %403, %402 : vector<1x256xf32>
    %405 = vector.broadcast %cst_127 : f32 to vector<1x256xf32>
    %406 = arith.minimumf %405, %404 : vector<1x256xf32>
    %cst_128 = arith.constant 0.000000e+00 : f32
    %cst_129 = arith.constant 1.700000e+01 : f32
    %407 = vector.broadcast %cst_128 : f32 to vector<1x256xf32>
    %408 = arith.maximumf %407, %395 : vector<1x256xf32>
    %409 = vector.broadcast %cst_129 : f32 to vector<1x256xf32>
    %410 = arith.minimumf %409, %408 : vector<1x256xf32>
    %411 = arith.subf %400, %410 : vector<1x256xf32>
    %cst_130 = arith.constant 1.000000e+00 : f32
    %412 = vector.broadcast %cst_130 : f32 to vector<1x256xf32>
    %413 = arith.addf %412, %411 : vector<1x256xf32>
    %414 = arith.subf %406, %410 : vector<1x256xf32>
    %cst_131 = arith.constant 1.000000e+00 : f32
    %415 = vector.broadcast %cst_131 : f32 to vector<1x256xf32>
    %416 = arith.subf %415, %414 : vector<1x256xf32>
    %417 = vector.broadcast %400 : vector<1x256xf32> to vector<18x256xf32>
    %418 = arith.cmpf oeq, %88, %417 : vector<18x256xf32>
    %cst_132 = arith.constant 0.000000e+00 : f32
    %419 = vector.shape_cast %413 : vector<1x256xf32> to vector<1x256xf32>
    %420 = vector.broadcast %419 : vector<1x256xf32> to vector<18x256xf32>
    %421 = vector.broadcast %cst_132 : f32 to vector<18x256xf32>
    %422 = arith.select %418, %420, %421 : vector<18x256xi1>, vector<18x256xf32>
    %423 = vector.broadcast %406 : vector<1x256xf32> to vector<18x256xf32>
    %424 = arith.cmpf oeq, %88, %423 : vector<18x256xf32>
    %cst_133 = arith.constant 0.000000e+00 : f32
    %425 = vector.shape_cast %416 : vector<1x256xf32> to vector<1x256xf32>
    %426 = vector.broadcast %425 : vector<1x256xf32> to vector<18x256xf32>
    %427 = vector.broadcast %cst_133 : f32 to vector<18x256xf32>
    %428 = arith.select %424, %426, %427 : vector<18x256xi1>, vector<18x256xf32>
    %429 = arith.addf %422, %428 : vector<18x256xf32>
    %430 = vector.extract_strided_slice %68 {offsets = [8, 0], sizes = [1, 256], strides = [1, 1]} : vector<16x256xf32> to vector<1x256xf32>
    %431 = vector.broadcast %430 : vector<1x256xf32> to vector<18x256xf32>
    %432 = arith.mulf %429, %431 : vector<18x256xf32>
    %433 = tpu.concatenate %128, %166, %204, %242, %280, %318, %356, %394, %432 in 1 : vector<18x256xf32>, vector<18x256xf32>, vector<18x256xf32>, vector<18x256xf32>, vector<18x256xf32>, vector<18x256xf32>, vector<18x256xf32>, vector<18x256xf32>, vector<18x256xf32> -> vector<18x2304xf32>
    %cst_134 = arith.constant dense<0.000000e+00> : vector<96x2304xf32>
    %434 = tpu.matmul %9, %433, %cst_134 {dimension_numbers = #tpu.dot_dimension_numbers<[1], [0], [0], [1], [0, 0, 1, 1], [], []>} : vector<96x18xf32>, vector<18x2304xf32>, vector<96x2304xf32> -> vector<96x2304xf32>
    %cst_135 = arith.constant 0.000000e+00 : f32
    %435 = vector.broadcast %cst_135 : f32 to vector<8x256xf32>
    %436 = vector.extract_strided_slice %86 {offsets = [0, 0], sizes = [1, 256], strides = [1, 1]} : vector<24x256xf32> to vector<1x256xf32>
    %437 = math.floor %436 : vector<1x256xf32>
    %cst_136 = arith.constant 0.000000e+00 : f32
    %cst_137 = arith.constant 1.700000e+01 : f32
    %438 = vector.broadcast %cst_136 : f32 to vector<1x256xf32>
    %439 = arith.maximumf %438, %437 : vector<1x256xf32>
    %440 = vector.broadcast %cst_137 : f32 to vector<1x256xf32>
    %441 = arith.minimumf %440, %439 : vector<1x256xf32>
    %cst_138 = arith.constant 1.000000e+00 : f32
    %442 = vector.broadcast %cst_138 : f32 to vector<1x256xf32>
    %443 = arith.addf %437, %442 : vector<1x256xf32>
    %cst_139 = arith.constant 0.000000e+00 : f32
    %cst_140 = arith.constant 1.700000e+01 : f32
    %444 = vector.broadcast %cst_139 : f32 to vector<1x256xf32>
    %445 = arith.maximumf %444, %443 : vector<1x256xf32>
    %446 = vector.broadcast %cst_140 : f32 to vector<1x256xf32>
    %447 = arith.minimumf %446, %445 : vector<1x256xf32>
    %cst_141 = arith.constant 0.000000e+00 : f32
    %cst_142 = arith.constant 1.700000e+01 : f32
    %448 = vector.broadcast %cst_141 : f32 to vector<1x256xf32>
    %449 = arith.maximumf %448, %436 : vector<1x256xf32>
    %450 = vector.broadcast %cst_142 : f32 to vector<1x256xf32>
    %451 = arith.minimumf %450, %449 : vector<1x256xf32>
    %452 = arith.subf %441, %451 : vector<1x256xf32>
    %cst_143 = arith.constant 1.000000e+00 : f32
    %453 = vector.broadcast %cst_143 : f32 to vector<1x256xf32>
    %454 = arith.addf %453, %452 : vector<1x256xf32>
    %455 = arith.subf %447, %451 : vector<1x256xf32>
    %cst_144 = arith.constant 1.000000e+00 : f32
    %456 = vector.broadcast %cst_144 : f32 to vector<1x256xf32>
    %457 = arith.subf %456, %455 : vector<1x256xf32>
    %458 = vector.broadcast %441 : vector<1x256xf32> to vector<24x256xf32>
    %459 = arith.cmpf oeq, %90, %458 : vector<24x256xf32>
    %cst_145 = arith.constant 0.000000e+00 : f32
    %460 = vector.shape_cast %454 : vector<1x256xf32> to vector<1x256xf32>
    %461 = vector.broadcast %460 : vector<1x256xf32> to vector<24x256xf32>
    %462 = vector.broadcast %cst_145 : f32 to vector<24x256xf32>
    %463 = arith.select %459, %461, %462 : vector<24x256xi1>, vector<24x256xf32>
    %464 = vector.broadcast %447 : vector<1x256xf32> to vector<24x256xf32>
    %465 = arith.cmpf oeq, %90, %464 : vector<24x256xf32>
    %cst_146 = arith.constant 0.000000e+00 : f32
    %466 = vector.shape_cast %457 : vector<1x256xf32> to vector<1x256xf32>
    %467 = vector.broadcast %466 : vector<1x256xf32> to vector<24x256xf32>
    %468 = vector.broadcast %cst_146 : f32 to vector<24x256xf32>
    %469 = arith.select %465, %467, %468 : vector<24x256xi1>, vector<24x256xf32>
    %470 = arith.addf %463, %469 : vector<24x256xf32>
    %471 = vector.extract_strided_slice %434 {offsets = [0, 0], sizes = [96, 256], strides = [1, 1]} : vector<96x2304xf32> to vector<96x256xf32>
    %472 = vector.extract_strided_slice %471 {offsets = [0, 0], sizes = [24, 256], strides = [1, 1]} : vector<96x256xf32> to vector<24x256xf32>
    %473 = arith.mulf %472, %470 : vector<24x256xf32>
    %474 = vector.extract_strided_slice %471 {offsets = [24, 0], sizes = [24, 256], strides = [1, 1]} : vector<96x256xf32> to vector<24x256xf32>
    %475 = arith.mulf %474, %470 : vector<24x256xf32>
    %476 = vector.extract_strided_slice %471 {offsets = [48, 0], sizes = [24, 256], strides = [1, 1]} : vector<96x256xf32> to vector<24x256xf32>
    %477 = arith.mulf %476, %470 : vector<24x256xf32>
    %478 = vector.extract_strided_slice %471 {offsets = [72, 0], sizes = [24, 256], strides = [1, 1]} : vector<96x256xf32> to vector<24x256xf32>
    %479 = arith.mulf %478, %470 : vector<24x256xf32>
    %480 = tpu.concatenate %473, %475, %477, %479 in 0 : vector<24x256xf32>, vector<24x256xf32>, vector<24x256xf32>, vector<24x256xf32> -> vector<96x256xf32>
    %c0_147 = arith.constant 0 : index
    %c0_148 = arith.constant 0 : index
    %c0_149 = arith.constant 0 : index
    %481 = vector.load %arg10[%c0_147, %c0_148, %c0_149] : memref<9x8x96xf32, #tpu.memory_space<vmem>>, vector<1x8x96xf32>
    %482 = vector.shape_cast %481 : vector<1x8x96xf32> to vector<8x96xf32>
    %cst_150 = arith.constant dense<0.000000e+00> : vector<8x256xf32>
    %483 = tpu.matmul %482, %480, %cst_150 {dimension_numbers = #tpu.dot_dimension_numbers<[1], [0], [0], [1], [0, 0, 1, 1], [], []>} : vector<8x96xf32>, vector<96x256xf32>, vector<8x256xf32> -> vector<8x256xf32>
    %484 = arith.addf %435, %483 : vector<8x256xf32>
    %485 = vector.extract_strided_slice %86 {offsets = [1, 0], sizes = [1, 256], strides = [1, 1]} : vector<24x256xf32> to vector<1x256xf32>
    %486 = math.floor %485 : vector<1x256xf32>
    %cst_151 = arith.constant 0.000000e+00 : f32
    %cst_152 = arith.constant 1.700000e+01 : f32
    %487 = vector.broadcast %cst_151 : f32 to vector<1x256xf32>
    %488 = arith.maximumf %487, %486 : vector<1x256xf32>
    %489 = vector.broadcast %cst_152 : f32 to vector<1x256xf32>
    %490 = arith.minimumf %489, %488 : vector<1x256xf32>
    %cst_153 = arith.constant 1.000000e+00 : f32
    %491 = vector.broadcast %cst_153 : f32 to vector<1x256xf32>
    %492 = arith.addf %486, %491 : vector<1x256xf32>
    %cst_154 = arith.constant 0.000000e+00 : f32
    %cst_155 = arith.constant 1.700000e+01 : f32
    %493 = vector.broadcast %cst_154 : f32 to vector<1x256xf32>
    %494 = arith.maximumf %493, %492 : vector<1x256xf32>
    %495 = vector.broadcast %cst_155 : f32 to vector<1x256xf32>
    %496 = arith.minimumf %495, %494 : vector<1x256xf32>
    %cst_156 = arith.constant 0.000000e+00 : f32
    %cst_157 = arith.constant 1.700000e+01 : f32
    %497 = vector.broadcast %cst_156 : f32 to vector<1x256xf32>
    %498 = arith.maximumf %497, %485 : vector<1x256xf32>
    %499 = vector.broadcast %cst_157 : f32 to vector<1x256xf32>
    %500 = arith.minimumf %499, %498 : vector<1x256xf32>
    %501 = arith.subf %490, %500 : vector<1x256xf32>
    %cst_158 = arith.constant 1.000000e+00 : f32
    %502 = vector.broadcast %cst_158 : f32 to vector<1x256xf32>
    %503 = arith.addf %502, %501 : vector<1x256xf32>
    %504 = arith.subf %496, %500 : vector<1x256xf32>
    %cst_159 = arith.constant 1.000000e+00 : f32
    %505 = vector.broadcast %cst_159 : f32 to vector<1x256xf32>
    %506 = arith.subf %505, %504 : vector<1x256xf32>
    %507 = vector.broadcast %490 : vector<1x256xf32> to vector<24x256xf32>
    %508 = arith.cmpf oeq, %90, %507 : vector<24x256xf32>
    %cst_160 = arith.constant 0.000000e+00 : f32
    %509 = vector.shape_cast %503 : vector<1x256xf32> to vector<1x256xf32>
    %510 = vector.broadcast %509 : vector<1x256xf32> to vector<24x256xf32>
    %511 = vector.broadcast %cst_160 : f32 to vector<24x256xf32>
    %512 = arith.select %508, %510, %511 : vector<24x256xi1>, vector<24x256xf32>
    %513 = vector.broadcast %496 : vector<1x256xf32> to vector<24x256xf32>
    %514 = arith.cmpf oeq, %90, %513 : vector<24x256xf32>
    %cst_161 = arith.constant 0.000000e+00 : f32
    %515 = vector.shape_cast %506 : vector<1x256xf32> to vector<1x256xf32>
    %516 = vector.broadcast %515 : vector<1x256xf32> to vector<24x256xf32>
    %517 = vector.broadcast %cst_161 : f32 to vector<24x256xf32>
    %518 = arith.select %514, %516, %517 : vector<24x256xi1>, vector<24x256xf32>
    %519 = arith.addf %512, %518 : vector<24x256xf32>
    %520 = vector.extract_strided_slice %434 {offsets = [0, 256], sizes = [96, 256], strides = [1, 1]} : vector<96x2304xf32> to vector<96x256xf32>
    %521 = vector.extract_strided_slice %520 {offsets = [0, 0], sizes = [24, 256], strides = [1, 1]} : vector<96x256xf32> to vector<24x256xf32>
    %522 = arith.mulf %521, %519 : vector<24x256xf32>
    %523 = vector.extract_strided_slice %520 {offsets = [24, 0], sizes = [24, 256], strides = [1, 1]} : vector<96x256xf32> to vector<24x256xf32>
    %524 = arith.mulf %523, %519 : vector<24x256xf32>
    %525 = vector.extract_strided_slice %520 {offsets = [48, 0], sizes = [24, 256], strides = [1, 1]} : vector<96x256xf32> to vector<24x256xf32>
    %526 = arith.mulf %525, %519 : vector<24x256xf32>
    %527 = vector.extract_strided_slice %520 {offsets = [72, 0], sizes = [24, 256], strides = [1, 1]} : vector<96x256xf32> to vector<24x256xf32>
    %528 = arith.mulf %527, %519 : vector<24x256xf32>
    %529 = tpu.concatenate %522, %524, %526, %528 in 0 : vector<24x256xf32>, vector<24x256xf32>, vector<24x256xf32>, vector<24x256xf32> -> vector<96x256xf32>
    %c1 = arith.constant 1 : index
    %c0_162 = arith.constant 0 : index
    %c0_163 = arith.constant 0 : index
    %530 = vector.load %arg10[%c1, %c0_162, %c0_163] : memref<9x8x96xf32, #tpu.memory_space<vmem>>, vector<1x8x96xf32>
    %531 = vector.shape_cast %530 : vector<1x8x96xf32> to vector<8x96xf32>
    %cst_164 = arith.constant dense<0.000000e+00> : vector<8x256xf32>
    %532 = tpu.matmul %531, %529, %cst_164 {dimension_numbers = #tpu.dot_dimension_numbers<[1], [0], [0], [1], [0, 0, 1, 1], [], []>} : vector<8x96xf32>, vector<96x256xf32>, vector<8x256xf32> -> vector<8x256xf32>
    %533 = arith.addf %484, %532 : vector<8x256xf32>
    %534 = vector.extract_strided_slice %86 {offsets = [2, 0], sizes = [1, 256], strides = [1, 1]} : vector<24x256xf32> to vector<1x256xf32>
    %535 = math.floor %534 : vector<1x256xf32>
    %cst_165 = arith.constant 0.000000e+00 : f32
    %cst_166 = arith.constant 1.700000e+01 : f32
    %536 = vector.broadcast %cst_165 : f32 to vector<1x256xf32>
    %537 = arith.maximumf %536, %535 : vector<1x256xf32>
    %538 = vector.broadcast %cst_166 : f32 to vector<1x256xf32>
    %539 = arith.minimumf %538, %537 : vector<1x256xf32>
    %cst_167 = arith.constant 1.000000e+00 : f32
    %540 = vector.broadcast %cst_167 : f32 to vector<1x256xf32>
    %541 = arith.addf %535, %540 : vector<1x256xf32>
    %cst_168 = arith.constant 0.000000e+00 : f32
    %cst_169 = arith.constant 1.700000e+01 : f32
    %542 = vector.broadcast %cst_168 : f32 to vector<1x256xf32>
    %543 = arith.maximumf %542, %541 : vector<1x256xf32>
    %544 = vector.broadcast %cst_169 : f32 to vector<1x256xf32>
    %545 = arith.minimumf %544, %543 : vector<1x256xf32>
    %cst_170 = arith.constant 0.000000e+00 : f32
    %cst_171 = arith.constant 1.700000e+01 : f32
    %546 = vector.broadcast %cst_170 : f32 to vector<1x256xf32>
    %547 = arith.maximumf %546, %534 : vector<1x256xf32>
    %548 = vector.broadcast %cst_171 : f32 to vector<1x256xf32>
    %549 = arith.minimumf %548, %547 : vector<1x256xf32>
    %550 = arith.subf %539, %549 : vector<1x256xf32>
    %cst_172 = arith.constant 1.000000e+00 : f32
    %551 = vector.broadcast %cst_172 : f32 to vector<1x256xf32>
    %552 = arith.addf %551, %550 : vector<1x256xf32>
    %553 = arith.subf %545, %549 : vector<1x256xf32>
    %cst_173 = arith.constant 1.000000e+00 : f32
    %554 = vector.broadcast %cst_173 : f32 to vector<1x256xf32>
    %555 = arith.subf %554, %553 : vector<1x256xf32>
    %556 = vector.broadcast %539 : vector<1x256xf32> to vector<24x256xf32>
    %557 = arith.cmpf oeq, %90, %556 : vector<24x256xf32>
    %cst_174 = arith.constant 0.000000e+00 : f32
    %558 = vector.shape_cast %552 : vector<1x256xf32> to vector<1x256xf32>
    %559 = vector.broadcast %558 : vector<1x256xf32> to vector<24x256xf32>
    %560 = vector.broadcast %cst_174 : f32 to vector<24x256xf32>
    %561 = arith.select %557, %559, %560 : vector<24x256xi1>, vector<24x256xf32>
    %562 = vector.broadcast %545 : vector<1x256xf32> to vector<24x256xf32>
    %563 = arith.cmpf oeq, %90, %562 : vector<24x256xf32>
    %cst_175 = arith.constant 0.000000e+00 : f32
    %564 = vector.shape_cast %555 : vector<1x256xf32> to vector<1x256xf32>
    %565 = vector.broadcast %564 : vector<1x256xf32> to vector<24x256xf32>
    %566 = vector.broadcast %cst_175 : f32 to vector<24x256xf32>
    %567 = arith.select %563, %565, %566 : vector<24x256xi1>, vector<24x256xf32>
    %568 = arith.addf %561, %567 : vector<24x256xf32>
    %569 = vector.extract_strided_slice %434 {offsets = [0, 512], sizes = [96, 256], strides = [1, 1]} : vector<96x2304xf32> to vector<96x256xf32>
    %570 = vector.extract_strided_slice %569 {offsets = [0, 0], sizes = [24, 256], strides = [1, 1]} : vector<96x256xf32> to vector<24x256xf32>
    %571 = arith.mulf %570, %568 : vector<24x256xf32>
    %572 = vector.extract_strided_slice %569 {offsets = [24, 0], sizes = [24, 256], strides = [1, 1]} : vector<96x256xf32> to vector<24x256xf32>
    %573 = arith.mulf %572, %568 : vector<24x256xf32>
    %574 = vector.extract_strided_slice %569 {offsets = [48, 0], sizes = [24, 256], strides = [1, 1]} : vector<96x256xf32> to vector<24x256xf32>
    %575 = arith.mulf %574, %568 : vector<24x256xf32>
    %576 = vector.extract_strided_slice %569 {offsets = [72, 0], sizes = [24, 256], strides = [1, 1]} : vector<96x256xf32> to vector<24x256xf32>
    %577 = arith.mulf %576, %568 : vector<24x256xf32>
    %578 = tpu.concatenate %571, %573, %575, %577 in 0 : vector<24x256xf32>, vector<24x256xf32>, vector<24x256xf32>, vector<24x256xf32> -> vector<96x256xf32>
    %c2 = arith.constant 2 : index
    %c0_176 = arith.constant 0 : index
    %c0_177 = arith.constant 0 : index
    %579 = vector.load %arg10[%c2, %c0_176, %c0_177] : memref<9x8x96xf32, #tpu.memory_space<vmem>>, vector<1x8x96xf32>
    %580 = vector.shape_cast %579 : vector<1x8x96xf32> to vector<8x96xf32>
    %cst_178 = arith.constant dense<0.000000e+00> : vector<8x256xf32>
    %581 = tpu.matmul %580, %578, %cst_178 {dimension_numbers = #tpu.dot_dimension_numbers<[1], [0], [0], [1], [0, 0, 1, 1], [], []>} : vector<8x96xf32>, vector<96x256xf32>, vector<8x256xf32> -> vector<8x256xf32>
    %582 = arith.addf %533, %581 : vector<8x256xf32>
    %583 = vector.extract_strided_slice %86 {offsets = [3, 0], sizes = [1, 256], strides = [1, 1]} : vector<24x256xf32> to vector<1x256xf32>
    %584 = math.floor %583 : vector<1x256xf32>
    %cst_179 = arith.constant 0.000000e+00 : f32
    %cst_180 = arith.constant 1.700000e+01 : f32
    %585 = vector.broadcast %cst_179 : f32 to vector<1x256xf32>
    %586 = arith.maximumf %585, %584 : vector<1x256xf32>
    %587 = vector.broadcast %cst_180 : f32 to vector<1x256xf32>
    %588 = arith.minimumf %587, %586 : vector<1x256xf32>
    %cst_181 = arith.constant 1.000000e+00 : f32
    %589 = vector.broadcast %cst_181 : f32 to vector<1x256xf32>
    %590 = arith.addf %584, %589 : vector<1x256xf32>
    %cst_182 = arith.constant 0.000000e+00 : f32
    %cst_183 = arith.constant 1.700000e+01 : f32
    %591 = vector.broadcast %cst_182 : f32 to vector<1x256xf32>
    %592 = arith.maximumf %591, %590 : vector<1x256xf32>
    %593 = vector.broadcast %cst_183 : f32 to vector<1x256xf32>
    %594 = arith.minimumf %593, %592 : vector<1x256xf32>
    %cst_184 = arith.constant 0.000000e+00 : f32
    %cst_185 = arith.constant 1.700000e+01 : f32
    %595 = vector.broadcast %cst_184 : f32 to vector<1x256xf32>
    %596 = arith.maximumf %595, %583 : vector<1x256xf32>
    %597 = vector.broadcast %cst_185 : f32 to vector<1x256xf32>
    %598 = arith.minimumf %597, %596 : vector<1x256xf32>
    %599 = arith.subf %588, %598 : vector<1x256xf32>
    %cst_186 = arith.constant 1.000000e+00 : f32
    %600 = vector.broadcast %cst_186 : f32 to vector<1x256xf32>
    %601 = arith.addf %600, %599 : vector<1x256xf32>
    %602 = arith.subf %594, %598 : vector<1x256xf32>
    %cst_187 = arith.constant 1.000000e+00 : f32
    %603 = vector.broadcast %cst_187 : f32 to vector<1x256xf32>
    %604 = arith.subf %603, %602 : vector<1x256xf32>
    %605 = vector.broadcast %588 : vector<1x256xf32> to vector<24x256xf32>
    %606 = arith.cmpf oeq, %90, %605 : vector<24x256xf32>
    %cst_188 = arith.constant 0.000000e+00 : f32
    %607 = vector.shape_cast %601 : vector<1x256xf32> to vector<1x256xf32>
    %608 = vector.broadcast %607 : vector<1x256xf32> to vector<24x256xf32>
    %609 = vector.broadcast %cst_188 : f32 to vector<24x256xf32>
    %610 = arith.select %606, %608, %609 : vector<24x256xi1>, vector<24x256xf32>
    %611 = vector.broadcast %594 : vector<1x256xf32> to vector<24x256xf32>
    %612 = arith.cmpf oeq, %90, %611 : vector<24x256xf32>
    %cst_189 = arith.constant 0.000000e+00 : f32
    %613 = vector.shape_cast %604 : vector<1x256xf32> to vector<1x256xf32>
    %614 = vector.broadcast %613 : vector<1x256xf32> to vector<24x256xf32>
    %615 = vector.broadcast %cst_189 : f32 to vector<24x256xf32>
    %616 = arith.select %612, %614, %615 : vector<24x256xi1>, vector<24x256xf32>
    %617 = arith.addf %610, %616 : vector<24x256xf32>
    %618 = vector.extract_strided_slice %434 {offsets = [0, 768], sizes = [96, 256], strides = [1, 1]} : vector<96x2304xf32> to vector<96x256xf32>
    %619 = vector.extract_strided_slice %618 {offsets = [0, 0], sizes = [24, 256], strides = [1, 1]} : vector<96x256xf32> to vector<24x256xf32>
    %620 = arith.mulf %619, %617 : vector<24x256xf32>
    %621 = vector.extract_strided_slice %618 {offsets = [24, 0], sizes = [24, 256], strides = [1, 1]} : vector<96x256xf32> to vector<24x256xf32>
    %622 = arith.mulf %621, %617 : vector<24x256xf32>
    %623 = vector.extract_strided_slice %618 {offsets = [48, 0], sizes = [24, 256], strides = [1, 1]} : vector<96x256xf32> to vector<24x256xf32>
    %624 = arith.mulf %623, %617 : vector<24x256xf32>
    %625 = vector.extract_strided_slice %618 {offsets = [72, 0], sizes = [24, 256], strides = [1, 1]} : vector<96x256xf32> to vector<24x256xf32>
    %626 = arith.mulf %625, %617 : vector<24x256xf32>
    %627 = tpu.concatenate %620, %622, %624, %626 in 0 : vector<24x256xf32>, vector<24x256xf32>, vector<24x256xf32>, vector<24x256xf32> -> vector<96x256xf32>
    %c3 = arith.constant 3 : index
    %c0_190 = arith.constant 0 : index
    %c0_191 = arith.constant 0 : index
    %628 = vector.load %arg10[%c3, %c0_190, %c0_191] : memref<9x8x96xf32, #tpu.memory_space<vmem>>, vector<1x8x96xf32>
    %629 = vector.shape_cast %628 : vector<1x8x96xf32> to vector<8x96xf32>
    %cst_192 = arith.constant dense<0.000000e+00> : vector<8x256xf32>
    %630 = tpu.matmul %629, %627, %cst_192 {dimension_numbers = #tpu.dot_dimension_numbers<[1], [0], [0], [1], [0, 0, 1, 1], [], []>} : vector<8x96xf32>, vector<96x256xf32>, vector<8x256xf32> -> vector<8x256xf32>
    %631 = arith.addf %582, %630 : vector<8x256xf32>
    %632 = vector.extract_strided_slice %86 {offsets = [4, 0], sizes = [1, 256], strides = [1, 1]} : vector<24x256xf32> to vector<1x256xf32>
    %633 = math.floor %632 : vector<1x256xf32>
    %cst_193 = arith.constant 0.000000e+00 : f32
    %cst_194 = arith.constant 1.700000e+01 : f32
    %634 = vector.broadcast %cst_193 : f32 to vector<1x256xf32>
    %635 = arith.maximumf %634, %633 : vector<1x256xf32>
    %636 = vector.broadcast %cst_194 : f32 to vector<1x256xf32>
    %637 = arith.minimumf %636, %635 : vector<1x256xf32>
    %cst_195 = arith.constant 1.000000e+00 : f32
    %638 = vector.broadcast %cst_195 : f32 to vector<1x256xf32>
    %639 = arith.addf %633, %638 : vector<1x256xf32>
    %cst_196 = arith.constant 0.000000e+00 : f32
    %cst_197 = arith.constant 1.700000e+01 : f32
    %640 = vector.broadcast %cst_196 : f32 to vector<1x256xf32>
    %641 = arith.maximumf %640, %639 : vector<1x256xf32>
    %642 = vector.broadcast %cst_197 : f32 to vector<1x256xf32>
    %643 = arith.minimumf %642, %641 : vector<1x256xf32>
    %cst_198 = arith.constant 0.000000e+00 : f32
    %cst_199 = arith.constant 1.700000e+01 : f32
    %644 = vector.broadcast %cst_198 : f32 to vector<1x256xf32>
    %645 = arith.maximumf %644, %632 : vector<1x256xf32>
    %646 = vector.broadcast %cst_199 : f32 to vector<1x256xf32>
    %647 = arith.minimumf %646, %645 : vector<1x256xf32>
    %648 = arith.subf %637, %647 : vector<1x256xf32>
    %cst_200 = arith.constant 1.000000e+00 : f32
    %649 = vector.broadcast %cst_200 : f32 to vector<1x256xf32>
    %650 = arith.addf %649, %648 : vector<1x256xf32>
    %651 = arith.subf %643, %647 : vector<1x256xf32>
    %cst_201 = arith.constant 1.000000e+00 : f32
    %652 = vector.broadcast %cst_201 : f32 to vector<1x256xf32>
    %653 = arith.subf %652, %651 : vector<1x256xf32>
    %654 = vector.broadcast %637 : vector<1x256xf32> to vector<24x256xf32>
    %655 = arith.cmpf oeq, %90, %654 : vector<24x256xf32>
    %cst_202 = arith.constant 0.000000e+00 : f32
    %656 = vector.shape_cast %650 : vector<1x256xf32> to vector<1x256xf32>
    %657 = vector.broadcast %656 : vector<1x256xf32> to vector<24x256xf32>
    %658 = vector.broadcast %cst_202 : f32 to vector<24x256xf32>
    %659 = arith.select %655, %657, %658 : vector<24x256xi1>, vector<24x256xf32>
    %660 = vector.broadcast %643 : vector<1x256xf32> to vector<24x256xf32>
    %661 = arith.cmpf oeq, %90, %660 : vector<24x256xf32>
    %cst_203 = arith.constant 0.000000e+00 : f32
    %662 = vector.shape_cast %653 : vector<1x256xf32> to vector<1x256xf32>
    %663 = vector.broadcast %662 : vector<1x256xf32> to vector<24x256xf32>
    %664 = vector.broadcast %cst_203 : f32 to vector<24x256xf32>
    %665 = arith.select %661, %663, %664 : vector<24x256xi1>, vector<24x256xf32>
    %666 = arith.addf %659, %665 : vector<24x256xf32>
    %667 = vector.extract_strided_slice %434 {offsets = [0, 1024], sizes = [96, 256], strides = [1, 1]} : vector<96x2304xf32> to vector<96x256xf32>
    %668 = vector.extract_strided_slice %667 {offsets = [0, 0], sizes = [24, 256], strides = [1, 1]} : vector<96x256xf32> to vector<24x256xf32>
    %669 = arith.mulf %668, %666 : vector<24x256xf32>
    %670 = vector.extract_strided_slice %667 {offsets = [24, 0], sizes = [24, 256], strides = [1, 1]} : vector<96x256xf32> to vector<24x256xf32>
    %671 = arith.mulf %670, %666 : vector<24x256xf32>
    %672 = vector.extract_strided_slice %667 {offsets = [48, 0], sizes = [24, 256], strides = [1, 1]} : vector<96x256xf32> to vector<24x256xf32>
    %673 = arith.mulf %672, %666 : vector<24x256xf32>
    %674 = vector.extract_strided_slice %667 {offsets = [72, 0], sizes = [24, 256], strides = [1, 1]} : vector<96x256xf32> to vector<24x256xf32>
    %675 = arith.mulf %674, %666 : vector<24x256xf32>
    %676 = tpu.concatenate %669, %671, %673, %675 in 0 : vector<24x256xf32>, vector<24x256xf32>, vector<24x256xf32>, vector<24x256xf32> -> vector<96x256xf32>
    %c4 = arith.constant 4 : index
    %c0_204 = arith.constant 0 : index
    %c0_205 = arith.constant 0 : index
    %677 = vector.load %arg10[%c4, %c0_204, %c0_205] : memref<9x8x96xf32, #tpu.memory_space<vmem>>, vector<1x8x96xf32>
    %678 = vector.shape_cast %677 : vector<1x8x96xf32> to vector<8x96xf32>
    %cst_206 = arith.constant dense<0.000000e+00> : vector<8x256xf32>
    %679 = tpu.matmul %678, %676, %cst_206 {dimension_numbers = #tpu.dot_dimension_numbers<[1], [0], [0], [1], [0, 0, 1, 1], [], []>} : vector<8x96xf32>, vector<96x256xf32>, vector<8x256xf32> -> vector<8x256xf32>
    %680 = arith.addf %631, %679 : vector<8x256xf32>
    %681 = vector.extract_strided_slice %86 {offsets = [5, 0], sizes = [1, 256], strides = [1, 1]} : vector<24x256xf32> to vector<1x256xf32>
    %682 = math.floor %681 : vector<1x256xf32>
    %cst_207 = arith.constant 0.000000e+00 : f32
    %cst_208 = arith.constant 1.700000e+01 : f32
    %683 = vector.broadcast %cst_207 : f32 to vector<1x256xf32>
    %684 = arith.maximumf %683, %682 : vector<1x256xf32>
    %685 = vector.broadcast %cst_208 : f32 to vector<1x256xf32>
    %686 = arith.minimumf %685, %684 : vector<1x256xf32>
    %cst_209 = arith.constant 1.000000e+00 : f32
    %687 = vector.broadcast %cst_209 : f32 to vector<1x256xf32>
    %688 = arith.addf %682, %687 : vector<1x256xf32>
    %cst_210 = arith.constant 0.000000e+00 : f32
    %cst_211 = arith.constant 1.700000e+01 : f32
    %689 = vector.broadcast %cst_210 : f32 to vector<1x256xf32>
    %690 = arith.maximumf %689, %688 : vector<1x256xf32>
    %691 = vector.broadcast %cst_211 : f32 to vector<1x256xf32>
    %692 = arith.minimumf %691, %690 : vector<1x256xf32>
    %cst_212 = arith.constant 0.000000e+00 : f32
    %cst_213 = arith.constant 1.700000e+01 : f32
    %693 = vector.broadcast %cst_212 : f32 to vector<1x256xf32>
    %694 = arith.maximumf %693, %681 : vector<1x256xf32>
    %695 = vector.broadcast %cst_213 : f32 to vector<1x256xf32>
    %696 = arith.minimumf %695, %694 : vector<1x256xf32>
    %697 = arith.subf %686, %696 : vector<1x256xf32>
    %cst_214 = arith.constant 1.000000e+00 : f32
    %698 = vector.broadcast %cst_214 : f32 to vector<1x256xf32>
    %699 = arith.addf %698, %697 : vector<1x256xf32>
    %700 = arith.subf %692, %696 : vector<1x256xf32>
    %cst_215 = arith.constant 1.000000e+00 : f32
    %701 = vector.broadcast %cst_215 : f32 to vector<1x256xf32>
    %702 = arith.subf %701, %700 : vector<1x256xf32>
    %703 = vector.broadcast %686 : vector<1x256xf32> to vector<24x256xf32>
    %704 = arith.cmpf oeq, %90, %703 : vector<24x256xf32>
    %cst_216 = arith.constant 0.000000e+00 : f32
    %705 = vector.shape_cast %699 : vector<1x256xf32> to vector<1x256xf32>
    %706 = vector.broadcast %705 : vector<1x256xf32> to vector<24x256xf32>
    %707 = vector.broadcast %cst_216 : f32 to vector<24x256xf32>
    %708 = arith.select %704, %706, %707 : vector<24x256xi1>, vector<24x256xf32>
    %709 = vector.broadcast %692 : vector<1x256xf32> to vector<24x256xf32>
    %710 = arith.cmpf oeq, %90, %709 : vector<24x256xf32>
    %cst_217 = arith.constant 0.000000e+00 : f32
    %711 = vector.shape_cast %702 : vector<1x256xf32> to vector<1x256xf32>
    %712 = vector.broadcast %711 : vector<1x256xf32> to vector<24x256xf32>
    %713 = vector.broadcast %cst_217 : f32 to vector<24x256xf32>
    %714 = arith.select %710, %712, %713 : vector<24x256xi1>, vector<24x256xf32>
    %715 = arith.addf %708, %714 : vector<24x256xf32>
    %716 = vector.extract_strided_slice %434 {offsets = [0, 1280], sizes = [96, 256], strides = [1, 1]} : vector<96x2304xf32> to vector<96x256xf32>
    %717 = vector.extract_strided_slice %716 {offsets = [0, 0], sizes = [24, 256], strides = [1, 1]} : vector<96x256xf32> to vector<24x256xf32>
    %718 = arith.mulf %717, %715 : vector<24x256xf32>
    %719 = vector.extract_strided_slice %716 {offsets = [24, 0], sizes = [24, 256], strides = [1, 1]} : vector<96x256xf32> to vector<24x256xf32>
    %720 = arith.mulf %719, %715 : vector<24x256xf32>
    %721 = vector.extract_strided_slice %716 {offsets = [48, 0], sizes = [24, 256], strides = [1, 1]} : vector<96x256xf32> to vector<24x256xf32>
    %722 = arith.mulf %721, %715 : vector<24x256xf32>
    %723 = vector.extract_strided_slice %716 {offsets = [72, 0], sizes = [24, 256], strides = [1, 1]} : vector<96x256xf32> to vector<24x256xf32>
    %724 = arith.mulf %723, %715 : vector<24x256xf32>
    %725 = tpu.concatenate %718, %720, %722, %724 in 0 : vector<24x256xf32>, vector<24x256xf32>, vector<24x256xf32>, vector<24x256xf32> -> vector<96x256xf32>
    %c5 = arith.constant 5 : index
    %c0_218 = arith.constant 0 : index
    %c0_219 = arith.constant 0 : index
    %726 = vector.load %arg10[%c5, %c0_218, %c0_219] : memref<9x8x96xf32, #tpu.memory_space<vmem>>, vector<1x8x96xf32>
    %727 = vector.shape_cast %726 : vector<1x8x96xf32> to vector<8x96xf32>
    %cst_220 = arith.constant dense<0.000000e+00> : vector<8x256xf32>
    %728 = tpu.matmul %727, %725, %cst_220 {dimension_numbers = #tpu.dot_dimension_numbers<[1], [0], [0], [1], [0, 0, 1, 1], [], []>} : vector<8x96xf32>, vector<96x256xf32>, vector<8x256xf32> -> vector<8x256xf32>
    %729 = arith.addf %680, %728 : vector<8x256xf32>
    %730 = vector.extract_strided_slice %86 {offsets = [6, 0], sizes = [1, 256], strides = [1, 1]} : vector<24x256xf32> to vector<1x256xf32>
    %731 = math.floor %730 : vector<1x256xf32>
    %cst_221 = arith.constant 0.000000e+00 : f32
    %cst_222 = arith.constant 1.700000e+01 : f32
    %732 = vector.broadcast %cst_221 : f32 to vector<1x256xf32>
    %733 = arith.maximumf %732, %731 : vector<1x256xf32>
    %734 = vector.broadcast %cst_222 : f32 to vector<1x256xf32>
    %735 = arith.minimumf %734, %733 : vector<1x256xf32>
    %cst_223 = arith.constant 1.000000e+00 : f32
    %736 = vector.broadcast %cst_223 : f32 to vector<1x256xf32>
    %737 = arith.addf %731, %736 : vector<1x256xf32>
    %cst_224 = arith.constant 0.000000e+00 : f32
    %cst_225 = arith.constant 1.700000e+01 : f32
    %738 = vector.broadcast %cst_224 : f32 to vector<1x256xf32>
    %739 = arith.maximumf %738, %737 : vector<1x256xf32>
    %740 = vector.broadcast %cst_225 : f32 to vector<1x256xf32>
    %741 = arith.minimumf %740, %739 : vector<1x256xf32>
    %cst_226 = arith.constant 0.000000e+00 : f32
    %cst_227 = arith.constant 1.700000e+01 : f32
    %742 = vector.broadcast %cst_226 : f32 to vector<1x256xf32>
    %743 = arith.maximumf %742, %730 : vector<1x256xf32>
    %744 = vector.broadcast %cst_227 : f32 to vector<1x256xf32>
    %745 = arith.minimumf %744, %743 : vector<1x256xf32>
    %746 = arith.subf %735, %745 : vector<1x256xf32>
    %cst_228 = arith.constant 1.000000e+00 : f32
    %747 = vector.broadcast %cst_228 : f32 to vector<1x256xf32>
    %748 = arith.addf %747, %746 : vector<1x256xf32>
    %749 = arith.subf %741, %745 : vector<1x256xf32>
    %cst_229 = arith.constant 1.000000e+00 : f32
    %750 = vector.broadcast %cst_229 : f32 to vector<1x256xf32>
    %751 = arith.subf %750, %749 : vector<1x256xf32>
    %752 = vector.broadcast %735 : vector<1x256xf32> to vector<24x256xf32>
    %753 = arith.cmpf oeq, %90, %752 : vector<24x256xf32>
    %cst_230 = arith.constant 0.000000e+00 : f32
    %754 = vector.shape_cast %748 : vector<1x256xf32> to vector<1x256xf32>
    %755 = vector.broadcast %754 : vector<1x256xf32> to vector<24x256xf32>
    %756 = vector.broadcast %cst_230 : f32 to vector<24x256xf32>
    %757 = arith.select %753, %755, %756 : vector<24x256xi1>, vector<24x256xf32>
    %758 = vector.broadcast %741 : vector<1x256xf32> to vector<24x256xf32>
    %759 = arith.cmpf oeq, %90, %758 : vector<24x256xf32>
    %cst_231 = arith.constant 0.000000e+00 : f32
    %760 = vector.shape_cast %751 : vector<1x256xf32> to vector<1x256xf32>
    %761 = vector.broadcast %760 : vector<1x256xf32> to vector<24x256xf32>
    %762 = vector.broadcast %cst_231 : f32 to vector<24x256xf32>
    %763 = arith.select %759, %761, %762 : vector<24x256xi1>, vector<24x256xf32>
    %764 = arith.addf %757, %763 : vector<24x256xf32>
    %765 = vector.extract_strided_slice %434 {offsets = [0, 1536], sizes = [96, 256], strides = [1, 1]} : vector<96x2304xf32> to vector<96x256xf32>
    %766 = vector.extract_strided_slice %765 {offsets = [0, 0], sizes = [24, 256], strides = [1, 1]} : vector<96x256xf32> to vector<24x256xf32>
    %767 = arith.mulf %766, %764 : vector<24x256xf32>
    %768 = vector.extract_strided_slice %765 {offsets = [24, 0], sizes = [24, 256], strides = [1, 1]} : vector<96x256xf32> to vector<24x256xf32>
    %769 = arith.mulf %768, %764 : vector<24x256xf32>
    %770 = vector.extract_strided_slice %765 {offsets = [48, 0], sizes = [24, 256], strides = [1, 1]} : vector<96x256xf32> to vector<24x256xf32>
    %771 = arith.mulf %770, %764 : vector<24x256xf32>
    %772 = vector.extract_strided_slice %765 {offsets = [72, 0], sizes = [24, 256], strides = [1, 1]} : vector<96x256xf32> to vector<24x256xf32>
    %773 = arith.mulf %772, %764 : vector<24x256xf32>
    %774 = tpu.concatenate %767, %769, %771, %773 in 0 : vector<24x256xf32>, vector<24x256xf32>, vector<24x256xf32>, vector<24x256xf32> -> vector<96x256xf32>
    %c6 = arith.constant 6 : index
    %c0_232 = arith.constant 0 : index
    %c0_233 = arith.constant 0 : index
    %775 = vector.load %arg10[%c6, %c0_232, %c0_233] : memref<9x8x96xf32, #tpu.memory_space<vmem>>, vector<1x8x96xf32>
    %776 = vector.shape_cast %775 : vector<1x8x96xf32> to vector<8x96xf32>
    %cst_234 = arith.constant dense<0.000000e+00> : vector<8x256xf32>
    %777 = tpu.matmul %776, %774, %cst_234 {dimension_numbers = #tpu.dot_dimension_numbers<[1], [0], [0], [1], [0, 0, 1, 1], [], []>} : vector<8x96xf32>, vector<96x256xf32>, vector<8x256xf32> -> vector<8x256xf32>
    %778 = arith.addf %729, %777 : vector<8x256xf32>
    %779 = vector.extract_strided_slice %86 {offsets = [7, 0], sizes = [1, 256], strides = [1, 1]} : vector<24x256xf32> to vector<1x256xf32>
    %780 = math.floor %779 : vector<1x256xf32>
    %cst_235 = arith.constant 0.000000e+00 : f32
    %cst_236 = arith.constant 1.700000e+01 : f32
    %781 = vector.broadcast %cst_235 : f32 to vector<1x256xf32>
    %782 = arith.maximumf %781, %780 : vector<1x256xf32>
    %783 = vector.broadcast %cst_236 : f32 to vector<1x256xf32>
    %784 = arith.minimumf %783, %782 : vector<1x256xf32>
    %cst_237 = arith.constant 1.000000e+00 : f32
    %785 = vector.broadcast %cst_237 : f32 to vector<1x256xf32>
    %786 = arith.addf %780, %785 : vector<1x256xf32>
    %cst_238 = arith.constant 0.000000e+00 : f32
    %cst_239 = arith.constant 1.700000e+01 : f32
    %787 = vector.broadcast %cst_238 : f32 to vector<1x256xf32>
    %788 = arith.maximumf %787, %786 : vector<1x256xf32>
    %789 = vector.broadcast %cst_239 : f32 to vector<1x256xf32>
    %790 = arith.minimumf %789, %788 : vector<1x256xf32>
    %cst_240 = arith.constant 0.000000e+00 : f32
    %cst_241 = arith.constant 1.700000e+01 : f32
    %791 = vector.broadcast %cst_240 : f32 to vector<1x256xf32>
    %792 = arith.maximumf %791, %779 : vector<1x256xf32>
    %793 = vector.broadcast %cst_241 : f32 to vector<1x256xf32>
    %794 = arith.minimumf %793, %792 : vector<1x256xf32>
    %795 = arith.subf %784, %794 : vector<1x256xf32>
    %cst_242 = arith.constant 1.000000e+00 : f32
    %796 = vector.broadcast %cst_242 : f32 to vector<1x256xf32>
    %797 = arith.addf %796, %795 : vector<1x256xf32>
    %798 = arith.subf %790, %794 : vector<1x256xf32>
    %cst_243 = arith.constant 1.000000e+00 : f32
    %799 = vector.broadcast %cst_243 : f32 to vector<1x256xf32>
    %800 = arith.subf %799, %798 : vector<1x256xf32>
    %801 = vector.broadcast %784 : vector<1x256xf32> to vector<24x256xf32>
    %802 = arith.cmpf oeq, %90, %801 : vector<24x256xf32>
    %cst_244 = arith.constant 0.000000e+00 : f32
    %803 = vector.shape_cast %797 : vector<1x256xf32> to vector<1x256xf32>
    %804 = vector.broadcast %803 : vector<1x256xf32> to vector<24x256xf32>
    %805 = vector.broadcast %cst_244 : f32 to vector<24x256xf32>
    %806 = arith.select %802, %804, %805 : vector<24x256xi1>, vector<24x256xf32>
    %807 = vector.broadcast %790 : vector<1x256xf32> to vector<24x256xf32>
    %808 = arith.cmpf oeq, %90, %807 : vector<24x256xf32>
    %cst_245 = arith.constant 0.000000e+00 : f32
    %809 = vector.shape_cast %800 : vector<1x256xf32> to vector<1x256xf32>
    %810 = vector.broadcast %809 : vector<1x256xf32> to vector<24x256xf32>
    %811 = vector.broadcast %cst_245 : f32 to vector<24x256xf32>
    %812 = arith.select %808, %810, %811 : vector<24x256xi1>, vector<24x256xf32>
    %813 = arith.addf %806, %812 : vector<24x256xf32>
    %814 = vector.extract_strided_slice %434 {offsets = [0, 1792], sizes = [96, 256], strides = [1, 1]} : vector<96x2304xf32> to vector<96x256xf32>
    %815 = vector.extract_strided_slice %814 {offsets = [0, 0], sizes = [24, 256], strides = [1, 1]} : vector<96x256xf32> to vector<24x256xf32>
    %816 = arith.mulf %815, %813 : vector<24x256xf32>
    %817 = vector.extract_strided_slice %814 {offsets = [24, 0], sizes = [24, 256], strides = [1, 1]} : vector<96x256xf32> to vector<24x256xf32>
    %818 = arith.mulf %817, %813 : vector<24x256xf32>
    %819 = vector.extract_strided_slice %814 {offsets = [48, 0], sizes = [24, 256], strides = [1, 1]} : vector<96x256xf32> to vector<24x256xf32>
    %820 = arith.mulf %819, %813 : vector<24x256xf32>
    %821 = vector.extract_strided_slice %814 {offsets = [72, 0], sizes = [24, 256], strides = [1, 1]} : vector<96x256xf32> to vector<24x256xf32>
    %822 = arith.mulf %821, %813 : vector<24x256xf32>
    %823 = tpu.concatenate %816, %818, %820, %822 in 0 : vector<24x256xf32>, vector<24x256xf32>, vector<24x256xf32>, vector<24x256xf32> -> vector<96x256xf32>
    %c7 = arith.constant 7 : index
    %c0_246 = arith.constant 0 : index
    %c0_247 = arith.constant 0 : index
    %824 = vector.load %arg10[%c7, %c0_246, %c0_247] : memref<9x8x96xf32, #tpu.memory_space<vmem>>, vector<1x8x96xf32>
    %825 = vector.shape_cast %824 : vector<1x8x96xf32> to vector<8x96xf32>
    %cst_248 = arith.constant dense<0.000000e+00> : vector<8x256xf32>
    %826 = tpu.matmul %825, %823, %cst_248 {dimension_numbers = #tpu.dot_dimension_numbers<[1], [0], [0], [1], [0, 0, 1, 1], [], []>} : vector<8x96xf32>, vector<96x256xf32>, vector<8x256xf32> -> vector<8x256xf32>
    %827 = arith.addf %778, %826 : vector<8x256xf32>
    %828 = vector.extract_strided_slice %86 {offsets = [8, 0], sizes = [1, 256], strides = [1, 1]} : vector<24x256xf32> to vector<1x256xf32>
    %829 = math.floor %828 : vector<1x256xf32>
    %cst_249 = arith.constant 0.000000e+00 : f32
    %cst_250 = arith.constant 1.700000e+01 : f32
    %830 = vector.broadcast %cst_249 : f32 to vector<1x256xf32>
    %831 = arith.maximumf %830, %829 : vector<1x256xf32>
    %832 = vector.broadcast %cst_250 : f32 to vector<1x256xf32>
    %833 = arith.minimumf %832, %831 : vector<1x256xf32>
    %cst_251 = arith.constant 1.000000e+00 : f32
    %834 = vector.broadcast %cst_251 : f32 to vector<1x256xf32>
    %835 = arith.addf %829, %834 : vector<1x256xf32>
    %cst_252 = arith.constant 0.000000e+00 : f32
    %cst_253 = arith.constant 1.700000e+01 : f32
    %836 = vector.broadcast %cst_252 : f32 to vector<1x256xf32>
    %837 = arith.maximumf %836, %835 : vector<1x256xf32>
    %838 = vector.broadcast %cst_253 : f32 to vector<1x256xf32>
    %839 = arith.minimumf %838, %837 : vector<1x256xf32>
    %cst_254 = arith.constant 0.000000e+00 : f32
    %cst_255 = arith.constant 1.700000e+01 : f32
    %840 = vector.broadcast %cst_254 : f32 to vector<1x256xf32>
    %841 = arith.maximumf %840, %828 : vector<1x256xf32>
    %842 = vector.broadcast %cst_255 : f32 to vector<1x256xf32>
    %843 = arith.minimumf %842, %841 : vector<1x256xf32>
    %844 = arith.subf %833, %843 : vector<1x256xf32>
    %cst_256 = arith.constant 1.000000e+00 : f32
    %845 = vector.broadcast %cst_256 : f32 to vector<1x256xf32>
    %846 = arith.addf %845, %844 : vector<1x256xf32>
    %847 = arith.subf %839, %843 : vector<1x256xf32>
    %cst_257 = arith.constant 1.000000e+00 : f32
    %848 = vector.broadcast %cst_257 : f32 to vector<1x256xf32>
    %849 = arith.subf %848, %847 : vector<1x256xf32>
    %850 = vector.broadcast %833 : vector<1x256xf32> to vector<24x256xf32>
    %851 = arith.cmpf oeq, %90, %850 : vector<24x256xf32>
    %cst_258 = arith.constant 0.000000e+00 : f32
    %852 = vector.shape_cast %846 : vector<1x256xf32> to vector<1x256xf32>
    %853 = vector.broadcast %852 : vector<1x256xf32> to vector<24x256xf32>
    %854 = vector.broadcast %cst_258 : f32 to vector<24x256xf32>
    %855 = arith.select %851, %853, %854 : vector<24x256xi1>, vector<24x256xf32>
    %856 = vector.broadcast %839 : vector<1x256xf32> to vector<24x256xf32>
    %857 = arith.cmpf oeq, %90, %856 : vector<24x256xf32>
    %cst_259 = arith.constant 0.000000e+00 : f32
    %858 = vector.shape_cast %849 : vector<1x256xf32> to vector<1x256xf32>
    %859 = vector.broadcast %858 : vector<1x256xf32> to vector<24x256xf32>
    %860 = vector.broadcast %cst_259 : f32 to vector<24x256xf32>
    %861 = arith.select %857, %859, %860 : vector<24x256xi1>, vector<24x256xf32>
    %862 = arith.addf %855, %861 : vector<24x256xf32>
    %863 = vector.extract_strided_slice %434 {offsets = [0, 2048], sizes = [96, 256], strides = [1, 1]} : vector<96x2304xf32> to vector<96x256xf32>
    %864 = vector.extract_strided_slice %863 {offsets = [0, 0], sizes = [24, 256], strides = [1, 1]} : vector<96x256xf32> to vector<24x256xf32>
    %865 = arith.mulf %864, %862 : vector<24x256xf32>
    %866 = vector.extract_strided_slice %863 {offsets = [24, 0], sizes = [24, 256], strides = [1, 1]} : vector<96x256xf32> to vector<24x256xf32>
    %867 = arith.mulf %866, %862 : vector<24x256xf32>
    %868 = vector.extract_strided_slice %863 {offsets = [48, 0], sizes = [24, 256], strides = [1, 1]} : vector<96x256xf32> to vector<24x256xf32>
    %869 = arith.mulf %868, %862 : vector<24x256xf32>
    %870 = vector.extract_strided_slice %863 {offsets = [72, 0], sizes = [24, 256], strides = [1, 1]} : vector<96x256xf32> to vector<24x256xf32>
    %871 = arith.mulf %870, %862 : vector<24x256xf32>
    %872 = tpu.concatenate %865, %867, %869, %871 in 0 : vector<24x256xf32>, vector<24x256xf32>, vector<24x256xf32>, vector<24x256xf32> -> vector<96x256xf32>
    %c8 = arith.constant 8 : index
    %c0_260 = arith.constant 0 : index
    %c0_261 = arith.constant 0 : index
    %873 = vector.load %arg10[%c8, %c0_260, %c0_261] : memref<9x8x96xf32, #tpu.memory_space<vmem>>, vector<1x8x96xf32>
    %874 = vector.shape_cast %873 : vector<1x8x96xf32> to vector<8x96xf32>
    %cst_262 = arith.constant dense<0.000000e+00> : vector<8x256xf32>
    %875 = tpu.matmul %874, %872, %cst_262 {dimension_numbers = #tpu.dot_dimension_numbers<[1], [0], [0], [1], [0, 0, 1, 1], [], []>} : vector<8x96xf32>, vector<96x256xf32>, vector<8x256xf32> -> vector<8x256xf32>
    %876 = arith.addf %827, %875 : vector<8x256xf32>
    %c0_263 = arith.constant 0 : index
    %c0_264 = arith.constant 0 : index
    %c0_265 = arith.constant 0 : index
    %877 = vector.load %arg13[%c0_263, %c0_264, %c0_265] : memref<1x8x256xf32, #tpu.memory_space<vmem>>, vector<1x8x256xf32>
    %878 = vector.shape_cast %877 : vector<1x8x256xf32> to vector<8x256xf32>
    %879 = vector.shape_cast %876 : vector<8x256xf32> to vector<1x8x256xf32>
    tpu.vector_store %arg13[%c0_263, %c0_264, %c0_265], %879 {strides = array<i32>} : memref<1x8x256xf32, #tpu.memory_space<vmem>>, vector<1x8x256xf32>,
    return
  }
  func.func @transform_0(%arg0: i32) -> (i32, i32, i32) {
    %c0_i32 = arith.constant 0 : i32
    %c0_i32_0 = arith.constant 0 : i32
    %c0_i32_1 = arith.constant 0 : i32
    return %arg0, %c0_i32, %c0_i32_0 : i32, i32, i32
  }
  func.func @transform_1(%arg0: i32) -> (i32, i32, i32) {
    %c0_i32 = arith.constant 0 : i32
    %c0_i32_0 = arith.constant 0 : i32
    %c0_i32_1 = arith.constant 0 : i32
    return %arg0, %c0_i32, %c0_i32_0 : i32, i32, i32
  }
  func.func @transform_2(%arg0: i32) -> (i32, i32, i32) {
    %c0_i32 = arith.constant 0 : i32
    %c0_i32_0 = arith.constant 0 : i32
    %c0_i32_1 = arith.constant 0 : i32
    return %arg0, %c0_i32, %c0_i32_0 : i32, i32, i32
  }
  func.func @transform_3(%arg0: i32) -> (i32, i32, i32) {
    %c0_i32 = arith.constant 0 : i32
    %c0_i32_0 = arith.constant 0 : i32
    %c0_i32_1 = arith.constant 0 : i32
    return %arg0, %c0_i32, %c0_i32_0 : i32, i32, i32
  }
  func.func @transform_4(%arg0: i32) -> (i32, i32, i32) {
    %c0_i32 = arith.constant 0 : i32
    %c0_i32_0 = arith.constant 0 : i32
    %c0_i32_1 = arith.constant 0 : i32
    return %arg0, %c0_i32, %c0_i32_0 : i32, i32, i32
  }
  func.func @transform_5(%arg0: i32) -> (i32, i32) {
    %c0_i32 = arith.constant 0 : i32
    %c0_i32_0 = arith.constant 0 : i32
    %c0_i32_1 = arith.constant 0 : i32
    return %c0_i32, %c0_i32_0 : i32, i32
  }
  func.func @transform_6(%arg0: i32) -> (i32, i32) {
    %c0_i32 = arith.constant 0 : i32
    %c0_i32_0 = arith.constant 0 : i32
    %c0_i32_1 = arith.constant 0 : i32
    return %c0_i32, %c0_i32_0 : i32, i32
  }
  func.func @transform_7(%arg0: i32) -> (i32, i32) {
    %c0_i32 = arith.constant 0 : i32
    %c0_i32_0 = arith.constant 0 : i32
    %c0_i32_1 = arith.constant 0 : i32
    return %c0_i32, %c0_i32_0 : i32, i32
  }
  func.func @transform_8(%arg0: i32) -> (i32, i32) {
    %c0_i32 = arith.constant 0 : i32
    %c0_i32_0 = arith.constant 0 : i32
    %c0_i32_1 = arith.constant 0 : i32
    return %c0_i32, %c0_i32_0 : i32, i32
  }
  func.func @transform_9(%arg0: i32) -> (i32, i32, i32) {
    %c0_i32 = arith.constant 0 : i32
    %c0_i32_0 = arith.constant 0 : i32
    %c0_i32_1 = arith.constant 0 : i32
    %c0_i32_2 = arith.constant 0 : i32
    return %c0_i32, %c0_i32_0, %c0_i32_1 : i32, i32, i32
  }
  func.func @transform_10(%arg0: i32) -> (i32, i32, i32) {
    %c0_i32 = arith.constant 0 : i32
    %c0_i32_0 = arith.constant 0 : i32
    %c0_i32_1 = arith.constant 0 : i32
    return %arg0, %c0_i32, %c0_i32_0 : i32, i32, i32
  }
  func.func @transform_11(%arg0: i32) -> (i32, i32, i32) {
    %c0_i32 = arith.constant 0 : i32
    %c0_i32_0 = arith.constant 0 : i32
    %c0_i32_1 = arith.constant 0 : i32
    return %arg0, %c0_i32, %c0_i32_0 : i32, i32, i32
  }
  func.func @transform_12(%arg0: i32) -> (i32, i32, i32) {
    %c0_i32 = arith.constant 0 : i32
    %c0_i32_0 = arith.constant 0 : i32
    %c0_i32_1 = arith.constant 0 : i32
    return %arg0, %c0_i32, %c0_i32_0 : i32, i32, i32
  }
}

</mosaic_0001>

<bundles_post_ra>
// kernel: tpu_custom_call.1
= control target key start
LH: loop header
LB: loop body
LE: loop exit
PB: predicated region body
PF: predicated region fallthrough
CT: control target
= control target key end

     0   :  { %s11208_s0 = inlined_call_operand.vmem [shape: f32[2,24,400], index: 0, kind: input, shape index: {}]   ;;  %s11209_s1 = inlined_call_operand.hbm [shape: f32[2,24,362], index: 1, kind: input, shape index: {}]   ;;  %s11210_s2 = inlined_call_operand.hbm [shape: f32[2,24,256], index: 2, kind: input, shape index: {}]   ;;  %s11211_s3 = inlined_call_operand.hbm [shape: f32[2,24,256], index: 3, kind: input, shape index: {}]   ;;  %s11212_s4 = inlined_call_operand.vmem [shape: f32[2,96,18], index: 4, kind: input, shape index: {}]   ;;  %s11213_s5 = inlined_call_operand.hbm [shape: bf16[88,216], index: 5, kind: input, shape index: {}]   ;;  %s11214_s6 = inlined_call_operand.vmem [shape: bf16[24,216], index: 6, kind: input, shape index: {}]   ;;  %s11215_s7 = inlined_call_operand.vmem [shape: s32[1,256], index: 7, kind: input, shape index: {}]   ;;  %s11216_s8 = inlined_call_operand.hbm [shape: f32[24,256], index: 8, kind: input, shape index: {}]   ;;  %s11217_s9 = inlined_call_operand.hbm [shape: f32[9,8,96], index: 9, kind: input, shape index: {}]   ;;  %s11218_s10 = inlined_call_operand.hbm [shape: f32[2,24,256], index: 10, kind: output, shape index: {0}]   ;;  %s11219_s11 = inlined_call_operand.hbm [shape: f32[2,24,256], index: 11, kind: output, shape index: {1}]   ;;  %s11220_s12 = inlined_call_operand.hbm [shape: f32[2,8,256], index: 12, kind: output, shape index: {2}]  }
   0x1   :  { %11277 = sst [smem:[#allocation74_spill]] %s11210_s2 }
   0x2   :  { %11278 = sst [smem:[#allocation75_spill]] %s11212_s4 }
   0x3   :  { %11279 = sst [smem:[#allocation76_spill]] %s11213_s5 }
   0x4   :  { %11280 = sst [smem:[#allocation77_spill]] %s11216_s8 }
   0x5   :  { %11281 = sst [smem:[#allocation78_spill]] %s11217_s9 }
   0x6   :  { %11282 = sst [smem:[#allocation79_spill]] %s11218_s10 }
   0x7   :  { %11283 = sst [smem:[#allocation80_spill]] %s11219_s11 }
   0x8   :  { %11284 = sst [smem:[#allocation81_spill]] %s11220_s12 }
   0x9   :  { %18 = vsyncpa [#allocation3], 0 }
   0xa   :  { %20 = vsyncpa [#allocation3 + $0x1], 0 }
   0xb   :  { %21 = vsyncpa [#allocation6], 0 }
   0xc   :  { %23 = vsyncpa [#allocation6 + $0x1], 0 }
   0xd   :  { %24 = vsyncpa [#allocation9], 0 }
   0xe   :  { %25 = vsyncpa [#allocation12], 0 }
   0xf   :  { %26 = vsyncpa [#allocation4], 0 }
  0x10   :  { %28 = vsyncpa [#allocation4 + $0x1], 0 }
  0x11   :  { %29 = vsyncpa [#allocation15], 0 }
  0x12   :  { %31 = vsyncpa [#allocation15 + $0x1], 0  ;;  %s7349_s21 = smov 0   ;;  %s7351_s22 = smov 0  }
  0x13   :  { %s7353_s23 = smov 0   ;;  %s7355_s24 = smov 0  }
  0x14 LB: > { %11285 = sst [smem:[#allocation23_spill]] %s7248_s21  ;;  %s7370_s25 = sadd.s32 4294967295, %s7260_s24   ;;  %s7260_s24 = sphi %s7355_s24, %s11575_s24   ;;  %s7256_s23 = sphi %s7353_s23, %s11577_s23   ;;  %s7252_s22 = sphi %s7351_s22, %s11579_s22   ;;  %s7248_s21 = sphi %s7349_s21, %s11578_s21  }
  0x15   : > { %11286 = sst [smem:[#allocation24_spill]] %s7256_s23  ;;  %s11221_s26 = sadd.s32 4294967294, %s7260_s24  }
  0x16   : > { %p83_p0 = scmp.ne.s32.totalorder %s7252_s22, %s7248_s21  ;;  %p11234_p1 = scmp.eq.s32.totalorder %s7370_s25, 0 }
  0x17   : > { %p290_p2 = scmp.eq.s32.totalorder %s7370_s25, 1  ;;  %p296_p3 = scmp.eq.s32.totalorder %s11221_s26, 1 }
  0x18   : > { %p7381_p4 = por %p11234_p1, %p83_p0  ;;  %p5766_p5 = scmp.ge.s32.totalorder %s7260_s24, 1 }
  0x19   : > { %p7386_p6 = por %p296_p3, %p83_p0  ;;  %p355_p7 = scmp.lt.s32.totalorder %s7260_s24, 3 }
  0x1a   : > { %s11290_s5 = sld [smem:[#allocation76_spill]]  ;;  %s7262_s15 = smov [#allocation8]  }
  0x1b   : > { %s11288_s28 = scalar_select %p7386_p6, 1, 0 }
  0x1c   : > { %p7394_p8 = pnand %p5766_p5, %p355_p7  ;;  %s368_s16 = sshll.u32 %s7262_s15, 4  ;;  %s369_s16 = int_to_ptr.vmem [resolvable:$true] %s368_s16 }
  0x1d   : > { %11289 = sst [smem:[#allocation25_spill]] %s11288_s28  ;;  %s7408_s18 = sadd.s32 1, %s7260_s24  }
  0x1e   : > { %p6365_p9 = pneg %p7394_p8  ;;  %11293 = sst [smem:[#allocation26_spill]] %s7408_s18 }
  0x1f   : > { %s11222_s19 = smov 128   ;;  %s11223_s20 = smov 8  }
  0x20   : > { %s366_s13 = sshll.u32 %s11290_s5, 4  ;;  %p7402_p10 = pnand %p6365_p9, %p11234_p1  ;;  %s367_s13 = int_to_ptr.hbm [resolvable:$true] %s366_s13 }
  0x21   : > { %s67_s29 = ssub.s32 %s7260_s24, %s7408_s18  ;;  %s70_s30 = sadd.s32 1, %s7256_s23 }
  0x22   : > { %6368 = dma.hbm_to_vmem [thread:$0]  (!%p7402_p10), %s367_s13, 1408, %s369_s16, [#allocation9], %s11222_s19, %s11222_s19, %s11223_s20  }
  0x23   : > { %p68_p12 = scmp.eq.s32.totalorder %s67_s29, 0  ;;  %p77_p13 = scmp.ne.s32.totalorder %s7256_s23, %s7252_s22 }
  0x24   : > { %p78_p0 = scmp.eq.s32.totalorder %s7260_s24, 0  ;;  %p6398_p7 = scmp.lt.s32.totalorder %s7260_s24, 2 }
  0x25   : > { %s7422_s15 = scalar_select %p68_p12, %s7256_s23, %s70_s30  }
  0x26   : > { %p79_p3 = por %p78_p0, %p77_p13  ;;  %p7426_p5 = por %p290_p2, %p77_p13 }
  0x27   : > { %11294 = sst [smem:[#allocation27_spill]] %s7422_s15  ;;  %s7432_s5 = sand.u32 1, %s7256_s23  }
  0x28   : > { %s11295_s26 = scalar_select %p7426_p5, 1, 0 }
  0x29   : > { %s446_s13 = sand.u32 1, %s7260_s24   ;;  %p7435_p9 = pnand %p6398_p7, %p79_p3 }
  0x2a   : > { %11296 = sst [smem:[#allocation28_spill]] %s11295_s26  ;;  %s11235_s29 = smul.u32 48, %s7432_s5 }
  0x2b   : > { %s11298_s8 = sld [smem:[#allocation77_spill]]  ;;  %s11236_s15 = smul.u32 48, %s7260_s24 }
  0x2c   : > { %s11299_s2 = sld [smem:[#allocation74_spill]]  ;;  %s450_s21 = scalar_lea.vmem [#allocation5], %s11235_s29 }
  0x2d   : > { %s458_s12 = sshll.u32 %s450_s21, 4  ;;  %s7453_s11 = scalar_lea.sflag [#allocation6], %s446_s13  ;;  %s459_s12 = int_to_ptr.vmem [resolvable:$true] %s458_s12 }
  0x2e   : > { %p6976_p12 = pneg %p7435_p9 }
  0x31   : > { %s386_s20 = sshll.u32 %s11298_s8, 4  ;;  %s7444_s20 = int_to_ptr.hbm [resolvable:$true] %s386_s20 }
  0x32   : > { %s455_s28 = scalar_lea.hbm %s11299_s2, %s11236_s15  ;;  %s6979_s30 = scalar_lea.hbm %s11299_s2, 96 }
  0x33   : > { %s456_s10 = sshll.u32 %s455_s28, 4  ;;  %s457_s10 = int_to_ptr.hbm [resolvable:$true] %s456_s10 }
  0x34   : > { %s6972_s26 = sshra.s32 %s457_s10, 4  ;;  %s6973_s26 = int_to_ptr.hbm [resolvable:$true] %s6972_s26 }
  0x35   : > { %s6974_s19 = scalar_lea.hbm %s6973_s26, 48  ;;  %p6980_p3 = scmp.lt.s32.totalorder %s6973_s26, %s11299_s2 }
  0x36   : > { %p6975_p2 = scmp.ne.s32.totalorder %s6973_s26, %s6974_s19  ;;  %p6981_p7 = scmp.lt.s32.totalorder %s6979_s30, %s6974_s19 }
  0x38   : > { %p6977_p13 = pnand %p6976_p12, %p6975_p2  ;;  %p6982_p11 = por %p6981_p7, %p6980_p3 }
  0x3a   : > { %p6978_p0 = pneg %p6977_p13 }
  0x3c   : > { %p6983_p1 = pnand %p6982_p11, %p6978_p0 }
  0x3e   : > { %6986 = shalt.err (!%p6983_p1)
}
  0x3f   : > { %s7265_s13 = smov 256   ;;  %s7266_s29 = smov 16  }
  0x40   : > { %6381 = dma.hbm_to_vmem [thread:$0]  (!%p7435_p9), %s457_s10, 768, %s459_s12, %s7453_s11, %s7265_s13, %s7265_s13, %s7266_s29  }
  0x41   : > { %s7267_s23 = smov [#allocation10]   ;;  %s11300_s9 = sld [smem:[#allocation78_spill]] }
  0x42   : > { %s388_s26 = sshll.u32 %s7267_s23, 4  ;;  %s7268_s21 = smov [#allocation11]   ;;  %s389_s26 = int_to_ptr.vmem [resolvable:$true] %s388_s26 }
  0x43   : > { %6371 = dma.hbm_to_vmem [thread:$0]  (!%p7402_p10), %s7444_s20, 768, %s389_s26, [#allocation9], %s7265_s13, %s7265_s13, %s7266_s29  }
  0x44   : > { %s402_s28 = sshll.u32 %s7268_s21, 4  ;;  %s6330_s15 = smul.u32 72, %s7432_s5  ;;  %s403_s28 = int_to_ptr.vmem [resolvable:$true] %s402_s28 }
  0x45   : > { %s6331_s10 = smul.u32 72, %s7260_s24  ;;  %s11301_s12 = smov 8  }
  0x46   : > { %s11302_s23 = smov 128   ;;  %s425_s20 = scalar_lea.sflag [#allocation3], %s7432_s5 }
  0x47   : > { %s400_s30 = sshll.u32 %s11300_s9, 4  ;;  %s433_s2 = scalar_lea.hbm %s11209_s1, %s6331_s10  ;;  %s401_s30 = int_to_ptr.hbm [resolvable:$true] %s400_s30 }
  0x48   : > { %6374 = dma.hbm_to_vmem [thread:$0]  (!%p7402_p10), %s401_s30, 1152, %s403_s28, [#allocation12], %s11302_s23, %s11302_s23, %s11301_s12  }
  0x49   : > { %s434_s8 = sshll.u32 %s433_s2, 4  ;;  %s428_s9 = scalar_lea.vmem [#allocation2], %s6330_s15  ;;  %s435_s8 = int_to_ptr.hbm [resolvable:$true] %s434_s8 }
  0x4a   : > { %s436_s4 = sshll.u32 %s428_s9, 4  ;;  %s7062_s26 = sshra.s32 %s435_s8, 4  ;;  %s437_s4 = int_to_ptr.vmem [resolvable:$true] %s436_s4  ;;  %s7063_s26 = int_to_ptr.hbm [resolvable:$true] %s7062_s26 }
  0x4b   : > { %s7064_s21 = scalar_lea.hbm %s7063_s26, 72  ;;  %s7069_s28 = scalar_lea.hbm %s11209_s1, 144 }
  0x4c   : > { %p7065_p1 = scmp.ne.s32.totalorder %s7063_s26, %s7064_s21  ;;  %p7070_p10 = scmp.lt.s32.totalorder %s7063_s26, %s11209_s1 }
  0x4d   : > { %p7071_p13 = scmp.lt.s32.totalorder %s7069_s28, %s7064_s21 }
  0x4e   : > { %p7067_p11 = pnand %p7065_p1, %p6976_p12 }
  0x4f   : > { %p7072_p0 = por %p7071_p13, %p7070_p10 }
  0x50   : > { %p7068_p2 = pneg %p7067_p11 }
  0x52   : > { %p7073_p3 = pnand %p7072_p0, %p7068_p2 }
  0x54   : > { %7076 = shalt.err (!%p7073_p3)
}
  0x55   : > { %s7269_s2 = smov 384   ;;  %s7270_s9 = smov 24  }
  0x56   : > { %6378 = dma.hbm_to_vmem [thread:$0]  (!%p7435_p9), %s435_s8, 1152, %s437_s4, %s425_s20, %s7269_s2, %s7269_s2, %s7270_s9  }
  0x57   : > { %s11303_s15 = smul.u32 48, %s7260_s24  ;;  %s7099_s20 = scalar_lea.hbm %s11211_s3, 96 }
  0x58   : > { %s11304_s30 = smul.u32 48, %s7432_s5 }
  0x59   : > { %s477_s18 = scalar_lea.hbm %s11211_s3, %s11303_s15 }
  0x5a   : > { %s478_s17 = sshll.u32 %s477_s18, 4  ;;  %s472_s26 = scalar_lea.vmem [#allocation7], %s11304_s30  ;;  %s479_s17 = int_to_ptr.hbm [resolvable:$true] %s478_s17 }
  0x5b   : > { %s480_s21 = sshll.u32 %s472_s26, 4  ;;  %s7092_s28 = sshra.s32 %s479_s17, 4  ;;  %s481_s21 = int_to_ptr.vmem [resolvable:$true] %s480_s21  ;;  %s7093_s28 = int_to_ptr.hbm [resolvable:$true] %s7092_s28 }
  0x5c   : > { %s7094_s12 = scalar_lea.hbm %s7093_s28, 48  ;;  %p7100_p2 = scmp.lt.s32.totalorder %s7093_s28, %s11211_s3 }
  0x5d   : > { %p7095_p7 = scmp.ne.s32.totalorder %s7093_s28, %s7094_s12  ;;  %p7101_p10 = scmp.lt.s32.totalorder %s7099_s20, %s7094_s12 }
  0x5f   : > { %p7097_p1 = pnand %p7095_p7, %p6976_p12  ;;  %p7102_p13 = por %p7101_p10, %p7100_p2 }
  0x61   : > { %p7098_p11 = pneg %p7097_p1 }
  0x63   : > { %p7103_p0 = pnand %p7102_p13, %p7098_p11 }
  0x65   : > { %7106 = shalt.err (!%p7103_p0)
}
  0x66   : > { %6384 = dma.hbm_to_vmem [thread:$0]  (!%p7435_p9), %s479_s17, 768, %s481_s21, %s7453_s11, %s7265_s13, %s7265_s13, %s7266_s29  }
  0x67   : > { %500 = sbr.rel (%p7394_p8) target bundleno = 2197 (0x895), region = 60 }
  0x6c   : > { %s7528_s5 = sand.u32 1, %s7252_s22  }
  0x6d   : > { %s6336_s9 = smul.u32 72, %s7528_s5  ;;  %s503_s15 = scalar_lea.sflag [#allocation3], %s7528_s5 }
  0x6f   : > { %s7532_s23 = scalar_lea.vmem [#allocation2], %s6336_s9 }
  0x70   : > { %7223 = dma.done.wait (%p7381_p4), %s503_s15, 1152  }
  0x71   : > { %7225 = vsyncadd (%p7381_p4), %s503_s15, 4294966144  ;;  %s512_s11 = sand.u32 1, %s7370_s25   ;;  %s7540_s14 = smul.u32 48, %s7528_s5 }
  0x72   : > { %s513_s16 = scalar_lea.sflag [#allocation6], %s512_s11 }
  0x73   : > { %s7545_s29 = scalar_lea.vmem [#allocation5], %s7540_s14 }
  0x74   : > { %7227 = dma.done.wait (%p7381_p4), %s513_s16, 1536  }
  0x75   : > { %7229 = vsyncadd (%p7381_p4), %s513_s16, 4294965760  ;;  %s7552_s13 = scalar_lea.vmem [#allocation7], %s7540_s14  ;;  %p11305_p8 = scmp.eq.s32.totalorder %s7370_s25, 0 }
  0x77   : > { %7231 = dma.done.wait (%p11305_p8), [#allocation9], 2176   ;;  %p11306_p9 = pmov %p11305_p8 }
  0x78   : > { %p11307_p12 = pmov %p11305_p8 }
  0x79   : > { %7233 = vsyncadd (%p11306_p9), [#allocation9], 4294965120 }
  0x7a   : > { %7235 = dma.done.wait (%p11307_p12), [#allocation12], 1152   ;;  %p11308_p3 = pmov %p11305_p8 }
  0x7b   : > { %p613_p7 = scmp.lt.s32.totalorder %s7370_s25, 1  ;;  %s7271_s26 = smov 90   ;;  %vm972_vm0 = vcmask 736256   ;;  %vm1103_vm1 = vcmask 1043456   ;;  %vm929_vm2 = vcmask 744448   ;;  %vm886_vm3 = vcmask 752640  }
  0x7c   : > { %7237 = vsyncadd (%p11308_p3), [#allocation12], 4294966144  ;;  %s7272_s21 = smov 91   ;;  %s7273_s28 = smov 92   ;;  %vm843_vm4 = vcmask 883712   ;;  %vm11238_vm5 = vcmask 719872  }
  0x7d   : > { %s7564_s27 = scalar_select %p613_p7, %s7370_s25, 1  ;;  %vm809_vm6 = vcmask 891904   ;;  %vm775_vm7 = vcmask 900096   ;;  %vm11239_vm8 = vcmask 1031168   ;;  %vm11237_vm9 = vcmask 1039360  }
  0x7e   : > { %s7274_s12 = smov 108   ;;  %s7275_s4 = smov 109  }
  0x7f   : > { %s6338_s19 = smul.u32 96, %s7564_s27  ;;  %s7276_s8 = smov 110  }
  0x80   : > { %s7277_s20 = smov 126   ;;  %s7278_s10 = smov 127  }
  0x81   : > { %s7572_s30 = scalar_lea.vmem %s11208_s0, %s6338_s19  ;;  %s11442_s2 = sld [smem:[#allocation75_spill]] }
  0x82   : > { %v7575_v0 = vld [vmem:[%s7572_s30 + $0x48] sm:$0xff]  ;;  %v7578_v1 = vld [vmem:[%s7572_s30 + $0x50] sm:$0xff]  ;;  %v7600_v8 = vld [vmem:[%s7572_s30] sm:$0xff]  ;;  %s11568_s15 = sld [smem:[#allocation80_spill]]  ;;  %s11144_s17 = scalar_lea.sflag [#allocation15], %s512_s11 }
  0x83   : > { %v7581_v2 = vld [vmem:[%s7572_s30 + $0x28] sm:$0xff]  ;;  %v6457_v3 = vpack.i.bf16 %v7578_v1, %v7575_v0  ;;  %v7586_v4 = vld [vmem:[%s7572_s30 + $0x30] sm:$0xff]  ;;  %v7603_v9 = vld [vmem:[%s7572_s30 + $0x40] sm:$0xff] }
  0x84   : > { %v6477_v5 = vpack.i.bf16 %v7586_v4, %v7581_v2  ;;  %v7594_v6 = vld [vmem:[%s7572_s30 + $0x8] sm:$0xff]  ;;  %v7597_v7 = vld [vmem:[%s7572_s30 + $0x10] sm:$0xff]  ;;  %v6472_v11 = vpack.i.bf16 %v7600_v8, %v7603_v9  ;;  %v7613_v12 = vld [vmem:[%s7572_s30 + $0x20] sm:$0xff] }
  0x85   : > { %6458 = vrot.lane.b32.xlu0 %v6457_v3, %s7271_s26  ;;  %v6462_v10 = vpack.i.bf16 %v7597_v7, %v7594_v6  ;;  %v6497_v13 = vpack.i.bf16 %v7603_v9, %v7613_v12  ;;  %v627_v15 = vld [vmem:[%s7572_s30 + $0x18] sm:$0xff] }
  0x86   : > { %6478 = vrot.lane.b32.xlu2 %v6477_v5, %s7272_s21  ;;  %6468 = vrot.lane.b32.xlu1 %v6477_v5, %s7271_s26  ;;  %v635_v16 = vld [vmem:[%s7572_s30 + $0x58] sm:$0xff] }
  0x87   : > { %v6617_v18 = vpack.i.bf16 %v627_v15, %v635_v16  ;;  %v631_v19 = vld [vmem:[%s7572_s30 + $0x38] sm:$0xff]  ;;  %s9153_s9 = scalar_lea.vmem %s11442_s2, %s6338_s19 }
  0x88   : > { %v6622_v21 = vpack.i.bf16 %v635_v16, %v631_v19 }
  0x8d   : > { %6463 = vrot.lane.b32.xlu0 %v6462_v10, %s7271_s26 }
  0x8e   : > { %6483 = vrot.lane.b32.xlu2 %v6457_v3, %s7272_s21  ;;  %6473 = vrot.lane.b32.xlu1 %v6472_v11, %s7271_s26 }
  0x95   : > { %956 = vrot.lane.b32.xlu0 %v7613_v12, %s7271_s26 }
  0x96   : > { %6493 = vrot.lane.b32.xlu2 %v6462_v10, %s7272_s21  ;;  %6488 = vrot.lane.b32.xlu1 %v6457_v3, %s7273_s28 }
  0x9d   : > { %6498 = vrot.lane.b32.xlu0 %v6497_v13, %s7272_s21 }
  0x9e   : > { %6508 = vrot.lane.b32.xlu2 %v6477_v5, %s7273_s28  ;;  %6503 = vrot.lane.b32.xlu1 %v6462_v10, %s7273_s28 }
  0xa5   : > { %6513 = vrot.lane.b32.xlu0 %v6472_v11, %s7273_s28 }
  0xa6   : > { %6518 = vrot.lane.b32.xlu2 %v6477_v5, %s7274_s12  ;;  %905 = vrot.lane.b32.xlu1 %v7600_v8, %s7272_s21 }
  0xad   : > { %6523 = vrot.lane.b32.xlu0 %v6457_v3, %s7274_s12 }
  0xae   : > { %6528 = vrot.lane.b32.xlu2 %v6497_v13, %s7274_s12  ;;  %870 = vrot.lane.b32.xlu1 %v7613_v12, %s7273_s28 }
  0xb5   : > { %6533 = vrot.lane.b32.xlu0 %v6457_v3, %s7275_s4 }
  0xb6   : > { %6543 = vrot.lane.b32.xlu2 %v6462_v10, %s7275_s4  ;;  %6538 = vrot.lane.b32.xlu1 %v6462_v10, %s7274_s12 }
  0xbd   : > { %6548 = vrot.lane.b32.xlu0 %v6477_v5, %s7275_s4 }
  0xbe   : > { %825 = vrot.lane.b32.xlu2 %v7600_v8, %s7274_s12  ;;  %6553 = vrot.lane.b32.xlu1 %v6472_v11, %s7275_s4 }
  0xc5   : > { %6558 = vrot.lane.b32.xlu0 %v6477_v5, %s7276_s8 }
  0xc6   : > { %797 = vrot.lane.b32.xlu2 %v7613_v12, %s7275_s4  ;;  %6563 = vrot.lane.b32.xlu1 %v6457_v3, %s7276_s8 }
  0xcd   : > { %6568 = vrot.lane.b32.xlu0 %v6457_v3, %s7277_s20 }
  0xce   : > { %6578 = vrot.lane.b32.xlu2 %v6497_v13, %s7276_s8  ;;  %6573 = vrot.lane.b32.xlu1 %v6462_v10, %s7276_s8 }
  0xd5   : > { %6583 = vrot.lane.b32.xlu0 %v6462_v10, %s7277_s20 }
  0xd6   : > { %6593 = vrot.lane.b32.xlu2 %v6472_v11, %s7277_s20  ;;  %6588 = vrot.lane.b32.xlu1 %v6477_v5, %s7277_s20 }
  0xdd   : > { %757 = vrot.lane.b32.xlu0 %v7600_v8, %s7276_s8 }
  0xde   : > { %6603 = vrot.lane.b32.xlu2 %v6457_v3, %s7278_s10  ;;  %6598 = vrot.lane.b32.xlu1 %v6477_v5, %s7278_s10 }
  0xe0   : > { %v7653_v14 = vpop.permute.xlu2 %6478 }
  0xe1   : > { %v6481_v32 = vunpack.i.h.bf16 %v7653_v14  ;;  %v6480_v33 = vunpack.i.l.bf16 %v7653_v14 }
  0xe3   : > { %v934_v47 = vsel %vm929_vm2, %v6480_v33, %v6481_v32 }
  0xe5   : > { %729 = vrot.lane.b32.xlu0 %v7613_v12, %s7277_s20 }
  0xe6   : > { %6613 = vrot.lane.b32.xlu2 %v6497_v13, %s7278_s10  ;;  %6608 = vrot.lane.b32.xlu1 %v6462_v10, %s7278_s10 }
  0xe8   : > { %v7661_v17 = vpop.permute.xlu2 %6483 }
  0xe9   : > { %v6486_v35 = vunpack.i.h.bf16 %v7661_v17  ;;  %v6485_v36 = vunpack.i.l.bf16 %v7661_v17 }
  0xeb   : > { %v937_v48 = vsel %vm929_vm2, %v6485_v36, %v6486_v35 }
  0xec   : > { %v1025_v54 = vpack.c.bf16 %v937_v48, %v934_v47 }
  0xed   : > { %689 = vrot.lane.b32.xlu0 %v7600_v8, %s7278_s10 }
  0xee   : > { %962 = vrot.lane.b32.xlu2 %v631_v19, %s7271_s26  ;;  %6618 = vrot.lane.b32.xlu1 %v6617_v18, %s7271_s26 }
  0xf0   : > { %v7668_v20 = vpop.permute.xlu2 %6493 }
  0xf1   : > { %v6496_v49 = vunpack.i.h.bf16 %v7668_v20  ;;  %v6495_v50 = vunpack.i.l.bf16 %v7668_v20  ;;  %v5799_v20 = vld [vmem:[#allocation8 + $0x20] sm:$0xf] }
  0xf3   : > { %v931_v60 = vsel %vm929_vm2, %v6495_v50, %v6496_v49 }
  0xf5   : > { %6623 = vrot.lane.b32.xlu0 %v6622_v21, %s7272_s21 }
  0xf6   : > { %911 = vrot.lane.b32.xlu2 %v627_v15, %s7272_s21  ;;  %6628 = vrot.lane.b32.xlu1 %v6617_v18, %s7273_s28 }
  0xf7   : > { %v7673_v22 = vpop.permute.xlu0 %6458 }
  0xf8   : > { %v6461_v23 = vunpack.i.h.bf16 %v7673_v22  ;;  %v6460_v24 = vunpack.i.l.bf16 %v7673_v22  ;;  %v7677_v25 = vpop.permute.xlu1 %6468  ;;  %v7679_v26 = vpop.permute.xlu2 %6508 }
  0xf9   : > { %v6471_v30 = vunpack.i.h.bf16 %v7677_v25  ;;  %v6470_v31 = vunpack.i.l.bf16 %v7677_v25  ;;  %v6511_v3 = vunpack.i.h.bf16 %v7679_v26  ;;  %v6510_v5 = vunpack.i.l.bf16 %v7679_v26  ;;  %v6316_v26 = vld [vmem:[#allocation8 + $0x24] sm:$0xf0] }
  0xfa   : > { %v980_v27 = vsel %vm972_vm0, %v6460_v24, %v6461_v23  ;;  %v993_v25 = vpack.c.bf16 %v7586_v4, %v7597_v7 }
  0xfb   : > { %v1031_v28 = vpack.c.bf16 %v980_v27, %v980_v27  ;;  %v977_v42 = vsel %vm972_vm0, %v6470_v31, %v6471_v30  ;;  %v891_v21 = vsel %vm886_vm3, %v6510_v5, %v6511_v3 }
  0xfd   : > { %876 = vrot.lane.b32.xlu0 %v631_v19, %s7273_s28  ;;  %v1108_v29 = vsel %vm1103_vm1, %v1031_v28, 0 }
  0xfe   : > { %1229 = vmatpush.bf16.msra.mxu3 %v1108_v29 }
  0xff   : > { %v7690_v34 = vpop.permute.xlu0 %6463 }
 0x100   : > { %v6466_v37 = vunpack.i.h.bf16 %v7690_v34  ;;  %v6465_v38 = vunpack.i.l.bf16 %v7690_v34  ;;  %v6474_v39 = vpop.permute.xlu1 %6473  ;;  %v7702_v43 = vpop.permute.xlu2 %6518 }
 0x101   : > { %v6475_v40 = vunpack.i.l.bf16 %v6474_v39  ;;  %v6476_v51 = vunpack.i.h.bf16 %v6474_v39 }
 0x102   : > { %v974_v41 = vsel %vm972_vm0, %v6465_v38, %v6466_v37 }
 0x103   : > { %v1028_v44 = vpack.c.bf16 %v977_v42, %v974_v41  ;;  %v979_v45 = vsel %vm972_vm0, %v6475_v40, %v6460_v24  ;;  %v973_v59 = vsel %vm972_vm0, %v6476_v51, %v6465_v38 }
 0x104   : > { %v1030_v46 = vpack.c.bf16 %v979_v45, %v979_v45 }
 0x105   : > { %1230 = vmatpush.bf16.msra.mxu3 %v1028_v44 }
 0x106   : > { %v1105_v52 = vsel %vm1103_vm1, %v1030_v46, 0  ;;  %v6520_v46 = vunpack.i.l.bf16 %v7702_v43 }
 0x107   : > { %1153 = vmatpush.bf16.msra.mxu1 %v1105_v52  ;;  %v957_v53 = vpop.permute.xlu0 %956 }
 0x108   : > { %v976_v55 = vsel %vm972_vm0, %v957_v53, %v6470_v31  ;;  %v7715_v56 = vpop.permute.xlu1 %6488  ;;  %v6529_v10 = vpop.permute.xlu2 %6528 }
 0x109   : > { %v6491_v57 = vunpack.i.h.bf16 %v7715_v56  ;;  %v6490_v58 = vunpack.i.l.bf16 %v7715_v56  ;;  %1231 = vmatpush.bf16.msra.mxu3 %v1025_v54  ;;  %v1027_v61 = vpack.c.bf16 %v976_v55, %v973_v59  ;;  %v6531_v47 = vunpack.i.h.bf16 %v6529_v10 }
 0x10a   : > { %v6530_v54 = vunpack.i.l.bf16 %v6529_v10 }
 0x10b   : > { %v894_v62 = vsel %vm886_vm3, %v6490_v58, %v6491_v57  ;;  %1154 = vmatpush.bf16.msra.mxu1 %v1027_v61 }
 0x10c   : > { %v1022_v63 = vpack.c.bf16 %v931_v60, %v894_v62  ;;  %v5785_v60 = vld [vmem:[#allocation8 + $0x8] sm:$0xf0] }
 0x10e   : > { %1232 = vmatpush.bf16.msra.mxu3 %v1022_v63 }
 0x10f   : > { %v6499_v11 = vpop.permute.xlu0 %6498 }
 0x110   : > { %v6501_v13 = vunpack.i.h.bf16 %v6499_v11  ;;  %v6500_v15 = vunpack.i.l.bf16 %v6499_v11  ;;  %v7728_v16 = vpop.permute.xlu1 %6503  ;;  %v7740_v38 = vpop.permute.xlu2 %6543 }
 0x111   : > { %v6506_v18 = vunpack.i.h.bf16 %v7728_v16  ;;  %v6505_v19 = vunpack.i.l.bf16 %v7728_v16  ;;  %v6318_v16 = vld [vmem:[#allocation8 + $0x34] sm:$0xf0] }
 0x112   : > { %v933_v24 = vsel %vm929_vm2, %v6500_v15, %v6480_v33  ;;  %v936_v27 = vsel %vm929_vm2, %v6501_v13, %v6485_v36  ;;  %v6521_v36 = vunpack.i.h.bf16 %v7702_v43 }
 0x113   : > { %v1024_v28 = vpack.c.bf16 %v936_v27, %v933_v24  ;;  %v888_v29 = vsel %vm886_vm3, %v6505_v19, %v6506_v18 }
 0x114   : > { %v1019_v31 = vpack.c.bf16 %v891_v21, %v888_v29  ;;  %v847_v62 = vsel %vm843_vm4, %v6520_v46, %v6521_v36 }
 0x115   : > { %1155 = vmatpush.bf16.msra.mxu1 %v1024_v28 }
 0x116   : > { %1233 = vmatpush.bf16.msra.mxu3 %v1019_v31 }
 0x117   : > { %v6514_v39 = vpop.permute.xlu0 %6513 }
 0x118   : > { %v6515_v40 = vunpack.i.l.bf16 %v6514_v39  ;;  %v906_v41 = vpop.permute.xlu1 %905  ;;  %v6516_v45 = vunpack.i.h.bf16 %v6514_v39  ;;  %v826_v55 = vpop.permute.xlu2 %825 }
 0x119   : > { %v930_v42 = vsel %vm929_vm2, %v906_v41, %v6495_v50 }
 0x11a   : > { %v893_v44 = vsel %vm886_vm3, %v6515_v40, %v6490_v58  ;;  %v887_v50 = vsel %vm886_vm3, %v6516_v45, %v6505_v19  ;;  %v6311_v58 = vld [vmem:[#allocation8 + $0x4] sm:$0xf] }
 0x11b   : > { %v1021_v33 = vpack.c.bf16 %v930_v42, %v893_v44  ;;  %v7753_v15 = vor.u32 %v6311_v58, %v5785_v60  ;;  %v6546_v44 = vunpack.i.h.bf16 %v7740_v38 }
 0x11d   : > { %1156 = vmatpush.bf16.msra.mxu1 %v1021_v33  ;;  %v6545_v33 = vunpack.i.l.bf16 %v7740_v38 }
 0x11f   : > { %v6524_v48 = vpop.permute.xlu0 %6523 }
 0x120   : > { %v6526_v51 = vunpack.i.h.bf16 %v6524_v48  ;;  %v6525_v52 = vunpack.i.l.bf16 %v6524_v48  ;;  %v871_v53 = vpop.permute.xlu1 %870  ;;  %v798_v39 = vpop.permute.xlu2 %797 }
 0x121   : > { %v890_v59 = vsel %vm886_vm3, %v871_v53, %v6510_v5  ;;  %v846_v5 = vsel %vm843_vm4, %v6530_v54, %v6520_v46  ;;  %v5793_v53 = vld [vmem:[#allocation8 + $0x18] sm:$0xf0] }
 0x122   : > { %v1018_v61 = vpack.c.bf16 %v890_v59, %v887_v50  ;;  %v849_v63 = vsel %vm843_vm4, %v6525_v52, %v6526_v51  ;;  %v848_v11 = vsel %vm843_vm4, %v6531_v47, %v6525_v52  ;;  %v7751_v13 = vpack.c.bf16 %v6526_v51, %v6521_v36  ;;  %v6313_v52 = vld [vmem:[#allocation8 + $0x14] sm:$0xf] }
 0x123   : > { %v1016_v43 = vpack.c.bf16 %v849_v63, %v847_v62  ;;  %v1015_v10 = vpack.c.bf16 %v848_v11, %v846_v5  ;;  %v811_v59 = vsel %vm809_vm6, %v6545_v33, %v6546_v44  ;;  %v7768_v62 = vor.u32 %v6313_v52, %v5793_v53  ;;  %v6315_v53 = vld [vmem:[#allocation8 + $0x24] sm:$0xf] }
 0x124   : > { %1157 = vmatpush.bf16.msra.mxu1 %v1018_v61 }
 0x125   : > { %1234 = vmatpush.bf16.msra.mxu3 %v1016_v43 }
 0x127   : > { %v6534_v19 = vpop.permute.xlu0 %6533 }
 0x128   : > { %v6536_v21 = vunpack.i.h.bf16 %v6534_v19  ;;  %v6535_v24 = vunpack.i.l.bf16 %v6534_v19  ;;  %v6539_v27 = vpop.permute.xlu1 %6538  ;;  %1158 = vmatpush.bf16.msra.mxu1 %v1015_v10  ;;  %5827 = vmatmul.msk.bf16.vlgmr.msra.gmra.mxu3 %vm11238_vm5, %v7753_v15  ;;  %v6579_v63 = vpop.permute.xlu2 %6578 }
 0x129   : > { %v6541_v28 = vunpack.i.h.bf16 %v6539_v27  ;;  %v6540_v29 = vunpack.i.l.bf16 %v6539_v27  ;;  %v6580_v5 = vunpack.i.l.bf16 %v6579_v63  ;;  %v6581_v10 = vunpack.i.h.bf16 %v6579_v63 }
 0x12a   : > { %v815_v31 = vsel %vm809_vm6, %v6535_v24, %v6536_v21 }
 0x12b   : > { %v1014_v40 = vpack.c.bf16 %v6541_v28, %v6536_v21  ;;  %v845_v41 = vsel %vm843_vm4, %v6540_v29, %v6541_v28  ;;  %5821 = vmatmul.msk.bf16.vlgmr.msra.gmra.mxu1 %vm11238_vm5, %v7753_v15  ;;  %v844_v60 = vsel %vm843_vm4, %v826_v55, %v6540_v29 }
 0x12c   : > { %v1013_v42 = vpack.c.bf16 %v845_v41, %v815_v31 }
 0x12d   : > { %1265 = vmatpush.bf16.msrb.mxu1 %v1014_v40 }
 0x12e   : > { %1189 = vmatpush.bf16.msra.mxu2 %v1013_v42 }
 0x12f   : > { %v6549_v45 = vpop.permute.xlu0 %6548 }
 0x130   : > { %v6551_v36 = vunpack.i.h.bf16 %v6549_v45  ;;  %v6550_v46 = vunpack.i.l.bf16 %v6549_v45  ;;  %v6554_v47 = vpop.permute.xlu1 %6553 }
 0x131   : > { %v6556_v48 = vunpack.i.h.bf16 %v6554_v47  ;;  %v6555_v51 = vunpack.i.l.bf16 %v6554_v47 }
 0x132   : > { %v1011_v54 = vpack.c.bf16 %v6551_v36, %v6546_v44  ;;  %v813_v50 = vsel %vm809_vm6, %v6550_v46, %v6551_v36  ;;  %v812_v11 = vsel %vm809_vm6, %v798_v39, %v6550_v46 }
 0x133   : > { %v814_v58 = vsel %vm809_vm6, %v6555_v51, %v6535_v24  ;;  %v1010_v61 = vpack.c.bf16 %v813_v50, %v811_v59  ;;  %v810_v43 = vsel %vm809_vm6, %v6556_v48, %v6545_v33  ;;  %v6594_v48 = vpop.permute.xlu2 %6593 }
 0x134   : > { %1266 = vmatpush.bf16.msrb.mxu1 %v1011_v54  ;;  %v1012_v38 = vpack.c.bf16 %v844_v60, %v814_v58  ;;  %v1009_v55 = vpack.c.bf16 %v812_v11, %v810_v43  ;;  %v5801_v54 = vld [vmem:[#allocation8 + $0x28] sm:$0xf0] }
 0x135   : > { %1190 = vmatpush.bf16.msra.mxu2 %v1010_v61  ;;  %v7782_v61 = vor.u32 %v6315_v53, %v5801_v54 }
 0x136   : > { %1113 = vmatpush.bf16.msra.mxu0 %v1012_v38 }
 0x137   : > { %v6559_v19 = vpop.permute.xlu0 %6558 }
 0x138   : > { %v6561_v21 = vunpack.i.h.bf16 %v6559_v19  ;;  %v6560_v24 = vunpack.i.l.bf16 %v6559_v19  ;;  %v6564_v27 = vpop.permute.xlu1 %6563  ;;  %5828 = vmatmul.msk.bf16.gmra.mxu3 %vm11238_vm5, %v7768_v62 }
 0x139   : > { %v6566_v28 = vunpack.i.h.bf16 %v6564_v27  ;;  %v6565_v29 = vunpack.i.l.bf16 %v6564_v27 }
 0x13a   : > { %1114 = vmatpush.bf16.msra.mxu0 %v1009_v55  ;;  %v778_v31 = vsel %vm775_vm7, %v6580_v5, %v6560_v24  ;;  %v779_v40 = vsel %vm775_vm7, %v6560_v24, %v6561_v21  ;;  %v6595_v55 = vunpack.i.l.bf16 %v6594_v48 }
 0x13b   : > { %v1008_v39 = vpack.c.bf16 %v6566_v28, %v6561_v21  ;;  %v780_v41 = vsel %vm775_vm7, %v6581_v10, %v6565_v29  ;;  %v781_v42 = vsel %vm775_vm7, %v6565_v29, %v6566_v28  ;;  %5822 = vmatmul.msk.bf16.gmra.mxu1 %vm11238_vm5, %v7768_v62  ;;  %v6604_v21 = vpop.permute.xlu2 %6603 }
 0x13c   : > { %v1006_v44 = vpack.c.bf16 %v780_v41, %v778_v31  ;;  %v1007_v33 = vpack.c.bf16 %v781_v42, %v779_v40  ;;  %v6606_v29 = vunpack.i.h.bf16 %v6604_v21  ;;  %v6605_v31 = vunpack.i.l.bf16 %v6604_v21 }
 0x13d   : > { %1267 = vmatpush.bf16.msrb.mxu1 %v1008_v39 }
 0x13e   : > { %1115 = vmatpush.bf16.msra.mxu0 %v1006_v44  ;;  %1191 = vmatpush.bf16.msra.mxu2 %v1007_v33 }
 0x13f   : > { %v6569_v45 = vpop.permute.xlu0 %6568 }
 0x140   : > { %v6571_v36 = vunpack.i.h.bf16 %v6569_v45  ;;  %v6570_v46 = vunpack.i.l.bf16 %v6569_v45  ;;  %v6574_v47 = vpop.permute.xlu1 %6573 }
 0x141   : > { %v6576_v51 = vunpack.i.h.bf16 %v6574_v47  ;;  %v6575_v52 = vunpack.i.l.bf16 %v6574_v47  ;;  %v6317_v47 = vld [vmem:[#allocation8 + $0x34] sm:$0xf] }
 0x142   : > { %v747_v59 = vsel %vm11239_vm8, %v6570_v46, %v6571_v36  ;;  %v746_v42 = vsel %vm11239_vm8, %v6595_v55, %v6570_v46 }
 0x143   : > { %v1005_v50 = vpack.c.bf16 %v6576_v51, %v6571_v36  ;;  %v777_v58 = vsel %vm775_vm7, %v6575_v52, %v6576_v51  ;;  %v713_v36 = vsel %vm11237_vm9, %v6605_v31, %v6606_v29  ;;  %v5809_v51 = vld [vmem:[#allocation8 + $0x38] sm:$0xf0] }
 0x144   : > { %v1004_v60 = vpack.c.bf16 %v777_v58, %v747_v59  ;;  %v6596_v59 = vunpack.i.h.bf16 %v6594_v48  ;;  %v7794_v58 = vor.u32 %v6317_v47, %v5809_v51 }
 0x145   : > { %1268 = vmatpush.bf16.msrb.mxu1 %v1005_v50 }
 0x146   : > { %1192 = vmatpush.bf16.msra.mxu2 %v1004_v60  ;;  %v6614_v60 = vpop.permute.xlu2 %6613 }
 0x147   : > { %v6584_v38 = vpop.permute.xlu0 %6583 }
 0x148   : > { %v6586_v63 = vunpack.i.h.bf16 %v6584_v38  ;;  %v6585_v43 = vunpack.i.l.bf16 %v6584_v38  ;;  %v6589_v11 = vpop.permute.xlu1 %6588  ;;  %5829 = vmatmul.msk.bf16.gmra.mxu3 %vm11238_vm5, %v7782_v61  ;;  %v6615_v38 = vunpack.i.l.bf16 %v6614_v60 }
 0x149   : > { %v6591_v5 = vunpack.i.h.bf16 %v6589_v11  ;;  %v6590_v10 = vunpack.i.l.bf16 %v6589_v11 }
 0x14a   : > { %v743_v19 = vsel %vm11239_vm8, %v6585_v43, %v6586_v63 }
 0x14b   : > { %v1002_v24 = vpack.c.bf16 %v6591_v5, %v6586_v63  ;;  %v745_v27 = vsel %vm11239_vm8, %v6590_v10, %v6591_v5  ;;  %5823 = vmatmul.msk.bf16.gmra.mxu1 %vm11238_vm5, %v7782_v61  ;;  %v742_v5 = vsel %vm11239_vm8, %v6596_v59, %v6585_v43  ;;  %v992_v43 = vpack.c.bf16 %v7581_v2, %v7594_v6 }
 0x14c   : > { %v1001_v28 = vpack.c.bf16 %v745_v27, %v743_v19  ;;  %v991_v6 = vpack.c.bf16 %v7613_v12, %v7600_v8 }
 0x14d   : > { %1269 = vmatpush.bf16.msrb.mxu1 %v1002_v24 }
 0x14e   : > { %1193 = vmatpush.bf16.msra.mxu2 %v1001_v28  ;;  %v963_v47 = vpop.permute.xlu2 %962 }
 0x14f   : > { %v758_v40 = vpop.permute.xlu0 %757  ;;  %v978_v22 = vsel %vm972_vm0, %v6471_v30, %v963_v47 }
 0x150   : > { %v776_v39 = vsel %vm775_vm7, %v758_v40, %v6575_v52  ;;  %v6599_v41 = vpop.permute.xlu1 %6598  ;;  %v6616_v52 = vunpack.i.h.bf16 %v6614_v60  ;;  %v5783_v40 = vld [vmem:[#allocation8] sm:$0xf] }
 0x151   : > { %v6601_v44 = vunpack.i.h.bf16 %v6599_v41  ;;  %v6600_v33 = vunpack.i.l.bf16 %v6599_v41  ;;  %v1003_v45 = vpack.c.bf16 %v776_v39, %v746_v42  ;;  %v6312_v39 = vld [vmem:[#allocation8 + $0x4] sm:$0xf0] }
 0x152   : > { %v712_v27 = vsel %vm11237_vm9, %v6616_v52, %v6605_v31 }
 0x153   : > { %1116 = vmatpush.bf16.msra.mxu0 %v1003_v45  ;;  %v999_v53 = vpack.c.bf16 %v6606_v29, %v6601_v44  ;;  %v711_v54 = vsel %vm11237_vm9, %v6600_v33, %v6601_v44  ;;  %v710_v24 = vsel %vm11237_vm9, %v6615_v38, %v6600_v33  ;;  %v5784_v33 = vor.u32 %v6312_v39, %v5783_v40  ;;  %v6319_v45 = vld [vmem:[#allocation8 + $0x44] sm:$0xf]  ;;  %v679_v38 = vld [vmem:[#allocation8 + $0x50] sm:$0xff] }
 0x154   : > { %v998_v50 = vpack.c.bf16 %v713_v36, %v711_v54  ;;  %v997_v29 = vpack.c.bf16 %v712_v27, %v710_v24  ;;  %v5817_v36 = vld [vmem:[#allocation8 + $0x48] sm:$0xf0]  ;;  %v1064_v27 = vunpack.c.l.b16 %v679_v38 }
 0x155   : > { %1270 = vmatpush.bf16.msrb.mxu1 %v999_v53  ;;  %v7816_v53 = vor.u32 %v6319_v45, %v5817_v36 }
 0x156   : > { %1194 = vmatpush.bf16.msra.mxu2 %v998_v50  ;;  %v912_v52 = vpop.permute.xlu2 %911 }
 0x157   : > { %v730_v46 = vpop.permute.xlu0 %729  ;;  %v932_v4 = vsel %vm929_vm2, %v6496_v49, %v912_v52  ;;  %v5800_v49 = vor.u32 %v6316_v26, %v5799_v20 }
 0x158   : > { %v744_v63 = vsel %vm11239_vm8, %v730_v46, %v6590_v10  ;;  %v6609_v11 = vpop.permute.xlu1 %6608  ;;  %5830 = vmatmul.msk.bf16.gmra.mxu3 %vm11238_vm5, %v7794_v58  ;;  %v6314_v46 = vld [vmem:[#allocation8 + $0x14] sm:$0xf0] }
 0x159   : > { %v6611_v19 = vunpack.i.h.bf16 %v6609_v11  ;;  %v6610_v21 = vunpack.i.l.bf16 %v6609_v11  ;;  %v1000_v48 = vpack.c.bf16 %v744_v63, %v742_v5 }
 0x15b   : > { %1117 = vmatpush.bf16.msra.mxu0 %v1000_v48  ;;  %v996_v55 = vpack.c.bf16 %v6611_v19, %v7578_v1  ;;  %v709_v28 = vsel %vm11237_vm9, %v6610_v21, %v6611_v19  ;;  %5824 = vmatmul.msk.bf16.gmra.mxu1 %vm11238_vm5, %v7794_v58 }
 0x15c   : > { %v995_v10 = vpack.c.bf16 %v709_v28, %v7575_v0  ;;  %v1076_v28 = vpack.c.b16 %v1064_v27, %v1064_v27 }
 0x15d   : > { %1271 = vmatpush.bf16.msrb.mxu1 %v996_v55 }
 0x15e   : > { %1195 = vmatpush.bf16.msra.mxu2 %v995_v10 }
 0x15f   : > { %v690_v41 = vpop.permute.xlu0 %689  ;;  %1118 = vmatpush.bf16.msra.mxu0 %v997_v29 }
 0x160   : > { %v708_v31 = vsel %vm11237_vm9, %v690_v41, %v6610_v21  ;;  %v6619_v1 = vpop.permute.xlu1 %6618  ;;  %v6320_v21 = vld [vmem:[#allocation8 + $0x44] sm:$0xf0] }
 0x161   : > { %v6620_v42 = vunpack.i.l.bf16 %v6619_v1  ;;  %v994_v44 = vpack.c.bf16 %v708_v31, %v7603_v9  ;;  %v6621_v0 = vunpack.i.h.bf16 %v6619_v1  ;;  %1272 = vmatpush.bf16.msrb.mxu1 %v993_v25 }
 0x162   : > { %1196 = vmatpush.bf16.msra.mxu2 %v992_v43 }
 0x163   : > { %1119 = vmatpush.bf16.msra.mxu0 %v994_v44  ;;  %v981_v2 = vsel %vm972_vm0, %v6461_v23, %v6620_v42  ;;  %v975_v54 = vsel %vm972_vm0, %v6466_v37, %v6621_v0 }
 0x164   : > { %v1032_v51 = vpack.c.bf16 %v981_v2, %v981_v2  ;;  %v1029_v12 = vpack.c.bf16 %v978_v22, %v975_v54 }
 0x165   : > { %1197 = vmatmul.bf16.vlgmr.msra.gmra.mxu2 %v5784_v33 }
 0x166   : > { %v1111_v9 = vsel %vm1103_vm1, %v1032_v51, 0 }
 0x167   : > { %1305 = vmatpush.bf16.msrb.mxu3 %v1111_v9  ;;  %v6624_v59 = vpop.permute.xlu0 %6623  ;;  %1120 = vmatpush.bf16.msra.mxu0 %v991_v6 }
 0x168   : > { %v6626_v23 = vunpack.i.h.bf16 %v6624_v59  ;;  %v6625_v50 = vunpack.i.l.bf16 %v6624_v59  ;;  %v6629_v8 = vpop.permute.xlu1 %6628  ;;  %5831 = vmatmul.msk.bf16.gmra.mxu3 %vm11238_vm5, %v7816_v53 }
 0x169   : > { %v6630_v60 = vunpack.i.l.bf16 %v6629_v8  ;;  %v6631_v7 = vunpack.i.h.bf16 %v6629_v8 }
 0x16a   : > { %1121 = vmatmul.bf16.vlgmr.msra.gmra.mxu0 %v5784_v33  ;;  %v935_v34 = vsel %vm929_vm2, %v6481_v32, %v6625_v50  ;;  %v938_v37 = vsel %vm929_vm2, %v6486_v35, %v6626_v23  ;;  %v5791_v32 = vld [vmem:[#allocation8 + $0x10] sm:$0xf]  ;;  %v1065_v35 = vunpack.c.h.b16 %v679_v38 }
 0x16b   : > { %1306 = vmatpush.bf16.msrb.mxu3 %v1029_v12  ;;  %5825 = vmatmul.msk.bf16.gmra.mxu1 %vm11238_vm5, %v7816_v53  ;;  %v1026_v30 = vpack.c.bf16 %v938_v37, %v935_v34  ;;  %v895_v14 = vsel %vm886_vm3, %v6491_v57, %v6630_v60  ;;  %v5792_v11 = vor.u32 %v6314_v46, %v5791_v32 }
 0x16c   : > { %v1023_v63 = vpack.c.bf16 %v932_v4, %v895_v14  ;;  %v889_v56 = vsel %vm886_vm3, %v6506_v18, %v6631_v7  ;;  %v1077_v57 = vpack.c.b16 %v1065_v35, %v1065_v35 }
 0x16f   : > { %1307 = vmatpush.bf16.msrb.mxu3 %v1026_v30  ;;  %v877_v17 = vpop.permute.xlu0 %876 }
 0x170   : > { %v892_v5 = vsel %vm886_vm3, %v6511_v3, %v877_v17  ;;  %v5807_v3 = vld [vmem:[#allocation8 + $0x30] sm:$0xf] }
 0x171   : > { %v1020_v19 = vpack.c.bf16 %v892_v5, %v889_v56  ;;  %v5808_v18 = vor.u32 %v6318_v16, %v5807_v3 }
 0x173   : > { %1308 = vmatpush.bf16.msrb.mxu3 %v1023_v63 }
 0x175   : > { %1202 = vmatmul.bf16.gmra.mxu2 %v5792_v11 }
 0x177   : > { %1309 = vmatpush.bf16.msrb.mxu3 %v1020_v19 }
 0x178   : > { %5832 = vmatmul.msk.bf16.gmra.mxu3 %vm11238_vm5, %v1077_v57 }
 0x17a   : > { %1126 = vmatmul.bf16.gmra.mxu0 %v5792_v11 }
 0x17b   : > { %1310 = vmatpush.bf16.msrb.mxu3 %v7751_v13  ;;  %5826 = vmatmul.msk.bf16.gmra.mxu1 %vm11238_vm5, %v1077_v57  ;;  %v5815_v13 = vld [vmem:[#allocation8 + $0x40] sm:$0xf] }
 0x17c   : > { %v5816_v48 = vor.u32 %v6320_v21, %v5815_v13 }
 0x185   : > { %1207 = vmatmul.bf16.gmra.mxu2 %v5800_v49 }
 0x188   : > { %5833 = vmatmul.msk.bf16.vlgmr.msrb.gmra.mxu3 %vm11238_vm5, %v7753_v15 }
 0x18a   : > { %1131 = vmatmul.bf16.gmra.mxu0 %v5800_v49 }
 0x18b   : > { %1273 = vmatmul.bf16.vlgmr.msrb.gmra.mxu1 %v5784_v33 }
 0x195   : > { %1212 = vmatmul.bf16.gmra.mxu2 %v5808_v18 }
 0x198   : > { %5834 = vmatmul.msk.bf16.gmra.mxu3 %vm11238_vm5, %v7768_v62 }
 0x19a   : > { %1136 = vmatmul.bf16.gmra.mxu0 %v5808_v18 }
 0x19b   : > { %1278 = vmatmul.bf16.gmra.mxu1 %v5792_v11 }
 0x1a5   : > { %1217 = vmatmul.bf16.gmra.mxu2 %v5816_v48 }
 0x1a8   : > { %5835 = vmatmul.msk.bf16.gmra.mxu3 %vm11238_vm5, %v7782_v61  ;;  %v7858_v24 = vpop.f32.mrf.mxu1 }
 0x1aa   : > { %1141 = vmatmul.bf16.gmra.mxu0 %v5816_v48 }
 0x1ab   : > { %v7860_v15 = vpop.f32.mrf.mxu3  ;;  %1283 = vmatmul.bf16.gmra.mxu1 %v5800_v49 }
 0x1b0   : > { %v7862_v55 = vpop.f32.mrf.mxu1 }
 0x1b1   : > { %11309 = vst [vmem:[#allocation29_spill] sm:$0xff] %v7862_v55 }
 0x1b3   : > { %v7864_v62 = vpop.f32.mrf.mxu3 }
 0x1b4   : > { %11310 = vst [vmem:[#allocation30_spill] sm:$0xff] %v7864_v62 }
 0x1b5   : > { %1222 = vmatmul.bf16.gmra.mxu2 %v1076_v28 }
 0x1b8   : > { %v7866_v10 = vpop.f32.mrf.mxu1  ;;  %5836 = vmatmul.msk.bf16.gmra.mxu3 %vm11238_vm5, %v7794_v58 }
 0x1b9   : > { %11311 = vst [vmem:[#allocation31_spill] sm:$0xff] %v7866_v10 }
 0x1ba   : > { %1146 = vmatmul.bf16.gmra.mxu0 %v1076_v28 }
 0x1bb   : > { %v7870_v61 = vpop.f32.mrf.mxu3  ;;  %1288 = vmatmul.bf16.gmra.mxu1 %v5808_v18 }
 0x1bc   : > { %11312 = vst [vmem:[#allocation32_spill] sm:$0xff] %v7870_v61 }
 0x1c0   : > { %v1167_v29 = vpop.f32.mrf.mxu1 }
 0x1c3   : > { %v1243_v43 = vpop.f32.mrf.mxu3 }
 0x1c8   : > { %v1170_v40 = vpop.f32.mrf.mxu1  ;;  %5837 = vmatmul.msk.bf16.gmra.mxu3 %vm11238_vm5, %v7816_v53 }
 0x1cb   : > { %v1246_v39 = vpop.f32.mrf.mxu3  ;;  %1293 = vmatmul.bf16.gmra.mxu1 %v5816_v48 }
 0x1d0   : > { %v1172_v41 = vpop.f32.mrf.mxu1 }
 0x1d3   : > { %v1248_v31 = vpop.f32.mrf.mxu3 }
 0x1d8   : > { %v7874_v1 = vpop.f32.mrf.mxu1  ;;  %5838 = vmatmul.msk.bf16.gmra.mxu3 %vm11238_vm5, %v1077_v57 }
 0x1d9   : > { %11313 = vst [vmem:[#allocation33_spill] sm:$0xff] %v7874_v1 }
 0x1db   : > { %v7877_v42 = vpop.f32.mrf.mxu3  ;;  %1298 = vmatmul.bf16.gmra.mxu1 %v1076_v28 }
 0x1dc   : > { %11314 = vst [vmem:[#allocation34_spill] sm:$0xff] %v7877_v42 }
 0x1e0   : > { %v7879_v58 = vpop.f32.mrf.mxu1 }
 0x1e1   : > { %11315 = vst [vmem:[#allocation35_spill] sm:$0xff] %v7879_v58 }
 0x1e3   : > { %v7881_v44 = vpop.f32.mrf.mxu3 }
 0x1e4   : > { %11316 = vst [vmem:[#allocation36_spill] sm:$0xff] %v7881_v44 }
 0x1e7   : > { %v7883_v33 = vpop.f32.mrf.mxu0 }
 0x1e8   : > { %v7885_v45 = vpop.f32.mrf.mxu2  ;;  %v7887_v36 = vpop.f32.mrf.mxu1 }
 0x1e9   : > { %11317 = vst [vmem:[#allocation37_spill] sm:$0xff] %v7887_v36 }
 0x1eb   : > { %v7889_v0 = vpop.f32.mrf.mxu3 }
 0x1ec   : > { %11318 = vst [vmem:[#allocation38_spill] sm:$0xff] %v7889_v0 }
 0x1ef   : > { %v7891_v47 = vpop.f32.mrf.mxu0 }
 0x1f0   : > { %11319 = vst [vmem:[#allocation39_spill] sm:$0xff] %v7891_v47  ;;  %v7893_v2 = vpop.f32.mrf.mxu2  ;;  %v7895_v6 = vpop.f32.mrf.mxu1 }
 0x1f1   : > { %11320 = vst [vmem:[#allocation40_spill] sm:$0xff] %v7893_v2 }
 0x1f2   : > { %11321 = vst [vmem:[#allocation41_spill] sm:$0xff] %v7895_v6 }
 0x1f3   : > { %v7897_v51 = vpop.f32.mrf.mxu3 }
 0x1f4   : > { %11322 = vst [vmem:[#allocation42_spill] sm:$0xff] %v7897_v51 }
 0x1f7   : > { %v7899_v53 = vpop.f32.mrf.mxu0 }
 0x1f8   : > { %11323 = vst [vmem:[#allocation43_spill] sm:$0xff] %v7899_v53  ;;  %v7901_v9 = vpop.f32.mrf.mxu2  ;;  %v7903_v54 = vpop.f32.mrf.mxu1 }
 0x1f9   : > { %11324 = vst [vmem:[#allocation44_spill] sm:$0xff] %v7901_v9 }
 0x1fa   : > { %11325 = vst [vmem:[#allocation45_spill] sm:$0xff] %v7903_v54 }
 0x1fb   : > { %v7905_v59 = vpop.f32.mrf.mxu3 }
 0x1fc   : > { %11326 = vst [vmem:[#allocation46_spill] sm:$0xff] %v7905_v59 }
 0x1ff   : > { %v1129_v22 = vpop.f32.mrf.mxu0 }
 0x200   : > { %v1168_v23 = vadd.f32 %v1167_v29, %v1129_v22  ;;  %v1205_v50 = vpop.f32.mrf.mxu2  ;;  %v1187_v8 = vpop.f32.mrf.mxu1 }
 0x201   : > { %v1244_v12 = vadd.f32 %v1243_v43, %v1205_v50 }
 0x202   : > { %v5839_v60 = vmul.f32 -1.442695, %v1168_v23 }
 0x203   : > { %v5840_v34 = vmul.f32 -1.442695, %v1244_v12  ;;  %v1263_v37 = vpop.f32.mrf.mxu3 }
 0x204   : > { %6827 = vpow2.f32 %v5839_v60 }
 0x205   : > { %6829 = vpow2.f32 %v5840_v34 }
 0x207   : > { %v1132_v25 = vpop.f32.mrf.mxu0 }
 0x208   : > { %v1171_v30 = vadd.f32 %v1170_v40, %v1132_v25  ;;  %v1208_v52 = vpop.f32.mrf.mxu2  ;;  %v7907_v38 = vpop.f32.mrf.mxu1  ;;  %v636_v25 = vld [vmem:[%s7532_s23] sm:$0xff] }
 0x209   : > { %v1247_v14 = vadd.f32 %v1246_v39, %v1208_v52 }
 0x20a   : > { %v6828_v32 = vpop.eup %6827  ;;  %v5842_v46 = vmul.f32 -1.442695, %v1171_v30 }
 0x20b   : > { %v6830_v17 = vpop.eup %6829  ;;  %v1368_v4 = vadd.f32 1.0, %v6828_v32  ;;  %v5843_v7 = vmul.f32 -1.442695, %v1247_v14  ;;  %v7909_v35 = vpop.f32.mrf.mxu3 }
 0x20c   : > { %v1369_v63 = vadd.f32 1.0, %v6830_v17  ;;  %6831 = vpow2.f32 %v5842_v46  ;;  %v637_v17 = vld [vmem:[%s7532_s23 + $0x8] sm:$0xff] }
 0x20d   : > { %6833 = vrcp.f32 %v1368_v4  ;;  %v1386_v43 = vand.u32 2147483647, %v1368_v4  ;;  %v1388_v40 = vand.u32 2147483648, %v1368_v4  ;;  %vm1382_vm12 = vweird.f32 %v1368_v4 }
 0x20e   : > { %6835 = vrcp.f32 %v1369_v63  ;;  %v1403_v22 = vand.u32 2147483648, %v1369_v63  ;;  %v1401_v12 = vand.u32 2147483647, %v1369_v63  ;;  %vm1397_vm14 = vweird.f32 %v1369_v63 }
 0x20f   : > { %6837 = vpow2.f32 %v5843_v7  ;;  %v1134_v11 = vpop.f32.mrf.mxu0  ;;  %v1389_v30 = vor.u32 1.1754944e-38, %v1388_v40  ;;  %vm1387_vm15 = vcmp.eq.f32.partialorder %v1386_v43, 8.507059e+37 }
 0x210   : > { %v1173_v5 = vadd.f32 %v1172_v41, %v1134_v11  ;;  %v1210_v56 = vpop.f32.mrf.mxu2  ;;  %v7911_v57 = vpop.f32.mrf.mxu1  ;;  %v1404_v7 = vor.u32 1.1754944e-38, %v1403_v22  ;;  %vm1402_vm5 = vcmp.eq.f32.partialorder %v1401_v12, 8.507059e+37 }
 0x211   : > { %v1249_v19 = vadd.f32 %v1248_v31, %v1210_v56 }
 0x212   : > { %v6832_v20 = vpop.eup %6831  ;;  %v5845_v26 = vmul.f32 -1.442695, %v1173_v5 }
 0x213   : > { %v6834_v49 = vpop.eup %6833  ;;  %v7913_v3 = vadd.f32 1.0, %v6832_v20  ;;  %v5846_v16 = vmul.f32 -1.442695, %v1249_v19  ;;  %v7915_v18 = vpop.f32.mrf.mxu3 }
 0x214   : > { %v6836_v13 = vpop.eup %6835  ;;  %v1378_v21 = vmul.f32 %v6834_v49, %v1368_v4  ;;  %6839 = vpow2.f32 %v5845_v26  ;;  %vm1383_vm10 = vweird.f32 %v6834_v49 }
 0x215   : > { %v6838_v48 = vpop.eup %6837  ;;  %v1393_v27 = vmul.f32 %v6836_v13, %v1369_v63  ;;  %6841 = vrcp.f32 %v7913_v3  ;;  %vm1398_vm11 = vweird.f32 %v6836_v13  ;;  %vm1384_vm13 = vmor %vm1382_vm12, %vm1383_vm10  ;;  %v1433_v19 = vand.u32 2147483648, %v7913_v3 }
 0x216   : > { %v1379_v28 = vsub.f32 1.0, %v1378_v21  ;;  %v7918_v29 = vadd.f32 1.0, %v6838_v48  ;;  %6843 = vpow2.f32 %v5846_v16  ;;  %vm1399_vm9 = vmor %vm1397_vm14, %vm1398_vm11 }
 0x217   : > { %v1394_v39 = vsub.f32 1.0, %v1393_v27  ;;  %v7920_v41 = vpop.f32.mrf.mxu0 }
 0x218   : > { %11327 = vst [vmem:[#allocation47_spill] sm:$0xff] %v7920_v41  ;;  %v1380_v31 = vmul.f32 %v6834_v49, %v1379_v28  ;;  %6845 = vrcp.f32 %v7918_v29  ;;  %v7923_v23 = vpop.f32.mrf.mxu2  ;;  %v7925_v50 = vpop.f32.mrf.mxu1  ;;  %v1446_v12 = vand.u32 2147483647, %v7918_v29 }
 0x219   : > { %11328 = vst [vmem:[#allocation48_spill] sm:$0xff] %v7923_v23  ;;  %v1395_v8 = vmul.f32 %v6836_v13, %v1394_v39  ;;  %v1434_v39 = vor.u32 1.1754944e-38, %v1433_v19 }
 0x21a   : > { %11329 = vst [vmem:[#allocation49_spill] sm:$0xff] %v7925_v50  ;;  %v6840_v60 = vpop.eup %6839  ;;  %v1381_v34 = vadd.f32 %v6834_v49, %v1380_v31 }
 0x21b   : > { %v6842_v37 = vpop.eup %6841  ;;  %v1396_v52 = vadd.f32 %v6836_v13, %v1395_v8  ;;  %v7928_v14 = vadd.f32 1.0, %v6840_v60  ;;  %v7930_v32 = vpop.f32.mrf.mxu3  ;;  %v1448_v60 = vand.u32 2147483648, %v7918_v29 }
 0x21c   : > { %11330 = vst [vmem:[#allocation50_spill] sm:$0xff] %v7930_v32  ;;  %v1385_v46 = vsel %vm1384_vm13, %v6834_v49, %v1381_v34  ;;  %v1423_v11 = vmul.f32 %v6842_v37, %v7913_v3  ;;  %v6844_v5 = vpop.eup %6843  ;;  %vm1428_vm10 = vweird.f32 %v6842_v37  ;;  %v639_v34 = vld [vmem:[%s7532_s23 + $0x18] sm:$0xff]  ;;  %vm1442_vm13 = vweird.f32 %v7918_v29 }
 0x21d   : > { %v1390_v4 = vsel %vm1387_vm15, %v1389_v30, %v1385_v46  ;;  %v1400_v56 = vsel %vm1399_vm9, %v6836_v13, %v1396_v52  ;;  %6847 = vrcp.f32 %v7928_v14  ;;  %v1431_v13 = vand.u32 2147483647, %v7913_v3 }
 0x21e   : > { %v6846_v20 = vpop.eup %6845  ;;  %v7936_v63 = vmul.f32 %v1390_v4, %v636_v25  ;;  %v1405_v26 = vsel %vm1402_vm5, %v1404_v7, %v1400_v56  ;;  %v1424_v16 = vsub.f32 1.0, %v1423_v11  ;;  %v7945_v28 = vadd.f32 1.0, %v6844_v5  ;;  %v640_v11 = vld [vmem:[%s7532_s23 + $0x20] sm:$0xff] }
 0x21f   : > { %v7939_v49 = vmul.f32 %v1405_v26, %v637_v17  ;;  %v1438_v21 = vmul.f32 %v6846_v20, %v7918_v29  ;;  %v7942_v48 = vpop.f32.mrf.mxu0  ;;  %vm1427_vm5 = vweird.f32 %v7913_v3  ;;  %vm1443_vm11 = vweird.f32 %v6846_v20 }
 0x220   : > { %11331 = vst [vmem:[#allocation51_spill] sm:$0xff] %v7942_v48  ;;  %v1425_v27 = vmul.f32 %v6842_v37, %v1424_v16  ;;  %v7947_v43 = vpop.f32.mrf.mxu2  ;;  %v1281_v40 = vpop.f32.mrf.mxu1  ;;  %6849 = vrcp.f32 %v7945_v28  ;;  %vm1429_vm9 = vmor %vm1427_vm5, %vm1428_vm10  ;;  %vm1432_vm12 = vcmp.eq.f32.partialorder %v1431_v13, 8.507059e+37  ;;  %v1449_v5 = vor.u32 1.1754944e-38, %v1448_v60 }
 0x221   : > { %11332 = vst [vmem:[#allocation52_spill] sm:$0xff] %v7947_v43  ;;  %v1439_v31 = vsub.f32 1.0, %v1438_v21  ;;  %v7952_v22 = vpack.i.bf16 %v7939_v49, %v7936_v63  ;;  %vm1444_vm14 = vmor %vm1442_vm13, %vm1443_vm11  ;;  %vm1447_vm15 = vcmp.eq.f32.partialorder %v1446_v12, 8.507059e+37 }
 0x222   : > { %v1426_v8 = vadd.f32 %v6842_v37, %v1425_v27 }
 0x223   : > { %v1440_v25 = vmul.f32 %v6846_v20, %v1439_v31  ;;  %6643 = vrot.lane.b32.xlu0 %v7952_v22, %s7271_s26  ;;  %v1319_v3 = vpop.f32.mrf.mxu3  ;;  %v7960_v30 = vpop.eup %6847  ;;  %6638 = vrot.lane.b32.xlu1 %v7952_v22, %s7275_s4 }
 0x224   : > { %v1430_v52 = vsel %vm1429_vm9, %v6842_v37, %v1426_v8  ;;  %6633 = vrot.lane.b32.xlu2 %v7952_v22, %s7274_s12  ;;  %v1468_v37 = vmul.f32 %v7960_v30, %v7928_v14  ;;  %v1320_v12 = vadd.f32 %v1319_v3, %v1281_v40  ;;  %vm1473_vm10 = vweird.f32 %v7960_v30 }
 0x225   : > { %v1435_v46 = vsel %vm1432_vm12, %v1434_v39, %v1430_v52  ;;  %v1441_v17 = vadd.f32 %v6846_v20, %v1440_v25  ;;  %vm1472_vm9 = vweird.f32 %v7928_v14  ;;  %vm1487_vm12 = vweird.f32 %v7945_v28 }
 0x226   : > { %v7967_v7 = vmul.f32 %v1435_v46, %v639_v34  ;;  %v6850_v19 = vpop.eup %6849  ;;  %v1469_v39 = vsub.f32 1.0, %v1468_v37  ;;  %vm8005_vm11 = vmor %vm1472_vm9, %vm1473_vm10 }
 0x227   : > { %v1445_v4 = vsel %vm1444_vm14, %v6846_v20, %v1441_v17  ;;  %v7972_v56 = vpop.f32.mrf.mxu0  ;;  %v1483_v27 = vmul.f32 %v6850_v19, %v7945_v28  ;;  %vm1488_vm5 = vweird.f32 %v6850_v19 }
 0x228   : > { %11333 = vst [vmem:[#allocation53_spill] sm:$0xff] %v7972_v56  ;;  %v1450_v29 = vsel %vm1447_vm15, %v1449_v5, %v1445_v4  ;;  %v7974_v26 = vpop.f32.mrf.mxu2  ;;  %v1284_v16 = vpop.f32.mrf.mxu1  ;;  %v1470_v60 = vmul.f32 %v7960_v30, %v1469_v39  ;;  %vm8017_vm13 = vmor %vm1487_vm12, %vm1488_vm5 }
 0x229   : > { %11334 = vst [vmem:[#allocation54_spill] sm:$0xff] %v7974_v26  ;;  %v7976_v21 = vmul.f32 %v1450_v29, %v640_v11  ;;  %v1484_v20 = vsub.f32 1.0, %v1483_v27  ;;  %v5841_v11 = vmul.f32 -1.442695, %v1320_v12  ;;  %v1478_v29 = vand.u32 2147483648, %v7928_v14 }
 0x22a   : > { %v1471_v40 = vadd.f32 %v7960_v30, %v1470_v60 }
 0x22b   : > { %6653 = vrot.lane.b32.xlu0 %v7952_v22, %s7272_s21  ;;  %v7985_v31 = vpack.i.bf16 %v7976_v21, %v7967_v7  ;;  %v1322_v8 = vpop.f32.mrf.mxu3  ;;  %6648 = vrot.lane.b32.xlu1 %v7952_v22, %s7276_s8  ;;  %v1485_v34 = vmul.f32 %v6850_v19, %v1484_v20  ;;  %v1476_v20 = vand.u32 2147483647, %v7928_v14  ;;  %6851 = vpow2.f32 %v5841_v11 }
 0x22c   : > { %v1323_v25 = vadd.f32 %v1322_v8, %v1284_v16  ;;  %v1493_v16 = vand.u32 2147483648, %v7945_v28  ;;  %v1491_v8 = vand.u32 2147483647, %v7945_v28  ;;  %v1475_v14 = vsel %vm8005_vm11, %v7960_v30, %v1471_v40 }
 0x22d   : > { %6668 = vrot.lane.b32.xlu2 %v7985_v31, %s7275_s4  ;;  %v1486_v3 = vadd.f32 %v6850_v19, %v1485_v34  ;;  %vm1477_vm14 = vcmp.eq.f32.partialorder %v1476_v20, 8.507059e+37 }
 0x22e   : > { %v5844_v4 = vmul.f32 -1.442695, %v1323_v25  ;;  %v1479_v25 = vor.u32 1.1754944e-38, %v1478_v29  ;;  %v1494_v11 = vor.u32 1.1754944e-38, %v1493_v16  ;;  %vm1492_vm15 = vcmp.eq.f32.partialorder %v1491_v8, 8.507059e+37 }
 0x22f   : > { %v7992_v52 = vpop.f32.mrf.mxu0  ;;  %v1490_v28 = vsel %vm8017_vm13, %v6850_v19, %v1486_v3 }
 0x230   : > { %11335 = vst [vmem:[#allocation55_spill] sm:$0xff] %v7992_v52  ;;  %v7996_v17 = vpop.f32.mrf.mxu2  ;;  %v1286_v5 = vpop.f32.mrf.mxu1  ;;  %6853 = vpow2.f32 %v5844_v4  ;;  %v1480_v46 = vsel %vm1477_vm14, %v1479_v25, %v1475_v14  ;;  %v1495_v13 = vsel %vm1492_vm15, %v1494_v11, %v1490_v28 }
 0x231   : > { %11336 = vst [vmem:[#allocation56_spill] sm:$0xff] %v7996_v17  ;;  %v6852_v59 = vpop.eup %6851 }
 0x232   : > { %v1370_v3 = vadd.f32 1.0, %v6852_v59 }
 0x233   : > { %6663 = vrot.lane.b32.xlu0 %v7952_v22, %s7273_s28  ;;  %v1324_v37 = vpop.f32.mrf.mxu3  ;;  %6658 = vrot.lane.b32.xlu1 %v7952_v22, %s7277_s20 }
 0x234   : > { %v1325_v27 = vadd.f32 %v1324_v37, %v1286_v5  ;;  %v642_v37 = vld [vmem:[%s7532_s23 + $0x30] sm:$0xff]  ;;  %vm1412_vm10 = vweird.f32 %v1370_v3 }
 0x235   : > { %6678 = vrot.lane.b32.xlu2 %v7985_v31, %s7276_s8  ;;  %v8034_v19 = vmul.f32 %v1480_v46, %v642_v37 }
 0x236   : > { %v5847_v60 = vmul.f32 -1.442695, %v1325_v27  ;;  %v643_v27 = vld [vmem:[%s7532_s23 + $0x38] sm:$0xff]  ;;  %v6854_v30 = vpop.eup %6853 }
 0x237   : > { %v8026_v34 = vpop.f32.mrf.mxu0  ;;  %v8036_v40 = vmul.f32 %v1495_v13, %v643_v27  ;;  %v1373_v16 = vadd.f32 1.0, %v6854_v30  ;;  %v1416_v27 = vand.u32 2147483647, %v1370_v3  ;;  %v1418_v30 = vand.u32 2147483648, %v1370_v3 }
 0x238   : > { %11341 = vst [vmem:[#allocation57_spill] sm:$0xff] %v8026_v34  ;;  %v8028_v5 = vpop.f32.mrf.mxu2  ;;  %6855 = vpow2.f32 %v5847_v60 }
 0x239   : > { %11342 = vst [vmem:[#allocation58_spill] sm:$0xff] %v8028_v5  ;;  %v6717_v20 = vpack.i.bf16 %v8036_v40, %v8034_v19  ;;  %6857 = vrcp.f32 %v1370_v3  ;;  %vm1457_vm9 = vweird.f32 %v1373_v16  ;;  %vm1417_vm15 = vcmp.eq.f32.partialorder %v1416_v27, 8.507059e+37  ;;  %v638_v27 = vld [vmem:[%s7532_s23 + $0x10] sm:$0xff] }
 0x23a   : > { %6859 = vrcp.f32 %v1373_v16 }
 0x23b   : > { %6713 = vrot.lane.b32.xlu0 %v7952_v22, %s7278_s10  ;;  %6673 = vrot.lane.b32.xlu1 %v7985_v31, %s7271_s26 }
 0x23d   : > { %6688 = vrot.lane.b32.xlu2 %v7985_v31, %s7277_s20 }
 0x23e   : > { %v6856_v4 = vpop.eup %6855 }
 0x23f   : > { %v1149_v29 = vpop.f32.mrf.mxu0  ;;  %v1376_v22 = vadd.f32 1.0, %v6856_v4  ;;  %v6858_v59 = vpop.eup %6857 }
 0x240   : > { %v1225_v39 = vpop.f32.mrf.mxu2  ;;  %v6860_v13 = vpop.eup %6859  ;;  %v1408_v46 = vmul.f32 %v6858_v59, %v1370_v3  ;;  %vm1413_vm5 = vweird.f32 %v6858_v59 }
 0x241   : > { %6861 = vrcp.f32 %v1376_v22  ;;  %v1453_v12 = vmul.f32 %v6860_v13, %v1373_v16  ;;  %vm1458_vm11 = vweird.f32 %v6860_v13  ;;  %vm8056_vm12 = vmor %vm1412_vm10, %vm1413_vm5  ;;  %vm1502_vm13 = vweird.f32 %v1376_v22 }
 0x242   : > { %v1409_v60 = vsub.f32 1.0, %v1408_v46  ;;  %v1463_v46 = vand.u32 2147483648, %v1373_v16  ;;  %vm8060_vm8 = vmor %vm1457_vm9, %vm1458_vm11  ;;  %v1508_v3 = vand.u32 2147483648, %v1376_v22  ;;  %v1506_v5 = vand.u32 2147483647, %v1376_v22 }
 0x243   : > { %6718 = vrot.lane.b32.xlu0 %v6717_v20, %s7271_s26  ;;  %6683 = vrot.lane.b32.xlu1 %v7985_v31, %s7272_s21  ;;  %v1454_v28 = vsub.f32 1.0, %v1453_v12 }
 0x244   : > { %v1410_v25 = vmul.f32 %v6858_v59, %v1409_v60  ;;  %v1461_v60 = vand.u32 2147483647, %v1373_v16  ;;  %v1464_v16 = vor.u32 1.1754944e-38, %v1463_v46  ;;  %v1509_v39 = vor.u32 1.1754944e-38, %v1508_v3  ;;  %v644_v46 = vld [vmem:[%s7532_s23 + $0x40] sm:$0xff] }
 0x245   : > { %6698 = vrot.lane.b32.xlu2 %v7985_v31, %s7278_s10  ;;  %v1455_v37 = vmul.f32 %v6860_v13, %v1454_v28  ;;  %vm1507_vm9 = vcmp.eq.f32.partialorder %v1506_v5, 8.507059e+37 }
 0x246   : > { %v1411_v4 = vadd.f32 %v6858_v59, %v1410_v25  ;;  %vm1462_vm5 = vcmp.eq.f32.partialorder %v1461_v60, 8.507059e+37 }
 0x247   : > { %v6862_v8 = vpop.eup %6861  ;;  %v1456_v12 = vadd.f32 %v6860_v13, %v1455_v37 }
 0x248   : > { %v1498_v14 = vmul.f32 %v6862_v8, %v1376_v22  ;;  %vm1503_vm14 = vweird.f32 %v6862_v8  ;;  %v1415_v25 = vsel %vm8056_vm12, %v6858_v59, %v1411_v4  ;;  %v641_v22 = vld [vmem:[%s7532_s23 + $0x28] sm:$0xff]  ;;  %vm11360_vm12 = vcmask 719872  }
 0x249   : > { %vm1504_vm10 = vmor %vm1502_vm13, %vm1503_vm14  ;;  %v1460_v37 = vsel %vm8060_vm8, %v6860_v13, %v1456_v12  ;;  %vm11357_vm8 = vcmask 1031168   ;;  %vm11362_vm14 = vcmask 1039360  }
 0x24a   : > { %v1499_v11 = vsub.f32 1.0, %v1498_v14  ;;  %v1419_v14 = vor.u32 1.1754944e-38, %v1418_v30  ;;  %v1465_v4 = vsel %vm1462_vm5, %v1464_v16, %v1460_v37  ;;  %vm11359_vm11 = vmmov %vm11357_vm8 }
 0x24b   : > { %6723 = vrot.lane.b32.xlu0 %v6717_v20, %s7276_s8  ;;  %6693 = vrot.lane.b32.xlu1 %v7985_v31, %s7273_s28  ;;  %v8077_v34 = vmul.f32 %v1465_v4, %v641_v22  ;;  %vm11361_vm13 = vmmov %vm11357_vm8 }
 0x24c   : > { %v1500_v29 = vmul.f32 %v6862_v8, %v1499_v11  ;;  %v1420_v30 = vsel %vm1417_vm15, %v1419_v14, %v1415_v25  ;;  %vm11363_vm15 = vmmov %vm11362_vm14 }
 0x24d   : > { %6728 = vrot.lane.b32.xlu2 %v6717_v20, %s7272_s21  ;;  %vm11370_vm5 = vmmov %vm11360_vm12 }
 0x24e   : > { %v1501_v11 = vadd.f32 %v6862_v8, %v1500_v29  ;;  %v8074_v29 = vmul.f32 %v1420_v30, %v638_v27 }
 0x250   : > { %v1505_v59 = vsel %vm1504_vm10, %v6862_v8, %v1501_v11  ;;  %vm11364_vm10 = vmmov %vm11362_vm14 }
 0x251   : > { %v1510_v54 = vsel %vm1507_vm9, %v1509_v39, %v1505_v59  ;;  %vm11391_vm9 = vmmov %vm11364_vm10 }
 0x253   : > { %6733 = vrot.lane.b32.xlu0 %v6717_v20, %s7277_s20  ;;  %6703 = vrot.lane.b32.xlu1 %v6717_v20, %s7275_s4 }
 0x255   : > { %6738 = vrot.lane.b32.xlu2 %v6717_v20, %s7273_s28 }
 0x25b   : > { %6743 = vrot.lane.b32.xlu0 %v6717_v20, %s7278_s10  ;;  %6708 = vrot.lane.b32.xlu1 %v7985_v31, %s7274_s12 }
 0x25d   : > { %6748 = vrot.lane.b32.xlu2 %v6717_v20, %s7274_s12  ;;  %v8081_v20 = vmul.f32 %v1510_v54, %v644_v46 }
 0x25f   : > { %v6757_v31 = vpack.i.bf16 %v8074_v29, %v8081_v20  ;;  %v6762_v54 = vpack.i.bf16 %v8081_v20, %v8077_v34 }
 0x263   : > { %1603 = vrot.lane.b32.xlu0 %v8074_v29, %s7276_s8  ;;  %1642 = vrot.lane.b32.xlu1 %v8077_v34, %s7275_s4 }
 0x265   : > { %1669 = vrot.lane.b32.xlu2 %v8074_v29, %s7274_s12 }
 0x26b   : > { %6758 = vrot.lane.b32.xlu0 %v6757_v31, %s7271_s26  ;;  %6753 = vrot.lane.b32.xlu1 %v6757_v31, %s7275_s4 }
 0x26d   : > { %1735 = vrot.lane.b32.xlu2 %v8074_v29, %s7272_s21 }
 0x273   : > { %6763 = vrot.lane.b32.xlu0 %v6762_v54, %s7276_s8  ;;  %6768 = vrot.lane.b32.xlu1 %v6762_v54, %s7272_s21 }
 0x275   : > { %1774 = vrot.lane.b32.xlu2 %v8077_v34, %s7271_s26 }
 0x27b   : > { %1576 = vrot.lane.b32.xlu0 %v8077_v34, %s7277_s20  ;;  %6778 = vrot.lane.b32.xlu1 %v6757_v31, %s7273_s28 }
 0x27d   : > { %6773 = vrot.lane.b32.xlu2 %v6757_v31, %s7277_s20  ;;  %s9016_s20 = scalar_lea.vmem [#allocation13], %s7540_s14 }
 0x27e   : > { %v8103_v5 = vpop.permute.xlu2 %6633 }
 0x27f   : > { %v11352_v41 = vunpack.i.h.bf16 %v8103_v5 }
 0x283   : > { %6788 = vrot.lane.b32.xlu0 %v6762_v54, %s7274_s12  ;;  %1708 = vrot.lane.b32.xlu1 %v8077_v34, %s7273_s28  ;;  %s7279_s28 = smov 19   ;;  %s7142_s12 = scalar_lea.hbm %s11568_s15, 96 }
 0x285   : > { %6783 = vrot.lane.b32.xlu2 %v6762_v54, %s7278_s10 }
 0x287   : > { %v8109_v13 = vpop.permute.xlu2 %6668 }
 0x28b   : > { %1537 = vrot.lane.b32.xlu1 %v8074_v29, %s7278_s10 }
 0x28f   : > { %v8113_v8 = vpop.permute.xlu2 %6678 }
 0x290   : > { %v11245_v62 = vunpack.i.h.bf16 %v8113_v8  ;;  %v6680_v2 = vunpack.i.l.bf16 %v8113_v8 }
 0x295   : > { %v8115_v12 = vpop.permute.xlu0 %6643  ;;  %v8117_v60 = vpop.permute.xlu1 %6638 }
 0x296   : > { %v11242_v17 = vunpack.i.h.bf16 %v8115_v12  ;;  %v6645_v6 = vunpack.i.l.bf16 %v8115_v12 }
 0x297   : > { %v8119_v14 = vpop.permute.xlu2 %6688 }
 0x29d   : > { %v8121_v28 = vpop.permute.xlu0 %6653  ;;  %v8123_v3 = vpop.permute.xlu1 %6648 }
 0x29f   : > { %v8125_v25 = vpop.permute.xlu2 %6698 }
 0x2a5   : > { %v8127_v11 = vpop.permute.xlu0 %6663  ;;  %v8129_v16 = vpop.permute.xlu1 %6658 }
 0x2a6   : > { %v11353_v32 = vunpack.i.h.bf16 %v8127_v11  ;;  %v6660_v55 = vunpack.i.l.bf16 %v8129_v16 }
 0x2a7   : > { %v8131_v37 = vpop.permute.xlu2 %6728 }
 0x2ad   : > { %v8133_v27 = vpop.permute.xlu0 %6713  ;;  %v8135_v30 = vpop.permute.xlu1 %6673 }
 0x2ae   : > { %v11241_v31 = vunpack.i.h.bf16 %v8135_v30  ;;  %v6675_v54 = vunpack.i.l.bf16 %v8135_v30 }
 0x2af   : > { %v8139_v59 = vpop.permute.xlu2 %6738 }
 0x2b0   : > { %v1784_v26 = vsel %vm972_vm0, %v6675_v54, %v11241_v31  ;;  %v6740_v58 = vunpack.i.l.bf16 %v8139_v59  ;;  %v11349_v42 = vunpack.i.h.bf16 %v8139_v59 }
 0x2b2   : > { %v1720_v23 = vsel %vm886_vm3, %v6740_v58, %v11349_v42  ;;  %v6640_v58 = vunpack.i.l.bf16 %v8117_v60 }
 0x2b5   : > { %v8137_v39 = vpop.permute.xlu0 %6718  ;;  %v8143_v46 = vpop.permute.xlu1 %6683 }
 0x2b6   : > { %v11240_v22 = vunpack.i.h.bf16 %v8137_v39  ;;  %v6720_v4 = vunpack.i.l.bf16 %v8137_v39  ;;  %v6685_v56 = vunpack.i.l.bf16 %v8143_v46  ;;  %v11365_v10 = vunpack.i.h.bf16 %v8137_v39 }
 0x2b7   : > { %v8169_v48 = vpop.permute.xlu2 %6748 }
 0x2b8   : > { %v1786_v51 = vsel %vm972_vm0, %v6720_v4, %v11240_v22  ;;  %v6730_v22 = vunpack.i.l.bf16 %v8131_v37  ;;  %v6655_v4 = vunpack.i.l.bf16 %v8121_v28 }
 0x2b9   : > { %v1836_v52 = vpack.c.bf16 %v1786_v51, %v1786_v51  ;;  %v1782_v51 = vsel %vm972_vm0, %v6645_v6, %v11242_v17  ;;  %v11348_v6 = vunpack.i.h.bf16 %v8131_v37 }
 0x2ba   : > { %v1833_v43 = vpack.c.bf16 %v1784_v26, %v1782_v51 }
 0x2bb   : > { %v1861_v0 = vsel %vm1103_vm1, %v1836_v52, 0  ;;  %v1753_v17 = vsel %vm929_vm2, %v6730_v22, %v11348_v6  ;;  %v6665_v22 = vunpack.i.l.bf16 %v8127_v11  ;;  %v6670_v6 = vunpack.i.l.bf16 %v8109_v13 }
 0x2bc   : > { %1889 = vmatpush.bf16.msrb.mxu2 %v1861_v0  ;;  %v11347_v0 = vunpack.i.h.bf16 %v8143_v46 }
 0x2bd   : > { %v8158_v44 = vpop.permute.xlu0 %6723  ;;  %v8165_v36 = vpop.permute.xlu1 %6693  ;;  %v1716_v50 = vsel %vm886_vm3, %v6665_v22, %v11353_v32  ;;  %v11246_v32 = vunpack.i.h.bf16 %v8169_v48  ;;  %v6750_v22 = vunpack.i.l.bf16 %v8169_v48 }
 0x2be   : > { %v1751_v54 = vsel %vm929_vm2, %v6685_v56, %v11347_v0  ;;  %v6695_v52 = vunpack.i.l.bf16 %v8165_v36  ;;  %v11351_v1 = vunpack.i.h.bf16 %v8165_v36 }
 0x2bf   : > { %v1830_v26 = vpack.c.bf16 %v1753_v17, %v1751_v54  ;;  %v11350_v17 = vunpack.i.h.bf16 %v8121_v28 }
 0x2c0   : > { %1890 = vmatpush.bf16.msrb.mxu2 %v1833_v43  ;;  %v6635_v43 = vunpack.i.l.bf16 %v8103_v5  ;;  %v1718_v31 = vsel %vm886_vm3, %v6695_v52, %v11351_v1  ;;  %v11244_v1 = vunpack.i.h.bf16 %v8158_v44  ;;  %v6725_v52 = vunpack.i.l.bf16 %v8158_v44 }
 0x2c1   : > { %v1749_v54 = vsel %vm929_vm2, %v6655_v4, %v11350_v17 }
 0x2c2   : > { %v1827_v42 = vpack.c.bf16 %v1749_v54, %v1720_v23  ;;  %v1683_v4 = vsel %vm843_vm4, %v6635_v43, %v11352_v41  ;;  %v8207_v23 = vpop.permute.xlu2 %1669  ;;  %v1824_v41 = vpack.c.bf16 %v1718_v31, %v1716_v50  ;;  %v11354_v43 = vunpack.i.h.bf16 %v8117_v60 }
 0x2c4   : > { %1891 = vmatpush.bf16.msrb.mxu2 %v1830_v26  ;;  %v1650_v17 = vsel %vm809_vm6, %v6640_v58, %v11354_v43  ;;  %v1621_v58 = vsel %vm775_vm7, %v6725_v52, %v11244_v1 }
 0x2c5   : > { %v8186_v0 = vpop.permute.xlu0 %6733  ;;  %v8194_v51 = vpop.permute.xlu1 %6703 }
 0x2c6   : > { %v11243_v56 = vunpack.i.h.bf16 %v8194_v51  ;;  %v6705_v26 = vunpack.i.l.bf16 %v8194_v51  ;;  %v11356_v52 = vunpack.i.h.bf16 %v8186_v0  ;;  %v11367_v39 = vunpack.i.h.bf16 %v8194_v51 }
 0x2c7   : > { %v11369_v51 = vunpack.i.h.bf16 %v8103_v5 }
 0x2c8   : > { %1892 = vmatpush.bf16.msrb.mxu2 %v1827_v42  ;;  %v1654_v54 = vsel %vm809_vm6, %v6705_v26, %v11243_v56  ;;  %v11355_v56 = vunpack.i.h.bf16 %v8109_v13 }
 0x2c9   : > { %v1818_v42 = vpack.c.bf16 %v1683_v4, %v1654_v54  ;;  %v11249_v54 = vunpack.i.h.bf16 %v8129_v16 }
 0x2ca   : > { %v1652_v50 = vsel %vm809_vm6, %v6670_v6, %v11355_v56  ;;  %v1619_v56 = vsel %vm775_vm7, %v6680_v2, %v11245_v62  ;;  %v6321_v6 = vld [vmem:[%s11214_s6 + $0x4] sm:$0xf]  ;;  %v1687_v2 = vsel %vm843_vm4, %v6750_v22, %v11246_v32  ;;  %v8257_v47 = vpop.permute.xlu2 %1735  ;;  %v11250_v22 = vunpack.i.h.bf16 %v8119_v14 }
 0x2cb   : > { %1869 = vmatpush.bf16.msrb.mxu0 %v1818_v42  ;;  %v1815_v4 = vpack.c.bf16 %v1652_v50, %v1650_v17  ;;  %v6735_v42 = vunpack.i.l.bf16 %v8186_v0  ;;  %v5852_v17 = vld [vmem:[%s11214_s6 + $0x8] sm:$0xf0]  ;;  %v6650_v50 = vunpack.i.l.bf16 %v8123_v3  ;;  %v1812_v1 = vpack.c.bf16 %v1621_v58, %v1619_v56 }
 0x2cc   : > { %1893 = vmatpush.bf16.msrb.mxu2 %v1824_v41  ;;  %v8262_v9 = vor.u32 %v6321_v6, %v5852_v17  ;;  %v6690_v58 = vunpack.i.l.bf16 %v8119_v14  ;;  %v11358_v56 = vunpack.i.h.bf16 %v8123_v3  ;;  %v6700_v6 = vunpack.i.l.bf16 %v8125_v25 }
 0x2cd   : > { %v8222_v26 = vpop.permute.xlu0 %6743  ;;  %v8229_v31 = vpop.permute.xlu1 %6708  ;;  %v1588_v61 = vsel %vm11357_vm8, %v6735_v42, %v11356_v52  ;;  %v11252_v52 = vunpack.i.h.bf16 %v8133_v27 }
 0x2ce   : > { %v11247_v41 = vunpack.i.h.bf16 %v8229_v31  ;;  %v6710_v43 = vunpack.i.l.bf16 %v8229_v31  ;;  %v6745_v42 = vunpack.i.l.bf16 %v8222_v26 }
 0x2cf   : > { %1870 = vmatpush.bf16.msrb.mxu0 %v1815_v4 }
 0x2d0   : > { %v1685_v4 = vsel %vm843_vm4, %v6710_v43, %v11247_v41  ;;  %v11248_v41 = vunpack.i.h.bf16 %v8222_v26 }
 0x2d1   : > { %v1821_v62 = vpack.c.bf16 %v1687_v2, %v1685_v4  ;;  %v1617_v4 = vsel %vm775_vm7, %v6650_v50, %v11358_v56  ;;  %v6715_v50 = vunpack.i.l.bf16 %v8133_v27 }
 0x2d2   : > { %v1809_v32 = vpack.c.bf16 %v1617_v4, %v1588_v61  ;;  %v1586_v61 = vsel %vm11361_vm13, %v6690_v58, %v11250_v22  ;;  %v8297_v4 = vpop.permute.xlu2 %1774 }
 0x2d3   : > { %1871 = vmatpush.bf16.msrb.mxu0 %v1812_v1  ;;  %1894 = vmatpush.bf16.msrb.mxu2 %v1821_v62  ;;  %v1584_v62 = vsel %vm11359_vm11, %v6660_v55, %v11249_v54  ;;  %v11251_v1 = vunpack.i.h.bf16 %v8125_v25  ;;  %v1555_v55 = vsel %vm11362_vm14, %v6745_v42, %v11248_v41  ;;  %v1551_v41 = vsel %vm11364_vm10, %v6715_v50, %v11252_v52 }
 0x2d4   : > { %v1806_v17 = vpack.c.bf16 %v1586_v61, %v1584_v62 }
 0x2d5   : > { %v8264_v43 = vpop.permute.xlu0 %1603  ;;  %v8271_v2 = vpop.permute.xlu1 %1642  ;;  %v1553_v62 = vsel %vm11363_vm15, %v6700_v6, %v11251_v1  ;;  %v1800_v1 = vpack.c.bf16 %v1551_v41, %v8034_v19  ;;  %v5850_v19 = vld [vmem:[%s11214_s6] sm:$0xf] }
 0x2d6   : > { %5856 = vmatmul.msk.bf16.vlgmr.msrb.gmra.mxu2 %vm11360_vm12, %v8262_v9  ;;  %v1803_v42 = vpack.c.bf16 %v1555_v55, %v1553_v62  ;;  %v11366_v62 = vunpack.i.h.bf16 %v8115_v12  ;;  %v6322_v12 = vld [vmem:[%s11214_s6 + $0x4] sm:$0xf0] }
 0x2d7   : > { %1872 = vmatpush.bf16.msrb.mxu0 %v1809_v32  ;;  %v8295_v32 = vld [vmem:[%s11214_s6 + $0x10] sm:$0xff] }
 0x2d8   : > { %v1847_v54 = vunpack.c.h.b16 %v8295_v32 }
 0x2da   : > { %v8324_v52 = vpack.c.b16 %v1847_v54, %v1847_v54  ;;  %v11368_v54 = vunpack.i.h.bf16 %v8135_v30 }
 0x2db   : > { %1873 = vmatpush.bf16.msrb.mxu0 %v1806_v17 }
 0x2dc   : > { %v1785_v41 = vsel %vm972_vm0, %v11368_v54, %v8297_v4  ;;  %v11371_v54 = vpack.c.bf16 %v7967_v7, %v7936_v63  ;;  %v11376_v7 = vunpack.i.h.bf16 %v8109_v13  ;;  %v11378_v13 = vunpack.i.h.bf16 %v8158_v44 }
 0x2dd   : > { %v8290_v56 = vpop.permute.xlu0 %6758  ;;  %v8305_v61 = vpop.permute.xlu1 %6753  ;;  %v11382_v44 = vunpack.i.h.bf16 %v8139_v59  ;;  %v11384_v59 = vunpack.i.h.bf16 %v8119_v14 }
 0x2de   : > { %v8300_v58 = vunpack.i.l.bf16 %v8290_v56  ;;  %v11254_v17 = vunpack.i.h.bf16 %v8290_v56  ;;  %v11253_v22 = vunpack.i.l.bf16 %v8305_v61 }
 0x2df   : > { %1874 = vmatpush.bf16.msrb.mxu0 %v1803_v42  ;;  %v8354_v42 = vor.u32 %v6322_v12, %v5850_v19  ;;  %v11374_v19 = vunpack.i.h.bf16 %v8143_v46 }
 0x2e0   : > { %v1787_v53 = vsel %vm972_vm0, %v11365_v10, %v8300_v58  ;;  %v1783_v50 = vsel %vm972_vm0, %v11366_v62, %v11254_v17  ;;  %v1655_v10 = vsel %vm809_vm6, %v11367_v39, %v11253_v22  ;;  %v8350_v62 = vpop.permute.xlu2 %6773  ;;  %vm11380_vm0 = vmmov %vm11357_vm8 }
 0x2e1   : > { %v1837_v6 = vpack.c.bf16 %v1787_v53, %v1787_v53  ;;  %vm11393_vm8 = vmmov %vm11391_vm9 }
 0x2e3   : > { %v1864_v55 = vsel %vm1103_vm1, %v1837_v6, 0  ;;  %1875 = vmatpush.bf16.msrb.mxu0 %v1800_v1  ;;  %v1684_v1 = vsel %vm843_vm4, %v11369_v51, %v8207_v23  ;;  %v11375_v51 = vunpack.i.h.bf16 %v8131_v37  ;;  %v11377_v37 = vunpack.i.h.bf16 %v8113_v8 }
 0x2e4   : > { %1925 = vmatpush.bf16.msra.mxu2 %v1864_v55  ;;  %v1834_v55 = vpack.c.bf16 %v1785_v41, %v1783_v50  ;;  %v1819_v39 = vpack.c.bf16 %v1684_v1, %v1655_v10  ;;  %v11372_v50 = vunpack.i.h.bf16 %v8305_v61  ;;  %v11373_v10 = vunpack.i.h.bf16 %v8117_v60 }
 0x2e5   : > { %v8332_v53 = vpop.permute.xlu0 %6763  ;;  %v8348_v6 = vpop.permute.xlu1 %6768  ;;  %v1653_v60 = vsel %vm809_vm6, %v11376_v7, %v8271_v2  ;;  %v11381_v8 = vunpack.i.h.bf16 %v8121_v28  ;;  %v1846_v28 = vunpack.c.l.b16 %v8295_v32 }
 0x2e6   : > { %v6771_v22 = vunpack.i.h.bf16 %v8348_v6  ;;  %v6770_v17 = vunpack.i.l.bf16 %v8348_v6  ;;  %5857 = vmatmul.msk.bf16.gmra.mxu2 %vm11370_vm5, %v8324_v52  ;;  %v6766_v30 = vunpack.i.h.bf16 %v8332_v53  ;;  %v6765_v5 = vunpack.i.l.bf16 %v8332_v53 }
 0x2e7   : > { %1876 = vmatpush.bf16.msrb.mxu0 %v11371_v54  ;;  %v1651_v41 = vsel %vm809_vm6, %v11373_v10, %v11372_v50 }
 0x2e8   : > { %1926 = vmatpush.bf16.msra.mxu2 %v1834_v55  ;;  %v1752_v12 = vsel %vm929_vm2, %v11374_v19, %v6770_v17  ;;  %v1754_v63 = vsel %vm929_vm2, %v11375_v51, %v6771_v22  ;;  %v1816_v55 = vpack.c.bf16 %v1653_v60, %v1651_v41  ;;  %v1620_v54 = vsel %vm775_vm7, %v11377_v37, %v6765_v5  ;;  %v8405_v7 = vpop.permute.xlu2 %6783 }
 0x2e9   : > { %v1831_v1 = vpack.c.bf16 %v1754_v63, %v1752_v12  ;;  %v1622_v50 = vsel %vm775_vm7, %v11378_v13, %v6766_v30  ;;  %v11379_v12 = vunpack.i.h.bf16 %v8186_v0  ;;  %v1750_v63 = vsel %vm929_vm2, %v11381_v8, %v8257_v47  ;;  %vm11385_vm2 = vmmov %vm11380_vm0 }
 0x2ea   : > { %1877 = vmatmul.bf16.vlgmr.msrb.gmra.mxu0 %v8354_v42  ;;  %v1813_v19 = vpack.c.bf16 %v1622_v50, %v1620_v54  ;;  %v6786_v50 = vunpack.i.h.bf16 %v8405_v7 }
 0x2eb   : > { %1905 = vmatpush.bf16.msra.mxu0 %v1819_v39  ;;  %v6775_v39 = vunpack.i.l.bf16 %v8350_v62 }
 0x2ec   : > { %1927 = vmatpush.bf16.msra.mxu2 %v1831_v1  ;;  %v6776_v1 = vunpack.i.h.bf16 %v8350_v62 }
 0x2ed   : > { %v8384_v46 = vpop.permute.xlu0 %1576  ;;  %v6779_v10 = vpop.permute.xlu1 %6778  ;;  %v1589_v51 = vsel %vm11380_vm0, %v11379_v12, %v6775_v39 }
 0x2ee   : > { %v6780_v41 = vunpack.i.l.bf16 %v6779_v10  ;;  %v6781_v13 = vunpack.i.h.bf16 %v6779_v10  ;;  %v1587_v12 = vsel %vm11385_vm2, %v11384_v59, %v8384_v46 }
 0x2ef   : > { %1906 = vmatpush.bf16.msra.mxu0 %v1816_v55  ;;  %v11383_v55 = vunpack.i.h.bf16 %v8123_v3 }
 0x2f0   : > { %v1721_v60 = vsel %vm886_vm3, %v11382_v44, %v6780_v41 }
 0x2f1   : > { %v1618_v0 = vsel %vm775_vm7, %v11383_v55, %v8264_v43  ;;  %v1828_v37 = vpack.c.bf16 %v1750_v63, %v1721_v60  ;;  %v11386_v63 = vunpack.i.h.bf16 %v8129_v16  ;;  %vm11387_vm7 = vmmov %vm11380_vm0  ;;  %v11388_v60 = vunpack.i.h.bf16 %v8127_v11 }
 0x2f2   : > { %v1810_v54 = vpack.c.bf16 %v1618_v0, %v1589_v51  ;;  %v11389_v55 = vunpack.i.h.bf16 %v8165_v36  ;;  %v1850_v0 = vpack.c.b16 %v1846_v28, %v1846_v28  ;;  %v11392_v16 = vunpack.i.h.bf16 %v8222_v26 }
 0x2f3   : > { %1907 = vmatpush.bf16.msra.mxu0 %v1813_v19  ;;  %v6785_v19 = vunpack.i.l.bf16 %v8405_v7  ;;  %1928 = vmatpush.bf16.msra.mxu2 %v1828_v37  ;;  %v1585_v10 = vsel %vm11387_vm7, %v11386_v63, %v6776_v1  ;;  %v1717_v7 = vsel %vm886_vm3, %v11388_v60, %v6781_v13  ;;  %v11395_v63 = vunpack.i.h.bf16 %v8169_v48 }
 0x2f4   : > { %v1807_v32 = vpack.c.bf16 %v1587_v12, %v1585_v10  ;;  %v11394_v12 = vunpack.i.h.bf16 %v8229_v31  ;;  %v1838_v28 = vpack.c.bf16 %v8300_v58, %v8300_v58  ;;  %v11396_v31 = vunpack.i.h.bf16 %v8133_v27 }
 0x2f5   : > { %v6789_v8 = vpop.permute.xlu0 %6788  ;;  %v1709_v51 = vpop.permute.xlu1 %1708  ;;  %v1832_v27 = vpack.c.bf16 %v6771_v22, %v6770_v17  ;;  %v1814_v22 = vpack.c.bf16 %v6766_v30, %v6765_v5  ;;  %v1799_v17 = vpack.c.bf16 %v8077_v34, %v8074_v29 }
 0x2f6   : > { %v6791_v3 = vunpack.i.h.bf16 %v6789_v8  ;;  %v6790_v44 = vunpack.i.l.bf16 %v6789_v8  ;;  %v1719_v14 = vsel %vm886_vm3, %v11389_v55, %v1709_v51  ;;  %v1556_v8 = vsel %vm11393_vm8, %v11392_v16, %v6786_v50  ;;  %vm11397_vm3 = vmmov %vm11393_vm8 }
 0x2f7   : > { %1908 = vmatpush.bf16.msra.mxu0 %v1810_v54  ;;  %v1825_v37 = vpack.c.bf16 %v1719_v14, %v1717_v7  ;;  %v11390_v54 = vunpack.i.h.bf16 %v8125_v25  ;;  %v11398_v7 = vunpack.i.h.bf16 %v8290_v56  ;;  %v11400_v55 = vunpack.i.l.bf16 %v8305_v61 }
 0x2f8   : > { %v1686_v11 = vsel %vm843_vm4, %v11394_v12, %v6790_v44  ;;  %v1688_v36 = vsel %vm843_vm4, %v11395_v63, %v6791_v3  ;;  %vm11399_vm4 = vmmov %vm11370_vm5  ;;  %v1829_v56 = vpack.c.bf16 %v8257_v47, %v6780_v41  ;;  %v1811_v47 = vpack.c.bf16 %v8264_v43, %v6775_v39  ;;  %v11407_v12 = vld [vmem:[#allocation31_spill] sm:$0xff]  ;;  %v11408_v63 = vld [vmem:[#allocation44_spill] sm:$0xff] }
 0x2f9   : > { %v1554_v59 = vsel %vm11391_vm9, %v11390_v54, %v6785_v19  ;;  %1929 = vmatpush.bf16.msra.mxu2 %v1825_v37  ;;  %v1822_v10 = vpack.c.bf16 %v1688_v36, %v1686_v11  ;;  %v1835_v58 = vpack.c.bf16 %v8297_v4, %v11398_v7  ;;  %v1820_v14 = vpack.c.bf16 %v8207_v23, %v11400_v55  ;;  %vm11403_vm11 = vmmov %vm11399_vm4  ;;  %v11409_v36 = vld [vmem:[#allocation32_spill] sm:$0xff] }
 0x2fa   : > { %1882 = vmatmul.bf16.gmra.mxu0 %v1850_v0  ;;  %v1804_v25 = vpack.c.bf16 %v1556_v8, %v1554_v59  ;;  %v11402_v4 = vunpack.i.h.bf16 %v8305_v61  ;;  %v1826_v23 = vpack.c.bf16 %v1709_v51, %v6781_v13  ;;  %vm11404_vm12 = vmmov %vm11399_vm4  ;;  %v1315_v13 = vadd.f32 %v7915_v18, %v7911_v57  ;;  %v2071_v57 = vld [vmem:[%s11215_s7] sm:$0x3]  ;;  %v11406_v8 = vld [vmem:[#allocation43_spill] sm:$0xff] }
 0x2fb   : > { %1909 = vmatpush.bf16.msra.mxu0 %v1807_v32  ;;  %v1867_v32 = vsel %vm1103_vm1, %v1838_v28, 0  ;;  %vm11405_vm13 = vmmov %vm11399_vm4  ;;  %v1313_v18 = vadd.f32 %v7909_v35, %v7907_v38  ;;  %v8509_v59 = vperm.slane %v2071_v57, 0  ;;  %v8511_v16 = vperm.slane %v2071_v57, 1 }
 0x2fc   : > { %v1817_v37 = vpack.c.bf16 %v8271_v2, %v11402_v4  ;;  %v1805_v2 = vpack.c.bf16 %v6786_v50, %v6785_v19  ;;  %v1166_v11 = vadd.f32 %v11407_v12, %v11406_v8  ;;  %v1242_v28 = vadd.f32 %v11409_v36, %v11408_v63 }
 0x2fd   : > { %v1538_v26 = vpop.permute.xlu1 %1537  ;;  %1930 = vmatpush.bf16.msra.mxu2 %v1822_v10  ;;  %v7280_v38 = vmov 1.0   ;;  %v7281_v57 = vmov 0.0  }
 0x2fe   : > { %v1552_v60 = vsel %vm11397_vm3, %v11396_v31, %v1538_v26  ;;  %v1802_v61 = vpack.c.bf16 %v1538_v26, %v8081_v20  ;;  %v6802_v31 = vpack.i.bf16 %v1166_v11, %v1242_v28 }
 0x2ff   : > { %1910 = vmatpush.bf16.msra.mxu0 %v1804_v25  ;;  %v1801_v48 = vpack.c.bf16 %v1552_v60, %v8036_v40  ;;  %v11401_v40 = vpack.c.bf16 %v7976_v21, %v7939_v49  ;;  %v1823_v49 = vpack.c.bf16 %v6791_v3, %v6790_v44  ;;  %v1808_v21 = vpack.c.bf16 %v8384_v46, %v6776_v1 }
 0x300   : > { %5858 = vmatmul.msk.bf16.vlgmr.msra.gmra.mxu2 %vm11399_vm4, %v8262_v9 }
 0x301   : > { %1961 = vmatpush.bf16.msrb.mxu2 %v1867_v32 }
 0x303   : > { %1911 = vmatpush.bf16.msra.mxu0 %v1801_v48 }
 0x305   : > { %1962 = vmatpush.bf16.msrb.mxu2 %v1835_v58 }
 0x307   : > { %1912 = vmatpush.bf16.msra.mxu0 %v11401_v40 }
 0x309   : > { %1963 = vmatpush.bf16.msrb.mxu2 %v1832_v27 }
 0x30a   : > { %1913 = vmatmul.bf16.vlgmr.msra.gmra.mxu0 %v8354_v42 }
 0x30b   : > { %1941 = vmatpush.bf16.msrb.mxu0 %v1820_v14 }
 0x30d   : > { %1964 = vmatpush.bf16.msrb.mxu2 %v1829_v56 }
 0x30f   : > { %1942 = vmatpush.bf16.msrb.mxu0 %v1817_v37 }
 0x310   : > { %5859 = vmatmul.msk.bf16.gmra.mxu2 %vm11403_vm11, %v8324_v52 }
 0x311   : > { %1965 = vmatpush.bf16.msrb.mxu2 %v1826_v23 }
 0x313   : > { %1943 = vmatpush.bf16.msrb.mxu0 %v1814_v22 }
 0x315   : > { %1966 = vmatpush.bf16.msrb.mxu2 %v1823_v49 }
 0x317   : > { %1944 = vmatpush.bf16.msrb.mxu0 %v1811_v47 }
 0x31a   : > { %1918 = vmatmul.bf16.gmra.mxu0 %v1850_v0 }
 0x31b   : > { %1945 = vmatpush.bf16.msrb.mxu0 %v1808_v21 }
 0x31f   : > { %1946 = vmatpush.bf16.msrb.mxu0 %v1805_v2 }
 0x320   : > { %5860 = vmatmul.msk.bf16.vlgmr.msrb.gmra.mxu2 %vm11404_vm12, %v8262_v9 }
 0x323   : > { %1947 = vmatpush.bf16.msrb.mxu0 %v1802_v61 }
 0x327   : > { %1948 = vmatpush.bf16.msrb.mxu0 %v1799_v17 }
 0x32a   : > { %1949 = vmatmul.bf16.vlgmr.msrb.gmra.mxu0 %v8354_v42  ;;  %v1237_v42 = vadd.f32 %v7860_v15, %v7885_v45 }
 0x330   : > { %5861 = vmatmul.msk.bf16.gmra.mxu2 %vm11405_vm13, %v8324_v52  ;;  %v1161_v52 = vadd.f32 %v7858_v24, %v7883_v33 }
 0x332   : > { %v6792_v46 = vpack.i.bf16 %v1161_v52, %v1237_v42 }
 0x33a   : > { %1954 = vmatmul.bf16.gmra.mxu0 %v1850_v0  ;;  %v2029_v0 = vlaneseq }
 0x33c   : > { %v8507_v54 = vshrl.u32 %v2029_v0, 7 }
 0x33e   : > { %v2045_v10 = vadd.s32 120, %v8507_v54  ;;  %v2044_v26 = vadd.s32 112, %v8507_v54  ;;  %v2043_v35 = vadd.s32 104, %v8507_v54  ;;  %v2042_v32 = vadd.s32 96, %v8507_v54 }
 0x33f   : > { %v2041_v7 = vadd.s32 88, %v8507_v54  ;;  %v2040_v58 = vadd.s32 80, %v8507_v54  ;;  %v2039_v14 = vadd.s32 72, %v8507_v54  ;;  %v2038_v27 = vadd.s32 64, %v8507_v54 }
 0x340   : > { %vm2104_vm14 = vcmp.eq.s32.totalorder %v2045_v10, %v8509_v59  ;;  %vm2105_vm15 = vcmp.eq.s32.totalorder %v2045_v10, %v8511_v16  ;;  %vm2102_vm10 = vcmp.eq.s32.totalorder %v2044_v26, %v8509_v59  ;;  %vm2103_vm5 = vcmp.eq.s32.totalorder %v2044_v26, %v8511_v16 }
 0x341   : > { %5944 = vmatpush.msk.msra.mxu1 %vm2104_vm14, %v7280_v38  ;;  %5993 = vmatpush.msk.msra.mxu2 %vm2105_vm15, %v7280_v38  ;;  %vm2100_vm0 = vcmp.eq.s32.totalorder %v2043_v35, %v8509_v59  ;;  %vm2101_vm2 = vcmp.eq.s32.totalorder %v2043_v35, %v8511_v16  ;;  %vm2098_vm7 = vcmp.eq.s32.totalorder %v2042_v32, %v8509_v59  ;;  %v2037_v4 = vadd.s32 56, %v8507_v54 }
 0x342   : > { %vm2099_vm9 = vcmp.eq.s32.totalorder %v2042_v32, %v8511_v16  ;;  %vm2096_vm8 = vcmp.eq.s32.totalorder %v2041_v7, %v8509_v59  ;;  %vm2097_vm3 = vcmp.eq.s32.totalorder %v2041_v7, %v8511_v16  ;;  %vm2094_vm4 = vcmp.eq.s32.totalorder %v2040_v58, %v8509_v59 }
 0x343   : > { %5945 = vmatpush.msk.msra.mxu1 %vm2102_vm10, %v7280_v38  ;;  %5994 = vmatpush.msk.msra.mxu2 %vm2103_vm5, %v7280_v38  ;;  %vm2095_vm11 = vcmp.eq.s32.totalorder %v2040_v58, %v8511_v16  ;;  %vm2092_vm12 = vcmp.eq.s32.totalorder %v2039_v14, %v8509_v59  ;;  %vm2093_vm13 = vcmp.eq.s32.totalorder %v2039_v14, %v8511_v16  ;;  %v2036_v37 = vadd.s32 48, %v8507_v54  ;;  %v1289_v14 = vpop.f32.mrf.mxu1 }
 0x344   : > { %vm2090_vm14 = vcmp.eq.s32.totalorder %v2038_v27, %v8509_v59  ;;  %vm2091_vm15 = vcmp.eq.s32.totalorder %v2038_v27, %v8511_v16  ;;  %vm2088_vm10 = vcmp.eq.s32.totalorder %v2037_v4, %v8509_v59  ;;  %vm2089_vm5 = vcmp.eq.s32.totalorder %v2037_v4, %v8511_v16  ;;  %v11416_v27 = vld [vmem:[#allocation47_spill] sm:$0xff]  ;;  %v11418_v4 = vld [vmem:[#allocation48_spill] sm:$0xff] }
 0x345   : > { %5946 = vmatpush.msk.msra.mxu1 %vm2100_vm0, %v7280_v38  ;;  %5995 = vmatpush.msk.msra.mxu2 %vm2101_vm2, %v7280_v38  ;;  %v2035_v22 = vadd.s32 40, %v8507_v54  ;;  %vm2086_vm0 = vcmp.eq.s32.totalorder %v2036_v37, %v8509_v59  ;;  %vm2087_vm2 = vcmp.eq.s32.totalorder %v2036_v37, %v8511_v16  ;;  %v2034_v49 = vadd.s32 32, %v8507_v54  ;;  %v11419_v37 = vld [vmem:[#allocation34_spill] sm:$0xff] }
 0x346   : > { %v2033_v2 = vadd.s32 24, %v8507_v54  ;;  %v8580_v61 = vadd.s32 16, %v8507_v54  ;;  %v8617_v52 = vadd.s32 248, %v8507_v54  ;;  %v8620_v42 = vadd.s32 240, %v8507_v54 }
 0x347   : > { %5947 = vmatpush.msk.msra.mxu1 %vm2098_vm7, %v7280_v38  ;;  %5996 = vmatpush.msk.msra.mxu2 %vm2099_vm9, %v7280_v38  ;;  %vm2084_vm7 = vcmp.eq.s32.totalorder %v2035_v22, %v8509_v59  ;;  %vm2085_vm9 = vcmp.eq.s32.totalorder %v2035_v22, %v8511_v16  ;;  %v8670_v0 = vadd.s32 320, %v8507_v54  ;;  %v8681_v8 = vadd.s32 192, %v8507_v54 }
 0x348   : > { %v8684_v12 = vadd.s32 312, %v8507_v54  ;;  %v8687_v11 = vadd.s32 184, %v8507_v54  ;;  %v8690_v63 = vadd.s32 304, %v8507_v54  ;;  %v8694_v36 = vadd.s32 176, %v8507_v54 }
 0x349   : > { %5948 = vmatpush.msk.msra.mxu1 %vm2096_vm8, %v7280_v38  ;;  %5997 = vmatpush.msk.msra.mxu2 %vm2097_vm3, %v7280_v38  ;;  %vm2082_vm8 = vcmp.eq.s32.totalorder %v2034_v49, %v8509_v59  ;;  %vm2083_vm3 = vcmp.eq.s32.totalorder %v2034_v49, %v8511_v16  ;;  %v8697_v28 = vadd.s32 296, %v8507_v54  ;;  %v8717_v10 = vadd.s32 288, %v8507_v54  ;;  %v1327_v49 = vpop.f32.mrf.mxu3 }
 0x34a   : > { %v8728_v26 = vadd.s32 160, %v8507_v54  ;;  %v8731_v35 = vadd.s32 280, %v8507_v54  ;;  %v8734_v32 = vadd.s32 152, %v8507_v54  ;;  %v8748_v7 = vadd.s32 136, %v8507_v54 }
 0x34b   : > { %5949 = vmatpush.msk.msra.mxu1 %vm2094_vm4, %v7280_v38  ;;  %5998 = vmatpush.msk.msra.mxu2 %vm2095_vm11, %v7280_v38  ;;  %vm2080_vm4 = vcmp.eq.s32.totalorder %v2033_v2, %v8509_v59  ;;  %vm2081_vm11 = vcmp.eq.s32.totalorder %v2033_v2, %v8511_v16  ;;  %v8751_v58 = vadd.s32 256, %v8507_v54 }
 0x34d   : > { %5950 = vmatpush.msk.msra.mxu1 %vm2092_vm12, %v7280_v38  ;;  %5999 = vmatpush.msk.msra.mxu2 %vm2093_vm13, %v7280_v38  ;;  %vm2078_vm12 = vcmp.eq.s32.totalorder %v8580_v61, %v8509_v59  ;;  %vm2079_vm13 = vcmp.eq.s32.totalorder %v8580_v61, %v8511_v16 }
 0x34f   : > { %5951 = vmatpush.msk.msra.mxu1 %vm2090_vm14, %v7280_v38  ;;  %6000 = vmatpush.msk.msra.mxu2 %vm2091_vm15, %v7280_v38 }
 0x351   : > { %5952 = vmatpush.msk.msra.mxu1 %vm2088_vm10, %v7280_v38  ;;  %6001 = vmatpush.msk.msra.mxu2 %vm2089_vm5, %v7280_v38  ;;  %vm2074_vm10 = vcmp.eq.s32.totalorder %v8507_v54, %v8509_v59  ;;  %vm2075_vm5 = vcmp.eq.s32.totalorder %v8507_v54, %v8511_v16 }
 0x353   : > { %5953 = vmatpush.msk.msra.mxu1 %vm2086_vm0, %v7280_v38  ;;  %6002 = vmatpush.msk.msra.mxu2 %vm2087_vm2, %v7280_v38  ;;  %vm2136_vm0 = vcmp.eq.s32.totalorder %v8617_v52, %v8509_v59  ;;  %vm2134_vm2 = vcmp.eq.s32.totalorder %v8620_v42, %v8509_v59 }
 0x354   : > { %5960 = vmatpush.msk.msra.mxu3 %vm2136_vm0, %v7280_v38 }
 0x355   : > { %5954 = vmatpush.msk.msra.mxu1 %vm2084_vm7, %v7280_v38  ;;  %6003 = vmatpush.msk.msra.mxu2 %vm2085_vm9, %v7280_v38 }
 0x356   : > { %5961 = vmatpush.msk.msra.mxu3 %vm2134_vm2, %v7280_v38  ;;  %vm2146_vm2 = vcmp.eq.s32.totalorder %v8717_v10, %v8509_v59 }
 0x357   : > { %5955 = vmatpush.msk.msra.mxu1 %vm2082_vm8, %v7280_v38  ;;  %6004 = vmatpush.msk.msra.mxu2 %vm2083_vm3, %v7280_v38 }
 0x359   : > { %v1896_v43 = vpop.f32.mrf.mxu2  ;;  %5956 = vmatpush.msk.msra.mxu1 %vm2080_vm4, %v7280_v38  ;;  %6005 = vmatpush.msk.msra.mxu2 %vm2081_vm11, %v7280_v38  ;;  %vm2154_vm11 = vcmp.eq.s32.totalorder %v8670_v0, %v8509_v59 }
 0x35b   : > { %5957 = vmatpush.msk.msra.mxu1 %vm2078_vm12, %v7280_v38  ;;  %6006 = vmatpush.msk.msra.mxu2 %vm2079_vm13, %v7280_v38  ;;  %vm2122_vm12 = vcmp.eq.s32.totalorder %v8681_v8, %v8509_v59  ;;  %vm2152_vm13 = vcmp.eq.s32.totalorder %v8684_v12, %v8509_v59 }
 0x361   : > { %v1898_v53 = vpop.f32.mrf.mxu2 }
 0x367   : > { %v1878_v6 = vpop.f32.mrf.mxu0 }
 0x368   : > { %v1897_v62 = vadd.f32 %v1896_v43, %v1878_v6  ;;  %v11410_v43 = vld [vmem:[#allocation39_spill] sm:$0xff] }
 0x369   : > { %v1901_v30 = vpop.f32.mrf.mxu2 }
 0x36a   : > { %1986 = vrot.lane.b32.xlu2 %v1897_v62, %s7279_s28  ;;  %v11412_v62 = vld [vmem:[#allocation40_spill] sm:$0xff] }
 0x36f   : > { %v1880_v20 = vpop.f32.mrf.mxu0 }
 0x370   : > { %v1899_v9 = vadd.f32 %v1898_v53, %v1880_v20  ;;  %v11411_v53 = vld [vmem:[#allocation29_spill] sm:$0xff] }
 0x371   : > { %v1903_v5 = vpop.f32.mrf.mxu2  ;;  %v1163_v6 = vadd.f32 %v11411_v53, %v11410_v43  ;;  %v11421_v43 = vld [vmem:[#allocation35_spill] sm:$0xff] }
 0x372   : > { %1992 = vrot.lane.b32.xlu2 %v1899_v9, %s7279_s28  ;;  %v8593_v9 = vadd.s32 8, %v8507_v54 }
 0x374   : > { %vm2076_vm14 = vcmp.eq.s32.totalorder %v8593_v9, %v8509_v59  ;;  %vm2077_vm15 = vcmp.eq.s32.totalorder %v8593_v9, %v8511_v16 }
 0x375   : > { %5958 = vmatpush.msk.msra.mxu1 %vm2076_vm14, %v7280_v38  ;;  %6007 = vmatpush.msk.msra.mxu2 %vm2077_vm15, %v7280_v38  ;;  %vm2120_vm14 = vcmp.eq.s32.totalorder %v8687_v11, %v8509_v59  ;;  %vm2150_vm15 = vcmp.eq.s32.totalorder %v8690_v63, %v8509_v59 }
 0x377   : > { %v1883_v34 = vpop.f32.mrf.mxu0  ;;  %5959 = vmatpush.msk.msra.mxu1 %vm2074_vm10, %v7280_v38  ;;  %6008 = vmatpush.msk.msra.mxu2 %vm2075_vm5, %v7280_v38  ;;  %vm2118_vm10 = vcmp.eq.s32.totalorder %v8694_v36, %v8509_v59  ;;  %vm2148_vm5 = vcmp.eq.s32.totalorder %v8697_v28, %v8509_v59 }
 0x378   : > { %v1902_v29 = vadd.f32 %v1901_v30, %v1883_v34  ;;  %v11413_v30 = vld [vmem:[#allocation30_spill] sm:$0xff] }
 0x379   : > { %v1239_v20 = vadd.f32 %v11413_v30, %v11412_v62  ;;  %v11423_v62 = vld [vmem:[#allocation36_spill] sm:$0xff] }
 0x37a   : > { %1998 = vrot.lane.b32.xlu2 %v1902_v29, %s7279_s28 }
 0x37b   : > { %v6797_v34 = vpack.i.bf16 %v1163_v6, %v1239_v20  ;;  %v11422_v6 = vld [vmem:[#allocation52_spill] sm:$0xff] }
 0x37c   : > { %v1254_v30 = vadd.f32 %v11423_v62, %v11422_v6 }
 0x37f   : > { %v1885_v39 = vpop.f32.mrf.mxu0 }
 0x380   : > { %v8623_v39 = vadd.s32 232, %v8507_v54 }
 0x382   : > { %6793 = vrot.lane.b32.xlu2 %v6792_v46, %s7275_s4  ;;  %v11414_v46 = vld [vmem:[#allocation49_spill] sm:$0xff]  ;;  %vm2132_vm7 = vcmp.eq.s32.totalorder %v8623_v39, %v8509_v59 }
 0x383   : > { %v1932_v41 = vpop.f32.mrf.mxu2  ;;  %5962 = vmatpush.msk.msra.mxu3 %vm2132_vm7, %v7280_v38  ;;  %vm2114_vm7 = vcmp.eq.s32.totalorder %v8728_v26, %v8509_v59 }
 0x387   : > { %v1914_v1 = vpop.f32.mrf.mxu0 }
 0x388   : > { %v1933_v50 = vadd.f32 %v1932_v41, %v1914_v1  ;;  %v11415_v41 = vld [vmem:[#allocation50_spill] sm:$0xff] }
 0x389   : > { %v1318_v1 = vadd.f32 %v11415_v41, %v11414_v46  ;;  %v1291_v41 = vpop.f32.mrf.mxu1 }
 0x38a   : > { %2354 = vrot.lane.b32.xlu2 %v1315_v13, %s7275_s4  ;;  %1988 = vrot.lane.b32.xlu0 %v1933_v50, %s7279_s28 }
 0x38b   : > { %v1934_v19 = vpop.f32.mrf.mxu2 }
 0x38f   : > { %v1916_v3 = vpop.f32.mrf.mxu0 }
 0x390   : > { %v1935_v24 = vadd.f32 %v1934_v19, %v1916_v3 }
 0x392   : > { %1994 = vrot.lane.b32.xlu0 %v1935_v24, %s7279_s28 }
 0x393   : > { %v1937_v15 = vpop.f32.mrf.mxu2 }
 0x397   : > { %v1919_v33 = vpop.f32.mrf.mxu0 }
 0x398   : > { %v1938_v45 = vadd.f32 %v1937_v15, %v1919_v33  ;;  %v8648_v15 = vadd.s32 224, %v8507_v54  ;;  %v8651_v33 = vadd.s32 216, %v8507_v54 }
 0x39a   : > { %2000 = vrot.lane.b32.xlu0 %v1938_v45, %s7279_s28  ;;  %v8654_v45 = vadd.s32 208, %v8507_v54  ;;  %vm2130_vm9 = vcmp.eq.s32.totalorder %v8648_v15, %v8509_v59  ;;  %vm2128_vm8 = vcmp.eq.s32.totalorder %v8651_v33, %v8509_v59 }
 0x39b   : > { %v1939_v44 = vpop.f32.mrf.mxu2  ;;  %5963 = vmatpush.msk.msra.mxu3 %vm2130_vm9, %v7280_v38  ;;  %vm2144_vm9 = vcmp.eq.s32.totalorder %v8731_v35, %v8509_v59 }
 0x39c   : > { %vm2126_vm3 = vcmp.eq.s32.totalorder %v8654_v45, %v8509_v59 }
 0x39d   : > { %5964 = vmatpush.msk.msra.mxu3 %vm2128_vm8, %v7280_v38  ;;  %vm2112_vm8 = vcmp.eq.s32.totalorder %v8734_v32, %v8509_v59 }
 0x39f   : > { %v1921_v51 = vpop.f32.mrf.mxu0  ;;  %5965 = vmatpush.msk.msra.mxu3 %vm2126_vm3, %v7280_v38 }
 0x3a0   : > { %v8667_v51 = vadd.s32 200, %v8507_v54 }
 0x3a2   : > { %2348 = vrot.lane.b32.xlu0 %v1313_v18, %s7275_s4  ;;  %vm2124_vm4 = vcmp.eq.s32.totalorder %v8667_v51, %v8509_v59  ;;  %v5942_v18 = vsel %vm2154_vm11, 1.0, %v7281_v57 }
 0x3a3   : > { %v1968_v25 = vpop.f32.mrf.mxu2  ;;  %5976 = vmatpush.msk.msra.mxu0 %vm1103_vm1, %v5942_v18  ;;  %5966 = vmatpush.msk.msra.mxu3 %vm2124_vm4, %v7280_v38 }
 0x3a5   : > { %5967 = vmatpush.msk.msra.mxu3 %vm2122_vm12, %v7280_v38  ;;  %5977 = vmatpush.msk.msra.mxu0 %vm2152_vm13, %v7280_v38  ;;  %vm2108_vm12 = vcmp.eq.s32.totalorder %v8748_v7, %v8509_v59  ;;  %vm2138_vm13 = vcmp.eq.s32.totalorder %v8751_v58, %v8509_v59 }
 0x3a7   : > { %v1950_v60 = vpop.f32.mrf.mxu0  ;;  %5968 = vmatpush.msk.msra.mxu3 %vm2120_vm14, %v7280_v38  ;;  %5978 = vmatpush.msk.msra.mxu0 %vm2150_vm15, %v7280_v38  ;;  %vm2004_vm15 = vcmask 154624  }
 0x3a8   : > { %v1969_v48 = vadd.f32 %v1968_v25, %v1950_v60  ;;  %v8714_v25 = vadd.s32 168, %v8507_v54  ;;  %v8742_v60 = vadd.s32 144, %v8507_v54 }
 0x3a9   : > { %5969 = vmatpush.msk.msra.mxu3 %vm2118_vm10, %v7280_v38  ;;  %5979 = vmatpush.msk.msra.mxu0 %vm2148_vm5, %v7280_v38  ;;  %vm2424_vm10 = vcmask 556032   ;;  %vm2137_vm5 = vcmp.eq.s32.totalorder %v8617_v52, %v8511_v16 }
 0x3aa   : > { %6803 = vrot.lane.b32.xlu0 %v6802_v31, %s7275_s4  ;;  %1990 = vrot.lane.b32.xlu1 %v1969_v48, %s7279_s28  ;;  %vm2116_vm0 = vcmp.eq.s32.totalorder %v8714_v25, %v8509_v59  ;;  %v8737_v31 = vadd.s32 272, %v8507_v54  ;;  %v8745_v48 = vadd.s32 264, %v8507_v54  ;;  %vm2110_vm4 = vcmp.eq.s32.totalorder %v8742_v60, %v8509_v59 }
 0x3ab   : > { %v1970_v55 = vpop.f32.mrf.mxu2  ;;  %5970 = vmatpush.msk.msra.mxu3 %vm2116_vm0, %v7280_v38  ;;  %5980 = vmatpush.msk.msra.mxu0 %vm2146_vm2, %v7280_v38  ;;  %vm2135_vm0 = vcmp.eq.s32.totalorder %v8620_v42, %v8511_v16  ;;  %vm2133_vm2 = vcmp.eq.s32.totalorder %v8623_v39, %v8511_v16 }
 0x3ac   : > { %vm2142_vm3 = vcmp.eq.s32.totalorder %v8737_v31, %v8509_v59  ;;  %vm2140_vm11 = vcmp.eq.s32.totalorder %v8745_v48, %v8509_v59  ;;  %6009 = vmatpush.msk.msrb.mxu1 %vm2137_vm5, %v7280_v38  ;;  %vm2153_vm5 = vcmp.eq.s32.totalorder %v8684_v12, %v8511_v16 }
 0x3ad   : > { %5971 = vmatpush.msk.msra.mxu3 %vm2114_vm7, %v7280_v38  ;;  %5981 = vmatpush.msk.msra.mxu0 %vm2144_vm9, %v7280_v38  ;;  %vm2131_vm7 = vcmp.eq.s32.totalorder %v8648_v15, %v8511_v16  ;;  %vm2129_vm9 = vcmp.eq.s32.totalorder %v8651_v33, %v8511_v16 }
 0x3ae   : > { %6010 = vmatpush.msk.msrb.mxu1 %vm2135_vm0, %v7280_v38  ;;  %vm2113_vm0 = vcmp.eq.s32.totalorder %v8734_v32, %v8511_v16 }
 0x3af   : > { %v1952_v40 = vpop.f32.mrf.mxu0  ;;  %5972 = vmatpush.msk.msra.mxu3 %vm2112_vm8, %v7280_v38  ;;  %5982 = vmatpush.msk.msra.mxu0 %vm2142_vm3, %v7280_v38  ;;  %vm2127_vm8 = vcmp.eq.s32.totalorder %v8654_v45, %v8511_v16  ;;  %vm2125_vm3 = vcmp.eq.s32.totalorder %v8667_v51, %v8511_v16 }
 0x3b0   : > { %v1971_v56 = vadd.f32 %v1970_v55, %v1952_v40  ;;  %v8776_v55 = vadd.s32 128, %v8507_v54  ;;  %v11417_v40 = vld [vmem:[#allocation33_spill] sm:$0xff]  ;;  %6011 = vmatpush.msk.msrb.mxu1 %vm2133_vm2, %v7280_v38  ;;  %vm2151_vm2 = vcmp.eq.s32.totalorder %v8690_v63, %v8511_v16 }
 0x3b1   : > { %5973 = vmatpush.msk.msra.mxu3 %vm2110_vm4, %v7280_v38  ;;  %5983 = vmatpush.msk.msra.mxu0 %vm2140_vm11, %v7280_v38  ;;  %vm2123_vm4 = vcmp.eq.s32.totalorder %v8681_v8, %v8511_v16  ;;  %vm2121_vm11 = vcmp.eq.s32.totalorder %v8687_v11, %v8511_v16 }
 0x3b2   : > { %1996 = vrot.lane.b32.xlu1 %v1971_v56, %s7279_s28  ;;  %vm2106_vm14 = vcmp.eq.s32.totalorder %v8776_v55, %v8509_v59  ;;  %v1176_v56 = vadd.f32 %v11417_v40, %v11416_v27  ;;  %v11420_v59 = vld [vmem:[#allocation51_spill] sm:$0xff]  ;;  %6012 = vmatpush.msk.msrb.mxu1 %vm2131_vm7, %v7280_v38  ;;  %vm2149_vm7 = vcmp.eq.s32.totalorder %v8697_v28, %v8511_v16 }
 0x3b3   : > { %v1973_v23 = vpop.f32.mrf.mxu2  ;;  %5974 = vmatpush.msk.msra.mxu3 %vm2108_vm12, %v7280_v38  ;;  %5984 = vmatpush.msk.msra.mxu0 %vm2138_vm13, %v7280_v38  ;;  %v1178_v53 = vadd.f32 %v11421_v43, %v11420_v59  ;;  %vm2119_vm12 = vcmp.eq.s32.totalorder %v8694_v36, %v8511_v16  ;;  %vm2155_vm13 = vcmp.eq.s32.totalorder %v8670_v0, %v8511_v16 }
 0x3b4   : > { %6013 = vmatpush.msk.msrb.mxu1 %vm2129_vm9, %v7280_v38  ;;  %v5943_v52 = vsel %vm2155_vm13, 1.0, %v7281_v57  ;;  %vm2109_vm9 = vcmp.eq.s32.totalorder %v8748_v7, %v8511_v16  ;;  %vm2139_vm13 = vcmp.eq.s32.totalorder %v8751_v58, %v8511_v16 }
 0x3b5   : > { %5975 = vmatpush.msk.msra.mxu3 %vm2106_vm14, %v7280_v38  ;;  %vm2117_vm14 = vcmp.eq.s32.totalorder %v8714_v25, %v8511_v16 }
 0x3b6   : > { %6014 = vmatpush.msk.msrb.mxu1 %vm2127_vm8, %v7280_v38  ;;  %vm2147_vm8 = vcmp.eq.s32.totalorder %v8717_v10, %v8511_v16 }
 0x3b7   : > { %v1955_v47 = vpop.f32.mrf.mxu0  ;;  %6025 = vmatpush.msk.msrb.mxu3 %vm1103_vm1, %v5943_v52  ;;  %vm2111_vm1 = vcmp.eq.s32.totalorder %v8742_v60, %v8511_v16 }
 0x3b8   : > { %v1974_v21 = vadd.f32 %v1973_v23, %v1955_v47  ;;  %v1252_v23 = vadd.f32 %v11419_v37, %v11418_v4  ;;  %6015 = vmatpush.msk.msrb.mxu1 %vm2125_vm3, %v7280_v38  ;;  %vm2107_vm3 = vcmp.eq.s32.totalorder %v8776_v55, %v8511_v16 }
 0x3b9   : > { %6026 = vmatpush.msk.msrb.mxu3 %vm2153_vm5, %v7280_v38 }
 0x3ba   : > { %2002 = vrot.lane.b32.xlu1 %v1974_v21, %s7279_s28  ;;  %6016 = vmatpush.msk.msrb.mxu1 %vm2123_vm4, %v7280_v38  ;;  %vm2145_vm4 = vcmp.eq.s32.totalorder %v8731_v35, %v8511_v16 }
 0x3bb   : > { %v1975_v17 = vpop.f32.mrf.mxu2  ;;  %6027 = vmatpush.msk.msrb.mxu3 %vm2151_vm2, %v7280_v38 }
 0x3bc   : > { %6017 = vmatpush.msk.msrb.mxu1 %vm2121_vm11, %v7280_v38  ;;  %vm2143_vm11 = vcmp.eq.s32.totalorder %v8737_v31, %v8511_v16 }
 0x3bd   : > { %6028 = vmatpush.msk.msrb.mxu3 %vm2149_vm7, %v7280_v38 }
 0x3be   : > { %6018 = vmatpush.msk.msrb.mxu1 %vm2119_vm12, %v7280_v38  ;;  %vm2141_vm12 = vcmp.eq.s32.totalorder %v8745_v48, %v8511_v16 }
 0x3bf   : > { %v1957_v5 = vpop.f32.mrf.mxu0  ;;  %6029 = vmatpush.msk.msrb.mxu3 %vm2147_vm8, %v7280_v38 }
 0x3c0   : > { %6019 = vmatpush.msk.msrb.mxu1 %vm2117_vm14, %v7280_v38 }
 0x3c1   : > { %6030 = vmatpush.msk.msrb.mxu3 %vm2145_vm4, %v7280_v38 }
 0x3c2   : > { %6798 = vrot.lane.b32.xlu1 %v6797_v34, %s7275_s4 }
 0x3c3   : > { %6031 = vmatpush.msk.msrb.mxu3 %vm2143_vm11, %v7280_v38 }
 0x3c4   : > { %v8614_v29 = vpop.permute.xlu2 %1986 }
 0x3c5   : > { %v2020_v21 = vadd.f32 %v8614_v29, %v1176_v56  ;;  %6032 = vmatpush.msk.msrb.mxu3 %vm2141_vm12, %v7280_v38 }
 0x3c7   : > { %6033 = vmatpush.msk.msrb.mxu3 %vm2139_vm13, %v7280_v38 }
 0x3ca   : > { %2360 = vrot.lane.b32.xlu1 %v1318_v1, %s7275_s4  ;;  %v1329_v1 = vpop.f32.mrf.mxu3 }
 0x3cb   : > { %v1330_v62 = vadd.f32 %v1329_v1, %v1291_v41 }
 0x3cc   : > { %v8639_v13 = vpop.permute.xlu2 %1992 }
 0x3cd   : > { %v2023_v34 = vadd.f32 %v8639_v13, %v1178_v53 }
 0x3d2   : > { %v1332_v18 = vpop.f32.mrf.mxu3 }
 0x3d4   : > { %v8641_v50 = vpop.permute.xlu2 %1998 }
 0x3da   : > { %v1334_v4 = vpop.f32.mrf.mxu3 }
 0x3dc   : > { %v8643_v19 = vpop.permute.xlu2 %6793 }
 0x3dd   : > { %v6796_v3 = vunpack.i.h.bf16 %v8643_v19  ;;  %v6795_v24 = vunpack.i.l.bf16 %v8643_v19 }
 0x3df   : > { %v2392_v44 = vsel %vm809_vm6, %v6796_v3, %v6795_v24 }
 0x3e0   : > { %2463 = vmatmul.f32.vlgmr.msra.gmra.mxu1 %v2392_v44  ;;  %2586 = vmatmul.f32.vlgmr.msra.gmra.mxu2 %v2392_v44  ;;  %v1294_v44 = vpop.f32.mrf.mxu1 }
 0x3e2   : > { %v1337_v6 = vpop.f32.mrf.mxu3 }
 0x3e4   : > { %v8810_v37 = vpop.permute.xlu2 %2354 }
 0x3e8   : > { %v1296_v56 = vpop.f32.mrf.mxu1 }
 0x3f0   : > { %v1299_v53 = vpop.f32.mrf.mxu1 }
 0x3fc   : > { %v1989_v22 = vpop.permute.xlu0 %1988 }
 0x3fd   : > { %v2005_v47 = vsel %vm2004_vm15, %v8614_v29, %v1989_v22 }
 0x3fe   : > { %v2021_v2 = vadd.f32 %v2005_v47, %v1252_v23 }
 0x400   : > { %v6807_v17 = vpack.i.bf16 %v2020_v21, %v2021_v2  ;;  %v11424_v21 = vld [vmem:[#allocation54_spill] sm:$0xff] }
 0x401   : > { %v11425_v2 = vld [vmem:[#allocation38_spill] sm:$0xff] }
 0x402   : > { %6808 = vrot.lane.b32.xlu2 %v6807_v17, %s7275_s4  ;;  %v1257_v17 = vadd.f32 %v11425_v2, %v11424_v21  ;;  %v1333_v21 = vadd.f32 %v1332_v18, %v1294_v44  ;;  %v1301_v2 = vpop.f32.mrf.mxu1  ;;  %v1338_v18 = vadd.f32 %v1337_v6, %v1299_v53 }
 0x404   : > { %v1995_v20 = vpop.permute.xlu0 %1994 }
 0x405   : > { %v2007_v5 = vsel %vm2004_vm15, %v8639_v13, %v1995_v20  ;;  %v1328_v13 = vadd.f32 %v1327_v49, %v1289_v14  ;;  %v11426_v14 = vld [vmem:[#allocation53_spill] sm:$0xff] }
 0x406   : > { %v2024_v46 = vadd.f32 %v2007_v5, %v1254_v30  ;;  %v11427_v49 = vld [vmem:[#allocation37_spill] sm:$0xff] }
 0x407   : > { %v1181_v59 = vadd.f32 %v11427_v49, %v11426_v14  ;;  %v1335_v14 = vadd.f32 %v1334_v4, %v1296_v56 }
 0x408   : > { %v6812_v29 = vpack.i.bf16 %v2023_v34, %v2024_v46 }
 0x40a   : > { %6813 = vrot.lane.b32.xlu1 %v6812_v29, %s7275_s4  ;;  %v11428_v29 = vld [vmem:[#allocation55_spill] sm:$0xff] }
 0x40c   : > { %v2001_v3 = vpop.permute.xlu0 %2000 }
 0x414   : > { %v8799_v27 = vpop.permute.xlu0 %2348 }
 0x415   : > { %v8805_v40 = vsel %vm809_vm6, %v6795_v24, %v8799_v27  ;;  %5985 = vmatmul.msk.f32.vlgmr.msra.gmra.mxu0 %vm2424_vm10, %v8799_v27  ;;  %v2009_v24 = vsel %vm2004_vm15, %v8641_v50, %v2001_v3 }
 0x416   : > { %2504 = vmatmul.f32.vlgmr.msra.gmra.mxu3 %v8805_v40  ;;  %v2027_v43 = vadd.f32 %v2009_v24, %v1257_v17  ;;  %v1339_v17 = vpop.f32.mrf.mxu3 }
 0x41c   : > { %v1991_v23 = vpop.permute.xlu1 %1990  ;;  %v6804_v4 = vpop.permute.xlu0 %6803 }
 0x41d   : > { %v2006_v47 = vsel %vm2004_vm15, %v1989_v22, %v1991_v23  ;;  %5986 = vmatmul.msk.f32.gmra.mxu0 %vm2424_vm10, %v8810_v37  ;;  %v2026_v22 = vadd.f32 %v8641_v50, %v1181_v59  ;;  %v6806_v53 = vunpack.i.h.bf16 %v6804_v4  ;;  %v6805_v6 = vunpack.i.l.bf16 %v6804_v4 }
 0x41e   : > { %v2022_v19 = vadd.f32 %v2006_v47, %v1328_v13  ;;  %v11429_v13 = vld [vmem:[#allocation41_spill] sm:$0xff]  ;;  %v11430_v47 = vld [vmem:[#allocation56_spill] sm:$0xff] }
 0x41f   : > { %v6817_v46 = vpack.i.bf16 %v2026_v22, %v2027_v43  ;;  %v1183_v23 = vadd.f32 %v11429_v13, %v11428_v29  ;;  %v11432_v22 = vld [vmem:[#allocation57_spill] sm:$0xff]  ;;  %v2396_v29 = vsel %vm809_vm6, %v6806_v53, %v6805_v6 }
 0x420   : > { %2366 = vrot.lane.b32.xlu0 %v2022_v19, %s7275_s4  ;;  %v11431_v19 = vld [vmem:[#allocation42_spill] sm:$0xff] }
 0x421   : > { %v1259_v24 = vadd.f32 %v11431_v19, %v11430_v47 }
 0x423   : > { %v6822_v1 = vpack.i.bf16 %v1183_v23, %v1259_v24 }
 0x424   : > { %v1997_v30 = vpop.permute.xlu1 %1996 }
 0x425   : > { %v2008_v5 = vsel %vm2004_vm15, %v1995_v20, %v1997_v30  ;;  %v11434_v30 = vld [vmem:[#allocation58_spill] sm:$0xff] }
 0x426   : > { %v2025_v34 = vadd.f32 %v2008_v5, %v1330_v62  ;;  %v11433_v62 = vld [vmem:[#allocation45_spill] sm:$0xff]  ;;  %v11435_v5 = vld [vmem:[#allocation46_spill] sm:$0xff] }
 0x427   : > { %v1186_v44 = vadd.f32 %v11433_v62, %v11432_v22  ;;  %v8974_v62 = vld [vmem:[%s7545_s29] sm:$0xff] }
 0x428   : > { %6818 = vrot.lane.b32.xlu0 %v6817_v46, %s7275_s4  ;;  %2372 = vrot.lane.b32.xlu2 %v2025_v34, %s7275_s4  ;;  %v1262_v34 = vadd.f32 %v11435_v5, %v11434_v30 }
 0x42c   : > { %v2003_v50 = vpop.permute.xlu1 %2002 }
 0x42d   : > { %v2010_v41 = vsel %vm2004_vm15, %v2001_v3, %v2003_v50  ;;  %vm2115_vm15 = vcmp.eq.s32.totalorder %v8728_v26, %v8511_v16 }
 0x42e   : > { %v2028_v20 = vadd.f32 %v2010_v41, %v1333_v21  ;;  %6020 = vmatpush.msk.msrb.mxu1 %vm2115_vm15, %v7280_v38 }
 0x430   : > { %2384 = vrot.lane.b32.xlu0 %v1335_v14, %s7275_s4  ;;  %6823 = vrot.lane.b32.xlu2 %v6822_v1, %s7275_s4 }
 0x431   : > { %2378 = vrot.lane.b32.xlu1 %v2028_v20, %s7275_s4  ;;  %6021 = vmatpush.msk.msrb.mxu1 %vm2113_vm0, %v7280_v38 }
 0x433   : > { %6022 = vmatpush.msk.msrb.mxu1 %vm2111_vm1, %v7280_v38 }
 0x434   : > { %v6799_v49 = vpop.permute.xlu1 %6798 }
 0x435   : > { %v6801_v59 = vunpack.i.h.bf16 %v6799_v49  ;;  %v6800_v43 = vunpack.i.l.bf16 %v6799_v49  ;;  %6023 = vmatpush.msk.msrb.mxu1 %vm2109_vm9, %v7280_v38 }
 0x437   : > { %v2394_v3 = vsel %vm809_vm6, %v6801_v59, %v6800_v43  ;;  %v8841_v56 = vsel %vm809_vm6, %v6800_v43, %v8810_v37  ;;  %6024 = vmatpush.msk.msrb.mxu1 %vm2107_vm3, %v7280_v38  ;;  %v651_v43 = vld [vmem:[%s7552_s13] sm:$0xff] }
 0x438   : > { %2386 = vrot.lane.b32.xlu0 %v1186_v44, %s7275_s4  ;;  %2466 = vmatmul.f32.gmra.mxu1 %v2394_v3 }
 0x439   : > { %2388 = vrot.lane.b32.xlu1 %v1262_v34, %s7275_s4  ;;  %2507 = vmatmul.f32.gmra.mxu3 %v8841_v56 }
 0x43a   : > { %2589 = vmatmul.f32.gmra.mxu2 %v2394_v3  ;;  %2390 = vrot.lane.b32.xlu2 %v1338_v18, %s7275_s4  ;;  %v2889_v18 = vsub.f32 %v8974_v62, %v651_v43  ;;  %s8980_s4 = scalar_lea.vmem [#allocation14], %s7540_s14 }
 0x43b   : > { %s5515_s16 = sshll.u32 %s8980_s4, 4  ;;  %s5516_s16 = int_to_ptr.vmem [resolvable:$true] %s5515_s16 }
 0x43c   : > { %v8847_v46 = vpop.permute.xlu1 %2360  ;;  %v2895_v34 = vmul.f32 0.5, %v2889_v18 }
 0x43d   : > { %5987 = vmatmul.msk.f32.gmra.mxu0 %vm2424_vm10, %v8847_v46  ;;  %v8854_v13 = vsel %vm809_vm6, %v6805_v6, %v8847_v46 }
 0x43e   : > { %v8977_v3 = vadd.f32 %v2895_v34, %v651_v43 }
 0x440   : > { %2469 = vmatmul.f32.gmra.mxu1 %v2396_v29  ;;  %2943 = vst [vmem:[%s8980_s4] sm:$0xff] %v8977_v3 }
 0x441   : > { %2510 = vmatmul.f32.gmra.mxu3 %v8854_v13 }
 0x442   : > { %2592 = vmatmul.f32.gmra.mxu2 %v2396_v29 }
 0x45c   : > { %v6809_v23 = vpop.permute.xlu2 %6808 }
 0x45d   : > { %v6811_v47 = vunpack.i.h.bf16 %v6809_v23  ;;  %v6810_v19 = vunpack.i.l.bf16 %v6809_v23  ;;  %v2464_v60 = vpop.f32.mrf.mxu1 }
 0x45f   : > { %v2398_v24 = vsel %vm809_vm6, %v6811_v47, %v6810_v19  ;;  %v8988_v47 = vld [vmem:[%s7545_s29 + $0x10] sm:$0xff] }
 0x460   : > { %2472 = vmatmul.f32.gmra.mxu1 %v2398_v24  ;;  %2595 = vmatmul.f32.gmra.mxu2 %v2398_v24 }
 0x47c   : > { %v6814_v21 = vpop.permute.xlu1 %6813 }
 0x47d   : > { %v6816_v2 = vunpack.i.h.bf16 %v6814_v21  ;;  %v6815_v17 = vunpack.i.l.bf16 %v6814_v21 }
 0x47f   : > { %v2400_v50 = vsel %vm809_vm6, %v6816_v2, %v6815_v17 }
 0x480   : > { %2475 = vmatmul.f32.gmra.mxu1 %v2400_v50  ;;  %2598 = vmatmul.f32.gmra.mxu2 %v2400_v50 }
 0x482   : > { %v8912_v15 = vpop.permute.xlu2 %2372 }
 0x483   : > { %v2401_v0 = vsel %vm809_vm6, %v6815_v17, %v8912_v15 }
 0x48a   : > { %v6824_v8 = vpop.permute.xlu2 %6823 }
 0x48b   : > { %v6826_v12 = vunpack.i.h.bf16 %v6824_v8  ;;  %v6825_v11 = vunpack.i.l.bf16 %v6824_v8 }
 0x48d   : > { %v2404_v25 = vsel %vm809_vm6, %v6826_v12, %v6825_v11 }
 0x492   : > { %v8900_v42 = vpop.permute.xlu0 %2366  ;;  %v2546_v7 = vpop.f32.mrf.mxu0 }
 0x493   : > { %5988 = vmatmul.msk.f32.gmra.mxu0 %vm2424_vm10, %v8900_v42  ;;  %v2399_v39 = vsel %vm809_vm6, %v6810_v19, %v8900_v42  ;;  %v653_v19 = vld [vmem:[%s7552_s13 + $0x10] sm:$0xff] }
 0x494   : > { %2513 = vmatmul.f32.gmra.mxu3 %v2399_v39  ;;  %v2391_v38 = vpop.permute.xlu2 %2390  ;;  %v2891_v21 = vsub.f32 %v8988_v47, %v653_v19 }
 0x496   : > { %v2897_v17 = vmul.f32 0.5, %v2891_v21 }
 0x499   : > { %v2505_v31 = vpop.f32.mrf.mxu3 }
 0x49a   : > { %v6819_v33 = vpop.permute.xlu0 %6818  ;;  %v2506_v48 = vadd.f32 %v2505_v31, %v2464_v60  ;;  %v2549_v41 = vpop.f32.mrf.mxu0 }
 0x49b   : > { %v6821_v45 = vunpack.i.h.bf16 %v6819_v33  ;;  %v6820_v51 = vunpack.i.l.bf16 %v6819_v33  ;;  %5989 = vmatmul.msk.f32.gmra.mxu0 %vm2424_vm10, %v8912_v15 }
 0x49c   : > { %2516 = vmatmul.f32.gmra.mxu3 %v2401_v0  ;;  %v2547_v58 = vadd.f32 %v2546_v7, %v2506_v48 }
 0x49d   : > { %v2402_v57 = vsel %vm809_vm6, %v6821_v45, %v6820_v51 }
 0x49e   : > { %2478 = vmatmul.f32.gmra.mxu1 %v2402_v57  ;;  %2601 = vmatmul.f32.gmra.mxu2 %v2402_v57 }
 0x4a2   : > { %v2385_v63 = vpop.permute.xlu0 %2384 }
 0x4a3   : > { %v2379_v36 = vpop.permute.xlu1 %2378  ;;  %v2405_v16 = vsel %vm809_vm6, %v6825_v11, %v2385_v63 }
 0x4a4   : > { %5990 = vmatmul.msk.f32.gmra.mxu0 %vm2424_vm10, %v2379_v36  ;;  %v2403_v28 = vsel %vm809_vm6, %v6820_v51, %v2379_v36  ;;  %v9001_v51 = vld [vmem:[%s7545_s29 + $0x20] sm:$0xff] }
 0x4a5   : > { %2519 = vmatmul.f32.gmra.mxu3 %v2403_v28 }
 0x4a6   : > { %2481 = vmatmul.f32.gmra.mxu1 %v2404_v25  ;;  %2604 = vmatmul.f32.gmra.mxu2 %v2404_v25 }
 0x4aa   : > { %v2387_v10 = vpop.permute.xlu0 %2386 }
 0x4ab   : > { %v2389_v26 = vpop.permute.xlu1 %2388 }
 0x4ac   : > { %5991 = vmatmul.msk.f32.gmra.mxu0 %vm2424_vm10, %v2385_v63  ;;  %v2406_v35 = vsel %vm809_vm6, %v2387_v10, %v2389_v26  ;;  %v2407_v32 = vsel %vm809_vm6, %v2389_v26, %v2391_v38 }
 0x4ad   : > { %2522 = vmatmul.f32.gmra.mxu3 %v2405_v16 }
 0x4ae   : > { %2484 = vmatmul.f32.gmra.mxu1 %v2406_v35  ;;  %2607 = vmatmul.f32.gmra.mxu2 %v2406_v35 }
 0x4b4   : > { %5992 = vmatmul.msk.f32.gmra.mxu0 %vm2424_vm10, %v2391_v38 }
 0x4b5   : > { %2525 = vmatmul.f32.gmra.mxu3 %v2407_v32 }
 0x4b6   : > { %2627 = vmatmul.f32.vlgmr.msrb.gmra.mxu1 %v8805_v40  ;;  %v6042_v40 = vmul.f32 -1.442695, %v2547_v58 }
 0x4b8   : > { %6863 = vpow2.f32 %v6042_v40 }
 0x4ba   : > { %v2552_v30 = vpop.f32.mrf.mxu0 }
 0x4bc   : > { %v2508_v55 = vpop.f32.mrf.mxu3 }
 0x4bd   : > { %6034 = vmatmul.msk.f32.vlgmr.msrb.gmra.mxu3 %vm2424_vm10, %v8799_v27  ;;  %v2467_v27 = vpop.f32.mrf.mxu1 }
 0x4be   : > { %2630 = vmatmul.f32.gmra.mxu1 %v8841_v56  ;;  %v6864_v49 = vpop.eup %6863 }
 0x4bf   : > { %v2711_v44 = vadd.f32 1.0, %v6864_v49 }
 0x4c1   : > { %v2728_v57 = vand.u32 2147483648, %v2711_v44  ;;  %v2726_v11 = vand.u32 2147483647, %v2711_v44 }
 0x4c3   : > { %vm2727_vm15 = vcmp.eq.f32.partialorder %v2726_v11, 8.507059e+37 }
 0x4c4   : > { %v2511_v14 = vpop.f32.mrf.mxu3 }
 0x4c5   : > { %6035 = vmatmul.msk.f32.gmra.mxu3 %vm2424_vm10, %v8810_v37  ;;  %v2509_v37 = vadd.f32 %v2508_v55, %v2467_v27  ;;  %v2470_v59 = vpop.f32.mrf.mxu1 }
 0x4c6   : > { %2633 = vmatmul.f32.gmra.mxu1 %v8854_v13  ;;  %v2512_v22 = vadd.f32 %v2511_v14, %v2470_v59 }
 0x4c7   : > { %v2550_v1 = vadd.f32 %v2549_v41, %v2509_v37 }
 0x4c8   : > { %v2553_v5 = vadd.f32 %v2552_v30, %v2512_v22 }
 0x4c9   : > { %v6044_v20 = vmul.f32 -1.442695, %v2550_v1 }
 0x4ca   : > { %v6046_v4 = vmul.f32 -1.442695, %v2553_v5 }
 0x4cb   : > { %6865 = vpow2.f32 %v6044_v20 }
 0x4cc   : > { %6867 = vrcp.f32 %v2711_v44 }
 0x4cd   : > { %6036 = vmatmul.msk.f32.gmra.mxu3 %vm2424_vm10, %v8847_v46  ;;  %6869 = vpow2.f32 %v6046_v4 }
 0x4ce   : > { %2636 = vmatmul.f32.gmra.mxu1 %v2399_v39 }
 0x4d1   : > { %v6866_v56 = vpop.eup %6865 }
 0x4d2   : > { %v8984_v53 = vadd.f32 1.0, %v6866_v56  ;;  %v6868_v6 = vpop.eup %6867 }
 0x4d3   : > { %v2718_v46 = vmul.f32 %v6868_v6, %v2711_v44  ;;  %v6870_v13 = vpop.eup %6869  ;;  %vm2723_vm6 = vweird.f32 %v6868_v6 }
 0x4d4   : > { %6871 = vrcp.f32 %v8984_v53  ;;  %v8992_v2 = vadd.f32 1.0, %v6870_v13  ;;  %v2758_v48 = vand.u32 2147483648, %v8984_v53  ;;  %vm2752_vm0 = vweird.f32 %v8984_v53 }
 0x4d5   : > { %6037 = vmatmul.msk.f32.gmra.mxu3 %vm2424_vm10, %v8900_v42  ;;  %v2719_v23 = vsub.f32 1.0, %v2718_v46  ;;  %v8995_v42 = vadd.f32 %v2897_v17, %v653_v19  ;;  %v2756_v27 = vand.u32 2147483647, %v8984_v53  ;;  %v2951_v17 = vld [vmem:[#allocation10 + $0x10] sm:$0xff] }
 0x4d6   : > { %2639 = vmatmul.f32.gmra.mxu1 %v2401_v0  ;;  %6873 = vrcp.f32 %v8992_v2  ;;  %v655_v0 = vld [vmem:[%s7552_s13 + $0x20] sm:$0xff]  ;;  %v2759_v14 = vor.u32 1.1754944e-38, %v2758_v48  ;;  %vm2782_vm9 = vweird.f32 %v8992_v2  ;;  %v2786_v46 = vand.u32 2147483647, %v8992_v2 }
 0x4d7   : > { %v2720_v52 = vmul.f32 %v6868_v6, %v2719_v23  ;;  %2945 = vst [vmem:[%s8980_s4 + $0x10] sm:$0xff] %v8995_v42  ;;  %v2893_v8 = vsub.f32 %v9001_v51, %v655_v0  ;;  %vm2757_vm1 = vcmp.eq.f32.partialorder %v2756_v27, 8.507059e+37 }
 0x4d8   : > { %vm2787_vm3 = vcmp.eq.f32.partialorder %v2786_v46, 8.507059e+37 }
 0x4d9   : > { %v2721_v45 = vadd.f32 %v6868_v6, %v2720_v52 }
 0x4da   : > { %v6872_v24 = vpop.eup %6871 }
 0x4db   : > { %v2748_v50 = vmul.f32 %v6872_v24, %v8984_v53  ;;  %vm2753_vm5 = vweird.f32 %v6872_v24 }
 0x4dc   : > { %vm2754_vm2 = vmor %vm2752_vm0, %vm2753_vm5  ;;  %vm3463_vm5 = vcmask 1041408  }
 0x4dd   : > { %6038 = vmatmul.msk.f32.gmra.mxu3 %vm2424_vm10, %v8912_v15  ;;  %v2473_v29 = vpop.f32.mrf.mxu1  ;;  %v2749_v15 = vsub.f32 1.0, %v2748_v50 }
 0x4de   : > { %2642 = vmatmul.f32.gmra.mxu1 %v2403_v28  ;;  %v6874_v28 = vpop.eup %6873 }
 0x4df   : > { %v2750_v10 = vmul.f32 %v6872_v24, %v2749_v15  ;;  %vm2783_vm7 = vweird.f32 %v6874_v28 }
 0x4e0   : > { %vm2784_vm8 = vmor %vm2782_vm9, %vm2783_vm7  ;;  %vm3426_vm9 = vcmask 146432  }
 0x4e1   : > { %v2751_v60 = vadd.f32 %v6872_v24, %v2750_v10 }
 0x4e3   : > { %v2755_v41 = vsel %vm2754_vm2, %v6872_v24, %v2751_v60 }
 0x4e4   : > { %v2760_v22 = vsel %vm2757_vm1, %v2759_v14, %v2755_v41  ;;  %v9053_v14 = vcvt.s32.f32 %v8593_v9 }
 0x4e5   : > { %6039 = vmatmul.msk.f32.gmra.mxu3 %vm2424_vm10, %v2379_v36  ;;  %v2899_v36 = vmul.f32 0.5, %v2893_v8  ;;  %v2909_v5 = vsub.f32 1.0, %v2760_v22 }
 0x4e6   : > { %2645 = vmatmul.f32.gmra.mxu1 %v2405_v16  ;;  %v2729_v16 = vor.u32 1.1754944e-38, %v2728_v57 }
 0x4e7   : > { %v9005_v35 = vadd.f32 %v2899_v36, %v655_v0 }
 0x4e9   : > { %2947 = vst [vmem:[%s8980_s4 + $0x20] sm:$0xff] %v9005_v35 }
 0x4ed   : > { %6040 = vmatmul.msk.f32.gmra.mxu3 %vm2424_vm10, %v2385_v63 }
 0x4ee   : > { %2648 = vmatmul.f32.gmra.mxu1 %v2407_v32  ;;  %v2778_v32 = vmul.f32 %v6874_v28, %v8992_v2 }
 0x4f0   : > { %v2779_v40 = vsub.f32 1.0, %v2778_v32 }
 0x4f5   : > { %6041 = vmatmul.msk.f32.gmra.mxu3 %vm2424_vm10, %v2391_v38  ;;  %vm2722_vm10 = vweird.f32 %v2711_v44  ;;  %v2780_v44 = vmul.f32 %v6874_v28, %v2779_v40 }
 0x4f6   : > { %vm2724_vm14 = vmor %vm2722_vm10, %vm2723_vm6 }
 0x4f7   : > { %v2725_v25 = vsel %vm2724_vm14, %v6868_v6, %v2721_v45  ;;  %v2781_v56 = vadd.f32 %v6874_v28, %v2780_v44  ;;  %v9058_v44 = vld [vmem:[%s7545_s29 + $0x8] sm:$0xff] }
 0x4f8   : > { %v2730_v31 = vsel %vm2727_vm15, %v2729_v16, %v2725_v25 }
 0x4f9   : > { %v2907_v7 = vsub.f32 1.0, %v2730_v31  ;;  %v2785_v19 = vsel %vm2784_vm8, %v6874_v28, %v2781_v56 }
 0x4fb   : > { %v2913_v49 = vmul.f32 %v2907_v7, %v8974_v62  ;;  %v2788_v62 = vand.u32 2147483648, %v8992_v2 }
 0x4fd   : > { %v2476_v39 = vpop.f32.mrf.mxu1  ;;  %v2789_v21 = vor.u32 1.1754944e-38, %v2788_v62 }
 0x4ff   : > { %v2790_v52 = vsel %vm2787_vm3, %v2789_v21, %v2785_v19 }
 0x510   : > { %v2555_v33 = vpop.f32.mrf.mxu0 }
 0x517   : > { %v2514_v12 = vpop.f32.mrf.mxu3 }
 0x518   : > { %v2515_v63 = vadd.f32 %v2514_v12, %v2473_v29  ;;  %v2558_v58 = vpop.f32.mrf.mxu0 }
 0x51a   : > { %v2556_v26 = vadd.f32 %v2555_v33, %v2515_v63  ;;  %v2587_v33 = vpop.f32.mrf.mxu2 }
 0x51b   : > { %v2479_v38 = vpop.f32.mrf.mxu1 }
 0x51c   : > { %6875 = vtanh.f32 %v2556_v26 }
 0x51f   : > { %v2517_v55 = vpop.f32.mrf.mxu3 }
 0x520   : > { %v2518_v37 = vadd.f32 %v2517_v55, %v2476_v39 }
 0x521   : > { %v2561_v4 = vpop.f32.mrf.mxu0 }
 0x522   : > { %v6876_v1 = vpop.eup %6875  ;;  %v2559_v20 = vadd.f32 %v2558_v58, %v2518_v37  ;;  %v2590_v60 = vpop.f32.mrf.mxu2 }
 0x523   : > { %v2919_v59 = vmul.f32 %v6876_v1, %v2730_v31  ;;  %v2482_v43 = vpop.f32.mrf.mxu1 }
 0x524   : > { %6877 = vtanh.f32 %v2559_v20  ;;  %v9050_v20 = vcvt.s32.f32 %v8580_v61 }
 0x525   : > { %v2925_v18 = vadd.f32 %v2919_v59, %v2913_v49 }
 0x527   : > { %v2931_v30 = vadd.f32 %v2925_v18, %v8977_v3  ;;  %v2915_v3 = vmul.f32 %v2909_v5, %v8988_v47  ;;  %v2911_v47 = vsub.f32 1.0, %v2790_v52  ;;  %v652_v18 = vld [vmem:[%s7552_s13 + $0x8] sm:$0xff] }
 0x528   : > { %v2520_v34 = vpop.f32.mrf.mxu3 }
 0x529   : > { %2937 = vst [vmem:[%s9016_s20] sm:$0xff] %v2931_v30  ;;  %v2521_v53 = vadd.f32 %v2520_v34, %v2479_v38  ;;  %v2564_v0 = vpop.f32.mrf.mxu0  ;;  %v2917_v28 = vmul.f32 %v2911_v47, %v9001_v51  ;;  %v9062_v30 = vcvt.s32.f32 %v8507_v54  ;;  %v2890_v54 = vsub.f32 %v9058_v44, %v652_v18 }
 0x52a   : > { %v6878_v6 = vpop.eup %6877  ;;  %v2593_v61 = vpop.f32.mrf.mxu2 }
 0x52b   : > { %v2921_v29 = vmul.f32 %v6878_v6, %v2760_v22  ;;  %v2562_v13 = vadd.f32 %v2561_v4, %v2521_v53  ;;  %v9023_v23 = vpop.f32.mrf.mxu1 }
 0x52d   : > { %v2927_v24 = vadd.f32 %v2921_v29, %v2915_v3  ;;  %6879 = vtanh.f32 %v2562_v13  ;;  %v2896_v29 = vmul.f32 0.5, %v2890_v54 }
 0x52f   : > { %v2933_v50 = vadd.f32 %v2927_v24, %v8995_v42 }
 0x530   : > { %v2523_v39 = vpop.f32.mrf.mxu3 }
 0x531   : > { %2939 = vst [vmem:[%s9016_s20 + $0x10] sm:$0xff] %v2933_v50  ;;  %v2957_v15 = vadd.f32 %v2951_v17, %v2933_v50  ;;  %v2524_v2 = vadd.f32 %v2523_v39, %v2482_v43 }
 0x533   : > { %v2964_v45 = vfloor.f32 %v2957_v15  ;;  %v2628_v57 = vpop.f32.mrf.mxu1  ;;  %v6880_v8 = vpop.eup %6879  ;;  %v2565_v12 = vadd.f32 %v2564_v0, %v2524_v2  ;;  %v2976_v36 = vmax.f32 %v2957_v15, 0.0 }
 0x534   : > { %v2923_v25 = vmul.f32 %v6880_v8, %v2790_v52  ;;  %v2629_v41 = vadd.f32 %v2628_v57, %v2587_v33  ;;  %v9088_v52 = vadd.f32 %v2896_v29, %v652_v18 }
 0x535   : > { %v2966_v11 = vmax.f32 %v2964_v45, 0.0  ;;  %v2970_v63 = vadd.f32 1.0, %v2964_v45  ;;  %v6048_v42 = vmul.f32 -1.442695, %v2565_v12  ;;  %v2978_v31 = vmin.f32 %v2976_v36, 17.0 }
 0x536   : > { %v2929_v16 = vadd.f32 %v2923_v25, %v2917_v28  ;;  %2944 = vst [vmem:[%s8980_s4 + $0x8] sm:$0xff] %v9088_v52 }
 0x537   : > { %v9028_v10 = vmin.f32 %v2966_v11, 17.0  ;;  %v2972_v26 = vmax.f32 %v2970_v63, 0.0  ;;  %6881 = vpow2.f32 %v6048_v42  ;;  %v2596_v11 = vpop.f32.mrf.mxu2 }
 0x538   : > { %v9030_v38 = vpop.f32.mrf.mxu3  ;;  %v9035_v48 = vadd.f32 %v2929_v16, %v9005_v35 }
 0x539   : > { %11436 = vst [vmem:[#allocation43_spill] sm:$0xff] %v9028_v10  ;;  %v9032_v32 = vmin.f32 %v2972_v26, 17.0  ;;  %v2980_v7 = vsub.f32 %v9028_v10, %v2978_v31  ;;  %v2988_v35 = vperm.slane %v9028_v10, 1  ;;  %v9065_v5 = vperm.slane %v9028_v10, 2 }
 0x53a   : > { %2941 = vst [vmem:[%s9016_s20 + $0x20] sm:$0xff] %v9035_v48  ;;  %v9069_v56 = vperm.slane %v9028_v10, 3  ;;  %v9072_v4 = vperm.slane %v9028_v10, 4 }
 0x53b   : > { %11437 = vst [vmem:[#allocation31_spill] sm:$0xff] %v9032_v32  ;;  %v2631_v58 = vpop.f32.mrf.mxu1  ;;  %v2984_v51 = vsub.f32 %v9032_v32, %v2978_v31  ;;  %v9041_v27 = vadd.f32 1.0, %v2980_v7  ;;  %v3004_v22 = vperm.slane %v9032_v32, 1  ;;  %vm2994_vm4 = vcmp.eq.f32.partialorder %v9050_v20, %v2988_v35 }
 0x53c   : > { %v2632_v62 = vadd.f32 %v2631_v58, %v2590_v60  ;;  %vm2992_vm11 = vcmp.eq.f32.partialorder %v9053_v14, %v2988_v35  ;;  %vm2990_vm12 = vcmp.eq.f32.partialorder %v9062_v30, %v2988_v35  ;;  %v9094_v8 = vperm.slane %v9032_v32, 2 }
 0x53d   : > { %v6882_v55 = vpop.eup %6881  ;;  %11438 = vst [vmem:[#allocation44_spill] sm:$0xff] %v9041_v27  ;;  %v9045_v37 = vsub.f32 1.0, %v2984_v51  ;;  %v2996_v43 = vperm.slane %v9041_v27, 1  ;;  %vm3010_vm13 = vcmp.eq.f32.partialorder %v9050_v20, %v3004_v22  ;;  %vm3008_vm6 = vcmp.eq.f32.partialorder %v9053_v14, %v3004_v22 }
 0x53e   : > { %v9043_v40 = vadd.f32 1.0, %v6882_v55  ;;  %vm3006_vm15 = vcmp.eq.f32.partialorder %v9062_v30, %v3004_v22  ;;  %v9104_v31 = vperm.slane %v9041_v27, 2  ;;  %v9107_v60 = vperm.slane %v9032_v32, 3 }
 0x53f   : > { %11439 = vst [vmem:[#allocation32_spill] sm:$0xff] %v9045_v37  ;;  %v3012_v9 = vperm.slane %v9045_v37, 1  ;;  %v3002_v3 = vsel %vm2994_vm4, %v2996_v43, 0.0  ;;  %v3000_v21 = vsel %vm2992_vm11, %v2996_v43, 0.0  ;;  %v2998_v36 = vsel %vm2990_vm12, %v2996_v43, 0.0 }
 0x540   : > { %v2669_v1 = vpop.f32.mrf.mxu3  ;;  %6883 = vrcp.f32 %v9043_v40  ;;  %v2838_v53 = vand.u32 2147483647, %v9043_v40  ;;  %v2840_v6 = vand.u32 2147483648, %v9043_v40  ;;  %vm2834_vm10 = vweird.f32 %v9043_v40 }
 0x541   : > { %v2670_v49 = vadd.f32 %v2669_v1, %v2629_v41  ;;  %v3018_v24 = vsel %vm3010_vm13, %v3012_v9, 0.0  ;;  %v3016_v2 = vsel %vm3008_vm6, %v3012_v9, 0.0  ;;  %v3014_v33 = vsel %vm3006_vm15, %v3012_v9, 0.0 }
 0x542   : > { %vm9084_vm14 = vcmp.eq.f32.partialorder %v2838_v53, 8.507059e+37  ;;  %v2841_v15 = vor.u32 1.1754944e-38, %v2840_v6  ;;  %v3024_v57 = vadd.f32 %v3018_v24, %v3002_v3  ;;  %v9099_v28 = vperm.slane %v9045_v37, 2  ;;  %v2599_v6 = vpop.f32.mrf.mxu2 }
 0x543   : > { %v2634_v59 = vpop.f32.mrf.mxu1  ;;  %v6043_v34 = vmul.f32 -1.442695, %v2670_v49  ;;  %v3022_v42 = vadd.f32 %v3016_v2, %v3000_v21  ;;  %v3020_v26 = vadd.f32 %v3014_v33, %v2998_v36  ;;  %v9110_v7 = vperm.slane %v9045_v37, 3 }
 0x544   : > { %v2635_v47 = vadd.f32 %v2634_v59, %v2593_v61  ;;  %vm3040_vm1 = vcmp.eq.f32.partialorder %v9050_v20, %v9065_v5  ;;  %vm3056_vm7 = vcmp.eq.f32.partialorder %v9050_v20, %v9094_v8  ;;  %v9120_v58 = vperm.slane %v9041_v27, 3 }
 0x545   : > { %6885 = vpow2.f32 %v6043_v34  ;;  %v3064_v41 = vsel %vm3056_vm7, %v9099_v28, 0.0  ;;  %vm3086_vm8 = vcmp.eq.f32.partialorder %v9050_v20, %v9069_v56  ;;  %vm3102_vm3 = vcmp.eq.f32.partialorder %v9050_v20, %v9107_v60 }
 0x546   : > { %v6884_v46 = vpop.eup %6883  ;;  %v3110_v49 = vsel %vm3102_vm3, %v9110_v7, 0.0  ;;  %v3048_v22 = vsel %vm3040_vm1, %v9104_v31, 0.0  ;;  %v3094_v54 = vsel %vm3086_vm8, %v9120_v58, 0.0  ;;  %vm3038_vm12 = vcmp.eq.f32.partialorder %v9053_v14, %v9065_v5 }
 0x547   : > { %v2830_v13 = vmul.f32 %v6884_v46, %v9043_v40  ;;  %vm2835_vm0 = vweird.f32 %v6884_v46  ;;  %v3116_v29 = vadd.f32 %v3110_v49, %v3094_v54  ;;  %v3046_v2 = vsel %vm3038_vm12, %v9104_v31, 0.0 }
 0x548   : > { %v2672_v19 = vpop.f32.mrf.mxu3  ;;  %vm2836_vm2 = vmor %vm2834_vm10, %vm2835_vm0  ;;  %vm3054_vm13 = vcmp.eq.f32.partialorder %v9053_v14, %v9094_v8  ;;  %vm3084_vm6 = vcmp.eq.f32.partialorder %v9053_v14, %v9069_v56  ;;  %vm3100_vm10 = vcmp.eq.f32.partialorder %v9053_v14, %v9107_v60  ;;  %vm3036_vm15 = vcmp.eq.f32.partialorder %v9062_v30, %v9065_v5 }
 0x549   : > { %v2673_v50 = vadd.f32 %v2672_v19, %v2632_v62  ;;  %v2831_v39 = vsub.f32 1.0, %v2830_v13  ;;  %v3070_v62 = vadd.f32 %v3064_v41, %v3048_v22  ;;  %vm3052_vm0 = vcmp.eq.f32.partialorder %v9062_v30, %v9094_v8 }
 0x54a   : > { %v3044_v41 = vsel %vm3036_vm15, %v9104_v31, 0.0  ;;  %vm3082_vm1 = vcmp.eq.f32.partialorder %v9062_v30, %v9069_v56  ;;  %vm3098_vm7 = vcmp.eq.f32.partialorder %v9062_v30, %v9107_v60  ;;  %vm3132_vm8 = vcmp.eq.f32.partialorder %v9050_v20, %v9072_v4 }
 0x54b   : > { %v6045_v45 = vmul.f32 -1.442695, %v2673_v50  ;;  %v2637_v0 = vpop.f32.mrf.mxu1  ;;  %v6886_v12 = vpop.eup %6885  ;;  %v2832_v63 = vmul.f32 %v6884_v46, %v2831_v39  ;;  %v9226_v56 = vperm.slane %v9041_v27, 4 }
 0x54c   : > { %v9101_v25 = vadd.f32 1.0, %v6886_v12  ;;  %v2638_v1 = vadd.f32 %v2637_v0, %v2596_v11  ;;  %v9180_v0 = vld [vmem:[%s9153_s9 + $0x58] sm:$0xff]  ;;  %v3092_v12 = vsel %vm3084_vm6, %v9120_v58, 0.0  ;;  %v3108_v11 = vsel %vm3100_vm10, %v9110_v7, 0.0 }
 0x54d   : > { %6887 = vpow2.f32 %v6045_v45  ;;  %v2833_v16 = vadd.f32 %v6884_v46, %v2832_v63  ;;  %v9177_v45 = vld [vmem:[%s9153_s9] sm:$0xff] }
 0x54e   : > { %6889 = vrcp.f32 %v9101_v25  ;;  %v2741_v43 = vand.u32 2147483647, %v9101_v25  ;;  %v2743_v53 = vand.u32 2147483648, %v9101_v25  ;;  %vm2737_vm4 = vweird.f32 %v9101_v25 }
 0x54f   : > { %v2837_v51 = vsel %vm2836_vm2, %v6884_v46, %v2833_v16 }
 0x550   : > { %v2675_v55 = vpop.f32.mrf.mxu3  ;;  %v9129_v40 = vsel %vm9084_vm14, %v2841_v15, %v2837_v51  ;;  %vm9162_vm11 = vcmp.eq.f32.partialorder %v2741_v43, 8.507059e+37  ;;  %v2744_v49 = vor.u32 1.1754944e-38, %v2743_v53 }
 0x551   : > { %v2676_v35 = vadd.f32 %v2675_v55, %v2635_v47  ;;  %v3026_v59 = vperm.slane %v9129_v40, 0  ;;  %v9136_v18 = vperm.slane %v9129_v40, 1  ;;  %v9144_v13 = vperm.slane %v9129_v40, 2 }
 0x552   : > { %v9236_v54 = vperm.slane %v9129_v40, 3 }
 0x553   : > { %v6888_v61 = vpop.eup %6887  ;;  %v6047_v34 = vmul.f32 -1.442695, %v2676_v35  ;;  %v2640_v9 = vpop.f32.mrf.mxu1  ;;  %v3032_v3 = vmul.f32 %v3026_v59, %v3024_v57  ;;  %v3030_v21 = vmul.f32 %v3026_v59, %v3022_v42  ;;  %v3028_v17 = vmul.f32 %v3026_v59, %v3020_v26 }
 0x554   : > { %v9140_v46 = vadd.f32 1.0, %v6888_v61  ;;  %v9146_v19 = vpop.eup %6889  ;;  %v9155_v24 = vadd.f32 %v2640_v9, %v2599_v6  ;;  %v3078_v15 = vmul.f32 %v9136_v18, %v3070_v62  ;;  %v3062_v57 = vsel %vm3054_vm13, %v9099_v28, 0.0 }
 0x555   : > { %6891 = vpow2.f32 %v6047_v34  ;;  %v2733_v50 = vmul.f32 %v9146_v19, %v9101_v25  ;;  %6052 = vmatpush.msk.msrb.mxu0 %vm3463_vm5, %v3032_v3  ;;  %6324 = vmatpush.msk.msra.mxu1 %vm3463_vm5, %v3032_v3  ;;  %v3124_v36 = vmul.f32 %v9144_v13, %v3116_v29  ;;  %v3068_v42 = vadd.f32 %v3062_v57, %v3046_v2  ;;  %v9245_v29 = vld [vmem:[%s9153_s9 + $0x8] sm:$0xff] }
 0x556   : > { %6893 = vrcp.f32 %v9140_v46  ;;  %v3114_v26 = vadd.f32 %v3108_v11, %v3092_v12  ;;  %vm2738_vm14 = vweird.f32 %v9146_v19  ;;  %v3090_v61 = vsel %vm3082_vm1, %v9120_v58, 0.0 }
 0x557   : > { %v2734_v33 = vsub.f32 1.0, %v2733_v50  ;;  %3532 = vmatpush.msrb.mxu0 %v3030_v21  ;;  %6325 = vmatpush.msra.mxu1 %v3030_v21  ;;  %v3076_v55 = vmul.f32 %v9136_v18, %v3068_v42  ;;  %vm2739_vm2 = vmor %vm2737_vm4, %vm2738_vm14  ;;  %v3106_v34 = vsel %vm3098_vm7, %v9110_v7, 0.0  ;;  %v9232_v58 = vperm.slane %v9045_v37, 4 }
 0x558   : > { %v2678_v47 = vpop.f32.mrf.mxu3  ;;  %v3122_v8 = vmul.f32 %v9144_v13, %v3114_v26  ;;  %v3112_v9 = vadd.f32 %v3106_v34, %v3090_v61  ;;  %v9239_v6 = vperm.slane %v9028_v10, 5  ;;  %v9242_v3 = vperm.slane %v9041_v27, 5  ;;  %v648_v26 = vld [vmem:[%s7545_s29 + $0x18] sm:$0xff] }
 0x559   : > { %v2679_v63 = vadd.f32 %v2678_v47, %v2638_v1  ;;  %v2735_v16 = vmul.f32 %v9146_v19, %v2734_v33  ;;  %3533 = vmatpush.msrb.mxu0 %v3028_v17  ;;  %6326 = vmatpush.msra.mxu1 %v3028_v17  ;;  %v3060_v1 = vsel %vm3052_vm0, %v9099_v28, 0.0  ;;  %v9251_v17 = vperm.slane %v9032_v32, 5 }
 0x55a   : > { %6053 = vmatmul.msk.f32.vlgmr.msrb.gmra.mxu0 %vm3426_vm9, %v9177_v45  ;;  %6064 = vmatmul.msk.f32.vlgmr.msra.gmra.mxu1 %vm3426_vm9, %v9180_v0  ;;  %v3066_v59 = vadd.f32 %v3060_v1, %v3044_v41  ;;  %v3120_v62 = vmul.f32 %v9144_v13, %v3112_v9  ;;  %v3140_v50 = vsel %vm3132_vm8, %v9226_v56, 0.0  ;;  %vm3178_vm4 = vcmp.eq.f32.partialorder %v9050_v20, %v9239_v6 }
 0x55b   : > { %v6892_v51 = vpop.eup %6891  ;;  %6895 = vtanh.f32 %v2679_v63  ;;  %v2736_v5 = vadd.f32 %v9146_v19, %v2735_v16  ;;  %6078 = vmatpush.msk.msrb.mxu1 %vm3463_vm5, %v3078_v15  ;;  %6104 = vmatpush.msk.msra.mxu0 %vm3463_vm5, %v3124_v36  ;;  %v9268_v33 = vperm.slane %v9129_v40, 4  ;;  %v3186_v47 = vsel %vm3178_vm4, %v9242_v3, 0.0  ;;  %v654_v16 = vld [vmem:[%s7552_s13 + $0x18] sm:$0xff] }
 0x55c   : > { %v9199_v35 = vpop.eup %6893  ;;  %v9207_v22 = vadd.f32 1.0, %v6892_v51  ;;  %v3074_v31 = vmul.f32 %v9136_v18, %v3066_v59  ;;  %v9229_v18 = vperm.slane %v9032_v32, 4  ;;  %vm2767_vm12 = vweird.f32 %v9140_v46 }
 0x55d   : > { %v2763_v43 = vmul.f32 %v9199_v35, %v9140_v46  ;;  %v2740_v28 = vsel %vm2739_vm2, %v9146_v19, %v2736_v5  ;;  %3638 = vmatpush.msrb.mxu1 %v3076_v55  ;;  %3744 = vmatpush.msra.mxu0 %v3122_v8  ;;  %vm2768_vm13 = vweird.f32 %v9199_v35  ;;  %v2771_v55 = vand.u32 2147483647, %v9140_v46 }
 0x55e   : > { %v2745_v25 = vsel %vm9162_vm11, %v2744_v49, %v2740_v28  ;;  %vm3148_vm3 = vcmp.eq.f32.partialorder %v9050_v20, %v9229_v18  ;;  %vm3194_vm11 = vcmp.eq.f32.partialorder %v9050_v20, %v9251_v17  ;;  %vm2769_vm6 = vmor %vm2767_vm12, %vm2768_vm13  ;;  %v2892_v1 = vsub.f32 %v648_v26, %v654_v16 }
 0x55f   : > { %v2764_v60 = vsub.f32 1.0, %v2763_v43  ;;  %v2908_v53 = vsub.f32 1.0, %v2745_v25  ;;  %3639 = vmatpush.msrb.mxu1 %v3074_v31  ;;  %3745 = vmatpush.msra.mxu0 %v3120_v62  ;;  %v3156_v39 = vsel %vm3148_vm3, %v9232_v58, 0.0  ;;  %vm2772_vm10 = vcmp.eq.f32.partialorder %v2771_v55, 8.507059e+37 }
 0x560   : > { %v2681_v13 = vpop.f32.mrf.mxu3  ;;  %v3162_v2 = vadd.f32 %v3156_v39, %v3140_v50  ;;  %v2898_v49 = vmul.f32 0.5, %v2892_v1  ;;  %vm3130_vm14 = vcmp.eq.f32.partialorder %v9053_v14, %v9072_v4  ;;  %vm3146_vm15 = vcmp.eq.f32.partialorder %v9053_v14, %v9229_v18  ;;  %v2952_v39 = vld [vmem:[#allocation10 + $0x18] sm:$0xff] }
 0x561   : > { %v6896_v7 = vpop.eup %6895  ;;  %v2914_v19 = vmul.f32 %v2908_v53, %v9058_v44  ;;  %v9261_v44 = vperm.slane %v9045_v37, 5  ;;  %v2682_v12 = vadd.f32 %v2681_v13, %v9155_v24  ;;  %v2765_v11 = vmul.f32 %v9199_v35, %v2764_v60  ;;  %v2602_v13 = vpop.f32.mrf.mxu2 }
 0x562   : > { %v2920_v21 = vmul.f32 %v6896_v7, %v2745_v25  ;;  %6079 = vmatmul.msk.f32.vlgmr.msrb.gmra.mxu1 %vm3426_vm9, %v9177_v45  ;;  %6054 = vmatmul.msk.f32.gmra.mxu0 %vm3426_vm9, %v9245_v29  ;;  %v3170_v36 = vmul.f32 %v9236_v54, %v3162_v2  ;;  %vm3176_vm0 = vcmp.eq.f32.partialorder %v9053_v14, %v9239_v6  ;;  %v3154_v43 = vsel %vm3146_vm15, %v9232_v58, 0.0  ;;  %v2643_v7 = vpop.f32.mrf.mxu1 }
 0x563   : > { %v3202_v57 = vsel %vm3194_vm11, %v9261_v44, 0.0  ;;  %v2766_v51 = vadd.f32 %v9199_v35, %v2765_v11  ;;  %6897 = vtanh.f32 %v2682_v12  ;;  %vm3192_vm2 = vcmp.eq.f32.partialorder %v9053_v14, %v9251_v17 }
 0x564   : > { %v2926_v15 = vadd.f32 %v2920_v21, %v2914_v19  ;;  %v3208_v42 = vadd.f32 %v3202_v57, %v3186_v47  ;;  %6130 = vmatpush.msk.msra.mxu1 %vm3463_vm5, %v3170_v36  ;;  %6899 = vrcp.f32 %v9207_v22  ;;  %v3184_v61 = vsel %vm3176_vm0, %v9242_v3, 0.0 }
 0x565   : > { %v2770_v41 = vsel %vm2769_vm6, %v9199_v35, %v2766_v51  ;;  %v2904_v35 = vadd.f32 %v2898_v49, %v654_v16  ;;  %v3200_v34 = vsel %vm3192_vm2, %v9261_v44, 0.0  ;;  %vm3128_vm1 = vcmp.eq.f32.partialorder %v9062_v30, %v9072_v4 }
 0x566   : > { %v2932_v63 = vadd.f32 %v2926_v15, %v9088_v52  ;;  %v3216_v24 = vmul.f32 %v9268_v33, %v3208_v42  ;;  %v2773_v52 = vand.u32 2147483648, %v9140_v46  ;;  %v3138_v46 = vsel %vm3130_vm14, %v9226_v56, 0.0 }
 0x567   : > { %v3160_v31 = vadd.f32 %v3154_v43, %v3138_v46  ;;  %2946 = vst [vmem:[%s8980_s4 + $0x18] sm:$0xff] %v2904_v35  ;;  %v3206_v53 = vadd.f32 %v3200_v34, %v3184_v61  ;;  %vm3144_vm7 = vcmp.eq.f32.partialorder %v9062_v30, %v9229_v18  ;;  %v3136_v15 = vsel %vm3128_vm1, %v9226_v56, 0.0  ;;  %v656_v43 = vld [vmem:[%s7552_s13 + $0x28] sm:$0xff]  ;;  %s6339_s13 = smul.u32 48, %s7370_s25 }
 0x568   : > { %2938 = vst [vmem:[%s9016_s20 + $0x8] sm:$0xff] %v2932_v63  ;;  %6156 = vmatpush.msk.msrb.mxu0 %vm3463_vm5, %v3216_v24  ;;  %v2774_v5 = vor.u32 1.1754944e-38, %v2773_v52  ;;  %v3152_v2 = vsel %vm3144_vm7, %v9232_v58, 0.0  ;;  %vm3174_vm8 = vcmp.eq.f32.partialorder %v9062_v30, %v9239_v6  ;;  %vm3190_vm3 = vcmp.eq.f32.partialorder %v9062_v30, %v9251_v17  ;;  %v2684_v36 = vpop.f32.mrf.mxu3 }
 0x569   : > { %v6898_v28 = vpop.eup %6897  ;;  %v3168_v62 = vmul.f32 %v9236_v54, %v3160_v31  ;;  %v3214_v21 = vmul.f32 %v9268_v33, %v3206_v53  ;;  %v3158_v57 = vadd.f32 %v3152_v2, %v3136_v15  ;;  %v3182_v4 = vsel %vm3174_vm8, %v9242_v3, 0.0  ;;  %s5514_s23 = scalar_lea.hbm %s11568_s15, %s6339_s13 }
 0x56a   : > { %6080 = vmatmul.msk.f32.gmra.mxu1 %vm3426_vm9, %v9245_v29  ;;  %v2775_v8 = vsel %vm2772_vm10, %v2774_v5, %v2770_v41  ;;  %v9305_v25 = vpop.eup %6899  ;;  %v3198_v18 = vsel %vm3190_vm3, %v9261_v44, 0.0  ;;  %v9325_v12 = vperm.slane %v9028_v10, 6  ;;  %v3226_v56 = vperm.slane %v9041_v27, 6  ;;  %v2646_v41 = vpop.f32.mrf.mxu1  ;;  %s5517_s18 = sshll.u32 %s5514_s23, 4  ;;  %s5518_s18 = int_to_ptr.hbm [resolvable:$true] %s5517_s18 }
 0x56b   : > { %v2910_v59 = vsub.f32 1.0, %v2775_v8  ;;  %v2922_v60 = vmul.f32 %v6898_v28, %v2775_v8  ;;  %v2793_v50 = vmul.f32 %v9305_v25, %v9207_v22  ;;  %3850 = vmatpush.msra.mxu1 %v3168_v62  ;;  %3956 = vmatpush.msrb.mxu0 %v3214_v21  ;;  %v3166_v11 = vmul.f32 %v9236_v54, %v3158_v57  ;;  %v2605_v28 = vpop.f32.mrf.mxu2  ;;  %s7136_s30 = sshra.s32 %s5518_s18, 4  ;;  %s7137_s30 = int_to_ptr.hbm [resolvable:$true] %s7136_s30 }
 0x56c   : > { %v3204_v63 = vadd.f32 %v3198_v18, %v3182_v4  ;;  %v3234_v6 = vperm.slane %v9032_v32, 6  ;;  %v2644_v17 = vadd.f32 %v2643_v7, %v2602_v13  ;;  %v3242_v3 = vperm.slane %v9045_v37, 6  ;;  %s7138_s26 = scalar_lea.hbm %s7137_s30, 48  ;;  %p7143_p2 = scmp.lt.s32.totalorder %s7137_s30, %s11568_s15 }
 0x56d   : > { %v2916_v9 = vmul.f32 %v2910_v59, %v648_v26  ;;  %v2794_v42 = vsub.f32 1.0, %v2793_v50  ;;  %v9335_v26 = vld [vmem:[%s9153_s9 + $0x10] sm:$0xff]  ;;  %3851 = vmatpush.msra.mxu1 %v3166_v11  ;;  %vm3224_vm4 = vcmp.eq.f32.partialorder %v9050_v20, %v9325_v12  ;;  %v3256_v54 = vperm.slane %v9129_v40, 5  ;;  %v650_v59 = vld [vmem:[%s7545_s29 + $0x28] sm:$0xff]  ;;  %p7139_p4 = scmp.ne.s32.totalorder %s7137_s30, %s7138_s26  ;;  %p7144_p10 = scmp.lt.s32.totalorder %s7142_s12, %s7138_s26 }
 0x56e   : > { %v3212_v16 = vmul.f32 %v9268_v33, %v3204_v63  ;;  %6055 = vmatmul.msk.f32.gmra.mxu0 %vm3426_vm9, %v9335_v26  ;;  %v3232_v51 = vsel %vm3224_vm4, %v3226_v56, 0.0  ;;  %vm3240_vm11 = vcmp.eq.f32.partialorder %v9050_v20, %v3234_v6  ;;  %vm3222_vm12 = vcmp.eq.f32.partialorder %v9053_v14, %v9325_v12  ;;  %v2953_v63 = vld [vmem:[#allocation10 + $0x20] sm:$0xff] }
 0x56f   : > { %v2928_v19 = vadd.f32 %v2922_v60, %v2916_v9  ;;  %vm3238_vm13 = vcmp.eq.f32.partialorder %v9053_v14, %v3234_v6  ;;  %v3248_v24 = vsel %vm3240_vm11, %v3242_v3, 0.0  ;;  %v2685_v52 = vadd.f32 %v2684_v36, %v2644_v17  ;;  %p7140_p1 = pnand %p7139_p4, %p7426_p5  ;;  %p7145_p13 = por %p7144_p10, %p7143_p2 }
 0x570   : > { %3957 = vmatpush.msrb.mxu0 %v3212_v16  ;;  %v3254_v1 = vadd.f32 %v3248_v24, %v3232_v51  ;;  %v3230_v5 = vsel %vm3222_vm12, %v3226_v56, 0.0  ;;  %v3246_v49 = vsel %vm3238_vm13, %v3242_v3, 0.0  ;;  %v2795_v8 = vmul.f32 %v9305_v25, %v2794_v42 }
 0x571   : > { %v2934_v47 = vadd.f32 %v2928_v19, %v2904_v35  ;;  %v3252_v35 = vadd.f32 %v3246_v49, %v3230_v5  ;;  %vm2797_vm6 = vweird.f32 %v9207_v22  ;;  %vm2798_vm10 = vweird.f32 %v9305_v25  ;;  %p7141_p11 = pneg %p7140_p1 }
 0x572   : > { %6081 = vmatmul.msk.f32.gmra.mxu1 %vm3426_vm9, %v9335_v26  ;;  %v3262_v31 = vmul.f32 %v3256_v54, %v3254_v1  ;;  %v2796_v61 = vadd.f32 %v9305_v25, %v2795_v8  ;;  %v2801_v34 = vand.u32 2147483647, %v9207_v22  ;;  %v2803_v9 = vand.u32 2147483648, %v9207_v22  ;;  %vm2799_vm14 = vmor %vm2797_vm6, %vm2798_vm10  ;;  %v2687_v22 = vpop.f32.mrf.mxu3  ;;  %v9404_v8 = vld [vmem:[%s9153_s9 + $0x28] sm:$0xff] }
 0x573   : > { %2940 = vst [vmem:[%s9016_s20 + $0x18] sm:$0xff] %v2934_v47  ;;  %v9329_v58 = vadd.f32 %v2952_v39, %v2934_v47  ;;  %v2647_v7 = vadd.f32 %v2646_v41, %v2605_v28  ;;  %6901 = vtanh.f32 %v2685_v52  ;;  %v3260_v62 = vmul.f32 %v3256_v54, %v3252_v35  ;;  %v9369_v39 = vld [vmem:[%s9153_s9 + $0x18] sm:$0xff]  ;;  %p7146_p0 = pnand %p7145_p13, %p7141_p11 }
 0x574   : > { %6182 = vmatpush.msk.msrb.mxu1 %vm3463_vm5, %v3262_v31  ;;  %v2800_v19 = vsel %vm2799_vm14, %v9305_v25, %v2796_v61  ;;  %v2804_v21 = vor.u32 1.1754944e-38, %v2803_v9  ;;  %v2894_v13 = vsub.f32 %v650_v59, %v656_v43  ;;  %vm2802_vm15 = vcmp.eq.f32.partialorder %v2801_v34, 8.507059e+37 }
 0x575   : > { %v2965_v44 = vfloor.f32 %v9329_v58  ;;  %v2977_v53 = vmax.f32 %v9329_v58, 0.0  ;;  %vm3220_vm0 = vcmp.eq.f32.partialorder %v9062_v30, %v9325_v12  ;;  %vm3236_vm2 = vcmp.eq.f32.partialorder %v9062_v30, %v3234_v6 }
 0x576   : > { %4062 = vmatpush.msrb.mxu1 %v3260_v62  ;;  %v2805_v15 = vsel %vm2802_vm15, %v2804_v21, %v2800_v19  ;;  %v2900_v2 = vmul.f32 0.5, %v2894_v13  ;;  %v3228_v47 = vsel %vm3220_vm0, %v3226_v56, 0.0  ;;  %v3244_v57 = vsel %vm3236_vm2, %v3242_v3, 0.0  ;;  %6056 = vmatmul.msk.f32.gmra.mxu0 %vm3426_vm9, %v9369_v39 }
 0x577   : > { %v2967_v33 = vmax.f32 %v2965_v44, 0.0  ;;  %v2971_v55 = vadd.f32 1.0, %v2965_v44  ;;  %v2979_v25 = vmin.f32 %v2977_v53, 17.0  ;;  %v2912_v4 = vsub.f32 1.0, %v2805_v15  ;;  %v9379_v44 = vld [vmem:[%s9153_s9 + $0x20] sm:$0xff] }
 0x578   : > { %v3250_v18 = vadd.f32 %v3244_v57, %v3228_v47  ;;  %v2906_v12 = vadd.f32 %v2900_v2, %v656_v43  ;;  %v2688_v58 = vadd.f32 %v2687_v22, %v2647_v7  ;;  %v9382_v16 = vadd.f32 %v2953_v63, %v9035_v48  ;;  %v9438_v57 = vld [vmem:[%s9153_s9 + $0x30] sm:$0xff] }
 0x579   : > { %v2973_v46 = vmax.f32 %v2971_v55, 0.0  ;;  %v9358_v60 = vmin.f32 %v2967_v33, 17.0  ;;  %v6902_v11 = vpop.eup %6901  ;;  %v2918_v36 = vmul.f32 %v2912_v4, %v650_v59 }
 0x57a   : > { %6082 = vmatmul.msk.f32.gmra.mxu1 %vm3426_vm9, %v9369_v39  ;;  %v3258_v56 = vmul.f32 %v3256_v54, %v3250_v18  ;;  %v2924_v17 = vmul.f32 %v6902_v11, %v2805_v15  ;;  %2948 = vst [vmem:[%s8980_s4 + $0x28] sm:$0xff] %v2906_v12  ;;  %v6049_v3 = vmul.f32 -1.442695, %v2688_v58  ;;  %v3310_v24 = vfloor.f32 %v9382_v16 }
 0x57b   : > { %11445 = vst [vmem:[#allocation39_spill] sm:$0xff] %v9358_v60  ;;  %v9363_v50 = vmin.f32 %v2973_v46, 17.0  ;;  %v2981_v6 = vsub.f32 %v9358_v60, %v2979_v25  ;;  %v2989_v48 = vperm.slane %v9358_v60, 1  ;;  %v3035_v28 = vperm.slane %v9358_v60, 2 }
 0x57c   : > { %4063 = vmatpush.msrb.mxu1 %v3258_v56  ;;  %v2930_v51 = vadd.f32 %v2924_v17, %v2918_v36  ;;  %6903 = vpow2.f32 %v6049_v3  ;;  %v9408_v46 = vadd.f32 1.0, %v3310_v24  ;;  %v9425_v7 = vperm.slane %v9358_v60, 3 }
 0x57d   : > { %11446 = vst [vmem:[#allocation29_spill] sm:$0xff] %v9363_v50  ;;  %v2985_v42 = vsub.f32 %v9363_v50, %v2979_v25  ;;  %v9384_v33 = vadd.f32 1.0, %v2981_v6  ;;  %v3005_v41 = vperm.slane %v9363_v50, 1  ;;  %vm2995_vm1 = vcmp.eq.f32.partialorder %v9050_v20, %v2989_v48 }
 0x57e   : > { %v9388_v54 = vadd.f32 %v2930_v51, %v2906_v12  ;;  %6057 = vmatmul.msk.f32.gmra.mxu0 %vm3426_vm9, %v9379_v44  ;;  %vm2993_vm8 = vcmp.eq.f32.partialorder %v9053_v14, %v2989_v48  ;;  %v3051_v34 = vperm.slane %v9363_v50, 2  ;;  %v3097_v62 = vperm.slane %v9363_v50, 3 }
 0x57f   : > { %11447 = vst [vmem:[#allocation40_spill] sm:$0xff] %v9384_v33  ;;  %v9386_v55 = vsub.f32 1.0, %v2985_v42  ;;  %v2997_v52 = vperm.slane %v9384_v33, 1  ;;  %vm3011_vm7 = vcmp.eq.f32.partialorder %v9050_v20, %v3005_v41  ;;  %vm3009_vm3 = vcmp.eq.f32.partialorder %v9053_v14, %v3005_v41 }
 0x580   : > { %2942 = vst [vmem:[%s9016_s20 + $0x28] sm:$0xff] %v9388_v54  ;;  %vm3007_vm4 = vcmp.eq.f32.partialorder %v9062_v30, %v3005_v41  ;;  %v3043_v61 = vperm.slane %v9384_v33, 2  ;;  %vm2991_vm11 = vcmp.eq.f32.partialorder %v9062_v30, %v2989_v48  ;;  %vm3041_vm12 = vcmp.eq.f32.partialorder %v9050_v20, %v3035_v28 }
 0x581   : > { %11448 = vst [vmem:[#allocation30_spill] sm:$0xff] %v9386_v55  ;;  %v3013_v5 = vperm.slane %v9386_v55, 1  ;;  %v3003_v35 = vsel %vm2995_vm1, %v2997_v52, 0.0  ;;  %v3001_v43 = vsel %vm2993_vm8, %v2997_v52, 0.0  ;;  %v3059_v53 = vperm.slane %v9386_v55, 2 }
 0x582   : > { %6083 = vmatmul.msk.f32.gmra.mxu1 %vm3426_vm9, %v9379_v44  ;;  %v6904_v1 = vpop.eup %6903  ;;  %v2999_v15 = vsel %vm2991_vm11, %v2997_v52, 0.0  ;;  %v3105_v2 = vperm.slane %v9386_v55, 3  ;;  %v3049_v4 = vsel %vm3041_vm12, %v3043_v61, 0.0  ;;  %vm3057_vm13 = vcmp.eq.f32.partialorder %v9050_v20, %v3051_v34 }
 0x583   : > { %v9401_v49 = vadd.f32 1.0, %v6904_v1  ;;  %v3019_v59 = vsel %vm3011_vm7, %v3013_v5, 0.0  ;;  %v3017_v31 = vsel %vm3009_vm3, %v3013_v5, 0.0  ;;  %v3015_v9 = vsel %vm3007_vm4, %v3013_v5, 0.0 }
 0x584   : > { %v9430_v13 = vadd.f32 %v3019_v59, %v3003_v35  ;;  %v9433_v22 = vadd.f32 %v3017_v31, %v3001_v43  ;;  %v9440_v25 = vadd.f32 %v3015_v9, %v2999_v15  ;;  %v3089_v18 = vperm.slane %v9384_v33, 3  ;;  %v9470_v43 = vld [vmem:[%s9153_s9 + $0x38] sm:$0xff] }
 0x585   : > { %6905 = vrcp.f32 %v9401_v49  ;;  %v2853_v19 = vand.u32 2147483647, %v9401_v49  ;;  %v2855_v21 = vand.u32 2147483648, %v9401_v49  ;;  %v3065_v58 = vsel %vm3057_vm13, %v3059_v53, 0.0 }
 0x586   : > { %6058 = vmatmul.msk.f32.gmra.mxu0 %vm3426_vm9, %v9404_v8  ;;  %vm3087_vm6 = vcmp.eq.f32.partialorder %v9050_v20, %v9425_v7  ;;  %vm3103_vm10 = vcmp.eq.f32.partialorder %v9050_v20, %v3097_v62  ;;  %vm2849_vm14 = vweird.f32 %v9401_v49  ;;  %vm3055_vm0 = vcmp.eq.f32.partialorder %v9053_v14, %v3051_v34 }
 0x587   : > { %vm9449_vm15 = vcmp.eq.f32.partialorder %v2853_v19, 8.507059e+37  ;;  %v2856_v63 = vor.u32 1.1754944e-38, %v2855_v21  ;;  %v3111_v36 = vsel %vm3103_vm10, %v3105_v2, 0.0  ;;  %vm3039_vm2 = vcmp.eq.f32.partialorder %v9053_v14, %v3035_v28 }
 0x588   : > { %v3063_v56 = vsel %vm3055_vm0, %v3059_v53, 0.0  ;;  %v3071_v42 = vadd.f32 %v3065_v58, %v3049_v4  ;;  %v3095_v17 = vsel %vm3087_vm6, %v3089_v18, 0.0  ;;  %v3047_v3 = vsel %vm3039_vm2, %v3043_v61, 0.0 }
 0x589   : > { %vm3101_vm1 = vcmp.eq.f32.partialorder %v9053_v14, %v3097_v62  ;;  %vm3053_vm8 = vcmp.eq.f32.partialorder %v9062_v30, %v3051_v34  ;;  %v3117_v52 = vadd.f32 %v3111_v36, %v3095_v17  ;;  %v3069_v41 = vadd.f32 %v3063_v56, %v3047_v3 }
 0x58a   : > { %6084 = vmatmul.msk.f32.gmra.mxu1 %vm3426_vm9, %v9404_v8  ;;  %v3109_v48 = vsel %vm3101_vm1, %v3105_v2, 0.0  ;;  %vm3085_vm3 = vcmp.eq.f32.partialorder %v9053_v14, %v9425_v7  ;;  %v3061_v1 = vsel %vm3053_vm8, %v3059_v53, 0.0  ;;  %vm3037_vm4 = vcmp.eq.f32.partialorder %v9062_v30, %v3035_v28 }
 0x58b   : > { %v6906_v47 = vpop.eup %6905  ;;  %v3093_v35 = vsel %vm3085_vm3, %v3089_v18, 0.0  ;;  %v9465_v59 = vperm.slane %v9363_v50, 4  ;;  %v3045_v34 = vsel %vm3037_vm4, %v3043_v61, 0.0  ;;  %v9473_v9 = vperm.slane %v9358_v60, 4 }
 0x58c   : > { %v2845_v12 = vmul.f32 %v6906_v47, %v9401_v49  ;;  %vm2850_vm7 = vweird.f32 %v6906_v47  ;;  %v3115_v31 = vadd.f32 %v3109_v48, %v3093_v35  ;;  %v9476_v19 = vperm.slane %v9386_v55, 4 }
 0x58d   : > { %vm2851_vm11 = vmor %vm2849_vm14, %vm2850_vm7  ;;  %v3067_v21 = vadd.f32 %v3061_v1, %v3045_v34  ;;  %vm3099_vm12 = vcmp.eq.f32.partialorder %v9062_v30, %v3097_v62  ;;  %v9480_v28 = vperm.slane %v9384_v33, 4  ;;  %vm3149_vm13 = vcmp.eq.f32.partialorder %v9050_v20, %v9465_v59 }
 0x58e   : > { %v2846_v6 = vsub.f32 1.0, %v2845_v12  ;;  %6059 = vmatmul.msk.f32.gmra.mxu0 %vm3426_vm9, %v9438_v57  ;;  %v9489_v61 = vperm.slane %v9358_v60, 5  ;;  %v9492_v15 = vperm.slane %v9363_v50, 5  ;;  %v3157_v4 = vsel %vm3149_vm13, %v9476_v19, 0.0 }
 0x58f   : > { %v9499_v12 = vperm.slane %v9384_v33, 5  ;;  %vm3083_vm6 = vcmp.eq.f32.partialorder %v9062_v30, %v9425_v7  ;;  %vm3133_vm10 = vcmp.eq.f32.partialorder %v9050_v20, %v9473_v9  ;;  %v3197_v11 = vperm.slane %v9386_v55, 5 }
 0x590   : > { %v2847_v51 = vmul.f32 %v6906_v47, %v2846_v6  ;;  %v3091_v6 = vsel %vm3083_vm6, %v3089_v18, 0.0  ;;  %v3141_v36 = vsel %vm3133_vm10, %v9480_v28, 0.0  ;;  %vm3179_vm14 = vcmp.eq.f32.partialorder %v9050_v20, %v9489_v61 }
 0x591   : > { %v3163_v17 = vadd.f32 %v3157_v4, %v3141_v36  ;;  %v3187_v18 = vsel %vm3179_vm14, %v9499_v12, 0.0  ;;  %vm3147_vm0 = vcmp.eq.f32.partialorder %v9053_v14, %v9465_v59  ;;  %vm3193_vm2 = vcmp.eq.f32.partialorder %v9053_v14, %v9492_v15 }
 0x592   : > { %6085 = vmatmul.msk.f32.gmra.mxu1 %vm3426_vm9, %v9438_v57  ;;  %v2848_v5 = vadd.f32 %v6906_v47, %v2847_v51  ;;  %v3155_v35 = vsel %vm3147_vm0, %v9476_v19, 0.0  ;;  %vm3131_vm1 = vcmp.eq.f32.partialorder %v9053_v14, %v9473_v9  ;;  %vm3177_vm7 = vcmp.eq.f32.partialorder %v9053_v14, %v9489_v61 }
 0x593   : > { %vm3129_vm8 = vcmp.eq.f32.partialorder %v9062_v30, %v9473_v9  ;;  %vm3145_vm3 = vcmp.eq.f32.partialorder %v9062_v30, %v9465_v59  ;;  %vm3191_vm4 = vcmp.eq.f32.partialorder %v9062_v30, %v9492_v15  ;;  %v3243_v9 = vperm.slane %v9386_v55, 6 }
 0x594   : > { %v2852_v53 = vsel %vm2851_vm11, %v6906_v47, %v2848_v5  ;;  %v3107_v47 = vsel %vm3099_vm12, %v3105_v2, 0.0  ;;  %v3137_v59 = vsel %vm3129_vm8, %v9480_v28, 0.0  ;;  %v3153_v36 = vsel %vm3145_vm3, %v9476_v19, 0.0 }
 0x595   : > { %v9484_v49 = vsel %vm9449_vm15, %v2856_v63, %v2852_v53  ;;  %v3113_v56 = vadd.f32 %v3107_v47, %v3091_v6  ;;  %vm3195_vm15 = vcmp.eq.f32.partialorder %v9050_v20, %v9492_v15  ;;  %v3235_v6 = vperm.slane %v9363_v50, 6 }
 0x596   : > { %6060 = vmatmul.msk.f32.gmra.mxu0 %vm3426_vm9, %v9470_v43  ;;  %v3027_v62 = vperm.slane %v9484_v49, 0  ;;  %v3073_v58 = vperm.slane %v9484_v49, 1  ;;  %v3119_v63 = vperm.slane %v9484_v49, 2  ;;  %v3203_v3 = vsel %vm3195_vm15, %v3197_v11, 0.0 }
 0x597   : > { %v9525_v1 = vperm.slane %v9484_v49, 4  ;;  %v3209_v53 = vadd.f32 %v3203_v3, %v3187_v18  ;;  %vm3175_vm11 = vcmp.eq.f32.partialorder %v9062_v30, %v9489_v61  ;;  %vm3241_vm12 = vcmp.eq.f32.partialorder %v9050_v20, %v3235_v6 }
 0x598   : > { %v3033_v2 = vmul.f32 %v3027_v62, %v9430_v13  ;;  %v3031_v7 = vmul.f32 %v3027_v62, %v9433_v22  ;;  %v9520_v13 = vperm.slane %v9484_v49, 3  ;;  %v3029_v51 = vmul.f32 %v3027_v62, %v9440_v25 }
 0x599   : > { %v3079_v48 = vmul.f32 %v3073_v58, %v3071_v42  ;;  %v3125_v5 = vmul.f32 %v3119_v63, %v3117_v52  ;;  %v3077_v22 = vmul.f32 %v3073_v58, %v3069_v41  ;;  %v3123_v34 = vmul.f32 %v3119_v63, %v3115_v31  ;;  %v9535_v42 = vld [vmem:[%s9153_s9 + $0x40] sm:$0xff] }
 0x59a   : > { %6086 = vmatmul.msk.f32.gmra.mxu1 %vm3426_vm9, %v9470_v43  ;;  %6065 = vmatpush.msk.msrb.mxu2 %vm3463_vm5, %v3033_v2  ;;  %v3201_v25 = vsel %vm3193_vm2, %v3197_v11, 0.0  ;;  %v3075_v62 = vmul.f32 %v3073_v58, %v3067_v21  ;;  %v3121_v47 = vmul.f32 %v3119_v63, %v3113_v56  ;;  %v3139_v52 = vsel %vm3131_vm1, %v9480_v28, 0.0 }
 0x59b   : > { %6327 = vmatpush.msk.msra.mxu3 %vm3463_vm5, %v3033_v2  ;;  %v3171_v41 = vmul.f32 %v9520_v13, %v3163_v17  ;;  %v3217_v31 = vmul.f32 %v9525_v1, %v3209_v53  ;;  %v3161_v4 = vadd.f32 %v3155_v35, %v3139_v52  ;;  %v3185_v2 = vsel %vm3177_vm7, %v9499_v12, 0.0 }
 0x59c   : > { %3585 = vmatpush.msrb.mxu2 %v3031_v7  ;;  %v3207_v21 = vadd.f32 %v3201_v25, %v3185_v2  ;;  %v3219_v58 = vperm.slane %v9358_v60, 6  ;;  %v3227_v63 = vperm.slane %v9384_v33, 6  ;;  %v3199_v56 = vsel %vm3191_vm4, %v3197_v11, 0.0 }
 0x59d   : > { %6328 = vmatpush.msra.mxu3 %v3031_v7  ;;  %v3169_v15 = vmul.f32 %v9520_v13, %v3161_v4  ;;  %v3183_v7 = vsel %vm3175_vm11, %v9499_v12, 0.0  ;;  %v3249_v18 = vsel %vm3241_vm12, %v3243_v9, 0.0  ;;  %v3257_v28 = vperm.slane %v9484_v49, 5  ;;  %v9598_v4 = vld [vmem:[%s9153_s9 + $0x50] sm:$0xff] }
 0x59e   : > { %3586 = vmatpush.msrb.mxu2 %v3029_v51  ;;  %6061 = vmatmul.msk.f32.gmra.mxu0 %vm3426_vm9, %v9535_v42  ;;  %v3215_v17 = vmul.f32 %v9525_v1, %v3207_v21  ;;  %vm3225_vm13 = vcmp.eq.f32.partialorder %v9050_v20, %v3219_v58  ;;  %vm3239_vm6 = vcmp.eq.f32.partialorder %v9053_v14, %v3235_v6  ;;  %v3318_v3 = vmax.f32 %v9408_v46, 0.0 }
 0x59f   : > { %6329 = vmatpush.msra.mxu3 %v3029_v51  ;;  %6066 = vmatmul.msk.f32.vlgmr.msrb.gmra.mxu2 %vm3426_vm9, %v9177_v45  ;;  %v3159_v19 = vadd.f32 %v3153_v36, %v3137_v59  ;;  %v3205_v61 = vadd.f32 %v3199_v56, %v3183_v7  ;;  %v3233_v11 = vsel %vm3225_vm13, %v3227_v63, 0.0  ;;  %v3247_v12 = vsel %vm3239_vm6, %v3243_v9, 0.0 }
 0x5a0   : > { %6077 = vmatmul.msk.f32.vlgmr.msra.gmra.mxu3 %vm3426_vm9, %v9180_v0  ;;  %6117 = vmatpush.msk.msra.mxu2 %vm3463_vm5, %v3125_v5  ;;  %v3255_v51 = vadd.f32 %v3249_v18, %v3233_v11  ;;  %vm3223_vm10 = vcmp.eq.f32.partialorder %v9053_v14, %v3219_v58  ;;  %vm3237_vm14 = vcmp.eq.f32.partialorder %v9062_v30, %v3235_v6  ;;  %v3312_v25 = vmax.f32 %v3310_v24, 0.0 }
 0x5a1   : > { %6091 = vmatpush.msk.msrb.mxu3 %vm3463_vm5, %v3079_v48  ;;  %v3167_v48 = vmul.f32 %v9520_v13, %v3159_v19  ;;  %v3213_v5 = vmul.f32 %v9525_v1, %v3205_v61  ;;  %v3231_v35 = vsel %vm3223_vm10, %v3227_v63, 0.0  ;;  %vm3221_vm15 = vcmp.eq.f32.partialorder %v9062_v30, %v3219_v58 }
 0x5a2   : > { %6087 = vmatmul.msk.f32.gmra.mxu1 %vm3426_vm9, %v9535_v42  ;;  %3797 = vmatpush.msra.mxu2 %v3123_v34  ;;  %v3245_v34 = vsel %vm3237_vm14, %v3243_v9, 0.0  ;;  %v3263_v46 = vmul.f32 %v3257_v28, %v3255_v51  ;;  %v3253_v53 = vadd.f32 %v3247_v12, %v3231_v35  ;;  %v3322_v13 = vmax.f32 %v9382_v16, 0.0 }
 0x5a3   : > { %3691 = vmatpush.msrb.mxu3 %v3077_v22  ;;  %v9582_v22 = vld [vmem:[%s9153_s9 + $0x48] sm:$0xff]  ;;  %v3229_v1 = vsel %vm3221_vm15, %v3227_v63, 0.0  ;;  %v3320_v52 = vmin.f32 %v3318_v3, 17.0  ;;  %v3314_v24 = vmin.f32 %v3312_v25, 17.0  ;;  %v3280_v2 = vperm.slane %v9032_v32, 7  ;;  %v9933_v32 = vld [vmem:[%s9153_s9 + $0x20] sm:$0xff] }
 0x5a4   : > { %3798 = vmatpush.msra.mxu2 %v3121_v47  ;;  %v3251_v47 = vadd.f32 %v3245_v34, %v3229_v1  ;;  %v3264_v21 = vperm.slane %v9028_v10, 7  ;;  %v3288_v58 = vperm.slane %v9045_v37, 7  ;;  %v3272_v6 = vperm.slane %v9041_v27, 7 }
 0x5a5   : > { %3692 = vmatpush.msrb.mxu3 %v3075_v62  ;;  %v3261_v62 = vmul.f32 %v3257_v28, %v3253_v53  ;;  %vm3286_vm0 = vcmp.eq.f32.partialorder %v9050_v20, %v3280_v2  ;;  %v3302_v56 = vperm.slane %v9129_v40, 6  ;;  %vm3284_vm1 = vcmp.eq.f32.partialorder %v9053_v14, %v3280_v2 }
 0x5a6   : > { %6169 = vmatpush.msk.msrb.mxu2 %vm3463_vm5, %v3217_v31  ;;  %6062 = vmatmul.msk.f32.gmra.mxu0 %vm3426_vm9, %v9582_v22  ;;  %v3324_v31 = vmin.f32 %v3322_v13, 17.0  ;;  %vm3270_vm2 = vcmp.eq.f32.partialorder %v9050_v20, %v3264_v21  ;;  %v3294_v59 = vsel %vm3286_vm0, %v3288_v58, 0.0  ;;  %vm3268_vm7 = vcmp.eq.f32.partialorder %v9053_v14, %v3264_v21 }
 0x5a7   : > { %6143 = vmatpush.msk.msra.mxu3 %vm3463_vm5, %v3171_v41  ;;  %6067 = vmatmul.msk.f32.gmra.mxu2 %vm3426_vm9, %v9245_v29  ;;  %v3259_v41 = vmul.f32 %v3257_v28, %v3251_v47  ;;  %v3278_v36 = vsel %vm3270_vm2, %v3272_v6, 0.0  ;;  %vm3282_vm8 = vcmp.eq.f32.partialorder %v9062_v30, %v3280_v2  ;;  %v3350_v7 = vperm.slane %v3320_v52, 0 }
 0x5a8   : > { %4009 = vmatpush.msrb.mxu2 %v3215_v17  ;;  %6092 = vmatmul.msk.f32.vlgmr.msrb.gmra.mxu3 %vm3426_vm9, %v9177_v45  ;;  %v3330_v16 = vsub.f32 %v3320_v52, %v3324_v31  ;;  %v3326_v63 = vsub.f32 %v3314_v24, %v3324_v31  ;;  %v3292_v17 = vsel %vm3284_vm1, %v3288_v58, 0.0  ;;  %v3300_v18 = vadd.f32 %v3294_v59, %v3278_v36 }
 0x5a9   : > { %3903 = vmatpush.msra.mxu3 %v3169_v15  ;;  %v3290_v28 = vsel %vm3282_vm8, %v3288_v58, 0.0  ;;  %v3334_v19 = vperm.slane %v3314_v24, 0  ;;  %v3276_v11 = vsel %vm3268_vm7, %v3272_v6, 0.0  ;;  %vm3266_vm3 = vcmp.eq.f32.partialorder %v9062_v30, %v3264_v21 }
 0x5aa   : > { %4010 = vmatpush.msrb.mxu2 %v3213_v5  ;;  %6088 = vmatmul.msk.f32.gmra.mxu1 %vm3426_vm9, %v9582_v22  ;;  %v3332_v9 = vsub.f32 1.0, %v3330_v16  ;;  %v3328_v15 = vadd.f32 1.0, %v3326_v63  ;;  %v3308_v12 = vmul.f32 %v3302_v56, %v3300_v18  ;;  %v3298_v3 = vadd.f32 %v3292_v17, %v3276_v11  ;;  %v2954_v11 = vld [vmem:[#allocation10 + $0x28] sm:$0xff] }
 0x5ab   : > { %3904 = vmatpush.msra.mxu3 %v3167_v48  ;;  %v3274_v51 = vsel %vm3266_vm3, %v3272_v6, 0.0  ;;  %vm3356_vm4 = vcmp.eq.f32.partialorder %v9050_v20, %v3350_v7  ;;  %vm3340_vm11 = vcmp.eq.f32.partialorder %v9050_v20, %v3334_v19  ;;  %vm3354_vm12 = vcmp.eq.f32.partialorder %v9053_v14, %v3350_v7 }
 0x5ac   : > { %v3358_v61 = vperm.slane %v3332_v9, 0  ;;  %v3342_v48 = vperm.slane %v3328_v15, 0  ;;  %v3296_v5 = vadd.f32 %v3290_v28, %v3274_v51  ;;  %v3306_v35 = vmul.f32 %v3302_v56, %v3298_v3 }
 0x5ad   : > { %6195 = vmatpush.msk.msrb.mxu3 %vm3463_vm5, %v3263_v46  ;;  %v3372_v53 = vperm.slane %v9129_v40, 7  ;;  %vm3338_vm13 = vcmp.eq.f32.partialorder %v9053_v14, %v3334_v19  ;;  %v3380_v1 = vperm.slane %v3314_v24, 1  ;;  %v3396_v47 = vperm.slane %v3320_v52, 1 }
 0x5ae   : > { %6063 = vmatmul.msk.f32.gmra.mxu0 %vm3426_vm9, %v9598_v4  ;;  %v3364_v34 = vsel %vm3356_vm4, %v3358_v61, 0.0  ;;  %v3304_v46 = vmul.f32 %v3302_v56, %v3296_v5  ;;  %v3362_v25 = vsel %vm3354_vm12, %v3358_v61, 0.0  ;;  %v3348_v13 = vsel %vm3340_vm11, %v3342_v48, 0.0 }
 0x5af   : > { %4115 = vmatpush.msrb.mxu3 %v3261_v62  ;;  %6068 = vmatmul.msk.f32.gmra.mxu2 %vm3426_vm9, %v9335_v26  ;;  %v3388_v62 = vperm.slane %v3328_v15, 1  ;;  %v3346_v31 = vsel %vm3338_vm13, %v3342_v48, 0.0  ;;  %vm3352_vm6 = vcmp.eq.f32.partialorder %v9062_v30, %v3350_v7  ;;  %vm3386_vm10 = vcmp.eq.f32.partialorder %v9050_v20, %v3380_v1  ;;  %v9656_v7 = vpop.f32.mrf.mxu1 }
 0x5b0   : > { %6093 = vmatmul.msk.f32.gmra.mxu3 %vm3426_vm9, %v9245_v29  ;;  %v3368_v16 = vadd.f32 %v3362_v25, %v3346_v31  ;;  %v3360_v2 = vsel %vm3352_vm6, %v3358_v61, 0.0  ;;  %vm3402_vm14 = vcmp.eq.f32.partialorder %v9050_v20, %v3396_v47  ;;  %vm3384_vm15 = vcmp.eq.f32.partialorder %v9053_v14, %v3380_v1 }
 0x5b1   : > { %4116 = vmatpush.msrb.mxu3 %v3259_v41  ;;  %v3370_v41 = vadd.f32 %v3364_v34, %v3348_v13  ;;  %v3394_v52 = vsel %vm3386_vm10, %v3388_v62, 0.0  ;;  %vm3400_vm0 = vcmp.eq.f32.partialorder %v9053_v14, %v3396_v47  ;;  %vm3382_vm2 = vcmp.eq.f32.partialorder %v9062_v30, %v3380_v1 }
 0x5b2   : > { %6089 = vmatmul.msk.f32.gmra.mxu1 %vm3426_vm9, %v9598_v4  ;;  %vm3398_vm1 = vcmp.eq.f32.partialorder %v9062_v30, %v3396_v47  ;;  %v3392_v58 = vsel %vm3384_vm15, %v3388_v62, 0.0  ;;  %v3390_v6 = vsel %vm3382_vm2, %v3388_v62, 0.0  ;;  %vm3336_vm7 = vcmp.eq.f32.partialorder %v9062_v30, %v3334_v19 }
 0x5b3   : > { %v3378_v40 = vmul.f32 %v3372_v53, %v3370_v41  ;;  %v3376_v56 = vmul.f32 %v3372_v53, %v3368_v16  ;;  %v3344_v15 = vsel %vm3336_vm7, %v3342_v48, 0.0  ;;  %v3281_v1 = vperm.slane %v9363_v50, 7 }
 0x5b4   : > { %v3366_v17 = vadd.f32 %v3360_v2, %v3344_v15  ;;  %v3289_v47 = vperm.slane %v9386_v55, 7  ;;  %v3265_v31 = vperm.slane %v9358_v60, 7  ;;  %v3273_v16 = vperm.slane %v9384_v33, 7 }
 0x5b5   : > { %vm3287_vm8 = vcmp.eq.f32.partialorder %v9050_v20, %v3281_v1  ;;  %vm3285_vm4 = vcmp.eq.f32.partialorder %v9053_v14, %v3281_v1  ;;  %vm3283_vm11 = vcmp.eq.f32.partialorder %v9062_v30, %v3281_v1 }
 0x5b6   : > { %6105 = vmatmul.msk.f32.vlgmr.msra.gmra.mxu0 %vm3426_vm9, %v9177_v45  ;;  %v3374_v18 = vmul.f32 %v3372_v53, %v3366_v17  ;;  %vm3271_vm3 = vcmp.eq.f32.partialorder %v9050_v20, %v3265_v31  ;;  %vm3269_vm12 = vcmp.eq.f32.partialorder %v9053_v14, %v3265_v31  ;;  %v3291_v17 = vsel %vm3283_vm11, %v3289_v47, 0.0 }
 0x5b7   : > { %6069 = vmatmul.msk.f32.gmra.mxu2 %vm3426_vm9, %v9369_v39  ;;  %6208 = vmatpush.msk.msra.mxu0 %vm3463_vm5, %v3308_v12  ;;  %v2960_v12 = vadd.f32 %v2954_v11, %v9388_v54  ;;  %vm3267_vm13 = vcmp.eq.f32.partialorder %v9062_v30, %v3265_v31 }
 0x5b8   : > { %6094 = vmatmul.msk.f32.gmra.mxu3 %vm3426_vm9, %v9335_v26 }
 0x5b9   : > { %4168 = vmatpush.msra.mxu0 %v3306_v35  ;;  %v3311_v5 = vfloor.f32 %v2960_v12 }
 0x5ba   : > { %6090 = vmatmul.msk.f32.gmra.mxu1 %vm3426_vm9, %v9180_v0  ;;  %v3404_v0 = vperm.slane %v3332_v9, 1 }
 0x5bb   : > { %4169 = vmatpush.msra.mxu0 %v3304_v46  ;;  %v3313_v54 = vmax.f32 %v3311_v5, 0.0  ;;  %v3323_v46 = vmax.f32 %v2960_v12, 0.0 }
 0x5bc   : > { %v3410_v24 = vsel %vm3402_vm14, %v3404_v0, 0.0  ;;  %v3408_v63 = vsel %vm3400_vm0, %v3404_v0, 0.0  ;;  %v3406_v9 = vsel %vm3398_vm1, %v3404_v0, 0.0 }
 0x5bd   : > { %v9641_v21 = vadd.f32 %v3410_v24, %v3394_v52  ;;  %v9651_v59 = vadd.f32 %v3408_v63, %v3392_v58  ;;  %v9653_v36 = vadd.f32 %v3406_v9, %v3390_v6  ;;  %v9715_v13 = vmin.f32 %v3313_v54, 17.0 }
 0x5be   : > { %6106 = vmatmul.msk.f32.gmra.mxu0 %vm3426_vm9, %v9245_v29  ;;  %v3325_v41 = vmin.f32 %v3323_v46, 17.0  ;;  %v3295_v52 = vsel %vm3287_vm8, %v3289_v47, 0.0  ;;  %v3303_v58 = vperm.slane %v9484_v49, 6  ;;  %v3279_v63 = vsel %vm3271_vm3, %v3273_v16, 0.0 }
 0x5bf   : > { %6070 = vmatmul.msk.f32.gmra.mxu2 %vm3426_vm9, %v9379_v44  ;;  %v3293_v6 = vsel %vm3285_vm4, %v3289_v47, 0.0  ;;  %v3301_v15 = vadd.f32 %v3295_v52, %v3279_v63 }
 0x5c0   : > { %6095 = vmatmul.msk.f32.gmra.mxu3 %vm3426_vm9, %v9369_v39  ;;  %v3327_v2 = vsub.f32 %v9715_v13, %v3325_v41 }
 0x5c1   : > { %v3309_v11 = vmul.f32 %v3303_v58, %v3301_v15 }
 0x5c2   : > { %6131 = vmatmul.msk.f32.vlgmr.msra.gmra.mxu1 %vm3426_vm9, %v9177_v45  ;;  %v2567_v45 = vpop.f32.mrf.mxu0 }
 0x5c3   : > { %6234 = vmatpush.msk.msra.mxu1 %vm3463_vm5, %v3378_v40 }
 0x5c5   : > { %4274 = vmatpush.msra.mxu1 %v3376_v56  ;;  %v3329_v56 = vadd.f32 1.0, %v3327_v2 }
 0x5c6   : > { %6107 = vmatmul.msk.f32.gmra.mxu0 %vm3426_vm9, %v9335_v26 }
 0x5c7   : > { %6071 = vmatmul.msk.f32.gmra.mxu2 %vm3426_vm9, %v9404_v8  ;;  %4275 = vmatpush.msra.mxu1 %v3374_v18 }
 0x5c8   : > { %6096 = vmatmul.msk.f32.gmra.mxu3 %vm3426_vm9, %v9379_v44 }
 0x5ca   : > { %6132 = vmatmul.msk.f32.gmra.mxu1 %vm3426_vm9, %v9245_v29  ;;  %v2527_v29 = vadd.f32 %v9030_v38, %v9023_v23  ;;  %v3317_v38 = vadd.f32 1.0, %v3311_v5 }
 0x5cc   : > { %v2568_v3 = vadd.f32 %v2567_v45, %v2527_v29  ;;  %v3319_v35 = vmax.f32 %v3317_v38, 0.0  ;;  %v3277_v45 = vsel %vm3269_vm12, %v3273_v16, 0.0  ;;  %v3381_v29 = vperm.slane %v9715_v13, 1 }
 0x5cd   : > { %v3299_v12 = vadd.f32 %v3293_v6, %v3277_v45 }
 0x5ce   : > { %6108 = vmatmul.msk.f32.gmra.mxu0 %vm3426_vm9, %v9369_v39  ;;  %v6050_v23 = vmul.f32 -1.442695, %v2568_v3  ;;  %v3321_v62 = vmin.f32 %v3319_v35, 17.0  ;;  %v3275_v3 = vsel %vm3267_vm13, %v3273_v16, 0.0  ;;  %v3389_v35 = vperm.slane %v3329_v56, 1 }
 0x5cf   : > { %6072 = vmatmul.msk.f32.gmra.mxu2 %vm3426_vm9, %v9438_v57  ;;  %v3297_v38 = vadd.f32 %v3291_v17, %v3275_v3  ;;  %v3307_v54 = vmul.f32 %v3303_v58, %v3299_v12  ;;  %vm3387_vm6 = vcmp.eq.f32.partialorder %v9050_v20, %v3381_v29  ;;  %vm3385_vm14 = vcmp.eq.f32.partialorder %v9053_v14, %v3381_v29  ;;  %v9784_v12 = vld [vmem:[%s9153_s9 + $0x8] sm:$0xff] }
 0x5d0   : > { %6097 = vmatmul.msk.f32.gmra.mxu3 %vm3426_vm9, %v9404_v8  ;;  %6907 = vpow2.f32 %v6050_v23  ;;  %v3331_v40 = vsub.f32 %v3321_v62, %v3325_v41  ;;  %v3397_v5 = vperm.slane %v3321_v62, 1  ;;  %v9748_v23 = vld [vmem:[%s9153_s9] sm:$0xff]  ;;  %v3351_v1 = vperm.slane %v3321_v62, 0 }
 0x5d1   : > { %vm3383_vm15 = vcmp.eq.f32.partialorder %v9062_v30, %v3381_v29  ;;  %v3395_v16 = vsel %vm3387_vm6, %v3389_v35, 0.0  ;;  %v3393_v62 = vsel %vm3385_vm14, %v3389_v35, 0.0  ;;  %v3335_v29 = vperm.slane %v9715_v13, 0 }
 0x5d2   : > { %6133 = vmatmul.msk.f32.gmra.mxu1 %vm3426_vm9, %v9335_v26  ;;  %v3333_v18 = vsub.f32 1.0, %v3331_v40  ;;  %vm3403_vm10 = vcmp.eq.f32.partialorder %v9050_v20, %v3397_v5  ;;  %vm3401_vm0 = vcmp.eq.f32.partialorder %v9053_v14, %v3397_v5  ;;  %vm3399_vm2 = vcmp.eq.f32.partialorder %v9062_v30, %v3397_v5 }
 0x5d3   : > { %v3391_v52 = vsel %vm3383_vm15, %v3389_v35, 0.0  ;;  %vm3357_vm1 = vcmp.eq.f32.partialorder %v9050_v20, %v3351_v1  ;;  %vm3341_vm7 = vcmp.eq.f32.partialorder %v9050_v20, %v3335_v29  ;;  %v3373_v13 = vperm.slane %v9484_v49, 7 }
 0x5d4   : > { %v3405_v41 = vperm.slane %v3333_v18, 1  ;;  %v3359_v63 = vperm.slane %v3333_v18, 0  ;;  %v3343_v18 = vperm.slane %v3329_v56, 0  ;;  %vm3355_vm8 = vcmp.eq.f32.partialorder %v9053_v14, %v3351_v1 }
 0x5d5   : > { %vm3339_vm3 = vcmp.eq.f32.partialorder %v9053_v14, %v3335_v29  ;;  %vm3353_vm4 = vcmp.eq.f32.partialorder %v9062_v30, %v3351_v1  ;;  %vm3337_vm11 = vcmp.eq.f32.partialorder %v9062_v30, %v3335_v29 }
 0x5d6   : > { %6109 = vmatmul.msk.f32.gmra.mxu0 %vm3426_vm9, %v9379_v44  ;;  %v6908_v25 = vpop.eup %6907  ;;  %v3411_v2 = vsel %vm3403_vm10, %v3405_v41, 0.0  ;;  %v3409_v40 = vsel %vm3401_vm0, %v3405_v41, 0.0  ;;  %v3365_v3 = vsel %vm3357_vm1, %v3359_v63, 0.0  ;;  %v3363_v56 = vsel %vm3355_vm8, %v3359_v63, 0.0 }
 0x5d7   : > { %v9666_v28 = vpop.f32.mrf.mxu1  ;;  %v9676_v19 = vpop.f32.mrf.mxu0  ;;  %6073 = vmatmul.msk.f32.gmra.mxu2 %vm3426_vm9, %v9470_v43  ;;  %v9720_v0 = vadd.f32 1.0, %v6908_v25  ;;  %v3305_v25 = vmul.f32 %v3303_v58, %v3297_v38  ;;  %v3407_v58 = vsel %vm3399_vm2, %v3405_v41, 0.0  ;;  %v9769_v6 = vadd.f32 %v3411_v2, %v3395_v16 }
 0x5d8   : > { %6098 = vmatmul.msk.f32.gmra.mxu3 %vm3426_vm9, %v9438_v57  ;;  %v9771_v15 = vadd.f32 %v3409_v40, %v3393_v62  ;;  %v9773_v17 = vadd.f32 %v3407_v58, %v3391_v52  ;;  %v3347_v41 = vsel %vm3339_vm3, %v3343_v18, 0.0  ;;  %v3361_v16 = vsel %vm3353_vm4, %v3359_v63, 0.0 }
 0x5d9   : > { %6909 = vrcp.f32 %v9720_v0  ;;  %v3369_v49 = vadd.f32 %v3363_v56, %v3347_v41  ;;  %v3345_v40 = vsel %vm3337_vm11, %v3343_v18, 0.0  ;;  %vm2864_vm13 = vweird.f32 %v9720_v0 }
 0x5da   : > { %6134 = vmatmul.msk.f32.gmra.mxu1 %vm3426_vm9, %v9369_v39  ;;  %v3367_v58 = vadd.f32 %v3361_v16, %v3345_v40  ;;  %v9839_v16 = vld [vmem:[%s9153_s9 + $0x10] sm:$0xff] }
 0x5db   : > { %v3377_v52 = vmul.f32 %v3373_v13, %v3369_v49  ;;  %v2690_v49 = vpop.f32.mrf.mxu3 }
 0x5dc   : > { %v3375_v1 = vmul.f32 %v3373_v13, %v3367_v58 }
 0x5de   : > { %6110 = vmatmul.msk.f32.gmra.mxu0 %vm3426_vm9, %v9404_v8 }
 0x5df   : > { %v9678_v61 = vpop.f32.mrf.mxu1  ;;  %6074 = vmatmul.msk.f32.gmra.mxu2 %vm3426_vm9, %v9535_v42  ;;  %v9695_v51 = vpop.f32.mrf.mxu0 }
 0x5e0   : > { %6099 = vmatmul.msk.f32.gmra.mxu3 %vm3426_vm9, %v9470_v43  ;;  %v9753_v46 = vpop.eup %6909 }
 0x5e1   : > { %v2860_v45 = vmul.f32 %v9753_v46, %v9720_v0  ;;  %vm2865_vm12 = vweird.f32 %v9753_v46 }
 0x5e2   : > { %6135 = vmatmul.msk.f32.gmra.mxu1 %vm3426_vm9, %v9379_v44  ;;  %vm2866_vm6 = vmor %vm2864_vm13, %vm2865_vm12 }
 0x5e3   : > { %v2861_v5 = vsub.f32 1.0, %v2860_v45  ;;  %v2870_v45 = vand.u32 2147483648, %v9720_v0 }
 0x5e5   : > { %v2862_v62 = vmul.f32 %v9753_v46, %v2861_v5  ;;  %v2871_v5 = vor.u32 1.1754944e-38, %v2870_v45 }
 0x5e6   : > { %6111 = vmatmul.msk.f32.gmra.mxu0 %vm3426_vm9, %v9438_v57 }
 0x5e7   : > { %v9697_v48 = vpop.f32.mrf.mxu1  ;;  %6075 = vmatmul.msk.f32.gmra.mxu2 %vm3426_vm9, %v9582_v22 }
 0x5e8   : > { %6100 = vmatmul.msk.f32.gmra.mxu3 %vm3426_vm9, %v9535_v42 }
 0x5ea   : > { %6136 = vmatmul.msk.f32.gmra.mxu1 %vm3426_vm9, %v9404_v8 }
 0x5eb   : > { %v9709_v34 = vpop.f32.mrf.mxu0 }
 0x5ee   : > { %6112 = vmatmul.msk.f32.gmra.mxu0 %vm3426_vm9, %v9470_v43 }
 0x5ef   : > { %v9713_v53 = vpop.f32.mrf.mxu1  ;;  %6076 = vmatmul.msk.f32.gmra.mxu2 %vm3426_vm9, %v9598_v4 }
 0x5f0   : > { %6101 = vmatmul.msk.f32.gmra.mxu3 %vm3426_vm9, %v9582_v22 }
 0x5f2   : > { %6137 = vmatmul.msk.f32.gmra.mxu1 %vm3426_vm9, %v9438_v57 }
 0x5f3   : > { %v9731_v24 = vpop.f32.mrf.mxu0 }
 0x5f6   : > { %6113 = vmatmul.msk.f32.gmra.mxu0 %vm3426_vm9, %v9535_v42 }
 0x5f7   : > { %v9740_v9 = vpop.f32.mrf.mxu1  ;;  %6118 = vmatmul.msk.f32.vlgmr.msra.gmra.mxu2 %vm3426_vm9, %v9748_v23 }
 0x5f8   : > { %6102 = vmatmul.msk.f32.gmra.mxu3 %vm3426_vm9, %v9598_v4  ;;  %6221 = vmatpush.msk.msra.mxu2 %vm3463_vm5, %v3309_v11  ;;  %v9779_v11 = vld [vmem:[%s9153_s9 + $0x58] sm:$0xff] }
 0x5f9   : > { %11451 = vst [vmem:[#allocation49_spill] sm:$0xff] %v9779_v11 }
 0x5fa   : > { %4221 = vmatpush.msra.mxu2 %v3307_v54  ;;  %6138 = vmatmul.msk.f32.gmra.mxu1 %vm3426_vm9, %v9470_v43  ;;  %v3349_v54 = vsel %vm3341_vm7, %v3343_v18, 0.0  ;;  %v2868_v18 = vand.u32 2147483647, %v9720_v0  ;;  %v6918_v0 = vld [vmem:[%s9016_s20] sm:$0xff] }
 0x5fb   : > { %v9758_v47 = vpop.f32.mrf.mxu0 }
 0x5fc   : > { %4222 = vmatpush.msra.mxu2 %v3305_v25  ;;  %v3371_v25 = vadd.f32 %v3365_v3, %v3349_v54  ;;  %vm2869_vm10 = vcmp.eq.f32.partialorder %v2868_v18, 8.507059e+37 }
 0x5fe   : > { %6114 = vmatmul.msk.f32.gmra.mxu0 %vm3426_vm9, %v9582_v22  ;;  %v3379_v2 = vmul.f32 %v3373_v13, %v3371_v25  ;;  %v2949_v13 = vld [vmem:[#allocation10] sm:$0xff] }
 0x5ff   : > { %v9765_v31 = vpop.f32.mrf.mxu1  ;;  %6119 = vmatmul.msk.f32.gmra.mxu2 %vm3426_vm9, %v9784_v12  ;;  %v2955_v56 = vadd.f32 %v6918_v0, %v2949_v13 }
 0x600   : > { %6103 = vmatmul.msk.f32.gmra.mxu3 %vm3426_vm9, %v9779_v11 }
 0x602   : > { %6139 = vmatmul.msk.f32.gmra.mxu1 %vm3426_vm9, %v9535_v42 }
 0x603   : > { %v9791_v38 = vpop.f32.mrf.mxu0 }
 0x606   : > { %6115 = vmatmul.msk.f32.gmra.mxu0 %vm3426_vm9, %v9598_v4 }
 0x607   : > { %v9798_v35 = vpop.f32.mrf.mxu1  ;;  %6120 = vmatmul.msk.f32.gmra.mxu2 %vm3426_vm9, %v9335_v26  ;;  %v2863_v26 = vadd.f32 %v9753_v46, %v2862_v62 }
 0x608   : > { %6144 = vmatmul.msk.f32.vlgmr.msra.gmra.mxu3 %vm3426_vm9, %v9748_v23 }
 0x609   : > { %6247 = vmatpush.msk.msra.mxu3 %vm3463_vm5, %v3379_v2  ;;  %v2867_v3 = vsel %vm2866_vm6, %v9753_v46, %v2863_v26  ;;  %v2608_v2 = vpop.f32.mrf.mxu2 }
 0x60a   : > { %6140 = vmatmul.msk.f32.gmra.mxu1 %vm3426_vm9, %v9582_v22  ;;  %v2872_v54 = vsel %vm2869_vm10, %v2871_v5, %v2867_v3  ;;  %v2650_v58 = vadd.f32 %v9656_v7, %v2608_v2  ;;  %v4484_v7 = vmax.f32 %v2955_v56, 0.0 }
 0x60b   : > { %4327 = vmatpush.msra.mxu3 %v3377_v52  ;;  %v9812_v63 = vpop.f32.mrf.mxu0  ;;  %v3418_v41 = vperm.slane %v2872_v54, 0 }
 0x60c   : > { %v2691_v45 = vadd.f32 %v2690_v49, %v2650_v58 }
 0x60d   : > { %4328 = vmatpush.msra.mxu3 %v3375_v1  ;;  %v3424_v62 = vmul.f32 %v3418_v41, %v9641_v21  ;;  %v3422_v40 = vmul.f32 %v3418_v41, %v9651_v59  ;;  %v3420_v1 = vmul.f32 %v3418_v41, %v9653_v36  ;;  %v9859_v59 = vld [vmem:[%s9153_s9 + $0x18] sm:$0xff]  ;;  %v4486_v41 = vmin.f32 %v4484_v7, 17.0 }
 0x60e   : > { %6116 = vmatmul.msk.f32.gmra.mxu0 %vm3426_vm9, %v9779_v11  ;;  %v6051_v13 = vmul.f32 -1.442695, %v2691_v45 }
 0x60f   : > { %v9818_v29 = vpop.f32.mrf.mxu1  ;;  %6121 = vmatmul.msk.f32.gmra.mxu2 %vm3426_vm9, %v9369_v39  ;;  %v4472_v39 = vfloor.f32 %v2955_v56 }
 0x610   : > { %6145 = vmatmul.msk.f32.gmra.mxu3 %vm3426_vm9, %v9784_v12  ;;  %6911 = vpow2.f32 %v6051_v13 }
 0x611   : > { %v4478_v52 = vadd.f32 1.0, %v4472_v39  ;;  %v4474_v3 = vmax.f32 %v4472_v39, 0.0 }
 0x612   : > { %6141 = vmatmul.msk.f32.gmra.mxu1 %vm3426_vm9, %v9598_v4 }
 0x613   : > { %v9832_v46 = vpop.f32.mrf.mxu0  ;;  %v4480_v18 = vmax.f32 %v4478_v52, 0.0  ;;  %v9873_v0 = vmin.f32 %v4474_v3, 17.0 }
 0x615   : > { %v9871_v54 = vmin.f32 %v4480_v18, 17.0  ;;  %v4488_v2 = vsub.f32 %v9873_v0, %v4486_v41  ;;  %v4559_v13 = vperm.slane %v9873_v0, 1 }
 0x616   : > { %6157 = vmatmul.msk.f32.vlgmr.msrb.gmra.mxu0 %vm3426_vm9, %v9748_v23  ;;  %v6912_v58 = vpop.eup %6911 }
 0x617   : > { %v9834_v25 = vpop.f32.mrf.mxu1  ;;  %6122 = vmatmul.msk.f32.gmra.mxu2 %vm3426_vm9, %v9379_v44  ;;  %6260 = vmatpush.msk.msrb.mxu0 %vm3463_vm5, %v3424_v62  ;;  %v4492_v56 = vsub.f32 %v9871_v54, %v4486_v41  ;;  %v9898_v18 = vadd.f32 1.0, %v6912_v58  ;;  %vm4565_vm15 = vcmp.eq.f32.partialorder %v9050_v20, %v4559_v13  ;;  %vm4563_vm2 = vcmp.eq.f32.partialorder %v9053_v14, %v4559_v13 }
 0x618   : > { %6146 = vmatmul.msk.f32.gmra.mxu3 %vm3426_vm9, %v9839_v16  ;;  %vm4561_vm7 = vcmp.eq.f32.partialorder %v9062_v30, %v4559_v13 }
 0x619   : > { %4380 = vmatpush.msrb.mxu0 %v3422_v40  ;;  %v9891_v52 = vsub.f32 1.0, %v4492_v56  ;;  %6913 = vrcp.f32 %v9898_v18  ;;  %vm2879_vm3 = vweird.f32 %v9898_v18 }
 0x61a   : > { %6142 = vmatmul.msk.f32.gmra.mxu1 %vm3426_vm9, %v9779_v11 }
 0x61b   : > { %v9852_v21 = vpop.f32.mrf.mxu0  ;;  %4381 = vmatpush.msrb.mxu0 %v3420_v1  ;;  %v9893_v1 = vadd.f32 1.0, %v4488_v2  ;;  %v4583_v3 = vperm.slane %v9891_v52, 1 }
 0x61d   : > { %v4567_v41 = vperm.slane %v9893_v1, 1 }
 0x61e   : > { %6158 = vmatmul.msk.f32.gmra.mxu0 %vm3426_vm9, %v9784_v12 }
 0x61f   : > { %v9854_v26 = vpop.f32.mrf.mxu1  ;;  %6123 = vmatmul.msk.f32.gmra.mxu2 %vm3426_vm9, %v9404_v8  ;;  %v4573_v58 = vsel %vm4565_vm15, %v4567_v41, 0.0  ;;  %v4571_v27 = vsel %vm4563_vm2, %v4567_v41, 0.0  ;;  %v9930_v37 = vpop.eup %6913 }
 0x620   : > { %6147 = vmatmul.msk.f32.gmra.mxu3 %vm3426_vm9, %v9859_v59  ;;  %vm2880_vm8 = vweird.f32 %v9930_v37 }
 0x621   : > { %vm2881_vm4 = vmor %vm2879_vm3, %vm2880_vm8 }
 0x622   : > { %v9865_v36 = vpop.f32.mrf.mxu2  ;;  %6183 = vmatmul.msk.f32.vlgmr.msrb.gmra.mxu1 %vm3426_vm9, %v9748_v23 }
 0x623   : > { %11452 = vst [vmem:[#allocation50_spill] sm:$0xff] %v9865_v36  ;;  %v9867_v5 = vpop.f32.mrf.mxu3  ;;  %v9875_v62 = vpop.f32.mrf.mxu0 }
 0x624   : > { %11453 = vst [vmem:[#allocation47_spill] sm:$0xff] %v9867_v5 }
 0x626   : > { %6159 = vmatmul.msk.f32.gmra.mxu0 %vm3426_vm9, %v9839_v16 }
 0x627   : > { %6124 = vmatmul.msk.f32.gmra.mxu2 %vm3426_vm9, %v9438_v57  ;;  %v3668_v39 = vpop.f32.mrf.mxu1 }
 0x628   : > { %6148 = vmatmul.msk.f32.gmra.mxu3 %vm3426_vm9, %v9379_v44  ;;  %v4575_v44 = vperm.slane %v9871_v54, 1 }
 0x62a   : > { %v9885_v49 = vpop.f32.mrf.mxu2  ;;  %6184 = vmatmul.msk.f32.gmra.mxu1 %vm3426_vm9, %v9784_v12  ;;  %vm4581_vm14 = vcmp.eq.f32.partialorder %v9050_v20, %v4575_v44  ;;  %vm4579_vm0 = vcmp.eq.f32.partialorder %v9053_v14, %v4575_v44  ;;  %vm4577_vm1 = vcmp.eq.f32.partialorder %v9062_v30, %v4575_v44 }
 0x62b   : > { %11454 = vst [vmem:[#allocation33_spill] sm:$0xff] %v9885_v49  ;;  %v9887_v40 = vpop.f32.mrf.mxu3  ;;  %v9896_v45 = vpop.f32.mrf.mxu0  ;;  %v4587_v33 = vsel %vm4579_vm0, %v4583_v3, 0.0 }
 0x62e   : > { %6160 = vmatmul.msk.f32.gmra.mxu0 %vm3426_vm9, %v9859_v59 }
 0x62f   : > { %6125 = vmatmul.msk.f32.gmra.mxu2 %vm3426_vm9, %v9470_v43  ;;  %v3671_v7 = vpop.f32.mrf.mxu1 }
 0x630   : > { %6149 = vmatmul.msk.f32.gmra.mxu3 %vm3426_vm9, %v9404_v8  ;;  %v4589_v8 = vsel %vm4581_vm14, %v4583_v3, 0.0 }
 0x631   : > { %v9919_v60 = vadd.f32 %v4589_v8, %v4573_v58  ;;  %v4585_v8 = vsel %vm4577_vm1, %v4583_v3, 0.0  ;;  %v4593_v58 = vadd.f32 %v4587_v33, %v4571_v27  ;;  %v2875_v27 = vmul.f32 %v9930_v37, %v9898_v18 }
 0x632   : > { %v9910_v56 = vpop.f32.mrf.mxu2  ;;  %6185 = vmatmul.msk.f32.gmra.mxu1 %vm3426_vm9, %v9839_v16 }
 0x633   : > { %11455 = vst [vmem:[#allocation48_spill] sm:$0xff] %v9910_v56  ;;  %v9912_v2 = vpop.f32.mrf.mxu3  ;;  %v9921_v55 = vpop.f32.mrf.mxu0  ;;  %v4617_v44 = vmul.f32 %v4593_v58, %v3671_v7  ;;  %v2876_v56 = vsub.f32 1.0, %v2875_v27  ;;  %v9957_v7 = vld [vmem:[%s9153_s9 + $0x28] sm:$0xff] }
 0x634   : > { %11456 = vst [vmem:[#allocation34_spill] sm:$0xff] %v9921_v55 }
 0x636   : > { %6161 = vmatmul.msk.f32.gmra.mxu0 %vm3426_vm9, %v9933_v32 }
 0x637   : > { %6126 = vmatmul.msk.f32.gmra.mxu2 %vm3426_vm9, %v9535_v42  ;;  %v3674_v50 = vpop.f32.mrf.mxu1 }
 0x638   : > { %6150 = vmatmul.msk.f32.gmra.mxu3 %vm3426_vm9, %v9438_v57  ;;  %v4619_v10 = vmul.f32 %v9919_v60, %v3674_v50  ;;  %v4569_v50 = vsel %vm4561_vm7, %v4567_v41, 0.0 }
 0x639   : > { %v4591_v33 = vadd.f32 %v4585_v8, %v4569_v50  ;;  %v4607_v50 = vmul.f32 %v9919_v60, %v9798_v35  ;;  %v2885_v35 = vand.u32 2147483648, %v9898_v18 }
 0x63a   : > { %v9938_v36 = vpop.f32.mrf.mxu2  ;;  %6186 = vmatmul.msk.f32.gmra.mxu1 %vm3426_vm9, %v9859_v59 }
 0x63b   : > { %11457 = vst [vmem:[#allocation51_spill] sm:$0xff] %v9938_v36  ;;  %v9940_v57 = vpop.f32.mrf.mxu3  ;;  %4631 = vmatpush.msrb.mxu1 %v4619_v10  ;;  %v4615_v3 = vmul.f32 %v4591_v33, %v3668_v39  ;;  %v9946_v49 = vpop.f32.mrf.mxu0  ;;  %v4613_v10 = vmul.f32 %v9919_v60, %v9854_v26  ;;  %v4611_v39 = vmul.f32 %v4593_v58, %v9834_v25 }
 0x63c   : > { %11458 = vst [vmem:[#allocation35_spill] sm:$0xff] %v9946_v49  ;;  %v4609_v26 = vmul.f32 %v4591_v33, %v9818_v29  ;;  %v4605_v29 = vmul.f32 %v4593_v58, %v9765_v31  ;;  %v4601_v31 = vmul.f32 %v9919_v60, %v9713_v53  ;;  %v4597_v60 = vmul.f32 %v4591_v33, %v9678_v61 }
 0x63d   : > { %4632 = vmatpush.msrb.mxu1 %v4617_v44 }
 0x63e   : > { %6162 = vmatmul.msk.f32.gmra.mxu0 %vm3426_vm9, %v9957_v7 }
 0x63f   : > { %6127 = vmatmul.msk.f32.gmra.mxu2 %vm3426_vm9, %v9582_v22  ;;  %v9952_v13 = vpop.f32.mrf.mxu1  ;;  %4633 = vmatpush.msrb.mxu1 %v4615_v3  ;;  %v2883_v3 = vand.u32 2147483647, %v9898_v18 }
 0x640   : > { %6151 = vmatmul.msk.f32.gmra.mxu3 %vm3426_vm9, %v9470_v43  ;;  %11459 = vst [vmem:[#allocation52_spill] sm:$0xff] %v9952_v13  ;;  %v2877_v43 = vmul.f32 %v9930_v37, %v2876_v56  ;;  %v9985_v56 = vld [vmem:[%s9153_s9 + $0x30] sm:$0xff] }
 0x641   : > { %4634 = vmatpush.msrb.mxu1 %v4613_v10  ;;  %v4603_v10 = vmul.f32 %v4591_v33, %v9740_v9  ;;  %vm2884_vm11 = vcmp.eq.f32.partialorder %v2883_v3, 8.507059e+37  ;;  %v4599_v9 = vmul.f32 %v4593_v58, %v9697_v48 }
 0x642   : > { %v9962_v41 = vpop.f32.mrf.mxu2  ;;  %6187 = vmatmul.msk.f32.gmra.mxu1 %vm3426_vm9, %v9933_v32  ;;  %v2878_v27 = vadd.f32 %v9930_v37, %v2877_v43 }
 0x643   : > { %11460 = vst [vmem:[#allocation36_spill] sm:$0xff] %v9962_v41  ;;  %v9964_v8 = vpop.f32.mrf.mxu3  ;;  %4635 = vmatpush.msrb.mxu1 %v4611_v39  ;;  %v9972_v44 = vpop.f32.mrf.mxu0  ;;  %v4512_v41 = vperm.slane %v9871_v54, 0 }
 0x644   : > { %11461 = vst [vmem:[#allocation54_spill] sm:$0xff] %v9972_v44 }
 0x645   : > { %4636 = vmatpush.msrb.mxu1 %v4609_v26  ;;  %v2882_v26 = vsel %vm2881_vm4, %v9930_v37, %v2878_v27  ;;  %v10012_v37 = vld [vmem:[%s9153_s9 + $0x38] sm:$0xff]  ;;  %vm4516_vm10 = vcmp.eq.f32.partialorder %v9053_v14, %v4512_v41  ;;  %vm4514_vm14 = vcmp.eq.f32.partialorder %v9062_v30, %v4512_v41 }
 0x646   : > { %6163 = vmatmul.msk.f32.gmra.mxu0 %vm3426_vm9, %v9985_v56 }
 0x647   : > { %6128 = vmatmul.msk.f32.gmra.mxu2 %vm3426_vm9, %v9598_v4  ;;  %v9978_v25 = vpop.f32.mrf.mxu1  ;;  %4637 = vmatpush.msrb.mxu1 %v4607_v50  ;;  %v2886_v50 = vor.u32 1.1754944e-38, %v2885_v35 }
 0x648   : > { %6152 = vmatmul.msk.f32.gmra.mxu3 %vm3426_vm9, %v9535_v42  ;;  %11462 = vst [vmem:[#allocation38_spill] sm:$0xff] %v9978_v25 }
 0x649   : > { %4638 = vmatpush.msrb.mxu1 %v4605_v29  ;;  %v2887_v13 = vsel %vm2884_vm11, %v2886_v50, %v2882_v26 }
 0x64a   : > { %v9992_v39 = vpop.f32.mrf.mxu2  ;;  %6188 = vmatmul.msk.f32.gmra.mxu1 %vm3426_vm9, %v9957_v7  ;;  %v3419_v58 = vperm.slane %v2887_v13, 0 }
 0x64b   : > { %11463 = vst [vmem:[#allocation53_spill] sm:$0xff] %v9992_v39  ;;  %v9994_v43 = vpop.f32.mrf.mxu3  ;;  %4639 = vmatpush.msrb.mxu1 %v4603_v10  ;;  %v10002_v18 = vpop.f32.mrf.mxu0  ;;  %v2950_v10 = vld [vmem:[#allocation10 + $0x8] sm:$0xff] }
 0x64c   : > { %11464 = vst [vmem:[#allocation37_spill] sm:$0xff] %v10002_v18  ;;  %v3425_v61 = vmul.f32 %v3419_v58, %v9769_v6  ;;  %v3423_v13 = vmul.f32 %v3419_v58, %v9771_v15  ;;  %v3421_v6 = vmul.f32 %v3419_v58, %v9773_v17 }
 0x64d   : > { %4640 = vmatpush.msrb.mxu1 %v4601_v31  ;;  %v6925_v31 = vld [vmem:[%s9016_s20 + $0x8] sm:$0xff] }
 0x64e   : > { %6164 = vmatmul.msk.f32.gmra.mxu0 %vm3426_vm9, %v10012_v37  ;;  %v2956_v26 = vadd.f32 %v6925_v31, %v2950_v10 }
 0x64f   : > { %6129 = vmatmul.msk.f32.gmra.mxu2 %vm3426_vm9, %v9779_v11  ;;  %v10008_v29 = vpop.f32.mrf.mxu1  ;;  %4641 = vmatpush.msrb.mxu1 %v4599_v9 }
 0x650   : > { %6153 = vmatmul.msk.f32.gmra.mxu3 %vm3426_vm9, %v9582_v22  ;;  %11465 = vst [vmem:[#allocation55_spill] sm:$0xff] %v10008_v29  ;;  %v4473_v17 = vfloor.f32 %v2956_v26  ;;  %v4485_v25 = vmax.f32 %v2956_v26, 0.0 }
 0x651   : > { %4642 = vmatpush.msrb.mxu1 %v4597_v60 }
 0x652   : > { %v10016_v48 = vpop.f32.mrf.mxu2  ;;  %6189 = vmatmul.msk.f32.gmra.mxu1 %vm3426_vm9, %v9985_v56  ;;  %v4479_v58 = vadd.f32 1.0, %v4473_v17 }
 0x653   : > { %11466 = vst [vmem:[#allocation41_spill] sm:$0xff] %v10016_v48  ;;  %v10018_v53 = vpop.f32.mrf.mxu3  ;;  %v10022_v27 = vpop.f32.mrf.mxu0 }
 0x656   : > { %6165 = vmatmul.msk.f32.gmra.mxu0 %vm3426_vm9, %v9535_v42 }
 0x657   : > { %6170 = vmatmul.msk.f32.vlgmr.msrb.gmra.mxu2 %vm3426_vm9, %v9748_v23  ;;  %v10029_v33 = vpop.f32.mrf.mxu1 }
 0x658   : > { %6154 = vmatmul.msk.f32.gmra.mxu3 %vm3426_vm9, %v9598_v4  ;;  %11467 = vst [vmem:[#allocation56_spill] sm:$0xff] %v10029_v33  ;;  %6273 = vmatpush.msk.msrb.mxu2 %vm3463_vm5, %v3425_v61  ;;  %vm4518_vm5 = vcmp.eq.f32.partialorder %v9050_v20, %v4512_v41 }
 0x65a   : > { %4433 = vmatpush.msrb.mxu2 %v3423_v13  ;;  %v10035_v35 = vpop.f32.mrf.mxu2  ;;  %6190 = vmatmul.msk.f32.gmra.mxu1 %vm3426_vm9, %v10012_v37 }
 0x65b   : > { %11468 = vst [vmem:[#allocation42_spill] sm:$0xff] %v10035_v35  ;;  %v10037_v3 = vpop.f32.mrf.mxu3  ;;  %v10043_v50 = vpop.f32.mrf.mxu0 }
 0x65c   : > { %4434 = vmatpush.msrb.mxu2 %v3421_v6  ;;  %v4481_v6 = vmax.f32 %v4479_v58, 0.0 }
 0x65e   : > { %6166 = vmatmul.msk.f32.gmra.mxu0 %vm3426_vm9, %v9582_v22  ;;  %v10075_v29 = vmin.f32 %v4481_v6, 17.0 }
 0x65f   : > { %6171 = vmatmul.msk.f32.gmra.mxu2 %vm3426_vm9, %v9784_v12  ;;  %v10049_v15 = vpop.f32.mrf.mxu1 }
 0x660   : > { %6155 = vmatmul.msk.f32.gmra.mxu3 %vm3426_vm9, %v9779_v11  ;;  %11469 = vst [vmem:[#allocation57_spill] sm:$0xff] %v10049_v15 }
 0x661   : > { %11473 = vst [vmem:[#allocation59_spill] sm:$0xff] %v10075_v29 }
 0x662   : > { %v10053_v9 = vpop.f32.mrf.mxu2  ;;  %6191 = vmatmul.msk.f32.gmra.mxu1 %vm3426_vm9, %v9535_v42  ;;  %v4475_v42 = vmax.f32 %v4473_v17, 0.0 }
 0x663   : > { %11470 = vst [vmem:[#allocation45_spill] sm:$0xff] %v10053_v9  ;;  %v10055_v60 = vpop.f32.mrf.mxu3  ;;  %v10059_v61 = vpop.f32.mrf.mxu0 }
 0x664   : > { %v10085_v15 = vmin.f32 %v4475_v42, 17.0 }
 0x666   : > { %6167 = vmatmul.msk.f32.gmra.mxu0 %vm3426_vm9, %v9598_v4  ;;  %11475 = vst [vmem:[#allocation61_spill] sm:$0xff] %v10085_v15 }
 0x667   : > { %6172 = vmatmul.msk.f32.gmra.mxu2 %vm3426_vm9, %v9839_v16  ;;  %v10065_v13 = vpop.f32.mrf.mxu1 }
 0x668   : > { %6196 = vmatmul.msk.f32.vlgmr.msrb.gmra.mxu3 %vm3426_vm9, %v9748_v23  ;;  %11471 = vst [vmem:[#allocation58_spill] sm:$0xff] %v10065_v13  ;;  %v4487_v13 = vmin.f32 %v4485_v25, 17.0 }
 0x66a   : > { %v10069_v10 = vpop.f32.mrf.mxu2  ;;  %6192 = vmatmul.msk.f32.gmra.mxu1 %vm3426_vm9, %v9582_v22  ;;  %v4493_v22 = vsub.f32 %v10075_v29, %v4487_v13  ;;  %v4489_v6 = vsub.f32 %v10085_v15, %v4487_v13  ;;  %v4576_v13 = vperm.slane %v10075_v29, 1 }
 0x66b   : > { %11472 = vst [vmem:[#allocation46_spill] sm:$0xff] %v10069_v10  ;;  %v10071_v31 = vpop.f32.mrf.mxu3  ;;  %v10077_v33 = vpop.f32.mrf.mxu0 }
 0x66c   : > { %v10097_v36 = vsub.f32 1.0, %v4493_v22  ;;  %v10107_v42 = vadd.f32 1.0, %v4489_v6  ;;  %v4496_v22 = vperm.slane %v9873_v0, 0  ;;  %v4560_v6 = vperm.slane %v10085_v15, 1 }
 0x66d   : > { %vm4582_vm12 = vcmp.eq.f32.partialorder %v9050_v20, %v4576_v13  ;;  %vm4580_vm2 = vcmp.eq.f32.partialorder %v9053_v14, %v4576_v13  ;;  %vm4578_vm1 = vcmp.eq.f32.partialorder %v9062_v30, %v4576_v13 }
 0x66e   : > { %6168 = vmatmul.msk.f32.gmra.mxu0 %vm3426_vm9, %v9779_v11  ;;  %11477 = vst [vmem:[#allocation63_spill] sm:$0xff] %v10097_v36  ;;  %v4584_v39 = vperm.slane %v10097_v36, 1  ;;  %v4568_v9 = vperm.slane %v10107_v42, 1  ;;  %vm4498_vm13 = vcmp.eq.f32.partialorder %v9062_v30, %v4496_v22  ;;  %vm4502_vm6 = vcmp.eq.f32.partialorder %v9050_v20, %v4496_v22 }
 0x66f   : > { %6173 = vmatmul.msk.f32.gmra.mxu2 %vm3426_vm9, %v9859_v59  ;;  %v10083_v58 = vpop.f32.mrf.mxu1  ;;  %11479 = vst [vmem:[#allocation65_spill] sm:$0xff] %v10107_v42  ;;  %vm4566_vm15 = vcmp.eq.f32.partialorder %v9050_v20, %v4560_v6  ;;  %vm4500_vm0 = vcmp.eq.f32.partialorder %v9053_v14, %v4496_v22  ;;  %vm4564_vm7 = vcmp.eq.f32.partialorder %v9053_v14, %v4560_v6 }
 0x670   : > { %6197 = vmatmul.msk.f32.gmra.mxu3 %vm3426_vm9, %v9784_v12  ;;  %11474 = vst [vmem:[#allocation60_spill] sm:$0xff] %v10083_v58  ;;  %v4574_v29 = vsel %vm4566_vm15, %v4568_v9, 0.0  ;;  %v4588_v55 = vsel %vm4580_vm2, %v4584_v39, 0.0  ;;  %vm4562_vm8 = vcmp.eq.f32.partialorder %v9062_v30, %v4560_v6 }
 0x671   : > { %v4570_v13 = vsel %vm4562_vm8, %v4568_v9, 0.0 }
 0x672   : > { %v10090_v26 = vpop.f32.mrf.mxu2  ;;  %6193 = vmatmul.msk.f32.gmra.mxu1 %vm3426_vm9, %v9598_v4  ;;  %v4520_v4 = vperm.slane %v9891_v52, 0 }
 0x673   : > { %11476 = vst [vmem:[#allocation62_spill] sm:$0xff] %v10090_v26  ;;  %v10092_v17 = vpop.f32.mrf.mxu3  ;;  %v10099_v58 = vpop.f32.mrf.mxu0 }
 0x674   : > { %v4526_v10 = vsel %vm4518_vm5, %v4520_v4, 0.0  ;;  %v4524_v15 = vsel %vm4516_vm10, %v4520_v4, 0.0  ;;  %v4522_v41 = vsel %vm4514_vm14, %v4520_v4, 0.0 }
 0x676   : > { %6209 = vmatmul.msk.f32.vlgmr.msra.gmra.mxu0 %vm3426_vm9, %v9748_v23 }
 0x677   : > { %6174 = vmatmul.msk.f32.gmra.mxu2 %vm3426_vm9, %v9933_v32  ;;  %v10105_v25 = vpop.f32.mrf.mxu1 }
 0x678   : > { %6198 = vmatmul.msk.f32.gmra.mxu3 %vm3426_vm9, %v9839_v16  ;;  %11478 = vst [vmem:[#allocation64_spill] sm:$0xff] %v10105_v25  ;;  %v4504_v25 = vperm.slane %v9893_v1, 0 }
 0x67a   : > { %v10116_v35 = vpop.f32.mrf.mxu2  ;;  %6194 = vmatmul.msk.f32.gmra.mxu1 %vm3426_vm9, %v9779_v11  ;;  %v4510_v5 = vsel %vm4502_vm6, %v4504_v25, 0.0  ;;  %v4508_v11 = vsel %vm4500_vm0, %v4504_v25, 0.0  ;;  %v4506_v4 = vsel %vm4498_vm13, %v4504_v25, 0.0  ;;  %v4726_v25 = vperm.slane %v9871_v54, 2 }
 0x67b   : > { %v3724_v48 = vpop.f32.mrf.mxu3  ;;  %11480 = vst [vmem:[#allocation66_spill] sm:$0xff] %v10116_v35  ;;  %v4590_v35 = vsel %vm4582_vm12, %v4584_v39, 0.0  ;;  %v10128_v26 = vpop.f32.mrf.mxu0  ;;  %v10138_v36 = vadd.f32 %v4526_v10, %v4510_v5  ;;  %v10148_v18 = vadd.f32 %v4524_v15, %v4508_v11 }
 0x67c   : > { %v10142_v49 = vadd.f32 %v4590_v35, %v4574_v29  ;;  %v4586_v29 = vsel %vm4578_vm1, %v4584_v39, 0.0  ;;  %v4572_v35 = vsel %vm4564_vm7, %v4568_v9, 0.0  ;;  %vm4732_vm3 = vcmp.eq.f32.partialorder %v9050_v20, %v4726_v25 }
 0x67d   : > { %v4556_v44 = vmul.f32 %v10138_v36, %v9666_v28  ;;  %v10159_v28 = vadd.f32 %v4522_v41, %v4506_v4  ;;  %v4554_v11 = vmul.f32 %v10148_v18, %v9896_v45  ;;  %v10164_v15 = vadd.f32 %v4588_v55, %v4572_v35 }
 0x67e   : > { %6210 = vmatmul.msk.f32.gmra.mxu0 %vm3426_vm9, %v9784_v12  ;;  %v10169_v22 = vadd.f32 %v4586_v29, %v4570_v13  ;;  %v4734_v41 = vperm.slane %v9891_v52, 2  ;;  %v4710_v45 = vperm.slane %v9873_v0, 2  ;;  %v4548_v9 = vmul.f32 %v10148_v18, %v9832_v46 }
 0x67f   : > { %6175 = vmatmul.msk.f32.gmra.mxu2 %vm3426_vm9, %v9957_v7  ;;  %v10136_v42 = vpop.f32.mrf.mxu1  ;;  %v4552_v39 = vmul.f32 %v10159_v28, %v9875_v62  ;;  %v4550_v62 = vmul.f32 %v10138_v36, %v9852_v21  ;;  %v4614_v4 = vmul.f32 %v10142_v49, %v10071_v31  ;;  %vm4730_vm11 = vcmp.eq.f32.partialorder %v9053_v14, %v4726_v25 }
 0x680   : > { %6199 = vmatmul.msk.f32.gmra.mxu3 %vm3426_vm9, %v9859_v59  ;;  %11481 = vst [vmem:[#allocation67_spill] sm:$0xff] %v10136_v42  ;;  %vm4716_vm4 = vcmp.eq.f32.partialorder %v9050_v20, %v4710_v45  ;;  %v4612_v31 = vmul.f32 %v10164_v15, %v10055_v60  ;;  %vm4714_vm5 = vcmp.eq.f32.partialorder %v9053_v14, %v4710_v45  ;;  %v4738_v35 = vsel %vm4730_vm11, %v4734_v41, 0.0 }
 0x681   : > { %v4544_v13 = vmul.f32 %v10138_v36, %v9791_v38  ;;  %vm4728_vm12 = vcmp.eq.f32.partialorder %v9062_v30, %v4726_v25  ;;  %vm4712_vm13 = vcmp.eq.f32.partialorder %v9062_v30, %v4710_v45  ;;  %v4542_v25 = vmul.f32 %v10148_v18, %v9758_v47 }
 0x682   : > { %v10152_v10 = vpop.f32.mrf.mxu2  ;;  %6235 = vmatmul.msk.f32.vlgmr.msra.gmra.mxu1 %vm3426_vm9, %v9748_v23  ;;  %v4604_v47 = vmul.f32 %v10169_v22, %v9964_v8  ;;  %v4540_v8 = vmul.f32 %v10159_v28, %v9731_v24  ;;  %v4538_v24 = vmul.f32 %v10138_v36, %v9709_v34  ;;  %v4534_v36 = vmul.f32 %v10159_v28, %v9676_v19  ;;  %v11486_v19 = vld [vmem:[#allocation37_spill] sm:$0xff] }
 0x683   : > { %v3727_v5 = vpop.f32.mrf.mxu3  ;;  %4674 = vmatpush.msra.mxu1 %v4556_v44  ;;  %v3777_v6 = vpop.f32.mrf.mxu0  ;;  %v4718_v44 = vperm.slane %v9893_v1, 2 }
 0x684   : > { %v4620_v42 = vmul.f32 %v10142_v49, %v3727_v5  ;;  %v4618_v5 = vmul.f32 %v10164_v15, %v3724_v48  ;;  %v4616_v48 = vmul.f32 %v10169_v22, %v10092_v17  ;;  %v4546_v17 = vmul.f32 %v10159_v28, %v9812_v63 }
 0x685   : > { %4675 = vmatpush.msra.mxu1 %v4554_v11  ;;  %v4724_v46 = vsel %vm4716_vm4, %v4718_v44, 0.0  ;;  %v4610_v63 = vmul.f32 %v10169_v22, %v10037_v3  ;;  %v4722_v60 = vsel %vm4714_vm5, %v4718_v44, 0.0  ;;  %v4608_v3 = vmul.f32 %v10142_v49, %v10018_v53 }
 0x686   : > { %4651 = vmatpush.msrb.mxu3 %v4620_v42  ;;  %6211 = vmatmul.msk.f32.gmra.mxu0 %vm3426_vm9, %v9839_v16  ;;  %v4740_v42 = vsel %vm4732_vm3, %v4734_v41, 0.0  ;;  %v10220_v38 = vadd.f32 %v4738_v35, %v4722_v60 }
 0x687   : > { %6176 = vmatmul.msk.f32.gmra.mxu2 %vm3426_vm9, %v9985_v56  ;;  %v10178_v55 = vpop.f32.mrf.mxu1  ;;  %4676 = vmatpush.msra.mxu1 %v4552_v39  ;;  %v10205_v11 = vadd.f32 %v4740_v42, %v4724_v46  ;;  %v4606_v42 = vmul.f32 %v10164_v15, %v9994_v43  ;;  %v4602_v43 = vmul.f32 %v10142_v49, %v9940_v57  ;;  %v10249_v46 = vld [vmem:[%s9153_s9 + $0x40] sm:$0xff] }
 0x688   : > { %6200 = vmatmul.msk.f32.gmra.mxu3 %vm3426_vm9, %v9933_v32  ;;  %v4768_v45 = vmul.f32 %v10220_v38, %v3777_v6  ;;  %v4600_v49 = vmul.f32 %v10164_v15, %v9912_v2  ;;  %v4762_v57 = vmul.f32 %v10220_v38, %v10077_v33  ;;  %v4536_v15 = vmul.f32 %v10148_v18, %v9695_v51  ;;  %v10285_v51 = vld [vmem:[%s9153_s9 + $0x48] sm:$0xff] }
 0x689   : > { %4652 = vmatpush.msrb.mxu3 %v4618_v5  ;;  %4677 = vmatpush.msra.mxu1 %v4550_v62  ;;  %v4736_v5 = vsel %vm4728_vm12, %v4734_v41, 0.0  ;;  %v4720_v41 = vsel %vm4712_vm13, %v4718_v44, 0.0  ;;  %v4764_v6 = vmul.f32 %v10205_v11, %v10099_v58  ;;  %v4598_v58 = vmul.f32 %v10169_v22, %v9887_v40 }
 0x68a   : > { %v10192_v21 = vpop.f32.mrf.mxu2  ;;  %6236 = vmatmul.msk.f32.gmra.mxu1 %vm3426_vm9, %v9784_v12  ;;  %v4758_v34 = vmul.f32 %v10205_v11, %v10043_v50  ;;  %v4756_v40 = vmul.f32 %v10220_v38, %v10022_v27  ;;  %v11487_v27 = vld [vmem:[#allocation54_spill] sm:$0xff] }
 0x68b   : > { %4653 = vmatpush.msrb.mxu3 %v4616_v48  ;;  %v10194_v29 = vpop.f32.mrf.mxu3  ;;  %4678 = vmatpush.msra.mxu1 %v4548_v9  ;;  %v3780_v39 = vpop.f32.mrf.mxu0  ;;  %v4742_v9 = vadd.f32 %v4736_v5, %v4720_v41  ;;  %v4752_v28 = vmul.f32 %v10205_v11, %v11487_v27  ;;  %v11493_v41 = vld [vmem:[#allocation49_spill] sm:$0xff] }
 0x68c   : > { %11482 = vst [vmem:[#allocation68_spill] sm:$0xff] %v10194_v29  ;;  %v4770_v62 = vmul.f32 %v10205_v11, %v3780_v39  ;;  %v11490_v39 = vld [vmem:[#allocation34_spill] sm:$0xff] }
 0x68d   : > { %4654 = vmatpush.msrb.mxu3 %v4614_v4  ;;  %4679 = vmatpush.msra.mxu1 %v4546_v17  ;;  %v4766_v44 = vmul.f32 %v4742_v9, %v10128_v26  ;;  %v4754_v50 = vmul.f32 %v4742_v9, %v11486_v19  ;;  %v4748_v5 = vmul.f32 %v4742_v9, %v11490_v39 }
 0x68e   : > { %6212 = vmatmul.msk.f32.gmra.mxu0 %vm3426_vm9, %v9859_v59 }
 0x68f   : > { %4655 = vmatpush.msrb.mxu3 %v4612_v31  ;;  %6177 = vmatmul.msk.f32.gmra.mxu2 %vm3426_vm9, %v10012_v37  ;;  %v10217_v48 = vpop.f32.mrf.mxu1  ;;  %v4760_v31 = vmul.f32 %v4742_v9, %v10059_v61 }
 0x690   : > { %6201 = vmatmul.msk.f32.gmra.mxu3 %vm3426_vm9, %v9957_v7  ;;  %4680 = vmatpush.msra.mxu1 %v4544_v13  ;;  %v11489_v13 = vld [vmem:[#allocation35_spill] sm:$0xff] }
 0x691   : > { %4656 = vmatpush.msrb.mxu3 %v4610_v63  ;;  %4781 = vmatpush.msra.mxu0 %v4770_v62  ;;  %v4750_v63 = vmul.f32 %v10220_v38, %v11489_v13  ;;  %v10310_v62 = vld [vmem:[%s9153_s9 + $0x50] sm:$0xff] }
 0x692   : > { %v10231_v4 = vpop.f32.mrf.mxu2  ;;  %4681 = vmatpush.msra.mxu1 %v4542_v25 }
 0x693   : > { %4657 = vmatpush.msrb.mxu3 %v4608_v3  ;;  %v10233_v53 = vpop.f32.mrf.mxu3  ;;  %4782 = vmatpush.msra.mxu0 %v4768_v45  ;;  %v10244_v17 = vpop.f32.mrf.mxu0 }
 0x694   : > { %11483 = vst [vmem:[#allocation69_spill] sm:$0xff] %v10233_v53  ;;  %6237 = vmatmul.msk.f32.gmra.mxu1 %vm3426_vm9, %v9839_v16 }
 0x695   : > { %4658 = vmatpush.msrb.mxu3 %v4606_v42  ;;  %4783 = vmatpush.msra.mxu0 %v4766_v44 }
 0x696   : > { %6213 = vmatmul.msk.f32.gmra.mxu0 %vm3426_vm9, %v9933_v32  ;;  %4682 = vmatpush.msra.mxu1 %v4540_v8  ;;  %v11497_v8 = vld [vmem:[#allocation59_spill] sm:$0xff] }
 0x697   : > { %4659 = vmatpush.msrb.mxu3 %v4604_v47  ;;  %6178 = vmatmul.msk.f32.gmra.mxu2 %vm3426_vm9, %v10249_v46  ;;  %v10255_v26 = vpop.f32.mrf.mxu1 }
 0x698   : > { %6202 = vmatmul.msk.f32.gmra.mxu3 %vm3426_vm9, %v9985_v56  ;;  %4784 = vmatpush.msra.mxu0 %v4764_v6 }
 0x699   : > { %4660 = vmatpush.msrb.mxu3 %v4602_v43  ;;  %4683 = vmatpush.msra.mxu1 %v4538_v24 }
 0x69a   : > { %4785 = vmatpush.msra.mxu0 %v4762_v57  ;;  %v10268_v2 = vpop.f32.mrf.mxu2  ;;  %v11498_v57 = vld [vmem:[#allocation63_spill] sm:$0xff] }
 0x69b   : > { %4661 = vmatpush.msrb.mxu3 %v4600_v49  ;;  %v10270_v33 = vpop.f32.mrf.mxu3  ;;  %4684 = vmatpush.msra.mxu1 %v4536_v15  ;;  %v10280_v61 = vpop.f32.mrf.mxu0  ;;  %v4513_v49 = vperm.slane %v11497_v8, 0  ;;  %v4521_v24 = vperm.slane %v11498_v57, 0 }
 0x69c   : > { %11484 = vst [vmem:[#allocation70_spill] sm:$0xff] %v10270_v33  ;;  %4786 = vmatpush.msra.mxu0 %v4760_v31  ;;  %6238 = vmatmul.msk.f32.gmra.mxu1 %vm3426_vm9, %v9859_v59 }
 0x69d   : > { %4662 = vmatpush.msrb.mxu3 %v4598_v58  ;;  %4685 = vmatpush.msra.mxu1 %v4534_v36  ;;  %v11499_v58 = vld [vmem:[#allocation61_spill] sm:$0xff]  ;;  %vm4519_vm6 = vcmp.eq.f32.partialorder %v9050_v20, %v4513_v49  ;;  %vm4517_vm14 = vcmp.eq.f32.partialorder %v9053_v14, %v4513_v49  ;;  %vm4515_vm15 = vcmp.eq.f32.partialorder %v9062_v30, %v4513_v49 }
 0x69e   : > { %4787 = vmatpush.msra.mxu0 %v4758_v34  ;;  %v4497_v31 = vperm.slane %v11499_v58, 0  ;;  %v10395_v49 = vld [vmem:[%s9153_s9] sm:$0xff] }
 0x69f   : > { %6179 = vmatmul.msk.f32.gmra.mxu2 %vm3426_vm9, %v10285_v51  ;;  %v10291_v18 = vpop.f32.mrf.mxu1  ;;  %6214 = vmatmul.msk.f32.gmra.mxu0 %vm3426_vm9, %v9957_v7 }
 0x6a0   : > { %6203 = vmatmul.msk.f32.gmra.mxu3 %vm3426_vm9, %v10012_v37  ;;  %11485 = vst [vmem:[#allocation71_spill] sm:$0xff] %v10291_v18  ;;  %4788 = vmatpush.msra.mxu0 %v4756_v40  ;;  %v4527_v40 = vsel %vm4519_vm6, %v4521_v24, 0.0  ;;  %vm4503_vm10 = vcmp.eq.f32.partialorder %v9050_v20, %v4497_v31  ;;  %vm4501_vm0 = vcmp.eq.f32.partialorder %v9053_v14, %v4497_v31 }
 0x6a1   : > { %vm4499_vm2 = vcmp.eq.f32.partialorder %v9062_v30, %v4497_v31  ;;  %v11503_v31 = vld [vmem:[#allocation62_spill] sm:$0xff] }
 0x6a2   : > { %4789 = vmatpush.msra.mxu0 %v4754_v50  ;;  %v10298_v22 = vpop.f32.mrf.mxu2 }
 0x6a3   : > { %v10300_v35 = vpop.f32.mrf.mxu3  ;;  %v10305_v60 = vpop.f32.mrf.mxu0 }
 0x6a4   : > { %11488 = vst [vmem:[#allocation37_spill] sm:$0xff] %v10300_v35  ;;  %4790 = vmatpush.msra.mxu0 %v4752_v28  ;;  %6239 = vmatmul.msk.f32.gmra.mxu1 %vm3426_vm9, %v9933_v32  ;;  %v4525_v28 = vsel %vm4517_vm14, %v4521_v24, 0.0  ;;  %vm4623_vm14 = vcmask 785408  }
 0x6a6   : > { %4791 = vmatpush.msra.mxu0 %v4750_v63  ;;  %v4523_v63 = vsel %vm4515_vm15, %v4521_v24, 0.0 }
 0x6a7   : > { %6180 = vmatmul.msk.f32.gmra.mxu2 %vm3426_vm9, %v10310_v62  ;;  %v10316_v11 = vpop.f32.mrf.mxu1  ;;  %6215 = vmatmul.msk.f32.gmra.mxu0 %vm3426_vm9, %v9985_v56 }
 0x6a8   : > { %6204 = vmatmul.msk.f32.gmra.mxu3 %vm3426_vm9, %v10249_v46  ;;  %11491 = vst [vmem:[#allocation54_spill] sm:$0xff] %v10316_v11  ;;  %4792 = vmatpush.msra.mxu0 %v4748_v5  ;;  %v11502_v5 = vld [vmem:[#allocation47_spill] sm:$0xff] }
 0x6aa   : > { %v10320_v38 = vpop.f32.mrf.mxu2 }
 0x6ab   : > { %v10322_v3 = vpop.f32.mrf.mxu3  ;;  %v10324_v25 = vpop.f32.mrf.mxu0 }
 0x6ac   : > { %11492 = vst [vmem:[#allocation35_spill] sm:$0xff] %v10322_v3  ;;  %6240 = vmatmul.msk.f32.gmra.mxu1 %vm3426_vm9, %v9957_v7 }
 0x6af   : > { %6181 = vmatmul.msk.f32.gmra.mxu2 %vm3426_vm9, %v11493_v41  ;;  %v10332_v9 = vpop.f32.mrf.mxu1  ;;  %6216 = vmatmul.msk.f32.gmra.mxu0 %vm3426_vm9, %v10012_v37 }
 0x6b0   : > { %6205 = vmatmul.msk.f32.gmra.mxu3 %vm3426_vm9, %v10285_v51  ;;  %11494 = vst [vmem:[#allocation34_spill] sm:$0xff] %v10332_v9 }
 0x6b2   : > { %v10336_v42 = vpop.f32.mrf.mxu2 }
 0x6b3   : > { %v10338_v45 = vpop.f32.mrf.mxu3  ;;  %v10340_v47 = vpop.f32.mrf.mxu0 }
 0x6b4   : > { %11495 = vst [vmem:[#allocation49_spill] sm:$0xff] %v10338_v45  ;;  %6241 = vmatmul.msk.f32.gmra.mxu1 %vm3426_vm9, %v9985_v56  ;;  %v11507_v45 = vld [vmem:[#allocation42_spill] sm:$0xff] }
 0x6b7   : > { %6222 = vmatmul.msk.f32.vlgmr.msra.gmra.mxu2 %vm3426_vm9, %v9748_v23  ;;  %v10348_v44 = vpop.f32.mrf.mxu1  ;;  %6217 = vmatmul.msk.f32.gmra.mxu0 %vm3426_vm9, %v10249_v46  ;;  %v11500_v23 = vld [vmem:[#allocation65_spill] sm:$0xff] }
 0x6b8   : > { %6206 = vmatmul.msk.f32.gmra.mxu3 %vm3426_vm9, %v10310_v62  ;;  %v4505_v34 = vperm.slane %v11500_v23, 0  ;;  %v4719_v3 = vperm.slane %v11500_v23, 2  ;;  %v10437_v23 = vld [vmem:[%s9153_s9 + $0x58] sm:$0xff] }
 0x6ba   : > { %v10352_v43 = vpop.f32.mrf.mxu2  ;;  %v4511_v27 = vsel %vm4503_vm10, %v4505_v34, 0.0  ;;  %v4509_v39 = vsel %vm4501_vm0, %v4505_v34, 0.0  ;;  %v4507_v33 = vsel %vm4499_vm2, %v4505_v34, 0.0  ;;  %v11504_v34 = vld [vmem:[#allocation46_spill] sm:$0xff] }
 0x6bb   : > { %v10354_v6 = vpop.f32.mrf.mxu3  ;;  %v10359_v15 = vpop.f32.mrf.mxu0  ;;  %v10380_v13 = vadd.f32 %v4527_v40, %v4511_v27  ;;  %v10386_v29 = vadd.f32 %v4525_v28, %v4509_v39  ;;  %v10399_v24 = vadd.f32 %v4523_v63, %v4507_v33  ;;  %v4727_v28 = vperm.slane %v11497_v8, 2 }
 0x6bc   : > { %11496 = vst [vmem:[#allocation72_spill] sm:$0xff] %v10354_v6  ;;  %6242 = vmatmul.msk.f32.gmra.mxu1 %vm3426_vm9, %v10012_v37  ;;  %v4711_v63 = vperm.slane %v11499_v58, 2  ;;  %v11509_v58 = vld [vmem:[#allocation53_spill] sm:$0xff] }
 0x6bd   : > { %v4555_v40 = vmul.f32 %v10386_v29, %v11503_v31  ;;  %v4553_v39 = vmul.f32 %v10399_v24, %v11504_v34  ;;  %v11506_v31 = vld [vmem:[#allocation45_spill] sm:$0xff]  ;;  %vm4733_vm1 = vcmp.eq.f32.partialorder %v9050_v20, %v4727_v28  ;;  %v4549_v34 = vmul.f32 %v10386_v29, %v11507_v45 }
 0x6be   : > { %vm4717_vm7 = vcmp.eq.f32.partialorder %v9050_v20, %v4711_v63  ;;  %vm4731_vm8 = vcmp.eq.f32.partialorder %v9053_v14, %v4727_v28  ;;  %vm4729_vm3 = vcmp.eq.f32.partialorder %v9062_v30, %v4727_v28  ;;  %vm4715_vm4 = vcmp.eq.f32.partialorder %v9053_v14, %v4711_v63  ;;  %v11512_v28 = vld [vmem:[#allocation51_spill] sm:$0xff] }
 0x6bf   : > { %6223 = vmatmul.msk.f32.gmra.mxu2 %vm3426_vm9, %v9784_v12  ;;  %v10369_v36 = vpop.f32.mrf.mxu1  ;;  %6218 = vmatmul.msk.f32.gmra.mxu0 %vm3426_vm9, %v10285_v51  ;;  %v4725_v45 = vsel %vm4717_vm7, %v4719_v3, 0.0  ;;  %v4723_v8 = vsel %vm4715_vm4, %v4719_v3, 0.0  ;;  %vm4713_vm11 = vcmp.eq.f32.partialorder %v9062_v30, %v4711_v63 }
 0x6c0   : > { %6207 = vmatmul.msk.f32.gmra.mxu3 %vm3426_vm9, %v11493_v41  ;;  %v4557_v41 = vmul.f32 %v10380_v13, %v11502_v5  ;;  %v4735_v5 = vperm.slane %v11498_v57, 2 }
 0x6c2   : > { %v10375_v19 = vpop.f32.mrf.mxu2  ;;  %v4741_v6 = vsel %vm4733_vm1, %v4735_v5, 0.0  ;;  %v4737_v57 = vsel %vm4729_vm3, %v4735_v5, 0.0 }
 0x6c3   : > { %v10377_v50 = vpop.f32.mrf.mxu3  ;;  %v10388_v53 = vpop.f32.mrf.mxu0 }
 0x6c4   : > { %11501 = vst [vmem:[#allocation73_spill] sm:$0xff] %v10377_v50  ;;  %6243 = vmatmul.msk.f32.gmra.mxu1 %vm3426_vm9, %v10249_v46  ;;  %v4739_v50 = vsel %vm4731_vm8, %v4735_v5, 0.0 }
 0x6c5   : > { %v10451_v11 = vadd.f32 %v4739_v50, %v4723_v8 }
 0x6c7   : > { %6224 = vmatmul.msk.f32.gmra.mxu2 %vm3426_vm9, %v9839_v16  ;;  %v10403_v27 = vpop.f32.mrf.mxu1  ;;  %6219 = vmatmul.msk.f32.gmra.mxu0 %vm3426_vm9, %v10310_v62 }
 0x6c8   : > { %6248 = vmatmul.msk.f32.vlgmr.msra.gmra.mxu3 %vm3426_vm9, %v10395_v49 }
 0x6c9   : > { %4694 = vmatpush.msra.mxu3 %v4557_v41  ;;  %v4551_v41 = vmul.f32 %v10380_v13, %v11506_v31 }
 0x6ca   : > { %v3830_v35 = vpop.f32.mrf.mxu2 }
 0x6cb   : > { %4695 = vmatpush.msra.mxu3 %v4555_v40  ;;  %v10411_v33 = vpop.f32.mrf.mxu3  ;;  %v10420_v40 = vpop.f32.mrf.mxu0  ;;  %v4769_v5 = vmul.f32 %v10451_v11, %v3830_v35  ;;  %v11514_v35 = vld [vmem:[#allocation33_spill] sm:$0xff] }
 0x6cc   : > { %11505 = vst [vmem:[#allocation47_spill] sm:$0xff] %v10411_v33  ;;  %6244 = vmatmul.msk.f32.gmra.mxu1 %vm3426_vm9, %v10285_v51  ;;  %v10434_v33 = vadd.f32 %v4741_v6, %v4725_v45  ;;  %v11511_v45 = vld [vmem:[#allocation36_spill] sm:$0xff]  ;;  %v4537_v50 = vmul.f32 %v10386_v29, %v11514_v35  ;;  %v4944_v35 = vperm.slane %v9871_v54, 4 }
 0x6cd   : > { %4696 = vmatpush.msra.mxu3 %v4553_v39  ;;  %v11508_v39 = vld [vmem:[#allocation41_spill] sm:$0xff]  ;;  %v4543_v18 = vmul.f32 %v10386_v29, %v11511_v45  ;;  %v4835_v29 = vperm.slane %v9871_v54, 3 }
 0x6ce   : > { %v4547_v31 = vmul.f32 %v10399_v24, %v11508_v39  ;;  %v4765_v63 = vmul.f32 %v10434_v33, %v10352_v43  ;;  %vm4950_vm0 = vcmp.eq.f32.partialorder %v9050_v20, %v4944_v35  ;;  %vm4948_vm1 = vcmp.eq.f32.partialorder %v9053_v14, %v4944_v35 }
 0x6cf   : > { %4697 = vmatpush.msra.mxu3 %v4551_v41  ;;  %6225 = vmatmul.msk.f32.gmra.mxu2 %vm3426_vm9, %v9859_v59  ;;  %v10432_v41 = vpop.f32.mrf.mxu1  ;;  %vm4841_vm5 = vcmp.eq.f32.partialorder %v9050_v20, %v4835_v29  ;;  %vm4839_vm12 = vcmp.eq.f32.partialorder %v9053_v14, %v4835_v29  ;;  %vm4837_vm10 = vcmp.eq.f32.partialorder %v9062_v30, %v4835_v29  ;;  %v4928_v29 = vperm.slane %v9873_v0, 4 }
 0x6d0   : > { %6249 = vmatmul.msk.f32.gmra.mxu3 %vm3426_vm9, %v9784_v12  ;;  %6220 = vmatmul.msk.f32.gmra.mxu0 %vm3426_vm9, %v10437_v23  ;;  %v4545_v12 = vmul.f32 %v10380_v13, %v11509_v58  ;;  %v4721_v58 = vsel %vm4713_vm11, %v4719_v3, 0.0  ;;  %v11513_v3 = vld [vmem:[#allocation48_spill] sm:$0xff]  ;;  %vm4946_vm7 = vcmp.eq.f32.partialorder %v9062_v30, %v4944_v35 }
 0x6d1   : > { %4698 = vmatpush.msra.mxu3 %v4549_v34  ;;  %v10455_v9 = vadd.f32 %v4737_v57, %v4721_v58  ;;  %v4539_v8 = vmul.f32 %v10380_v13, %v11513_v3  ;;  %v4819_v58 = vperm.slane %v9873_v0, 3  ;;  %vm4934_vm2 = vcmp.eq.f32.partialorder %v9050_v20, %v4928_v29 }
 0x6d2   : > { %v3833_v39 = vpop.f32.mrf.mxu2  ;;  %vm4932_vm8 = vcmp.eq.f32.partialorder %v9053_v14, %v4928_v29  ;;  %vm4930_vm3 = vcmp.eq.f32.partialorder %v9062_v30, %v4928_v29 }
 0x6d3   : > { %4699 = vmatpush.msra.mxu3 %v4547_v31  ;;  %v10445_v34 = vpop.f32.mrf.mxu3  ;;  %v4771_v6 = vmul.f32 %v10434_v33, %v3833_v39  ;;  %v4541_v31 = vmul.f32 %v10399_v24, %v11512_v28  ;;  %v4767_v57 = vmul.f32 %v10455_v9, %v10375_v19  ;;  %v11515_v19 = vld [vmem:[#allocation50_spill] sm:$0xff]  ;;  %v4763_v39 = vmul.f32 %v10451_v11, %v10336_v42 }
 0x6d4   : > { %11510 = vst [vmem:[#allocation62_spill] sm:$0xff] %v10445_v34  ;;  %v10458_v34 = vpop.f32.mrf.mxu0  ;;  %6245 = vmatmul.msk.f32.gmra.mxu1 %vm3426_vm9, %v10310_v62  ;;  %v4761_v43 = vmul.f32 %v10455_v9, %v10320_v38  ;;  %v4827_v42 = vperm.slane %v9893_v1, 3  ;;  %v10506_v28 = vld [vmem:[%s9153_s9 + $0x8] sm:$0xff]  ;;  %vm4825_vm13 = vcmp.eq.f32.partialorder %v9050_v20, %v4819_v58  ;;  %vm4823_vm6 = vcmp.eq.f32.partialorder %v9053_v14, %v4819_v58 }
 0x6d5   : > { %4700 = vmatpush.msra.mxu3 %v4545_v12  ;;  %4801 = vmatpush.msra.mxu2 %v4771_v6  ;;  %v4535_v12 = vmul.f32 %v10399_v24, %v11515_v19  ;;  %v4843_v6 = vperm.slane %v9891_v52, 3  ;;  %v4759_v24 = vmul.f32 %v10434_v33, %v10298_v22  ;;  %vm4821_vm15 = vcmp.eq.f32.partialorder %v9062_v30, %v4819_v58 }
 0x6d6   : > { %v4831_v19 = vsel %vm4823_vm6, %v4827_v42, 0.0 }
 0x6d7   : > { %4701 = vmatpush.msra.mxu3 %v4543_v18  ;;  %6226 = vmatmul.msk.f32.gmra.mxu2 %vm3426_vm9, %v9933_v32  ;;  %v10470_v18 = vpop.f32.mrf.mxu1  ;;  %v4847_v3 = vsel %vm4839_vm12, %v4843_v6, 0.0 }
 0x6d8   : > { %6250 = vmatmul.msk.f32.gmra.mxu3 %vm3426_vm9, %v9839_v16  ;;  %4802 = vmatpush.msra.mxu2 %v4769_v5 }
 0x6d9   : > { %4702 = vmatpush.msra.mxu3 %v4541_v31  ;;  %6261 = vmatmul.msk.f32.vlgmr.msrb.gmra.mxu0 %vm3426_vm9, %v10395_v49  ;;  %v4849_v31 = vsel %vm4841_vm5, %v4843_v6, 0.0 }
 0x6da   : > { %4803 = vmatpush.msra.mxu2 %v4767_v57  ;;  %v10480_v13 = vpop.f32.mrf.mxu2  ;;  %v4755_v57 = vmul.f32 %v10455_v9, %v10231_v4  ;;  %v10531_v4 = vadd.f32 %v4847_v3, %v4831_v19 }
 0x6db   : > { %4703 = vmatpush.msra.mxu3 %v4539_v8  ;;  %v10478_v16 = vpop.f32.mrf.mxu3  ;;  %v4833_v8 = vsel %vm4825_vm13, %v4827_v42, 0.0 }
 0x6dc   : > { %4804 = vmatpush.msra.mxu2 %v4765_v63  ;;  %v10490_v45 = vpop.f32.mrf.mxu0  ;;  %6246 = vmatmul.msk.f32.gmra.mxu1 %vm3426_vm9, %v10437_v23  ;;  %v4845_v63 = vsel %vm4837_vm10, %v4843_v6, 0.0  ;;  %v4936_v6 = vperm.slane %v9893_v1, 4 }
 0x6dd   : > { %4704 = vmatpush.msra.mxu3 %v4537_v50  ;;  %v10525_v50 = vld [vmem:[#allocation11 + $0x8] sm:$0xff] }
 0x6de   : > { %4805 = vmatpush.msra.mxu2 %v4763_v39  ;;  %v4952_v39 = vperm.slane %v9891_v52, 4 }
 0x6df   : > { %4705 = vmatpush.msra.mxu3 %v4535_v12  ;;  %6227 = vmatmul.msk.f32.gmra.mxu2 %vm3426_vm9, %v9957_v7  ;;  %v10502_v38 = vpop.f32.mrf.mxu1  ;;  %v4753_v12 = vmul.f32 %v10434_v33, %v10192_v21  ;;  %v4829_v21 = vsel %vm4821_vm15, %v4827_v42, 0.0  ;;  %v4751_v33 = vmul.f32 %v10451_v11, %v10152_v10  ;;  %v11516_v10 = vld [vmem:[#allocation66_spill] sm:$0xff] }
 0x6e0   : > { %6251 = vmatmul.msk.f32.gmra.mxu3 %vm3426_vm9, %v9859_v59  ;;  %4806 = vmatpush.msra.mxu2 %v4761_v43  ;;  %v4757_v59 = vmul.f32 %v10451_v11, %v10268_v2  ;;  %v10522_v2 = vadd.f32 %v4849_v31, %v4833_v8  ;;  %v10547_v31 = vadd.f32 %v4845_v63, %v4829_v21  ;;  %v4958_v42 = vsel %vm4950_vm0, %v4952_v39, 0.0 }
 0x6e1   : > { %6262 = vmatmul.msk.f32.gmra.mxu0 %vm3426_vm9, %v10506_v28  ;;  %v4749_v11 = vmul.f32 %v10455_v9, %v11516_v10  ;;  %v4942_v8 = vsel %vm4934_vm2, %v4936_v6, 0.0  ;;  %v11518_v9 = vld [vmem:[#allocation67_spill] sm:$0xff]  ;;  %v4940_v21 = vsel %vm4932_vm8, %v4936_v6, 0.0 }
 0x6e2   : > { %4807 = vmatpush.msra.mxu2 %v4759_v24  ;;  %v10514_v22 = vpop.f32.mrf.mxu2  ;;  %v4879_v24 = vmul.f32 %v10522_v2, %v10255_v26  ;;  %v4877_v26 = vmul.f32 %v10531_v4, %v10217_v48  ;;  %v4875_v48 = vmul.f32 %v10547_v31, %v10178_v55  ;;  %v10567_v63 = vadd.f32 %v4958_v42, %v4942_v8  ;;  %v10588_v42 = vld [vmem:[%s9153_s9 + $0x18] sm:$0xff] }
 0x6e3   : > { %v10512_v5 = vpop.f32.mrf.mxu3  ;;  %v4873_v19 = vmul.f32 %v10522_v2, %v11518_v9  ;;  %v5053_v9 = vperm.slane %v9871_v54, 5 }
 0x6e4   : > { %4808 = vmatpush.msra.mxu2 %v4757_v59  ;;  %v3989_v43 = vpop.f32.mrf.mxu0  ;;  %6286 = vmatmul.msk.f32.vlgmr.msrb.gmra.mxu1 %vm4623_vm14, %v10525_v50 }
 0x6e5   : > { %4890 = vmatpush.msrb.mxu1 %v4879_v24  ;;  %v4954_v24 = vsel %vm4946_vm7, %v4952_v39, 0.0  ;;  %vm5059_vm4 = vcmp.eq.f32.partialorder %v9050_v20, %v5053_v9  ;;  %vm5057_vm5 = vcmp.eq.f32.partialorder %v9053_v14, %v5053_v9  ;;  %vm5055_vm12 = vcmp.eq.f32.partialorder %v9062_v30, %v5053_v9 }
 0x6e6   : > { %4809 = vmatpush.msra.mxu2 %v4755_v57  ;;  %v4956_v57 = vsel %vm4948_vm1, %v4952_v39, 0.0  ;;  %v4938_v39 = vsel %vm4930_vm3, %v4936_v6, 0.0 }
 0x6e7   : > { %6228 = vmatmul.msk.f32.gmra.mxu2 %vm3426_vm9, %v9985_v56  ;;  %v10545_v58 = vpop.f32.mrf.mxu1  ;;  %4891 = vmatpush.msrb.mxu1 %v4877_v26  ;;  %v11519_v26 = vld [vmem:[#allocation64_spill] sm:$0xff]  ;;  %v10583_v35 = vadd.f32 %v4956_v57, %v4940_v21  ;;  %v10596_v8 = vadd.f32 %v4954_v24, %v4938_v39  ;;  %v5061_v21 = vperm.slane %v9891_v52, 5  ;;  %v11523_v24 = vld [vmem:[#allocation57_spill] sm:$0xff]  ;;  %v4982_v39 = vmul.f32 %v10567_v63, %v10458_v34 }
 0x6e8   : > { %6252 = vmatmul.msk.f32.gmra.mxu3 %vm3426_vm9, %v9933_v32  ;;  %4810 = vmatpush.msra.mxu2 %v4753_v12  ;;  %v10553_v32 = vld [vmem:[%s9153_s9 + $0x10] sm:$0xff]  ;;  %v10573_v12 = vld [vmem:[#allocation11] sm:$0xff]  ;;  %v4871_v10 = vmul.f32 %v10531_v4, %v11519_v26 }
 0x6e9   : > { %6263 = vmatmul.msk.f32.gmra.mxu0 %vm3426_vm9, %v10553_v32  ;;  %4892 = vmatpush.msrb.mxu1 %v4875_v48  ;;  %v4986_v29 = vmul.f32 %v10583_v35, %v3989_v43  ;;  %v4984_v26 = vmul.f32 %v10596_v8, %v10490_v45  ;;  %v5037_v43 = vperm.slane %v9873_v0, 5  ;;  %v11525_v45 = vld [vmem:[#allocation56_spill] sm:$0xff] }
 0x6ea   : > { %4811 = vmatpush.msra.mxu2 %v4751_v33  ;;  %v10559_v59 = vpop.f32.mrf.mxu2 }
 0x6eb   : > { %v10561_v3 = vpop.f32.mrf.mxu3  ;;  %4893 = vmatpush.msrb.mxu1 %v4873_v19  ;;  %v11522_v19 = vld [vmem:[#allocation58_spill] sm:$0xff]  ;;  %vm5043_vm11 = vcmp.eq.f32.partialorder %v9050_v20, %v5037_v43  ;;  %vm5041_vm13 = vcmp.eq.f32.partialorder %v9053_v14, %v5037_v43  ;;  %vm5039_vm6 = vcmp.eq.f32.partialorder %v9062_v30, %v5037_v43 }
 0x6ec   : > { %11517 = vst [vmem:[#allocation46_spill] sm:$0xff] %v10561_v3  ;;  %4812 = vmatpush.msra.mxu2 %v4749_v11  ;;  %v3992_v55 = vpop.f32.mrf.mxu0  ;;  %6288 = vmatmul.msk.f32.vlgmr.msra.gmra.mxu1 %vm4623_vm14, %v10573_v12 }
 0x6ed   : > { %v4988_v33 = vmul.f32 %v10567_v63, %v3992_v55  ;;  %4894 = vmatpush.msrb.mxu1 %v4871_v10  ;;  %v4867_v55 = vmul.f32 %v10522_v2, %v11522_v19  ;;  %v5045_v10 = vperm.slane %v9893_v1, 5  ;;  %v4980_v19 = vmul.f32 %v10583_v35, %v10420_v40 }
 0x6ef   : > { %6229 = vmatmul.msk.f32.gmra.mxu2 %vm3426_vm9, %v10012_v37  ;;  %v10585_v11 = vpop.f32.mrf.mxu1  ;;  %4999 = vmatpush.msrb.mxu0 %v4988_v33  ;;  %v4865_v33 = vmul.f32 %v10531_v4, %v11523_v24  ;;  %v5051_v24 = vsel %vm5043_vm11, %v5045_v10, 0.0 }
 0x6f0   : > { %6253 = vmatmul.msk.f32.gmra.mxu3 %vm3426_vm9, %v9957_v7  ;;  %v11520_v7 = vld [vmem:[#allocation60_spill] sm:$0xff] }
 0x6f1   : > { %6264 = vmatmul.msk.f32.gmra.mxu0 %vm3426_vm9, %v10588_v42  ;;  %v4869_v48 = vmul.f32 %v10547_v31, %v11520_v7 }
 0x6f2   : > { %v10599_v57 = vpop.f32.mrf.mxu2  ;;  %5000 = vmatpush.msrb.mxu0 %v4986_v29  ;;  %v5067_v29 = vsel %vm5059_vm4, %v5061_v21, 0.0 }
 0x6f3   : > { %v10601_v6 = vpop.f32.mrf.mxu3  ;;  %4895 = vmatpush.msrb.mxu1 %v4869_v48  ;;  %v4863_v48 = vmul.f32 %v10547_v31, %v11525_v45  ;;  %v4978_v45 = vmul.f32 %v10596_v8, %v10388_v53 }
 0x6f4   : > { %11521 = vst [vmem:[#allocation45_spill] sm:$0xff] %v10601_v6  ;;  %5001 = vmatpush.msrb.mxu0 %v4984_v26  ;;  %v10615_v7 = vpop.f32.mrf.mxu0  ;;  %v11526_v26 = vld [vmem:[#allocation55_spill] sm:$0xff]  ;;  %v5065_v6 = vsel %vm5057_vm5, %v5061_v21, 0.0 }
 0x6f5   : > { %4896 = vmatpush.msrb.mxu1 %v4867_v55  ;;  %11524 = vst [vmem:[#allocation42_spill] sm:$0xff] %v10615_v7  ;;  %v10628_v55 = vld [vmem:[%s9153_s9 + $0x20] sm:$0xff]  ;;  %v11527_v7 = vld [vmem:[#allocation38_spill] sm:$0xff] }
 0x6f6   : > { %5002 = vmatpush.msrb.mxu0 %v4982_v39  ;;  %v10641_v39 = vadd.f32 %v5067_v29, %v5051_v24  ;;  %v4859_v3 = vmul.f32 %v10531_v4, %v11527_v7  ;;  %v5063_v29 = vsel %vm5055_vm12, %v5061_v21, 0.0  ;;  %v4974_v4 = vmul.f32 %v10583_v35, %v10340_v47 }
 0x6f7   : > { %6230 = vmatmul.msk.f32.gmra.mxu2 %vm3426_vm9, %v10249_v46  ;;  %4897 = vmatpush.msrb.mxu1 %v4865_v33  ;;  %v4098_v34 = vpop.f32.mrf.mxu1  ;;  %v4972_v21 = vmul.f32 %v10596_v8, %v10324_v25 }
 0x6f8   : > { %6254 = vmatmul.msk.f32.gmra.mxu3 %vm3426_vm9, %v9985_v56  ;;  %v4861_v56 = vmul.f32 %v10522_v2, %v11526_v26  ;;  %5003 = vmatpush.msrb.mxu0 %v4980_v19  ;;  %v4976_v2 = vmul.f32 %v10567_v63, %v10359_v15  ;;  %v5097_v53 = vmul.f32 %v10641_v39, %v4098_v34  ;;  %v5049_v26 = vsel %vm5041_vm13, %v5045_v10, 0.0  ;;  %v10667_v34 = vld [vmem:[%s9153_s9 + $0x28] sm:$0xff] }
 0x6f9   : > { %6265 = vmatmul.msk.f32.gmra.mxu0 %vm3426_vm9, %v10628_v55  ;;  %4898 = vmatpush.msrb.mxu1 %v4863_v48  ;;  %v11528_v48 = vld [vmem:[#allocation52_spill] sm:$0xff]  ;;  %v5071_v9 = vadd.f32 %v5065_v6, %v5049_v26 }
 0x6fa   : > { %v10636_v40 = vpop.f32.mrf.mxu2  ;;  %5004 = vmatpush.msrb.mxu0 %v4978_v45  ;;  %v4857_v19 = vmul.f32 %v10547_v31, %v11528_v48  ;;  %v5047_v31 = vsel %vm5039_vm6, %v5045_v10, 0.0  ;;  %v4966_v10 = vmul.f32 %v10596_v8, %v10244_v17  ;;  %v10714_v45 = vld [vmem:[%s9153_s9 + $0x38] sm:$0xff] }
 0x6fb   : > { %v10638_v33 = vpop.f32.mrf.mxu3  ;;  %4899 = vmatpush.msrb.mxu1 %v4861_v56  ;;  %v5095_v7 = vmul.f32 %v5071_v9, %v10585_v11  ;;  %v4968_v11 = vmul.f32 %v10583_v35, %v10280_v61  ;;  %v10692_v61 = vld [vmem:[%s9153_s9 + $0x30] sm:$0xff]  ;;  %v5083_v56 = vmul.f32 %v5071_v9, %v10369_v36 }
 0x6fc   : > { %5005 = vmatpush.msrb.mxu0 %v4976_v2  ;;  %v10654_v15 = vpop.f32.mrf.mxu0 }
 0x6fd   : > { %4900 = vmatpush.msrb.mxu1 %v4859_v3  ;;  %v5069_v3 = vadd.f32 %v5063_v29, %v5047_v31 }
 0x6fe   : > { %5006 = vmatpush.msrb.mxu0 %v4974_v4 }
 0x6ff   : > { %6231 = vmatmul.msk.f32.gmra.mxu2 %vm3426_vm9, %v10285_v51  ;;  %4901 = vmatpush.msrb.mxu1 %v4857_v19  ;;  %v10663_v47 = vpop.f32.mrf.mxu1  ;;  %v5093_v43 = vmul.f32 %v5069_v3, %v10545_v58  ;;  %v5089_v58 = vmul.f32 %v5071_v9, %v10470_v18  ;;  %v5085_v18 = vmul.f32 %v10641_v39, %v10403_v27  ;;  %v11531_v27 = vld [vmem:[#allocation34_spill] sm:$0xff] }
 0x700   : > { %6255 = vmatmul.msk.f32.gmra.mxu3 %vm3426_vm9, %v10012_v37  ;;  %11529 = vst [vmem:[#allocation41_spill] sm:$0xff] %v10663_v47  ;;  %v4970_v37 = vmul.f32 %v10567_v63, %v10305_v60  ;;  %5007 = vmatpush.msrb.mxu0 %v4972_v21  ;;  %v5091_v60 = vmul.f32 %v10641_v39, %v10502_v38  ;;  %v11533_v19 = vld [vmem:[#allocation54_spill] sm:$0xff]  ;;  %v11536_v21 = vld [vmem:[#allocation59_spill] sm:$0xff] }
 0x701   : > { %6266 = vmatmul.msk.f32.gmra.mxu0 %vm3426_vm9, %v10667_v34  ;;  %5108 = vmatpush.msra.mxu1 %v5097_v53  ;;  %v5087_v38 = vmul.f32 %v5069_v3, %v10432_v41  ;;  %v5081_v41 = vmul.f32 %v5069_v3, %v10348_v44  ;;  %v5079_v36 = vmul.f32 %v10641_v39, %v11531_v27  ;;  %v11534_v44 = vld [vmem:[#allocation71_spill] sm:$0xff] }
 0x702   : > { %v10673_v6 = vpop.f32.mrf.mxu2  ;;  %5008 = vmatpush.msrb.mxu0 %v4970_v37  ;;  %v5077_v29 = vmul.f32 %v5071_v9, %v11533_v19  ;;  %v5075_v26 = vmul.f32 %v5069_v3, %v11534_v44  ;;  %v4836_v3 = vperm.slane %v11536_v21, 3 }
 0x703   : > { %v10675_v25 = vpop.f32.mrf.mxu3  ;;  %5109 = vmatpush.msra.mxu1 %v5095_v7  ;;  %v11537_v7 = vld [vmem:[#allocation63_spill] sm:$0xff] }
 0x704   : > { %5009 = vmatpush.msrb.mxu0 %v4968_v11  ;;  %v10684_v63 = vpop.f32.mrf.mxu0  ;;  %v4844_v37 = vperm.slane %v11537_v7, 3  ;;  %vm4842_vm10 = vcmp.eq.f32.partialorder %v9050_v20, %v4836_v3  ;;  %vm4840_vm15 = vcmp.eq.f32.partialorder %v9053_v14, %v4836_v3  ;;  %vm4838_vm2 = vcmp.eq.f32.partialorder %v9062_v30, %v4836_v3 }
 0x705   : > { %5110 = vmatpush.msra.mxu1 %v5093_v43  ;;  %v11538_v43 = vld [vmem:[#allocation61_spill] sm:$0xff] }
 0x706   : > { %5010 = vmatpush.msrb.mxu0 %v4966_v10  ;;  %v4820_v11 = vperm.slane %v11538_v43, 3  ;;  %v4846_v27 = vsel %vm4838_vm2, %v4844_v37, 0.0 }
 0x707   : > { %6232 = vmatmul.msk.f32.gmra.mxu2 %vm3426_vm9, %v10310_v62  ;;  %5111 = vmatpush.msra.mxu1 %v5091_v60  ;;  %v10696_v17 = vpop.f32.mrf.mxu1  ;;  %v11539_v60 = vld [vmem:[#allocation65_spill] sm:$0xff] }
 0x708   : > { %6256 = vmatmul.msk.f32.gmra.mxu3 %vm3426_vm9, %v10249_v46  ;;  %11530 = vst [vmem:[#allocation53_spill] sm:$0xff] %v10696_v17  ;;  %vm4826_vm0 = vcmp.eq.f32.partialorder %v9050_v20, %v4820_v11  ;;  %vm4824_vm1 = vcmp.eq.f32.partialorder %v9053_v14, %v4820_v11  ;;  %vm4822_vm7 = vcmp.eq.f32.partialorder %v9062_v30, %v4820_v11 }
 0x709   : > { %6267 = vmatmul.msk.f32.gmra.mxu0 %vm3426_vm9, %v10692_v61  ;;  %5112 = vmatpush.msra.mxu1 %v5089_v58 }
 0x70a   : > { %v10699_v35 = vpop.f32.mrf.mxu2 }
 0x70b   : > { %v10701_v8 = vpop.f32.mrf.mxu3  ;;  %5113 = vmatpush.msra.mxu1 %v5087_v38 }
 0x70c   : > { %v10706_v24 = vpop.f32.mrf.mxu0 }
 0x70d   : > { %5114 = vmatpush.msra.mxu1 %v5085_v18  ;;  %v4848_v18 = vsel %vm4840_vm15, %v4844_v37, 0.0 }
 0x70f   : > { %6233 = vmatmul.msk.f32.gmra.mxu2 %vm3426_vm9, %v10437_v23  ;;  %5115 = vmatpush.msra.mxu1 %v5083_v56 }
 0x710   : > { %6257 = vmatmul.msk.f32.gmra.mxu3 %vm3426_vm9, %v10285_v51 }
 0x711   : > { %6268 = vmatmul.msk.f32.gmra.mxu0 %vm3426_vm9, %v10714_v45  ;;  %5116 = vmatpush.msra.mxu1 %v5081_v41  ;;  %v10724_v48 = vpop.f32.mrf.mxu1 }
 0x712   : > { %v10720_v2 = vpop.f32.mrf.mxu2  ;;  %11532 = vst [vmem:[#allocation36_spill] sm:$0xff] %v10724_v48 }
 0x713   : > { %v10722_v53 = vpop.f32.mrf.mxu3  ;;  %5117 = vmatpush.msra.mxu1 %v5079_v36 }
 0x714   : > { %v10728_v4 = vpop.f32.mrf.mxu0 }
 0x715   : > { %5118 = vmatpush.msra.mxu1 %v5077_v29 }
 0x717   : > { %6274 = vmatmul.msk.f32.vlgmr.msrb.gmra.mxu2 %vm3426_vm9, %v10395_v49  ;;  %5119 = vmatpush.msra.mxu1 %v5075_v26  ;;  %v4828_v49 = vperm.slane %v11539_v60, 3 }
 0x718   : > { %6258 = vmatmul.msk.f32.gmra.mxu3 %vm3426_vm9, %v10310_v62 }
 0x719   : > { %6269 = vmatmul.msk.f32.gmra.mxu0 %vm3426_vm9, %v10249_v46  ;;  %v10740_v9 = vpop.f32.mrf.mxu1  ;;  %v4850_v46 = vsel %vm4842_vm10, %v4844_v37, 0.0  ;;  %v4834_v56 = vsel %vm4826_vm0, %v4828_v49, 0.0  ;;  %v4830_v44 = vsel %vm4822_vm7, %v4828_v49, 0.0  ;;  %v4945_v37 = vperm.slane %v11536_v21, 4 }
 0x71a   : > { %v10736_v39 = vpop.f32.mrf.mxu2  ;;  %11535 = vst [vmem:[#allocation51_spill] sm:$0xff] %v10740_v9  ;;  %v10778_v26 = vadd.f32 %v4846_v27, %v4830_v44  ;;  %v4937_v27 = vperm.slane %v11539_v60, 4 }
 0x71b   : > { %v10738_v31 = vpop.f32.mrf.mxu3  ;;  %vm4951_vm8 = vcmp.eq.f32.partialorder %v9050_v20, %v4945_v37  ;;  %vm4949_vm4 = vcmp.eq.f32.partialorder %v9053_v14, %v4945_v37  ;;  %vm4947_vm11 = vcmp.eq.f32.partialorder %v9062_v30, %v4945_v37 }
 0x71c   : > { %v10745_v10 = vpop.f32.mrf.mxu0 }
 0x71f   : > { %6275 = vmatmul.msk.f32.gmra.mxu2 %vm3426_vm9, %v10506_v28  ;;  %v10765_v28 = vadd.f32 %v4850_v46, %v4834_v56 }
 0x720   : > { %6259 = vmatmul.msk.f32.gmra.mxu3 %vm3426_vm9, %v10437_v23 }
 0x721   : > { %6270 = vmatmul.msk.f32.gmra.mxu0 %vm3426_vm9, %v10285_v51  ;;  %v10761_v41 = vpop.f32.mrf.mxu1  ;;  %v4832_v51 = vsel %vm4824_vm1, %v4828_v49, 0.0  ;;  %v4880_v19 = vmul.f32 %v10765_v28, %v10512_v5  ;;  %v11541_v5 = vld [vmem:[#allocation62_spill] sm:$0xff]  ;;  %v4953_v49 = vperm.slane %v11537_v7, 4 }
 0x722   : > { %v10757_v58 = vpop.f32.mrf.mxu2  ;;  %11540 = vst [vmem:[#allocation48_spill] sm:$0xff] %v10761_v41  ;;  %v10768_v36 = vadd.f32 %v4848_v18, %v4832_v51  ;;  %v4876_v11 = vmul.f32 %v10778_v26, %v11541_v5  ;;  %v10834_v41 = vld [vmem:[#allocation11 + $0x10] sm:$0xff] }
 0x723   : > { %v10759_v38 = vpop.f32.mrf.mxu3 }
 0x724   : > { %v10772_v29 = vpop.f32.mrf.mxu0  ;;  %v4878_v3 = vmul.f32 %v10768_v36, %v10478_v16  ;;  %v11542_v16 = vld [vmem:[#allocation47_spill] sm:$0xff] }
 0x725   : > { %v4874_v56 = vmul.f32 %v10765_v28, %v11542_v16  ;;  %v4957_v16 = vsel %vm4949_vm4, %v4953_v49, 0.0 }
 0x727   : > { %6276 = vmatmul.msk.f32.gmra.mxu2 %vm3426_vm9, %v10553_v32 }
 0x728   : > { %6287 = vmatmul.msk.f32.vlgmr.msrb.gmra.mxu3 %vm4623_vm14, %v10525_v50  ;;  %v4929_v50 = vperm.slane %v11538_v43, 4 }
 0x729   : > { %4910 = vmatpush.msrb.mxu3 %v4880_v19  ;;  %6271 = vmatmul.msk.f32.gmra.mxu0 %vm3426_vm9, %v10310_v62  ;;  %v10791_v18 = vpop.f32.mrf.mxu1  ;;  %v11543_v62 = vld [vmem:[#allocation73_spill] sm:$0xff]  ;;  %v4959_v19 = vsel %vm4951_vm8, %v4953_v49, 0.0 }
 0x72a   : > { %v4042_v32 = vpop.f32.mrf.mxu2  ;;  %v4872_v51 = vmul.f32 %v10768_v36, %v11543_v62  ;;  %vm4935_vm3 = vcmp.eq.f32.partialorder %v9050_v20, %v4929_v50  ;;  %vm4933_vm5 = vcmp.eq.f32.partialorder %v9053_v14, %v4929_v50  ;;  %vm4931_vm12 = vcmp.eq.f32.partialorder %v9062_v30, %v4929_v50 }
 0x72b   : > { %4911 = vmatpush.msrb.mxu3 %v4878_v3  ;;  %v10788_v46 = vpop.f32.mrf.mxu3  ;;  %v11544_v3 = vld [vmem:[#allocation72_spill] sm:$0xff]  ;;  %v4941_v17 = vsel %vm4933_vm5, %v4937_v27, 0.0  ;;  %v4939_v37 = vsel %vm4931_vm12, %v4937_v27, 0.0 }
 0x72c   : > { %v10799_v44 = vpop.f32.mrf.mxu0  ;;  %v4870_v5 = vmul.f32 %v10778_v26, %v11544_v3  ;;  %v4955_v3 = vsel %vm4947_vm11, %v4953_v49, 0.0 }
 0x72d   : > { %4912 = vmatpush.msrb.mxu3 %v4876_v11  ;;  %v4943_v11 = vsel %vm4935_vm3, %v4937_v27, 0.0  ;;  %v10829_v9 = vadd.f32 %v4955_v3, %v4939_v37  ;;  %v5054_v27 = vperm.slane %v11536_v21, 5  ;;  %v5062_v3 = vperm.slane %v11537_v7, 5 }
 0x72e   : > { %v10809_v62 = vadd.f32 %v4959_v19, %v4943_v11  ;;  %v11546_v11 = vld [vmem:[#allocation35_spill] sm:$0xff]  ;;  %v5046_v37 = vperm.slane %v11539_v60, 5 }
 0x72f   : > { %4913 = vmatpush.msrb.mxu3 %v4874_v56  ;;  %6277 = vmatmul.msk.f32.gmra.mxu2 %vm3426_vm9, %v10588_v42  ;;  %v11545_v56 = vld [vmem:[#allocation49_spill] sm:$0xff]  ;;  %v4985_v50 = vmul.f32 %v10829_v9, %v10757_v58  ;;  %vm5060_vm13 = vcmp.eq.f32.partialorder %v9050_v20, %v5054_v27  ;;  %vm5058_vm6 = vcmp.eq.f32.partialorder %v9053_v14, %v5054_v27 }
 0x730   : > { %6289 = vmatmul.msk.f32.vlgmr.msra.gmra.mxu3 %vm4623_vm14, %v10573_v12  ;;  %v4868_v47 = vmul.f32 %v10765_v28, %v11545_v56  ;;  %v10825_v56 = vadd.f32 %v4957_v16, %v4941_v17  ;;  %v11548_v17 = vld [vmem:[#allocation70_spill] sm:$0xff]  ;;  %vm5056_vm15 = vcmp.eq.f32.partialorder %v9062_v30, %v5054_v27 }
 0x731   : > { %4914 = vmatpush.msrb.mxu3 %v4872_v51  ;;  %6272 = vmatmul.msk.f32.gmra.mxu0 %vm3426_vm9, %v10437_v23  ;;  %v10820_v19 = vpop.f32.mrf.mxu1  ;;  %v4866_v23 = vmul.f32 %v10768_v36, %v11546_v11  ;;  %v11550_v11 = vld [vmem:[#allocation68_spill] sm:$0xff] }
 0x732   : > { %v4045_v12 = vpop.f32.mrf.mxu2  ;;  %v4987_v49 = vmul.f32 %v10825_v56, %v4042_v32  ;;  %v11549_v32 = vld [vmem:[#allocation69_spill] sm:$0xff] }
 0x733   : > { %4915 = vmatpush.msrb.mxu3 %v4870_v5  ;;  %v10817_v42 = vpop.f32.mrf.mxu3  ;;  %v4989_v51 = vmul.f32 %v10809_v62, %v4045_v12  ;;  %v11547_v5 = vld [vmem:[#allocation37_spill] sm:$0xff]  ;;  %v4860_v16 = vmul.f32 %v10768_v36, %v11549_v32  ;;  %v4981_v36 = vmul.f32 %v10825_v56, %v10720_v2  ;;  %v5066_v2 = vsel %vm5058_vm6, %v5062_v3, 0.0 }
 0x734   : > { %v4864_v48 = vmul.f32 %v10778_v26, %v11547_v5  ;;  %v10832_v12 = vpop.f32.mrf.mxu0  ;;  %v4979_v5 = vmul.f32 %v10829_v9, %v10699_v35 }
 0x735   : > { %4916 = vmatpush.msrb.mxu3 %v4868_v47  ;;  %5019 = vmatpush.msrb.mxu2 %v4989_v51  ;;  %v4862_v47 = vmul.f32 %v10765_v28, %v11548_v17  ;;  %v4977_v17 = vmul.f32 %v10809_v62, %v10673_v6 }
 0x737   : > { %4917 = vmatpush.msrb.mxu3 %v4866_v23  ;;  %6278 = vmatmul.msk.f32.gmra.mxu2 %vm3426_vm9, %v10628_v55  ;;  %v4983_v55 = vmul.f32 %v10809_v62, %v10736_v39  ;;  %v4858_v23 = vmul.f32 %v10778_v26, %v11550_v11  ;;  %v5068_v39 = vsel %vm5060_vm13, %v5062_v3, 0.0 }
 0x738   : > { %5020 = vmatpush.msrb.mxu2 %v4987_v49 }
 0x739   : > { %4918 = vmatpush.msrb.mxu3 %v4864_v48  ;;  %6290 = vmatmul.msk.f32.vlgmr.msra.gmra.mxu0 %vm4623_vm14, %v10834_v41  ;;  %v5038_v48 = vperm.slane %v11538_v43, 5  ;;  %v10853_v58 = vpop.f32.mrf.mxu1 }
 0x73a   : > { %5021 = vmatpush.msrb.mxu2 %v4985_v50  ;;  %v10850_v51 = vpop.f32.mrf.mxu2  ;;  %v5064_v50 = vsel %vm5056_vm15, %v5062_v3, 0.0  ;;  %v4973_v3 = vmul.f32 %v10829_v9, %v10599_v57 }
 0x73b   : > { %4919 = vmatpush.msrb.mxu3 %v4862_v47  ;;  %v4148_v28 = vpop.f32.mrf.mxu3  ;;  %vm5044_vm10 = vcmp.eq.f32.partialorder %v9050_v20, %v5038_v48  ;;  %v4882_v47 = vld [vmem:[#allocation11 + $0x18] sm:$0xff]  ;;  %vm5042_vm0 = vcmp.eq.f32.partialorder %v9053_v14, %v5038_v48  ;;  %vm5040_vm2 = vcmp.eq.f32.partialorder %v9062_v30, %v5038_v48  ;;  %v4971_v48 = vmul.f32 %v10809_v62, %v10559_v59 }
 0x73c   : > { %5022 = vmatpush.msrb.mxu2 %v4983_v55  ;;  %v10863_v49 = vpop.f32.mrf.mxu0  ;;  %v5052_v26 = vsel %vm5044_vm10, %v5046_v37, 0.0  ;;  %6292 = vmatmul.msk.f32.vlgmr.msrb.gmra.mxu1 %vm4623_vm14, %v4882_v47  ;;  %v5050_v32 = vsel %vm5042_vm0, %v5046_v37, 0.0  ;;  %v4967_v62 = vmul.f32 %v10829_v9, %v10480_v13 }
 0x73d   : > { %4920 = vmatpush.msrb.mxu3 %v4860_v16  ;;  %v10873_v35 = vadd.f32 %v5068_v39, %v5052_v26  ;;  %v10882_v27 = vadd.f32 %v5066_v2, %v5050_v32  ;;  %v5154_v26 = vperm.slane %v9893_v1, 6 }
 0x73e   : > { %5023 = vmatpush.msrb.mxu2 %v4981_v36 }
 0x73f   : > { %4921 = vmatpush.msrb.mxu3 %v4858_v23  ;;  %6279 = vmatmul.msk.f32.gmra.mxu2 %vm3426_vm9, %v10667_v34  ;;  %v4975_v34 = vmul.f32 %v10825_v56, %v10636_v40  ;;  %v5048_v23 = vsel %vm5040_vm2, %v5046_v37, 0.0  ;;  %v5162_v40 = vperm.slane %v9871_v54, 6  ;;  %v5096_v39 = vmul.f32 %v10882_v27, %v4148_v28 }
 0x740   : > { %5024 = vmatpush.msrb.mxu2 %v4979_v5  ;;  %6293 = vmatmul.msk.f32.vlgmr.msrb.gmra.mxu3 %vm4623_vm14, %v4882_v47  ;;  %v10889_v36 = vadd.f32 %v5064_v50, %v5048_v23  ;;  %v5170_v5 = vperm.slane %v9891_v52, 6  ;;  %v5146_v37 = vperm.slane %v9873_v0, 6  ;;  %v4969_v28 = vmul.f32 %v10825_v56, %v10514_v22 }
 0x741   : > { %v10885_v11 = vpop.f32.mrf.mxu1  ;;  %vm5168_vm1 = vcmp.eq.f32.partialorder %v9050_v20, %v5162_v40  ;;  %v5092_v59 = vmul.f32 %v10873_v35, %v10788_v46  ;;  %vm5166_vm7 = vcmp.eq.f32.partialorder %v9053_v14, %v5162_v40  ;;  %v5090_v22 = vmul.f32 %v10882_v27, %v10759_v38 }
 0x742   : > { %5025 = vmatpush.msrb.mxu2 %v4977_v17  ;;  %v10879_v6 = vpop.f32.mrf.mxu2  ;;  %v5094_v57 = vmul.f32 %v10889_v36, %v10817_v42  ;;  %v5176_v42 = vsel %vm5168_vm1, %v5170_v5, 0.0  ;;  %vm5152_vm8 = vcmp.eq.f32.partialorder %v9050_v20, %v5146_v37  ;;  %v5174_v46 = vsel %vm5166_vm7, %v5170_v5, 0.0 }
 0x743   : > { %v4151_v16 = vpop.f32.mrf.mxu3  ;;  %v5160_v47 = vsel %vm5152_vm8, %v5154_v26, 0.0  ;;  %vm5164_vm3 = vcmp.eq.f32.partialorder %v9062_v30, %v5162_v40  ;;  %vm5150_vm4 = vcmp.eq.f32.partialorder %v9053_v14, %v5146_v37  ;;  %v5088_v9 = vmul.f32 %v10889_v36, %v10738_v31 }
 0x744   : > { %v5098_v55 = vmul.f32 %v10873_v35, %v4151_v16  ;;  %5026 = vmatpush.msrb.mxu2 %v4975_v34  ;;  %v4201_v2 = vpop.f32.mrf.mxu0  ;;  %v10921_v13 = vadd.f32 %v5176_v42, %v5160_v47  ;;  %vm5148_vm11 = vcmp.eq.f32.partialorder %v9062_v30, %v5146_v37  ;;  %v5172_v50 = vsel %vm5164_vm3, %v5170_v5, 0.0 }
 0x745   : > { %v5158_v38 = vsel %vm5150_vm4, %v5154_v26, 0.0  ;;  %v5086_v16 = vmul.f32 %v10873_v35, %v10722_v53  ;;  %v5156_v23 = vsel %vm5148_vm11, %v5154_v26, 0.0  ;;  %v5084_v31 = vmul.f32 %v10882_v27, %v10701_v8 }
 0x746   : > { %5128 = vmatpush.msra.mxu3 %v5098_v55  ;;  %5027 = vmatpush.msrb.mxu2 %v4973_v3  ;;  %v10926_v34 = vadd.f32 %v5174_v46, %v5158_v38  ;;  %v10933_v3 = vadd.f32 %v5172_v50, %v5156_v23  ;;  %v5082_v53 = vmul.f32 %v10889_v36, %v10675_v25  ;;  %v5271_v8 = vperm.slane %v9871_v54, 7  ;;  %v6938_v54 = vld [vmem:[%s9153_s9 + $0x40] sm:$0xff] }
 0x747   : > { %6280 = vmatmul.msk.f32.gmra.mxu2 %vm3426_vm9, %v10692_v61  ;;  %v5279_v37 = vperm.slane %v9891_v52, 7  ;;  %v5200_v25 = vmul.f32 %v10921_v13, %v10832_v12  ;;  %v5194_v42 = vmul.f32 %v10921_v13, %v10745_v10 }
 0x748   : > { %5129 = vmatpush.msra.mxu3 %v5096_v39  ;;  %5028 = vmatpush.msrb.mxu2 %v4971_v48  ;;  %v5204_v40 = vmul.f32 %v10926_v34, %v4201_v2  ;;  %v5080_v2 = vmul.f32 %v10873_v35, %v10638_v33  ;;  %vm5277_vm5 = vcmp.eq.f32.partialorder %v9050_v20, %v5271_v8 }
 0x749   : > { %v10917_v56 = vpop.f32.mrf.mxu1  ;;  %v5198_v52 = vmul.f32 %v10926_v34, %v10799_v44  ;;  %v5285_v12 = vsel %vm5277_vm5, %v5279_v37, 0.0  ;;  %vm5275_vm12 = vcmp.eq.f32.partialorder %v9053_v14, %v5271_v8  ;;  %vm5273_vm6 = vcmp.eq.f32.partialorder %v9062_v30, %v5271_v8 }
 0x74a   : > { %5130 = vmatpush.msra.mxu3 %v5094_v57  ;;  %5029 = vmatpush.msrb.mxu2 %v4969_v28  ;;  %v10909_v17 = vpop.f32.mrf.mxu2  ;;  %v5255_v57 = vperm.slane %v9873_v0, 7  ;;  %v11552_v0 = vld [vmem:[#allocation46_spill] sm:$0xff]  ;;  %v5190_v10 = vmul.f32 %v10933_v3, %v10706_v24 }
 0x74b   : > { %v10911_v61 = vpop.f32.mrf.mxu3  ;;  %v5076_v33 = vmul.f32 %v10889_v36, %v11552_v0  ;;  %v11558_v0 = vld [vmem:[#allocation41_spill] sm:$0xff] }
 0x74c   : > { %5131 = vmatpush.msra.mxu3 %v5092_v59  ;;  %5030 = vmatpush.msrb.mxu2 %v4967_v62  ;;  %v5263_v59 = vperm.slane %v9893_v1, 7  ;;  %vm5261_vm13 = vcmp.eq.f32.partialorder %v9050_v20, %v5255_v57  ;;  %v5196_v1 = vmul.f32 %v10933_v3, %v10772_v29  ;;  %v5283_v62 = vsel %vm5275_vm12, %v5279_v37, 0.0 }
 0x74d   : > { %v4204_v32 = vpop.f32.mrf.mxu0  ;;  %vm5259_vm10 = vcmp.eq.f32.partialorder %v9053_v14, %v5255_v57  ;;  %vm5257_vm15 = vcmp.eq.f32.partialorder %v9062_v30, %v5255_v57 }
 0x74e   : > { %5132 = vmatpush.msra.mxu3 %v5090_v22  ;;  %v5206_v55 = vmul.f32 %v10921_v13, %v4204_v32  ;;  %v5269_v44 = vsel %vm5261_vm13, %v5263_v59, 0.0  ;;  %v5281_v22 = vsel %vm5273_vm6, %v5279_v37, 0.0  ;;  %v5267_v29 = vsel %vm5259_vm10, %v5263_v59, 0.0  ;;  %v11555_v37 = vld [vmem:[#allocation51_spill] sm:$0xff] }
 0x74f   : > { %6281 = vmatmul.msk.f32.gmra.mxu2 %vm3426_vm9, %v10714_v45  ;;  %v5202_v45 = vmul.f32 %v10933_v3, %v10863_v49  ;;  %v11551_v49 = vld [vmem:[#allocation45_spill] sm:$0xff]  ;;  %v5291_v36 = vadd.f32 %v5285_v12, %v5269_v44  ;;  %v5289_v47 = vadd.f32 %v5283_v62, %v5267_v29  ;;  %v5265_v32 = vsel %vm5257_vm15, %v5263_v59, 0.0 }
 0x750   : > { %5133 = vmatpush.msra.mxu3 %v5088_v9  ;;  %5217 = vmatpush.msra.mxu0 %v5206_v55  ;;  %v5078_v26 = vmul.f32 %v10882_v27, %v11551_v49  ;;  %v5192_v9 = vmul.f32 %v10926_v34, %v10728_v4  ;;  %v5287_v55 = vadd.f32 %v5281_v22, %v5265_v32  ;;  %v6941_v49 = vld [vmem:[%s9153_s9 + $0x58] sm:$0xff]  ;;  %v5163_v29 = vperm.slane %v11536_v21, 6 }
 0x751   : > { %v4307_v5 = vpop.f32.mrf.mxu1  ;;  %v5309_v24 = vmul.f32 %v5291_v36, %v10885_v11 }
 0x752   : > { %5134 = vmatpush.msra.mxu3 %v5086_v16  ;;  %v10938_v39 = vpop.f32.mrf.mxu2  ;;  %5218 = vmatpush.msra.mxu0 %v5204_v40  ;;  %v6939_v16 = vld [vmem:[%s9153_s9 + $0x48] sm:$0xff]  ;;  %v5313_v23 = vmul.f32 %v5289_v47, %v4307_v5  ;;  %v5311_v4 = vmul.f32 %v5287_v55, %v10917_v56  ;;  %v5299_v57 = vmul.f32 %v5287_v55, %v11555_v37  ;;  %v5272_v37 = vperm.slane %v11536_v21, 7 }
 0x753   : > { %v10940_v48 = vpop.f32.mrf.mxu3  ;;  %v11553_v5 = vld [vmem:[#allocation42_spill] sm:$0xff]  ;;  %vm5167_vm0 = vcmp.eq.f32.partialorder %v9053_v14, %v5163_v29  ;;  %vm5165_vm1 = vcmp.eq.f32.partialorder %v9062_v30, %v5163_v29 }
 0x754   : > { %5135 = vmatpush.msra.mxu3 %v5084_v31  ;;  %5219 = vmatpush.msra.mxu0 %v5202_v45  ;;  %v5188_v31 = vmul.f32 %v10921_v13, %v10684_v63  ;;  %v5186_v45 = vmul.f32 %v10926_v34, %v10654_v15  ;;  %v5184_v8 = vmul.f32 %v10933_v3, %v11553_v5  ;;  %v6940_v13 = vld [vmem:[%s9153_s9 + $0x50] sm:$0xff] }
 0x755   : > { %v5307_v63 = vmul.f32 %v5289_v47, %v10853_v58  ;;  %v5303_v15 = vmul.f32 %v5291_v36, %v10791_v18  ;;  %v11554_v58 = vld [vmem:[#allocation48_spill] sm:$0xff]  ;;  %v11557_v18 = vld [vmem:[#allocation53_spill] sm:$0xff]  ;;  %vm5278_vm3 = vcmp.eq.f32.partialorder %v9050_v20, %v5272_v37  ;;  %vm5276_vm4 = vcmp.eq.f32.partialorder %v9053_v14, %v5272_v37 }
 0x756   : > { %5136 = vmatpush.msra.mxu3 %v5082_v53  ;;  %v10953_v28 = vpop.f32.mrf.mxu0  ;;  %5220 = vmatpush.msra.mxu0 %v5200_v25  ;;  %v5301_v3 = vmul.f32 %v5289_v47, %v11554_v58  ;;  %v5295_v59 = vmul.f32 %v5289_v47, %v11557_v18  ;;  %v5256_v18 = vperm.slane %v11538_v43, 7  ;;  %vm5274_vm5 = vcmp.eq.f32.partialorder %v9062_v30, %v5272_v37  ;;  %v11562_v37 = vld [vmem:[#allocation44_spill] sm:$0xff] }
 0x757   : > { %6282 = vmatmul.msk.f32.gmra.mxu2 %vm3426_vm9, %v6938_v54 }
 0x758   : > { %5137 = vmatpush.msra.mxu3 %v5080_v2  ;;  %5221 = vmatpush.msra.mxu0 %v5198_v52  ;;  %v5305_v2 = vmul.f32 %v5287_v55, %v10820_v19  ;;  %v11556_v19 = vld [vmem:[#allocation36_spill] sm:$0xff]  ;;  %vm5262_vm11 = vcmp.eq.f32.partialorder %v9050_v20, %v5256_v18  ;;  %vm5260_vm12 = vcmp.eq.f32.partialorder %v9053_v14, %v5256_v18 }
 0x759   : > { %v4310_v46 = vpop.f32.mrf.mxu1  ;;  %vm5258_vm13 = vcmp.eq.f32.partialorder %v9062_v30, %v5256_v18 }
 0x75a   : > { %5138 = vmatpush.msra.mxu3 %v5078_v26  ;;  %v10969_v35 = vpop.f32.mrf.mxu2  ;;  %5222 = vmatpush.msra.mxu0 %v5196_v1  ;;  %v5315_v50 = vmul.f32 %v5291_v36, %v4310_v46  ;;  %v5297_v26 = vmul.f32 %v5291_v36, %v11556_v19  ;;  %v5171_v46 = vperm.slane %v11537_v7, 6 }
 0x75b   : > { %v10971_v27 = vpop.f32.mrf.mxu3 }
 0x75c   : > { %5139 = vmatpush.msra.mxu3 %v5076_v33  ;;  %5223 = vmatpush.msra.mxu0 %v5194_v42  ;;  %v5293_v33 = vmul.f32 %v5287_v55, %v11558_v0  ;;  %v4991_v55 = vld [vmem:[#allocation11 + $0x20] sm:$0xff]  ;;  %v5264_v0 = vperm.slane %v11539_v60, 7 }
 0x75d   : > { %5326 = vmatpush.msrb.mxu1 %v5315_v50  ;;  %v5147_v50 = vperm.slane %v11538_v43, 6  ;;  %6294 = vmatmul.msk.f32.vlgmr.msrb.gmra.mxu0 %vm4623_vm14, %v4991_v55 }
 0x75e   : > { %v10980_v38 = vpop.f32.mrf.mxu0  ;;  %5224 = vmatpush.msra.mxu0 %v5192_v9 }
 0x75f   : > { %6283 = vmatmul.msk.f32.gmra.mxu2 %vm3426_vm9, %v6939_v16  ;;  %5327 = vmatpush.msrb.mxu1 %v5313_v23  ;;  %vm5153_vm2 = vcmp.eq.f32.partialorder %v9050_v20, %v5147_v50  ;;  %vm5151_vm7 = vcmp.eq.f32.partialorder %v9053_v14, %v5147_v50  ;;  %vm5149_vm8 = vcmp.eq.f32.partialorder %v9062_v30, %v5147_v50 }
 0x760   : > { %5225 = vmatpush.msra.mxu0 %v5190_v10  ;;  %v5175_v10 = vsel %vm5167_vm0, %v5171_v46, 0.0 }
 0x761   : > { %5328 = vmatpush.msrb.mxu1 %v5311_v4  ;;  %v5173_v4 = vsel %vm5165_vm1, %v5171_v46, 0.0 }
 0x762   : > { %v10989_v40 = vpop.f32.mrf.mxu2  ;;  %5226 = vmatpush.msra.mxu0 %v5188_v31 }
 0x763   : > { %v10991_v53 = vpop.f32.mrf.mxu3  ;;  %5329 = vmatpush.msrb.mxu1 %v5309_v24 }
 0x764   : > { %5227 = vmatpush.msra.mxu0 %v5186_v45 }
 0x765   : > { %5330 = vmatpush.msrb.mxu1 %v5307_v63 }
 0x766   : > { %v10999_v56 = vpop.f32.mrf.mxu0  ;;  %5228 = vmatpush.msra.mxu0 %v5184_v8 }
 0x767   : > { %6284 = vmatmul.msk.f32.gmra.mxu2 %vm3426_vm9, %v6940_v13  ;;  %5331 = vmatpush.msrb.mxu1 %v5305_v2 }
 0x769   : > { %5332 = vmatpush.msrb.mxu1 %v5303_v15 }
 0x76a   : > { %v11005_v11 = vpop.f32.mrf.mxu2 }
 0x76b   : > { %v11007_v34 = vpop.f32.mrf.mxu3  ;;  %5333 = vmatpush.msrb.mxu1 %v5301_v3 }
 0x76d   : > { %5334 = vmatpush.msrb.mxu1 %v5299_v57 }
 0x76e   : > { %v11011_v25 = vpop.f32.mrf.mxu0 }
 0x76f   : > { %6285 = vmatmul.msk.f32.gmra.mxu2 %vm3426_vm9, %v6941_v49  ;;  %5335 = vmatpush.msrb.mxu1 %v5297_v26  ;;  %vm5169_vm9 = vcmp.eq.f32.partialorder %v9050_v20, %v5163_v29  ;;  %v5280_v49 = vperm.slane %v11537_v7, 7  ;;  %v5268_v29 = vsel %vm5260_vm12, %v5264_v0, 0.0 }
 0x770   : > { %v5177_v32 = vsel %vm5169_vm9, %v5171_v46, 0.0 }
 0x771   : > { %5336 = vmatpush.msrb.mxu1 %v5295_v59  ;;  %v5284_v43 = vsel %vm5276_vm4, %v5280_v49, 0.0 }
 0x772   : > { %v4245_v54 = vpop.f32.mrf.mxu2  ;;  %v5290_v50 = vadd.f32 %v5284_v43, %v5268_v29 }
 0x773   : > { %v11017_v52 = vpop.f32.mrf.mxu3  ;;  %5337 = vmatpush.msrb.mxu1 %v5293_v33 }
 0x774   : > { %v5302_v43 = vmul.f32 %v5290_v50, %v11007_v34  ;;  %v5296_v34 = vmul.f32 %v5290_v50, %v10940_v48 }
 0x776   : > { %v11020_v12 = vpop.f32.mrf.mxu0 }
 0x777   : > { %6291 = vmatmul.msk.f32.vlgmr.msra.gmra.mxu2 %vm4623_vm14, %v10834_v41  ;;  %v5155_v41 = vperm.slane %v11539_v60, 6 }
 0x779   : > { %v5161_v23 = vsel %vm5153_vm2, %v5155_v41, 0.0  ;;  %v5159_v45 = vsel %vm5151_vm7, %v5155_v41, 0.0  ;;  %v5157_v13 = vsel %vm5149_vm8, %v5155_v41, 0.0 }
 0x77a   : > { %v4248_v1 = vpop.f32.mrf.mxu2  ;;  %v5183_v31 = vadd.f32 %v5177_v32, %v5161_v23  ;;  %v5181_v8 = vadd.f32 %v5175_v10, %v5159_v45  ;;  %v5179_v2 = vadd.f32 %v5173_v4, %v5157_v13  ;;  %v5266_v32 = vsel %vm5258_vm13, %v5264_v0, 0.0  ;;  %v11559_v10 = vld [vmem:[#allocation31_spill] sm:$0xff]  ;;  %v11560_v45 = vld [vmem:[#allocation32_spill] sm:$0xff] }
 0x77b   : > { %v11024_v62 = vpop.f32.mrf.mxu3  ;;  %v5380_v23 = vperm.slane %v11559_v10, 0 }
 0x77c   : > { %v5201_v57 = vmul.f32 %v5183_v31, %v4248_v1  ;;  %v5199_v59 = vmul.f32 %v5181_v8, %v4245_v54  ;;  %v5197_v33 = vmul.f32 %v5179_v2, %v11005_v11  ;;  %v5195_v7 = vmul.f32 %v5183_v31, %v10989_v40 }
 0x77d   : > { %v5270_v54 = vsel %vm5262_vm11, %v5264_v0, 0.0  ;;  %v5193_v60 = vmul.f32 %v5181_v8, %v10969_v35  ;;  %v5282_v1 = vsel %vm5274_vm5, %v5280_v49, 0.0  ;;  %v5191_v40 = vmul.f32 %v5179_v2, %v10938_v39 }
 0x77e   : > { %v11026_v44 = vpop.f32.mrf.mxu0  ;;  %v5288_v35 = vadd.f32 %v5282_v1, %v5266_v32  ;;  %v5187_v13 = vmul.f32 %v5181_v8, %v10879_v6  ;;  %vm5386_vm6 = vcmp.eq.f32.partialorder %v9050_v20, %v5380_v23  ;;  %vm5384_vm10 = vcmp.eq.f32.partialorder %v9053_v14, %v5380_v23 }
 0x77f   : > { %6295 = vmatmul.msk.f32.vlgmr.msrb.gmra.mxu2 %vm4623_vm14, %v4991_v55  ;;  %v5189_v55 = vmul.f32 %v5183_v31, %v10909_v17  ;;  %v5185_v17 = vmul.f32 %v5179_v2, %v10850_v51  ;;  %vm5382_vm9 = vcmp.eq.f32.partialorder %v9062_v30, %v5380_v23 }
 0x782   : > { %v4251_v36 = vpop.f32.mrf.mxu2 }
 0x783   : > { %v11028_v42 = vpop.f32.mrf.mxu3  ;;  %v5203_v3 = vmul.f32 %v5179_v2, %v4251_v36  ;;  %v5286_v36 = vsel %vm5278_vm3, %v5280_v49, 0.0 }
 0x784   : > { %v11066_v11 = vadd.f32 %v5286_v36, %v5270_v54  ;;  %v5308_v6 = vmul.f32 %v5290_v50, %v11028_v42 }
 0x786   : > { %v11030_v22 = vpop.f32.mrf.mxu0  ;;  %v5304_v42 = vmul.f32 %v11066_v11, %v11017_v52  ;;  %v5298_v52 = vmul.f32 %v11066_v11, %v10971_v27 }
 0x78a   : > { %v4254_v47 = vpop.f32.mrf.mxu2 }
 0x78b   : > { %v11034_v9 = vpop.f32.mrf.mxu3  ;;  %v5205_v15 = vmul.f32 %v5181_v8, %v4254_v47  ;;  %v5306_v8 = vmul.f32 %v5288_v35, %v11024_v62 }
 0x78e   : > { %v11039_v16 = vpop.f32.mrf.mxu0 }
 0x792   : > { %v4257_v24 = vpop.f32.mrf.mxu2 }
 0x793   : > { %v4357_v5 = vpop.f32.mrf.mxu3  ;;  %v5207_v63 = vmul.f32 %v5183_v31, %v4257_v24  ;;  %v5388_v24 = vperm.slane %v11560_v45, 0  ;;  %v5310_v31 = vmul.f32 %v11066_v11, %v11034_v9 }
 0x795   : > { %5237 = vmatpush.msra.mxu2 %v5207_v63  ;;  %v5394_v49 = vsel %vm5386_vm6, %v5388_v24, 0.0  ;;  %v5390_v2 = vsel %vm5382_vm9, %v5388_v24, 0.0 }
 0x796   : > { %v11048_v58 = vpop.f32.mrf.mxu0 }
 0x797   : > { %5238 = vmatpush.msra.mxu2 %v5205_v15  ;;  %v11561_v15 = vld [vmem:[#allocation43_spill] sm:$0xff] }
 0x798   : > { %v5364_v39 = vperm.slane %v11561_v15, 0 }
 0x799   : > { %5239 = vmatpush.msra.mxu2 %v5203_v3  ;;  %v5312_v3 = vmul.f32 %v5288_v35, %v4357_v5  ;;  %v5392_v5 = vsel %vm5384_vm10, %v5388_v24, 0.0 }
 0x79a   : > { %v11052_v26 = vpop.f32.mrf.mxu2  ;;  %vm5370_vm15 = vcmp.eq.f32.partialorder %v9050_v20, %v5364_v39  ;;  %vm5368_vm0 = vcmp.eq.f32.partialorder %v9053_v14, %v5364_v39  ;;  %vm5366_vm2 = vcmp.eq.f32.partialorder %v9062_v30, %v5364_v39 }
 0x79b   : > { %v4360_v19 = vpop.f32.mrf.mxu3  ;;  %5240 = vmatpush.msra.mxu2 %v5201_v57  ;;  %v5372_v57 = vperm.slane %v11562_v37, 0 }
 0x79c   : > { %v5314_v4 = vmul.f32 %v5290_v50, %v4360_v19 }
 0x79d   : > { %5241 = vmatpush.msra.mxu2 %v5199_v59  ;;  %v5378_v51 = vsel %vm5370_vm15, %v5372_v57, 0.0  ;;  %v5376_v18 = vsel %vm5368_vm0, %v5372_v57, 0.0  ;;  %v5374_v36 = vsel %vm5366_vm2, %v5372_v57, 0.0 }
 0x79e   : > { %v11058_v21 = vpop.f32.mrf.mxu0  ;;  %v5400_v9 = vadd.f32 %v5394_v49, %v5378_v51  ;;  %v5398_v0 = vadd.f32 %v5392_v5, %v5376_v18 }
 0x79f   : > { %5242 = vmatpush.msra.mxu2 %v5197_v33 }
 0x7a0   : > { %v5418_v29 = vmul.f32 %v5400_v9, %v11048_v58  ;;  %v5412_v27 = vmul.f32 %v5400_v9, %v11026_v44  ;;  %v5410_v58 = vmul.f32 %v5398_v0, %v11020_v12  ;;  %v11563_v12 = vld [vmem:[#allocation29_spill] sm:$0xff] }
 0x7a1   : > { %5243 = vmatpush.msra.mxu2 %v5195_v7  ;;  %v5396_v7 = vadd.f32 %v5390_v2, %v5374_v36 }
 0x7a2   : > { %v11068_v47 = vpop.f32.mrf.mxu2 }
 0x7a3   : > { %v4363_v46 = vpop.f32.mrf.mxu3  ;;  %5244 = vmatpush.msra.mxu2 %v5193_v60  ;;  %v5300_v60 = vmul.f32 %v5288_v35, %v10991_v53  ;;  %v5420_v1 = vmul.f32 %v5396_v7, %v11058_v21  ;;  %v5414_v53 = vmul.f32 %v5396_v7, %v11030_v22  ;;  %v5408_v48 = vmul.f32 %v5396_v7, %v11011_v25  ;;  %v11564_v25 = vld [vmem:[#allocation30_spill] sm:$0xff] }
 0x7a4   : > { %v5316_v41 = vmul.f32 %v11066_v11, %v4363_v46  ;;  %v5416_v46 = vmul.f32 %v5398_v0, %v11039_v16  ;;  %v5406_v16 = vmul.f32 %v5400_v9, %v10999_v56  ;;  %v5404_v22 = vmul.f32 %v5398_v0, %v10980_v38  ;;  %v11565_v38 = vld [vmem:[#allocation39_spill] sm:$0xff] }
 0x7a5   : > { %5245 = vmatpush.msra.mxu2 %v5191_v40  ;;  %v5294_v40 = vmul.f32 %v5288_v35, %v10911_v61  ;;  %v5402_v11 = vmul.f32 %v5396_v7, %v10953_v28  ;;  %v5100_v35 = vld [vmem:[#allocation11 + $0x28] sm:$0xff]  ;;  %v5389_v10 = vperm.slane %v11564_v25, 0  ;;  %v5365_v56 = vperm.slane %v11565_v38, 0  ;;  %v11566_v28 = vld [vmem:[#allocation40_spill] sm:$0xff] }
 0x7a6   : > { %5346 = vmatpush.msrb.mxu3 %v5316_v41  ;;  %v4413_v63 = vpop.f32.mrf.mxu0  ;;  %6296 = vmatmul.msk.f32.vlgmr.msra.gmra.mxu1 %vm4623_vm14, %v5100_v35  ;;  %v5373_v45 = vperm.slane %v11566_v28, 0 }
 0x7a7   : > { %5246 = vmatpush.msra.mxu2 %v5189_v55  ;;  %v5422_v54 = vmul.f32 %v5398_v0, %v4413_v63  ;;  %v5381_v55 = vperm.slane %v11563_v12, 0  ;;  %6297 = vmatmul.msk.f32.vlgmr.msra.gmra.mxu3 %vm4623_vm14, %v5100_v35  ;;  %vm5371_vm8 = vcmp.eq.f32.partialorder %v9050_v20, %v5365_v56  ;;  %v5318_v63 = vld [vmem:[#allocation11 + $0x38] sm:$0xff]  ;;  %vm5369_vm4 = vcmp.eq.f32.partialorder %v9053_v14, %v5365_v56 }
 0x7a8   : > { %5347 = vmatpush.msrb.mxu3 %v5314_v4  ;;  %v5209_v4 = vld [vmem:[#allocation11 + $0x30] sm:$0xff]  ;;  %v5379_v15 = vsel %vm5371_vm8, %v5373_v45, 0.0  ;;  %v5377_v57 = vsel %vm5369_vm4, %v5373_v45, 0.0  ;;  %vm5367_vm11 = vcmp.eq.f32.partialorder %v9062_v30, %v5365_v56 }
 0x7a9   : > { %5247 = vmatpush.msra.mxu2 %v5187_v13  ;;  %6298 = vmatmul.msk.f32.vlgmr.msra.gmra.mxu0 %vm4623_vm14, %v5209_v4  ;;  %vm5387_vm1 = vcmp.eq.f32.partialorder %v9050_v20, %v5381_v55  ;;  %vm5385_vm7 = vcmp.eq.f32.partialorder %v9053_v14, %v5381_v55  ;;  %vm5383_vm3 = vcmp.eq.f32.partialorder %v9062_v30, %v5381_v55  ;;  %v5375_v49 = vsel %vm5367_vm11, %v5373_v45, 0.0 }
 0x7aa   : > { %5348 = vmatpush.msrb.mxu3 %v5312_v3  ;;  %v11083_v19 = vpop.f32.mrf.mxu2  ;;  %v5395_v24 = vsel %vm5387_vm1, %v5389_v10, 0.0  ;;  %v5393_v13 = vsel %vm5385_vm7, %v5389_v10, 0.0  ;;  %v5427_v3 = vld [vmem:[#allocation11 + $0x40] sm:$0xff]  ;;  %v5391_v37 = vsel %vm5383_vm3, %v5389_v10, 0.0 }
 0x7ab   : > { %5248 = vmatpush.msra.mxu2 %v5185_v17  ;;  %v5401_v39 = vadd.f32 %v5395_v24, %v5379_v15 }
 0x7ac   : > { %5349 = vmatpush.msrb.mxu3 %v5310_v31  ;;  %6299 = vmatmul.msk.f32.vlgmr.msra.gmra.mxu2 %vm4623_vm14, %v5209_v4  ;;  %v5399_v31 = vadd.f32 %v5393_v13, %v5377_v57 }
 0x7ae   : > { %5350 = vmatpush.msrb.mxu3 %v5308_v6  ;;  %v4416_v59 = vpop.f32.mrf.mxu0  ;;  %6300 = vmatmul.msk.f32.vlgmr.msrb.gmra.mxu1 %vm4623_vm14, %v5318_v63  ;;  %v5397_v6 = vadd.f32 %v5391_v37, %v5375_v49  ;;  %v5405_v0 = vmul.f32 %v5399_v31, %v11068_v47 }
 0x7af   : > { %v5424_v33 = vmul.f32 %v5400_v9, %v4416_v59  ;;  %v5407_v59 = vmul.f32 %v5401_v39, %v11083_v19 }
 0x7b0   : > { %5351 = vmatpush.msrb.mxu3 %v5306_v8 }
 0x7b1   : > { %5435 = vmatpush.msrb.mxu0 %v5424_v33 }
 0x7b2   : > { %5352 = vmatpush.msrb.mxu3 %v5304_v42  ;;  %v11095_v62 = vpop.f32.mrf.mxu2  ;;  %v5403_v42 = vmul.f32 %v5397_v6, %v11052_v26 }
 0x7b3   : > { %5436 = vmatpush.msrb.mxu0 %v5422_v54  ;;  %v5409_v18 = vmul.f32 %v5397_v6, %v11095_v62 }
 0x7b4   : > { %5353 = vmatpush.msrb.mxu3 %v5302_v43 }
 0x7b5   : > { %5437 = vmatpush.msrb.mxu0 %v5420_v1 }
 0x7b6   : > { %5354 = vmatpush.msrb.mxu3 %v5300_v60 }
 0x7b7   : > { %5438 = vmatpush.msrb.mxu0 %v5418_v29 }
 0x7b8   : > { %5355 = vmatpush.msrb.mxu3 %v5298_v52 }
 0x7b9   : > { %5439 = vmatpush.msrb.mxu0 %v5416_v46 }
 0x7ba   : > { %5356 = vmatpush.msrb.mxu3 %v5296_v34  ;;  %v11106_v21 = vpop.f32.mrf.mxu2 }
 0x7bb   : > { %5440 = vmatpush.msrb.mxu0 %v5414_v53  ;;  %v5411_v30 = vmul.f32 %v5399_v31, %v11106_v21 }
 0x7bc   : > { %5357 = vmatpush.msrb.mxu3 %v5294_v40 }
 0x7bd   : > { %5441 = vmatpush.msrb.mxu0 %v5412_v27  ;;  %6301 = vmatmul.msk.f32.vlgmr.msrb.gmra.mxu3 %vm4623_vm14, %v5318_v63 }
 0x7bf   : > { %5442 = vmatpush.msrb.mxu0 %v5410_v58 }
 0x7c1   : > { %5443 = vmatpush.msrb.mxu0 %v5408_v48 }
 0x7c2   : > { %v4451_v61 = vpop.f32.mrf.mxu2 }
 0x7c3   : > { %5444 = vmatpush.msrb.mxu0 %v5406_v16  ;;  %v5413_v2 = vmul.f32 %v5401_v39, %v4451_v61 }
 0x7c5   : > { %5445 = vmatpush.msrb.mxu0 %v5404_v22 }
 0x7c7   : > { %5446 = vmatpush.msrb.mxu0 %v5402_v11 }
 0x7c8   : > { %6302 = vmatmul.msk.f32.vlgmr.msrb.gmra.mxu0 %vm4623_vm14, %v5427_v3 }
 0x7ca   : > { %v4454_v44 = vpop.f32.mrf.mxu2 }
 0x7cb   : > { %v5415_v8 = vmul.f32 %v5397_v6, %v4454_v44 }
 0x7d2   : > { %v4457_v50 = vpop.f32.mrf.mxu2 }
 0x7d3   : > { %v5417_v9 = vmul.f32 %v5399_v31, %v4457_v50 }
 0x7da   : > { %v4460_v41 = vpop.f32.mrf.mxu2 }
 0x7db   : > { %v5419_v51 = vmul.f32 %v5401_v39, %v4460_v41 }
 0x7e2   : > { %v4463_v32 = vpop.f32.mrf.mxu2 }
 0x7e3   : > { %v5421_v14 = vmul.f32 %v5397_v6, %v4463_v32 }
 0x7ea   : > { %v4466_v23 = vpop.f32.mrf.mxu2 }
 0x7eb   : > { %v5423_v5 = vmul.f32 %v5399_v31, %v4466_v23 }
 0x7f2   : > { %v4469_v17 = vpop.f32.mrf.mxu2 }
 0x7f3   : > { %v5425_v20 = vmul.f32 %v5401_v39, %v4469_v17 }
 0x7f5   : > { %5455 = vmatpush.msrb.mxu2 %v5425_v20 }
 0x7f7   : > { %5456 = vmatpush.msrb.mxu2 %v5423_v5 }
 0x7f9   : > { %5457 = vmatpush.msrb.mxu2 %v5421_v14 }
 0x7fb   : > { %5458 = vmatpush.msrb.mxu2 %v5419_v51 }
 0x7fd   : > { %5459 = vmatpush.msrb.mxu2 %v5417_v9 }
 0x7ff   : > { %5460 = vmatpush.msrb.mxu2 %v5415_v8 }
 0x801   : > { %5461 = vmatpush.msrb.mxu2 %v5413_v2 }
 0x803   : > { %5462 = vmatpush.msrb.mxu2 %v5411_v30 }
 0x805   : > { %5463 = vmatpush.msrb.mxu2 %v5409_v18 }
 0x807   : > { %5464 = vmatpush.msrb.mxu2 %v5407_v59 }
 0x809   : > { %5465 = vmatpush.msrb.mxu2 %v5405_v0 }
 0x80b   : > { %5466 = vmatpush.msrb.mxu2 %v5403_v42 }
 0x80c   : > { %6303 = vmatmul.msk.f32.vlgmr.msrb.gmra.mxu2 %vm4623_vm14, %v5427_v3 }
 0x80d   : > { %7149 = shalt.err (!%p7146_p0)
}
 0x80e   : > { %s7282_s11 = smov 256   ;;  %s7283_s4 = smov 16  }
 0x80f   : > { %6360 = dma.vmem_to_hbm [thread:$0]  (%p7426_p5), %s5516_s16, 768, %s5518_s18, %s11144_s17, %s7282_s11, %s7282_s11, %s7283_s4  }
 0x810   : > { %s11569_s9 = sld [smem:[#allocation79_spill]]  ;;  %s5498_s19 = sshll.u32 %s9016_s20, 4  ;;  %s5499_s19 = int_to_ptr.vmem [resolvable:$true] %s5498_s19 }
 0x811   : > { %s5476_s30 = scalar_lea.sflag [#allocation4], %s7528_s5 }
 0x816   : > { %s5497_s27 = scalar_lea.hbm %s11569_s9, %s6339_s13  ;;  %s7170_s16 = scalar_lea.hbm %s11569_s9, 96 }
 0x817   : > { %s5500_s23 = sshll.u32 %s5497_s27, 4  ;;  %s5501_s23 = int_to_ptr.hbm [resolvable:$true] %s5500_s23 }
 0x818   : > { %s7164_s26 = sshra.s32 %s5501_s23, 4  ;;  %s7165_s26 = int_to_ptr.hbm [resolvable:$true] %s7164_s26 }
 0x819   : > { %s7166_s21 = scalar_lea.hbm %s7165_s26, 48  ;;  %p7171_p3 = scmp.lt.s32.totalorder %s7165_s26, %s11569_s9 }
 0x81a   : > { %p7167_p8 = scmp.ne.s32.totalorder %s7165_s26, %s7166_s21  ;;  %p7172_p7 = scmp.lt.s32.totalorder %s7170_s16, %s7166_s21 }
 0x81c   : > { %p7168_p9 = pnand %p7167_p8, %p7426_p5  ;;  %p7173_p4 = por %p7172_p7, %p7171_p3 }
 0x81e   : > { %p7169_p12 = pneg %p7168_p9 }
 0x820   : > { %p7174_p1 = pnand %p7173_p4, %p7169_p12 }
 0x822   : > { %7177 = shalt.err (!%p7174_p1)
}
 0x823   : > { %6359 = dma.vmem_to_hbm [thread:$0]  (%p7426_p5), %s5499_s19, 768, %s5501_s23, %s5476_s30, %s7282_s11, %s7282_s11, %s7283_s4   ;;  %v4644_v26 = vpop.f32.mrf.mxu1  ;;  %v4794_v19 = vpop.f32.mrf.mxu0 }
 0x824   : > { %v4664_v62 = vpop.f32.mrf.mxu3  ;;  %s5778_s20 = sshll.u32 %s7528_s5, 4  ;;  %v4814_v58 = vpop.f32.mrf.mxu2  ;;  %s6323_s14 = sshll.u32 %s7370_s25, 4 }
 0x825   : > { %s612_s13 = scalar_lea.vmem [#allocation16], %s5778_s20  ;;  %s11570_s4 = sld [smem:[#allocation81_spill]] }
 0x826   : > { %s5533_s2 = sshll.u32 %s612_s13, 4  ;;  %s5534_s2 = int_to_ptr.vmem [resolvable:$true] %s5533_s2 }
 0x82b   : > { %v4687_v47 = vpop.f32.mrf.mxu1  ;;  %v5012_v43 = vpop.f32.mrf.mxu0  ;;  %s5531_s10 = scalar_lea.hbm %s11570_s4, %s6323_s14  ;;  %s7198_s26 = scalar_lea.hbm %s11570_s4, 32 }
 0x82c   : > { %v4688_v33 = vadd.f32 %v4687_v47, %v4644_v26  ;;  %v4707_v46 = vpop.f32.mrf.mxu3  ;;  %v5032_v22 = vpop.f32.mrf.mxu2  ;;  %s5535_s27 = sshll.u32 %s5531_s10, 4  ;;  %s5536_s27 = int_to_ptr.hbm [resolvable:$true] %s5535_s27 }
 0x82d   : > { %v4708_v48 = vadd.f32 %v4707_v46, %v4664_v62  ;;  %s7192_s19 = sshra.s32 %s5536_s27, 4  ;;  %s7193_s19 = int_to_ptr.hbm [resolvable:$true] %s7192_s19 }
 0x82e   : > { %v4817_v36 = vadd.f32 %v4794_v19, %v4688_v33  ;;  %s7194_s23 = scalar_lea.hbm %s7193_s19, 16  ;;  %p7199_p13 = scmp.lt.s32.totalorder %s7193_s19, %s11570_s4 }
 0x82f   : > { %v4818_v61 = vadd.f32 %v4814_v58, %v4708_v48  ;;  %p7195_p11 = scmp.ne.s32.totalorder %s7193_s19, %s7194_s23  ;;  %p7200_p0 = scmp.lt.s32.totalorder %s7198_s26, %s7194_s23 }
 0x831   : > { %p7196_p2 = pnand %p7195_p11, %p7426_p5  ;;  %p7201_p8 = por %p7200_p0, %p7199_p13 }
 0x833   : > { %v4903_v7 = vpop.f32.mrf.mxu1  ;;  %v5230_v29 = vpop.f32.mrf.mxu0  ;;  %p7197_p10 = pneg %p7196_p2 }
 0x834   : > { %v4926_v54 = vadd.f32 %v4903_v7, %v4817_v36  ;;  %v4923_v16 = vpop.f32.mrf.mxu3  ;;  %v5250_v32 = vpop.f32.mrf.mxu2 }
 0x835   : > { %v4927_v11 = vadd.f32 %v4923_v16, %v4818_v61  ;;  %p7202_p9 = pnand %p7201_p8, %p7197_p10 }
 0x836   : > { %v5035_v60 = vadd.f32 %v5012_v43, %v4926_v54 }
 0x837   : > { %v5036_v50 = vadd.f32 %v5032_v22, %v4927_v11 }
 0x83b   : > { %v5121_v1 = vpop.f32.mrf.mxu1 }
 0x83c   : > { %v5144_v52 = vadd.f32 %v5121_v1, %v5035_v60  ;;  %v5141_v44 = vpop.f32.mrf.mxu3 }
 0x83d   : > { %v5145_v41 = vadd.f32 %v5141_v44, %v5036_v50 }
 0x83e   : > { %v5253_v34 = vadd.f32 %v5230_v29, %v5144_v52 }
 0x83f   : > { %v5254_v12 = vadd.f32 %v5250_v32, %v5145_v41 }
 0x843   : > { %v5339_v40 = vpop.f32.mrf.mxu1 }
 0x844   : > { %v5362_v53 = vadd.f32 %v5339_v40, %v5253_v34  ;;  %v5359_v55 = vpop.f32.mrf.mxu3 }
 0x845   : > { %v5448_v21 = vpop.f32.mrf.mxu0  ;;  %v5363_v35 = vadd.f32 %v5359_v55, %v5254_v12 }
 0x846   : > { %v5471_v27 = vadd.f32 %v5448_v21, %v5362_v53 }
 0x848   : > { %5473 = vst [vmem:[%s612_s13] sm:$0xff] %v5471_v27 }
 0x88f   : > { %v5468_v25 = vpop.f32.mrf.mxu2 }
 0x890   : > { %v5472_v10 = vadd.f32 %v5468_v25, %v5363_v35 }
 0x892   : > { %5474 = vst [vmem:[%s612_s13 + $0x8] sm:$0xff] %v5472_v10 }
 0x893   : > { %7205 = shalt.err (!%p7202_p9)
}
 0x894   : > { %6361 = dma.vmem_to_hbm [thread:$0]  (%p7426_p5), %s5534_s2, 256, %s5536_s27, %s11144_s17  }
 0x895 PF: > { %s11571_s12 = sld [smem:[#allocation23_spill]]  ;;  %p11573_p12 = scmp.ge.s32.totalorder %s7260_s24, 2 }
 0x897   : > { %p6386_p3 = pnand %p11573_p12, %p7386_p6 }
 0x899   : > { %p6387_p7 = pneg %p6386_p3 }
 0x89b   : > { %s5547_s18 = sand.u32 1, %s11571_s12  }
 0x89c   : > { %s5548_s8 = scalar_lea.sflag [#allocation4], %s5547_s18 }
 0x89d   : > { %7239 = dma.done.wait (%p6387_p7), %s5548_s8, 768  }
 0x89e   : > { %7241 = vsyncadd (%p6387_p7), %s5548_s8, 4294966528  ;;  %s11574_s20 = sadd.s32 4294967294, %s7260_s24  }
 0x89f   : > { %s5557_s13 = sand.u32 1, %s11574_s20  }
 0x8a0   : > { %s5558_s14 = scalar_lea.sflag [#allocation15], %s5557_s13 }
 0x8a1   : > { %7243 = dma.done.wait (%p6387_p7), %s5558_s14, 1024  }
 0x8a2   : > { %7245 = vsyncadd (%p6387_p7), %s5558_s14, 4294966272  ;;  %s11575_s24 = sld [smem:[#allocation26_spill]]  ;;  %s11578_s21 = smov %s7252_s22 }
 0x8a3   : > { %s11576_s29 = sld [smem:[#allocation24_spill]] }
 0x8a4   : > { %s11577_s23 = sld [smem:[#allocation27_spill]] }
 0x8a8   : > { %p34_p5 = scmp.ge.s32.totalorder %s11575_s24, 4  }
 0x8a9   : > { %s11579_s22 = smov %s11576_s29 }
 0x8aa   :  { %36 = sbr.rel (!%p34_p5) target bundleno = 20 (0x14), region = 187 }
 0x8af   :  { %5574 = vsyncpa [#allocation3], 1 }
 0x8b0   :  { %5576 = vsyncpa [#allocation3 + $0x1], 1 }
 0x8b1   :  { %5577 = vsyncpa [#allocation6], 1 }
 0x8b2   :  { %5579 = vsyncpa [#allocation6 + $0x1], 1 }
 0x8b3   :  { %5580 = vsyncpa [#allocation9], 1 }
 0x8b4   :  { %5581 = vsyncpa [#allocation12], 1 }
 0x8b5   :  { %5582 = vsyncpa [#allocation4], 1 }
 0x8b6   :  { %5584 = vsyncpa [#allocation4 + $0x1], 1 }
 0x8b7   :  { %5585 = vsyncpa [#allocation15], 1 }
 0x8b8   :  { %5587 = vsyncpa [#allocation15 + $0x1], 1 }

</bundles_post_ra>
